<compile_context>
chip_gen: v7x
topology: tpu7x:2x2x1
jax: 0.10.0
libtpu: 0.0.40
codegen_flags: <defaults>
</compile_context>

<pallas_src>
import functools

import jax
import jax.numpy as jnp
from jax.experimental import pallas as pl
from jax.experimental.pallas import tpu as pltpu

NCLASS = 10            # `nclass` is an external constant in the original file
AUDIO_DIM = 48960      # nn.Linear(48960, 512)
GYRO_DIM = 3264        # nn.Linear(3264, nclass)
H1, H2 = 512, 64
TK = 8192              # K-tile for the big line1 matmul (int8 stream)
AUDIO_DIM_PAD = 49152  # next multiple of TK (and of 128); zero padded
K_TILES = AUDIO_DIM_PAD // TK

# Only used on the v7x path; on older jax fall back to "parallel".
_CORE_PARALLEL = getattr(pltpu, "CORE_PARALLEL", None)


def _detect_n_split():
    """2-way output split only on v7x (2 TensorCores/chip); 1 elsewhere."""
    try:
        kind = jax.devices()[0].device_kind.lower()
    except Exception:
        return 1
    return 2 if ("v7" in kind or "7x" in kind) else 1


# ----------------------------------------------------------------------------
# One-time parameter prep: per-column int8 quantization + K pad + column split
# ----------------------------------------------------------------------------
def prepare_w1_int8(w1, n_split):
    """Quantize W1 to int8 with per-output-column scales, zero-pad K to
    AUDIO_DIM_PAD, and pre-split the H1=512 output columns into `n_split`
    contiguous slabs so each DMA tile is a contiguous HBM region.

    Returns:
      w1q   : (n_split, AUDIO_DIM_PAD, H1 // n_split) int8
      scale : (1, H1) float32 dequant scale (applied to the f32 accumulator)
    """
    amax = jnp.max(jnp.abs(w1), axis=0, keepdims=True)            # (1, H1)
    scale = jnp.maximum(amax, 1e-30) / 127.0
    q = jnp.clip(jnp.round(w1 / scale), -127, 127).astype(jnp.int8)
    q = jnp.pad(q, ((0, AUDIO_DIM_PAD - AUDIO_DIM), (0, 0)))      # zero pad K
    h_split = H1 // n_split
    q = q.reshape(AUDIO_DIM_PAD, n_split, h_split).transpose(1, 0, 2)
    return q, scale.astype(jnp.float32)


# ----------------------------------------------------------------------------
# Kernel A (single-TC path): line1 K-tiled + fully fused epilogue
# ----------------------------------------------------------------------------
def fused_kernel(audio_ref, w1q_ref, scale_ref, b1_ref,
                 w2_ref, b2_ref, w3_ref, b3_ref,
                 gyro_ref, wg_ref, bg_ref,
                 out_ref, acc_ref):
    k = pl.program_id(0)

    @pl.when(k == 0)
    def _():
        acc_ref[...] = jnp.zeros_like(acc_ref)

    # int8 W1 tile -> bf16 on the VPU (hidden under the HBM stream); bf16 MXU
    # matmul with f32 accumulation.
    w_tile = w1q_ref[...].astype(jnp.bfloat16)
    acc_ref[...] += jnp.dot(audio_ref[...], w_tile,
                            preferred_element_type=jnp.float32)

    @pl.when(k == pl.num_programs(0) - 1)
    def _():
        # Dequant + bias -> h1 (fully resident), then the tiny epilogue.
        h1 = acc_ref[...] * scale_ref[...] + b1_ref[...]                      # line1
        h2 = jnp.dot(h1, w2_ref[...],
                     preferred_element_type=jnp.float32) + b2_ref[...]        # line2
        audio_class = jnp.dot(h2, w3_ref[...],
                              preferred_element_type=jnp.float32) + b3_ref[...]  # line3
        gyro_class = jnp.dot(gyro_ref[...], wg_ref[...],
                             preferred_element_type=jnp.float32) + bg_ref[...]   # GyroLinear
        s = audio_class + gyro_class                                          # soft vote
        m = jnp.max(s, axis=-1, keepdims=True)
        lse = m + jnp.log(jnp.sum(jnp.exp(s - m), axis=-1, keepdims=True))
        out_ref[...] = (s - lse).astype(out_ref.dtype)                        # log_softmax


def _fused_forward(audio_p, gyro, w1q, w1_scale, b1, w2, b2, w3, b3, wg, bg):
    B = audio_p.shape[0]
    return pl.pallas_call(
        fused_kernel,
        out_shape=jax.ShapeDtypeStruct((B, NCLASS), jnp.float32),
        grid_spec=pltpu.PrefetchScalarGridSpec(
            num_scalar_prefetch=0,
            grid=(K_TILES,),
            in_specs=[
                pl.BlockSpec((B, TK), lambda k: (0, k)),             # audio (bf16)
                pl.BlockSpec((None, TK, H1), lambda k: (0, k, 0)),   # W1 int8 slab
                pl.BlockSpec((1, H1), lambda k: (0, 0)),             # dequant scale
                pl.BlockSpec((1, H1), lambda k: (0, 0)),             # b1
                pl.BlockSpec((H1, H2), lambda k: (0, 0)),            # W2
                pl.BlockSpec((1, H2), lambda k: (0, 0)),             # b2
                pl.BlockSpec((H2, NCLASS), lambda k: (0, 0)),        # W3
                pl.BlockSpec((1, NCLASS), lambda k: (0, 0)),         # b3
                pl.BlockSpec((B, GYRO_DIM), lambda k: (0, 0)),       # gyro (f32)
                pl.BlockSpec((GYRO_DIM, NCLASS), lambda k: (0, 0)),  # Wg
                pl.BlockSpec((1, NCLASS), lambda k: (0, 0)),         # bg
            ],
            out_specs=pl.BlockSpec((B, NCLASS), lambda k: (0, 0)),
            scratch_shapes=[pltpu.VMEM((B, H1), jnp.float32)],
        ),
        compiler_params=pltpu.CompilerParams(
            dimension_semantics=("arbitrary",),     # K is a reduction axis
            vmem_limit_bytes=48 << 20,              # ~20 MiB used; headroom
        ),
        cost_estimate=pl.CostEstimate(
            flops=2 * B * (AUDIO_DIM_PAD * H1 + H1 * H2 + H2 * NCLASS
                           + GYRO_DIM * NCLASS),
            transcendentals=B * (NCLASS + 1),
            bytes_accessed=(AUDIO_DIM_PAD * H1                   # W1 int8
                            + B * AUDIO_DIM_PAD * 2              # audio bf16
                            + (H1 * H2 + H2 * NCLASS + GYRO_DIM * NCLASS
                               + B * GYRO_DIM + B * NCLASS + 3 * H1) * 4),
        ),
    )(audio_p, w1q, w1_scale, b1, w2, b2, w3, b3, gyro, wg, bg)


# ----------------------------------------------------------------------------
# Kernel B (v7x path): line1 only, 2-way output split across TensorCores
# ----------------------------------------------------------------------------
def line1_split_kernel(audio_ref, w1q_ref, scale_ref, b1_ref, h1_ref, acc_ref):
    k = pl.program_id(1)

    @pl.when(k == 0)
    def _():
        acc_ref[...] = jnp.zeros_like(acc_ref)

    acc_ref[...] += jnp.dot(audio_ref[...], w1q_ref[...].astype(jnp.bfloat16),
                            preferred_element_type=jnp.float32)

    @pl.when(k == pl.num_programs(1) - 1)
    def _():
        h1_ref[...] = (acc_ref[...] * scale_ref[...] + b1_ref[...]).astype(h1_ref.dtype)


def _line1_split_forward(audio_p, w1q, w1_scale, b1, n_split):
    B = audio_p.shape[0]
    h_split = H1 // n_split
    sem0 = _CORE_PARALLEL if _CORE_PARALLEL is not None else "parallel"
    return pl.pallas_call(
        line1_split_kernel,
        out_shape=jax.ShapeDtypeStruct((B, H1), jnp.float32),
        grid_spec=pltpu.PrefetchScalarGridSpec(
            num_scalar_prefetch=0,
            grid=(n_split, K_TILES),
            in_specs=[
                pl.BlockSpec((B, TK), lambda n, k: (0, k)),               # audio
                pl.BlockSpec((None, TK, h_split), lambda n, k: (n, k, 0)),  # W1 half
                pl.BlockSpec((1, h_split), lambda n, k: (0, n)),          # scale half
                pl.BlockSpec((1, h_split), lambda n, k: (0, n)),          # b1 half
            ],
            out_specs=pl.BlockSpec((B, h_split), lambda n, k: (0, n)),
            scratch_shapes=[pltpu.VMEM((B, h_split), jnp.float32)],
        ),
        compiler_params=pltpu.CompilerParams(
            dimension_semantics=(sem0, "arbitrary"),  # real 2-TC split on v7x
            vmem_limit_bytes=32 << 20,                # ~10 MiB used per core
        ),
        cost_estimate=pl.CostEstimate(
            flops=2 * B * AUDIO_DIM_PAD * H1,
            transcendentals=0,
            bytes_accessed=(AUDIO_DIM_PAD * H1            # W1 int8 (counted once)
                            + B * AUDIO_DIM_PAD * 2       # audio bf16
                            + B * H1 * 4),                # h1 writeback
        ),
    )(audio_p, w1q, w1_scale, b1)


# ----------------------------------------------------------------------------
# Forward wrapper
# ----------------------------------------------------------------------------
@functools.partial(jax.jit, static_argnames=("n_split",))
def soft_vote_merge(audio, gyro, w1q, w1_scale, b1, w2, b2, w3, b3, wg, bg,
                    *, n_split=1):
    pad = AUDIO_DIM_PAD - AUDIO_DIM
    # Padding/casting the activations is cheap (B x 192 extra floats).
    audio_p = jnp.pad(audio, ((0, 0), (0, pad))).astype(jnp.bfloat16)

    if n_split == 1:
        # Single-TC chips: one fused kernel, no h1 HBM round-trip.
        return _fused_forward(audio_p, gyro, w1q, w1_scale,
                              b1, w2, b2, w3, b3, wg, bg)

    # v7x: core-parallel line1, then the sub-microsecond epilogue in XLA
    # (h1 halves live on different cores, so don't fuse it into the kernel).
    h1 = _line1_split_forward(audio_p, w1q, w1_scale, b1, n_split)
    h2 = h1 @ w2 + b2                     # line2
    audio_class = h2 @ w3 + b3            # line3
    gyro_class = gyro @ wg + bg           # GyroLinear
    return jax.nn.log_softmax(audio_class + gyro_class, axis=1)


# ----------------------------------------------------------------------------
# Test harness
# ----------------------------------------------------------------------------
def _init_params(key):
    ks = jax.random.split(key, 8)
    scale = 0.02
    w1 = scale * jax.random.normal(ks[0], (AUDIO_DIM, H1), jnp.float32)
    b1 = scale * jax.random.normal(ks[1], (1, H1), jnp.float32)
    w2 = scale * jax.random.normal(ks[2], (H1, H2), jnp.float32)
    b2 = scale * jax.random.normal(ks[3], (1, H2), jnp.float32)
    w3 = scale * jax.random.normal(ks[4], (H2, NCLASS), jnp.float32)
    b3 = scale * jax.random.normal(ks[5], (1, NCLASS), jnp.float32)
    wg = scale * jax.random.normal(ks[6], (GYRO_DIM, NCLASS), jnp.float32)
    bg = scale * jax.random.normal(ks[7], (1, NCLASS), jnp.float32)
    return w1, b1, w2, b2, w3, b3, wg, bg


def _reference(audio, gyro, w1, b1, w2, b2, w3, b3, wg, bg):
    h = ((audio @ w1 + b1) @ w2 + b2) @ w3 + b3
    g = gyro @ wg + bg
    s = h + g
    return jax.nn.log_softmax(s, axis=1)


if __name__ == "__main__":
    key = jax.random.PRNGKey(0)
    k_audio, k_gyro, k_params = jax.random.split(key, 3)

    B = 2
    input_audio = jax.random.normal(k_audio, (B, AUDIO_DIM), jnp.float32)
    input_gyro = jax.random.normal(k_gyro, (B, GYRO_DIM), jnp.float32)
    w1, b1, w2, b2, w3, b3, wg, bg = _init_params(k_params)

    n_split = _detect_n_split()
    # One-time parameter prep (int8 quant + pad + column split of W1),
    # hoisted off the per-call path.
    w1q, w1_scale = prepare_w1_int8(w1, n_split)
    w1q.block_until_ready()

    try:
        out = soft_vote_merge(input_audio, input_gyro, w1q, w1_scale,
                              b1, w2, b2, w3, b3, wg, bg, n_split=n_split)
        out = jax.block_until_ready(out)
    except Exception:
        if n_split == 1:
            raise
        # Safety net: if the core-parallel path is unavailable on this chip,
        # fall back to the (always valid) single-core fused path.
        n_split = 1
        w1q, w1_scale = prepare_w1_int8(w1, n_split)
        out = soft_vote_merge(input_audio, input_gyro, w1q, w1_scale,
                              b1, w2, b2, w3, b3, wg, bg, n_split=n_split)
        out = jax.block_until_ready(out)

    ref = _reference(input_audio, input_gyro, w1, b1, w2, b2, w3, b3, wg, bg)
    assert out.shape == (B, NCLASS)
    # Tolerance covers the int8 W1 (per-column scales) + bf16 audio stream
    # with f32 accumulation.
    assert jnp.allclose(out, ref, atol=5e-2, rtol=5e-2), "mismatch vs reference"

    print("KERNEL_OK")
</pallas_src>

<mosaic_0001>
module attributes {stable_mosaic.version = 11 : i64} {
  func.func @fused_kernel(%arg0: i32, %arg1: memref<2x8192xbf16, #tpu.memory_space<vmem>>, %arg2: memref<1x8192x512xi8, #tpu.memory_space<vmem>>, %arg3: memref<1x512xf32, #tpu.memory_space<vmem>>, %arg4: memref<1x512xf32, #tpu.memory_space<vmem>>, %arg5: memref<512x64xf32, #tpu.memory_space<vmem>>, %arg6: memref<1x64xf32, #tpu.memory_space<vmem>>, %arg7: memref<64x10xf32, #tpu.memory_space<vmem>>, %arg8: memref<1x10xf32, #tpu.memory_space<vmem>>, %arg9: memref<2x3264xf32, #tpu.memory_space<vmem>>, %arg10: memref<3264x10xf32, #tpu.memory_space<vmem>>, %arg11: memref<1x10xf32, #tpu.memory_space<vmem>>, %arg12: memref<2x10xf32, #tpu.memory_space<vmem>>, %arg13: memref<2x512xf32, #tpu.memory_space<vmem>>) attributes {dimension_semantics = [#tpu.dimension_semantics<arbitrary>], iteration_bounds = array<i64: 6>, scalar_prefetch = 0 : i64, scratch_operands = 1 : i64, tpu.core_type = #tpu.core_type<tc>, window_params = [{transform_indices = @transform_0, window_bounds = array<i64: 2, 8192>}, {transform_indices = @transform_1, window_bounds = array<i64: 1, 8192, 512>}, {pipeline_mode = #tpu.pipeline_mode<synchronous>, transform_indices = @transform_2, window_bounds = array<i64: 1, 512>}, {pipeline_mode = #tpu.pipeline_mode<synchronous>, transform_indices = @transform_3, window_bounds = array<i64: 1, 512>}, {pipeline_mode = #tpu.pipeline_mode<synchronous>, transform_indices = @transform_4, window_bounds = array<i64: 512, 64>}, {pipeline_mode = #tpu.pipeline_mode<synchronous>, transform_indices = @transform_5, window_bounds = array<i64: 1, 64>}, {pipeline_mode = #tpu.pipeline_mode<synchronous>, transform_indices = @transform_6, window_bounds = array<i64: 64, 10>}, {pipeline_mode = #tpu.pipeline_mode<synchronous>, transform_indices = @transform_7, window_bounds = array<i64: 1, 10>}, {pipeline_mode = #tpu.pipeline_mode<synchronous>, transform_indices = @transform_8, window_bounds = array<i64: 2, 3264>}, {pipeline_mode = #tpu.pipeline_mode<synchronous>, transform_indices = @transform_9, window_bounds = array<i64: 3264, 10>}, {pipeline_mode = #tpu.pipeline_mode<synchronous>, transform_indices = @transform_10, window_bounds = array<i64: 1, 10>}, {pipeline_mode = #tpu.pipeline_mode<synchronous>, transform_indices = @transform_11, window_bounds = array<i64: 2, 10>}]} {
    %c0_i32 = arith.constant 0 : i32
    %0 = arith.cmpi eq, %arg0, %c0_i32 : i32
    %1 = arith.extui %0 : i1 to i32
    %c0_i32_0 = arith.constant 0 : i32
    %2 = arith.cmpi ne, %1, %c0_i32_0 : i32
    scf.if %2 {
      %cst_10 = arith.constant 0.000000e+00 : f32
      %14 = vector.broadcast %cst_10 : f32 to vector<2x512xf32>
      %c0_11 = arith.constant 0 : index
      %c0_12 = arith.constant 0 : index
      %15 = vector.load %arg13[%c0_11, %c0_12] : memref<2x512xf32, #tpu.memory_space<vmem>>, vector<2x512xf32>
      tpu.vector_store %arg13[%c0_11, %c0_12], %14 {strides = array<i32>} : memref<2x512xf32, #tpu.memory_space<vmem>>, vector<2x512xf32>,
    } else {
    }
    %c0 = arith.constant 0 : index
    %c0_1 = arith.constant 0 : index
    %c0_2 = arith.constant 0 : index
    %3 = vector.load %arg2[%c0, %c0_1, %c0_2] : memref<1x8192x512xi8, #tpu.memory_space<vmem>>, vector<1x8192x512xi8>
    %4 = vector.shape_cast %3 : vector<1x8192x512xi8> to vector<8192x512xi8>
    %5 = arith.sitofp %4 : vector<8192x512xi8> to vector<8192x512xbf16>
    %c0_3 = arith.constant 0 : index
    %c0_4 = arith.constant 0 : index
    %6 = vector.load %arg13[%c0_3, %c0_4] : memref<2x512xf32, #tpu.memory_space<vmem>>, vector<2x512xf32>
    %c0_5 = arith.constant 0 : index
    %c0_6 = arith.constant 0 : index
    %7 = vector.load %arg1[%c0_5, %c0_6] : memref<2x8192xbf16, #tpu.memory_space<vmem>>, vector<2x8192xbf16>
    %cst = arith.constant dense<0.000000e+00> : vector<2x512xf32>
    %8 = tpu.matmul %7, %5, %cst {dimension_numbers = #tpu.dot_dimension_numbers<[1], [0], [0], [1], [0, 0, 1, 1], [], []>} : vector<2x8192xbf16>, vector<8192x512xbf16>, vector<2x512xf32> -> vector<2x512xf32>
    %9 = arith.addf %6, %8 : vector<2x512xf32>
    %c0_7 = arith.constant 0 : index
    %c0_8 = arith.constant 0 : index
    %10 = vector.load %arg13[%c0_7, %c0_8] : memref<2x512xf32, #tpu.memory_space<vmem>>, vector<2x512xf32>
    tpu.vector_store %arg13[%c0_7, %c0_8], %9 {strides = array<i32>} : memref<2x512xf32, #tpu.memory_space<vmem>>, vector<2x512xf32>,
    %c5_i32 = arith.constant 5 : i32
    %11 = arith.cmpi eq, %arg0, %c5_i32 : i32
    %12 = arith.extui %11 : i1 to i32
    %c0_i32_9 = arith.constant 0 : i32
    %13 = arith.cmpi ne, %12, %c0_i32_9 : i32
    scf.if %13 {
      %c0_10 = arith.constant 0 : index
      %c0_11 = arith.constant 0 : index
      %14 = vector.load %arg13[%c0_10, %c0_11] : memref<2x512xf32, #tpu.memory_space<vmem>>, vector<2x512xf32>
      %c0_12 = arith.constant 0 : index
      %c0_13 = arith.constant 0 : index
      %15 = vector.load %arg3[%c0_12, %c0_13] : memref<1x512xf32, #tpu.memory_space<vmem>>, vector<1x512xf32>
      %16 = vector.broadcast %15 : vector<1x512xf32> to vector<2x512xf32>
      %17 = arith.mulf %14, %16 : vector<2x512xf32>
      %c0_14 = arith.constant 0 : index
      %c0_15 = arith.constant 0 : index
      %18 = vector.load %arg4[%c0_14, %c0_15] : memref<1x512xf32, #tpu.memory_space<vmem>>, vector<1x512xf32>
      %19 = vector.broadcast %18 : vector<1x512xf32> to vector<2x512xf32>
      %20 = arith.addf %17, %19 : vector<2x512xf32>
      %c0_16 = arith.constant 0 : index
      %c0_17 = arith.constant 0 : index
      %21 = vector.load %arg5[%c0_16, %c0_17] : memref<512x64xf32, #tpu.memory_space<vmem>>, vector<512x64xf32>
      %cst_18 = arith.constant dense<0.000000e+00> : vector<2x64xf32>
      %22 = tpu.matmul %20, %21, %cst_18 {dimension_numbers = #tpu.dot_dimension_numbers<[1], [0], [0], [1], [0, 0, 1, 1], [], []>} : vector<2x512xf32>, vector<512x64xf32>, vector<2x64xf32> -> vector<2x64xf32>
      %c0_19 = arith.constant 0 : index
      %c0_20 = arith.constant 0 : index
      %23 = vector.load %arg6[%c0_19, %c0_20] : memref<1x64xf32, #tpu.memory_space<vmem>>, vector<1x64xf32>
      %24 = vector.broadcast %23 : vector<1x64xf32> to vector<2x64xf32>
      %25 = arith.addf %22, %24 : vector<2x64xf32>
      %c0_21 = arith.constant 0 : index
      %c0_22 = arith.constant 0 : index
      %26 = vector.load %arg7[%c0_21, %c0_22] : memref<64x10xf32, #tpu.memory_space<vmem>>, vector<64x10xf32>
      %cst_23 = arith.constant dense<0.000000e+00> : vector<2x10xf32>
      %27 = tpu.matmul %25, %26, %cst_23 {dimension_numbers = #tpu.dot_dimension_numbers<[1], [0], [0], [1], [0, 0, 1, 1], [], []>} : vector<2x64xf32>, vector<64x10xf32>, vector<2x10xf32> -> vector<2x10xf32>
      %c0_24 = arith.constant 0 : index
      %c0_25 = arith.constant 0 : index
      %28 = vector.load %arg8[%c0_24, %c0_25] : memref<1x10xf32, #tpu.memory_space<vmem>>, vector<1x10xf32>
      %29 = vector.broadcast %28 : vector<1x10xf32> to vector<2x10xf32>
      %30 = arith.addf %27, %29 : vector<2x10xf32>
      %c0_26 = arith.constant 0 : index
      %c0_27 = arith.constant 0 : index
      %31 = vector.load %arg9[%c0_26, %c0_27] : memref<2x3264xf32, #tpu.memory_space<vmem>>, vector<2x3264xf32>
      %c0_28 = arith.constant 0 : index
      %c0_29 = arith.constant 0 : index
      %32 = vector.load %arg10[%c0_28, %c0_29] : memref<3264x10xf32, #tpu.memory_space<vmem>>, vector<3264x10xf32>
      %cst_30 = arith.constant dense<0.000000e+00> : vector<2x10xf32>
      %33 = tpu.matmul %31, %32, %cst_30 {dimension_numbers = #tpu.dot_dimension_numbers<[1], [0], [0], [1], [0, 0, 1, 1], [], []>} : vector<2x3264xf32>, vector<3264x10xf32>, vector<2x10xf32> -> vector<2x10xf32>
      %c0_31 = arith.constant 0 : index
      %c0_32 = arith.constant 0 : index
      %34 = vector.load %arg11[%c0_31, %c0_32] : memref<1x10xf32, #tpu.memory_space<vmem>>, vector<1x10xf32>
      %35 = vector.broadcast %34 : vector<1x10xf32> to vector<2x10xf32>
      %36 = arith.addf %33, %35 : vector<2x10xf32>
      %37 = arith.addf %30, %36 : vector<2x10xf32>
      %cst_33 = arith.constant dense<0xFF800000> : vector<2xf32>
      %38 = vector.multi_reduction <maximumf>, %37, %cst_33 [1] : vector<2x10xf32> to vector<2xf32>
      %39 = vector.shape_cast %38 : vector<2xf32> to vector<2x1xf32>
      %40 = vector.broadcast %39 : vector<2x1xf32> to vector<2x10xf32>
      %41 = arith.subf %37, %40 : vector<2x10xf32>
      %42 = math.exp %41 : vector<2x10xf32>
      %cst_34 = arith.constant dense<0.000000e+00> : vector<2xf32>
      %43 = vector.multi_reduction <add>, %42, %cst_34 [1] : vector<2x10xf32> to vector<2xf32>
      %44 = vector.shape_cast %43 : vector<2xf32> to vector<2x1xf32>
      %45 = math.log %44 : vector<2x1xf32>
      %46 = arith.addf %39, %45 : vector<2x1xf32>
      %47 = vector.broadcast %46 : vector<2x1xf32> to vector<2x10xf32>
      %48 = arith.subf %37, %47 : vector<2x10xf32>
      %c0_35 = arith.constant 0 : index
      %c0_36 = arith.constant 0 : index
      %49 = vector.load %arg12[%c0_35, %c0_36] : memref<2x10xf32, #tpu.memory_space<vmem>>, vector<2x10xf32>
      tpu.vector_store %arg12[%c0_35, %c0_36], %48 {strides = array<i32>} : memref<2x10xf32, #tpu.memory_space<vmem>>, vector<2x10xf32>,
    } else {
    }
    return
  }
  func.func @transform_0(%arg0: i32) -> (i32, i32) {
    %c0_i32 = arith.constant 0 : i32
    %c0_i32_0 = arith.constant 0 : i32
    return %c0_i32, %arg0 : i32, i32
  }
  func.func @transform_1(%arg0: i32) -> (i32, i32, i32) {
    %c0_i32 = arith.constant 0 : i32
    %c0_i32_0 = arith.constant 0 : i32
    %c0_i32_1 = arith.constant 0 : i32
    return %c0_i32, %arg0, %c0_i32_0 : i32, i32, i32
  }
  func.func @transform_2(%arg0: i32) -> (i32, i32) {
    %c0_i32 = arith.constant 0 : i32
    %c0_i32_0 = arith.constant 0 : i32
    %c0_i32_1 = arith.constant 0 : i32
    return %c0_i32, %c0_i32_0 : i32, i32
  }
  func.func @transform_3(%arg0: i32) -> (i32, i32) {
    %c0_i32 = arith.constant 0 : i32
    %c0_i32_0 = arith.constant 0 : i32
    %c0_i32_1 = arith.constant 0 : i32
    return %c0_i32, %c0_i32_0 : i32, i32
  }
  func.func @transform_4(%arg0: i32) -> (i32, i32) {
    %c0_i32 = arith.constant 0 : i32
    %c0_i32_0 = arith.constant 0 : i32
    %c0_i32_1 = arith.constant 0 : i32
    return %c0_i32, %c0_i32_0 : i32, i32
  }
  func.func @transform_5(%arg0: i32) -> (i32, i32) {
    %c0_i32 = arith.constant 0 : i32
    %c0_i32_0 = arith.constant 0 : i32
    %c0_i32_1 = arith.constant 0 : i32
    return %c0_i32, %c0_i32_0 : i32, i32
  }
  func.func @transform_6(%arg0: i32) -> (i32, i32) {
    %c0_i32 = arith.constant 0 : i32
    %c0_i32_0 = arith.constant 0 : i32
    %c0_i32_1 = arith.constant 0 : i32
    return %c0_i32, %c0_i32_0 : i32, i32
  }
  func.func @transform_7(%arg0: i32) -> (i32, i32) {
    %c0_i32 = arith.constant 0 : i32
    %c0_i32_0 = arith.constant 0 : i32
    %c0_i32_1 = arith.constant 0 : i32
    return %c0_i32, %c0_i32_0 : i32, i32
  }
  func.func @transform_8(%arg0: i32) -> (i32, i32) {
    %c0_i32 = arith.constant 0 : i32
    %c0_i32_0 = arith.constant 0 : i32
    %c0_i32_1 = arith.constant 0 : i32
    return %c0_i32, %c0_i32_0 : i32, i32
  }
  func.func @transform_9(%arg0: i32) -> (i32, i32) {
    %c0_i32 = arith.constant 0 : i32
    %c0_i32_0 = arith.constant 0 : i32
    %c0_i32_1 = arith.constant 0 : i32
    return %c0_i32, %c0_i32_0 : i32, i32
  }
  func.func @transform_10(%arg0: i32) -> (i32, i32) {
    %c0_i32 = arith.constant 0 : i32
    %c0_i32_0 = arith.constant 0 : i32
    %c0_i32_1 = arith.constant 0 : i32
    return %c0_i32, %c0_i32_0 : i32, i32
  }
  func.func @transform_11(%arg0: i32) -> (i32, i32) {
    %c0_i32 = arith.constant 0 : i32
    %c0_i32_0 = arith.constant 0 : i32
    %c0_i32_1 = arith.constant 0 : i32
    return %c0_i32, %c0_i32_0 : i32, i32
  }
}

</mosaic_0001>

<bundles_post_ra>
// kernel: soft_vote_merge.1
= control target key start
LH: loop header
LB: loop body
LE: loop exit
PB: predicated region body
PF: predicated region fallthrough
CT: control target
= control target key end

     0   :  { %s13766_s0 = inlined_call_operand.vmem [shape: bf16[2,49152], index: 0, kind: input, shape index: {}]   ;;  %s13767_s1 = inlined_call_operand.hbm [shape: s8[1,49152,512], index: 1, kind: input, shape index: {}]   ;;  %s13768_s2 = inlined_call_operand.hbm [shape: f32[1,512], index: 2, kind: input, shape index: {}]   ;;  %s13769_s3 = inlined_call_operand.hbm [shape: f32[1,512], index: 3, kind: input, shape index: {}]   ;;  %s13770_s4 = inlined_call_operand.vmem [shape: f32[512,64], index: 4, kind: input, shape index: {}]   ;;  %s13771_s5 = inlined_call_operand.hbm [shape: f32[1,64], index: 5, kind: input, shape index: {}]   ;;  %s13772_s6 = inlined_call_operand.vmem [shape: f32[64,10], index: 6, kind: input, shape index: {}]   ;;  %s13773_s7 = inlined_call_operand.hbm [shape: f32[1,10], index: 7, kind: input, shape index: {}]   ;;  %s13774_s8 = inlined_call_operand.hbm [shape: f32[2,3264], index: 8, kind: input, shape index: {}]   ;;  %s13775_s9 = inlined_call_operand.vmem [shape: f32[3264,10], index: 9, kind: input, shape index: {}]   ;;  %s13776_s10 = inlined_call_operand.hbm [shape: f32[1,10], index: 10, kind: input, shape index: {}]   ;;  %s13777_s11 = inlined_call_operand.hbm [shape: f32[2,10], index: 11, kind: output, shape index: {}]  }
   0x1   :  { %13782 = sst [smem:[#allocation21_spill]] %s13772_s6 }
   0x2   :  { %13783 = sst [smem:[#allocation22_spill]] %s13777_s11 }
   0x3   :  { %16 = vsyncpa [#allocation4], 0 }
   0x4   :  { %18 = vsyncpa [#allocation4 + $0x1], 0 }
   0x5   :  { %19 = vsyncpa [#allocation7], 0 }
   0x6   :  { %20 = vsyncpa [#allocation10], 0 }
   0x7   :  { %21 = vsyncpa [#allocation13], 0 }
   0x8   :  { %22 = vsyncpa [#allocation5], 0  ;;  %s10490_s17 = smov 0   ;;  %s10492_s18 = smov 0  }
   0x9   :  { %s10494_s19 = smov 0   ;;  %s10496_s20 = smov 0  }
   0xa LB: > { %s10414_s21 = smov [#allocation6]   ;;  %s10511_s23 = sadd.s32 4294967295, %s10412_s20   ;;  %s10412_s20 = sphi %s10496_s20, %s13803_s20   ;;  %s10408_s19 = sphi %s10494_s19, %s13802_s19   ;;  %s10404_s18 = sphi %s10492_s18, %s13801_s18   ;;  %s10400_s17 = sphi %s10490_s17, %s13800_s17  }
   0xb   : > { %s308_s22 = sshll.u32 %s10414_s21, 4  ;;  %p8704_p0 = scmp.ge.s32.totalorder %s10412_s20, 1  ;;  %s10517_s22 = int_to_ptr.vmem [resolvable:$true] %s308_s22 }
   0xc   : > { %p13780_p1 = scmp.eq.s32.totalorder %s10511_s23, 0  ;;  %p295_p2 = scmp.lt.s32.totalorder %s10412_s20, 7 }
   0xd   : > { %s10415_s25 = smov [#allocation9]   ;;  %s10416_s27 = smov [#allocation12]  }
   0xe   : > { %p10519_p4 = pnand %p8704_p0, %p295_p2  ;;  %s333_s26 = sshll.u32 %s10415_s25, 4  ;;  %s10525_s26 = int_to_ptr.vmem [resolvable:$true] %s333_s26 }
   0xf   : > { %s358_s28 = sshll.u32 %s10416_s27, 4  ;;  %s10417_s30 = smov [#allocation8]   ;;  %s10533_s28 = int_to_ptr.vmem [resolvable:$true] %s358_s28 }
  0x10   : > { %s13784_s24 = scalar_select %p10519_p4, 1, 0 }
  0x11   : > { %p10035_p5 = pneg %p10519_p4  ;;  %s10535_s12 = sshll.u32 %s10417_s30, 4  ;;  %s320_s12 = int_to_ptr.vmem [resolvable:$true] %s10535_s12 }
  0x12   : > { %s10138_s15 = scalar_lea.hbm %s13768_s2, 64 }
  0x13   : > { %p10529_p6 = pnand %p10035_p5, %p13780_p1  ;;  %p10139_p7 = scmp.ne.s32.totalorder %s13768_s2, %s10138_s15 }
  0x14   : > { %p10145_p11 = scmp.lt.u32.totalorder %s10138_s15, %s13768_s2 }
  0x15   : > { %p10545_p8 = pneg %p10529_p6 }
  0x17   : > { %p10141_p9 = pnand %p10545_p8, %p10139_p7 }
  0x19   : > { %p10142_p10 = pneg %p10141_p9 }
  0x1b   : > { %p10147_p12 = pnand %p10145_p11, %p10142_p10 }
  0x1d   : > { %10150 = shalt.err (!%p10147_p12)
}
  0x1e   : > { %s10151_s13 = scalar_lea.vmem %s10517_s22, 64  ;;  %p10159_p5 = scmp.lt.s32.totalorder %s10517_s22, %s10517_s22 }
  0x1f   : > { %p10152_p13 = scmp.ne.s32.totalorder %s10517_s22, %s10151_s13  ;;  %p10160_p3 = scmp.lt.s32.totalorder %s10151_s13, %s10151_s13 }
  0x21   : > { %p10154_p0 = pnand %p10152_p13, %p10545_p8  ;;  %p10161_p7 = por %p10160_p3, %p10159_p5 }
  0x23   : > { %p10155_p2 = pneg %p10154_p0 }
  0x25   : > { %p10162_p9 = pnand %p10161_p7, %p10155_p2 }
  0x27   : > { %10165 = shalt.err (!%p10162_p9)
}
  0x28   : > { %10038 = dma.hbm_to_vmem [thread:$0]  (!%p10529_p6), %s13768_s2, 64, %s10517_s22, [#allocation7]  }
  0x29   : > { %s10166_s27 = scalar_lea.hbm %s13771_s5, 16 }
  0x2a   : > { %p10167_p10 = scmp.ne.s32.totalorder %s13771_s5, %s10166_s27  ;;  %p10173_p12 = scmp.lt.u32.totalorder %s10166_s27, %s13771_s5 }
  0x2c   : > { %p10169_p3 = pnand %p10167_p10, %p10545_p8 }
  0x2e   : > { %p10170_p11 = pneg %p10169_p3 }
  0x30   : > { %p10175_p13 = pnand %p10173_p12, %p10170_p11 }
  0x32   : > { %10178 = shalt.err (!%p10175_p13)
}
  0x33   : > { %s10179_s22 = scalar_lea.vmem %s10525_s26, 16  ;;  %s10186_s11 = scalar_lea.vmem %s10525_s26, 32 }
  0x34   : > { %p10180_p0 = scmp.ne.s32.totalorder %s10525_s26, %s10179_s22  ;;  %p10187_p7 = scmp.lt.s32.totalorder %s10525_s26, %s10525_s26 }
  0x35   : > { %p10188_p9 = scmp.lt.s32.totalorder %s10186_s11, %s10179_s22 }
  0x36   : > { %p10182_p2 = pnand %p10180_p0, %p10545_p8 }
  0x37   : > { %p10189_p10 = por %p10188_p9, %p10187_p7 }
  0x38   : > { %p10183_p5 = pneg %p10182_p2 }
  0x3a   : > { %p10190_p3 = pnand %p10189_p10, %p10183_p5 }
  0x3c   : > { %10193 = shalt.err (!%p10190_p3)
}
  0x3d   : > { %10044 = dma.hbm_to_vmem [thread:$0]  (!%p10529_p6), %s13771_s5, 16, %s10525_s26, [#allocation10]  }
  0x3e   : > { %s10194_s21 = scalar_lea.hbm %s13774_s8, 832 }
  0x3f   : > { %p10195_p11 = scmp.ne.s32.totalorder %s13774_s8, %s10194_s21  ;;  %p10201_p0 = scmp.lt.u32.totalorder %s10194_s21, %s13774_s8 }
  0x41   : > { %p10197_p12 = pnand %p10195_p11, %p10545_p8 }
  0x43   : > { %p10198_p13 = pneg %p10197_p12 }
  0x45   : > { %p10203_p2 = pnand %p10201_p0, %p10198_p13 }
  0x47   : > { %10206 = shalt.err (!%p10203_p2)
}
  0x48   : > { %s10207_s26 = scalar_lea.vmem %s10533_s28, 832  ;;  %p10215_p10 = scmp.lt.s32.totalorder %s10533_s28, %s10533_s28 }
  0x49   : > { %p10208_p5 = scmp.ne.s32.totalorder %s10533_s28, %s10207_s26  ;;  %p10216_p3 = scmp.lt.s32.totalorder %s10207_s26, %s10207_s26 }
  0x4b   : > { %p10210_p7 = pnand %p10208_p5, %p10545_p8  ;;  %p10217_p11 = por %p10216_p3, %p10215_p10 }
  0x4d   : > { %p10211_p9 = pneg %p10210_p7 }
  0x4f   : > { %p10218_p12 = pnand %p10217_p11, %p10211_p9 }
  0x51   : > { %10221 = shalt.err (!%p10218_p12)
}
  0x52   : > { %10050 = dma.hbm_to_vmem [thread:$0]  (!%p10529_p6), %s13774_s8, 832, %s10533_s28, [#allocation13]  }
  0x53   : > { %s10418_s14 = smov [#allocation11]   ;;  %s10222_s27 = scalar_lea.hbm %s13769_s3, 64 }
  0x54   : > { %s347_s15 = sshll.u32 %s10418_s14, 4  ;;  %p10223_p13 = scmp.ne.s32.totalorder %s13769_s3, %s10222_s27  ;;  %s348_s15 = int_to_ptr.vmem [resolvable:$true] %s347_s15 }
  0x55   : > { %p10229_p5 = scmp.lt.u32.totalorder %s10222_s27, %s13769_s3 }
  0x56   : > { %p10225_p0 = pnand %p10223_p13, %p10545_p8 }
  0x58   : > { %p10226_p2 = pneg %p10225_p0 }
  0x5a   : > { %p10231_p7 = pnand %p10229_p5, %p10226_p2 }
  0x5c   : > { %10234 = shalt.err (!%p10231_p7)
}
  0x5d   : > { %s10235_s28 = scalar_lea.vmem %s320_s12, 64  ;;  %p10243_p11 = scmp.lt.s32.totalorder %s320_s12, %s320_s12 }
  0x5e   : > { %p10236_p9 = scmp.ne.s32.totalorder %s320_s12, %s10235_s28  ;;  %p10244_p12 = scmp.lt.s32.totalorder %s10235_s28, %s10235_s28 }
  0x60   : > { %p10238_p10 = pnand %p10236_p9, %p10545_p8  ;;  %p10245_p1 = por %p10244_p12, %p10243_p11 }
  0x62   : > { %p10239_p3 = pneg %p10238_p10 }
  0x64   : > { %p10246_p4 = pnand %p10245_p1, %p10239_p3 }
  0x66   : > { %10249 = shalt.err (!%p10246_p4)
}
  0x67   : > { %10041 = dma.hbm_to_vmem [thread:$0]  (!%p10529_p6), %s13769_s3, 64, %s320_s12, [#allocation7]  }
  0x68   : > { %s10250_s21 = scalar_lea.hbm %s13773_s7, 16 }
  0x69   : > { %p10251_p13 = scmp.ne.s32.totalorder %s13773_s7, %s10250_s21  ;;  %p10257_p4 = scmp.lt.u32.totalorder %s10250_s21, %s13773_s7 }
  0x6b   : > { %p10253_p0 = pnand %p10251_p13, %p10545_p8 }
  0x6d   : > { %p10254_p1 = pneg %p10253_p0 }
  0x6f   : > { %p10259_p2 = pnand %p10257_p4, %p10254_p1 }
  0x71   : > { %10262 = shalt.err (!%p10259_p2)
}
  0x72   : > { %s10263_s26 = scalar_lea.vmem %s348_s15, 16  ;;  %s10270_s12 = scalar_lea.vmem %s348_s15, 32 }
  0x73   : > { %p10264_p5 = scmp.ne.s32.totalorder %s348_s15, %s10263_s26  ;;  %p10271_p10 = scmp.lt.s32.totalorder %s348_s15, %s348_s15 }
  0x74   : > { %p10272_p3 = scmp.lt.s32.totalorder %s10270_s12, %s10263_s26 }
  0x75   : > { %p10266_p7 = pnand %p10264_p5, %p10545_p8 }
  0x76   : > { %p10273_p11 = por %p10272_p3, %p10271_p10 }
  0x77   : > { %p10267_p9 = pneg %p10266_p7 }
  0x79   : > { %p10274_p12 = pnand %p10273_p11, %p10267_p9 }
  0x7b   : > { %10277 = shalt.err (!%p10274_p12)
}
  0x7c   : > { %10047 = dma.hbm_to_vmem [thread:$0]  (!%p10529_p6), %s13773_s7, 16, %s348_s15, [#allocation10]  }
  0x7d   : > { %s10419_s6 = smov [#allocation14]   ;;  %s10278_s27 = scalar_lea.hbm %s13776_s10, 16 }
  0x7e   : > { %s372_s14 = sshll.u32 %s10419_s6, 4  ;;  %p10279_p13 = scmp.ne.s32.totalorder %s13776_s10, %s10278_s27  ;;  %s373_s14 = int_to_ptr.vmem [resolvable:$true] %s372_s14 }
  0x7f   : > { %p10285_p4 = scmp.lt.u32.totalorder %s10278_s27, %s13776_s10 }
  0x80   : > { %p10281_p0 = pnand %p10279_p13, %p10545_p8 }
  0x82   : > { %p10282_p1 = pneg %p10281_p0 }
  0x84   : > { %p10287_p2 = pnand %p10285_p4, %p10282_p1 }
  0x86   : > { %10290 = shalt.err (!%p10287_p2)
}
  0x87   : > { %s10291_s15 = scalar_lea.vmem %s373_s14, 16  ;;  %s10298_s12 = scalar_lea.vmem %s373_s14, 32 }
  0x88   : > { %p10292_p5 = scmp.ne.s32.totalorder %s373_s14, %s10291_s15  ;;  %p10299_p10 = scmp.lt.s32.totalorder %s373_s14, %s373_s14 }
  0x89   : > { %p10300_p3 = scmp.lt.s32.totalorder %s10298_s12, %s10291_s15 }
  0x8a   : > { %p10294_p7 = pnand %p10292_p5, %p10545_p8 }
  0x8b   : > { %p10301_p11 = por %p10300_p3, %p10299_p10 }
  0x8c   : > { %p10295_p9 = pneg %p10294_p7 }
  0x8e   : > { %p10302_p12 = pnand %p10301_p11, %p10295_p9 }
  0x90   : > { %10305 = shalt.err (!%p10302_p12)
}
  0x91   : > { %10053 = dma.hbm_to_vmem [thread:$0]  (!%p10529_p6), %s13776_s10, 16, %s373_s14, [#allocation13]  }
  0x92   : > { %s10669_s25 = sadd.s32 1, %s10412_s20   ;;  %s61_s29 = sadd.s32 1, %s10408_s19 }
  0x93   : > { %s58_s6 = ssub.s32 %s10412_s20, %s10669_s25  ;;  %p68_p8 = scmp.ne.s32.totalorder %s10408_s19, %s10404_s18 }
  0x94   : > { %p59_p13 = scmp.eq.s32.totalorder %s58_s6, 0  ;;  %p69_p0 = scmp.eq.s32.totalorder %s10412_s20, 0 }
  0x95   : > { %p74_p1 = scmp.ne.s32.totalorder %s10404_s18, %s10400_s17  ;;  %p10064_p4 = scmp.lt.s32.totalorder %s10412_s20, 6 }
  0x96   : > { %s10681_s16 = scalar_select %p59_p13, %s10408_s19, %s61_s29  }
  0x97   : > { %p70_p2 = por %p69_p0, %p68_p8  ;;  %p13787_p5 = scmp.eq.s32.totalorder %s10511_s23, 0 }
  0x98   : > { %s391_s27 = sand.u32 1, %s10408_s19   ;;  %s8738_s14 = sshll.u32 %s10412_s20, 17 }
  0x99   : > { %p10685_p7 = por %p13787_p5, %p74_p1  ;;  %s8712_s30 = sshll.u32 %s391_s27, 13 }
  0x9a   : > { %s10694_s26 = scalar_lea.hbm %s13767_s1, %s8738_s14  ;;  %s395_s17 = scalar_lea.vmem [#allocation3], %s8712_s30 }
  0x9b   : > { %s403_s15 = sshll.u32 %s395_s17, 4  ;;  %p10696_p6 = pnand %p10064_p4, %p70_p2  ;;  %s10700_s15 = int_to_ptr.vmem [resolvable:$true] %s403_s15 }
  0x9c   : > { %s10702_s20 = scalar_lea.sflag [#allocation4], %s391_s27  ;;  %s10306_s28 = scalar_lea.hbm %s10694_s26, 131072 }
  0x9d   : > { %p10307_p9 = scmp.ne.s32.totalorder %s10694_s26, %s10306_s28  ;;  %p10308_p10 = pneg %p10696_p6 }
  0x9e   : > { %s10311_s6 = scalar_lea.hbm %s13767_s1, 786432  ;;  %p10312_p12 = scmp.lt.u32.totalorder %s10694_s26, %s13767_s1 }
  0x9f   : > { %p10309_p3 = pnand %p10308_p10, %p10307_p9  ;;  %p10313_p8 = scmp.lt.u32.totalorder %s10311_s6, %s10306_s28 }
  0xa0   : > { %p10315_p0 = scmp.lt.u32.totalorder %s10306_s28, %s10694_s26 }
  0xa1   : > { %p10310_p11 = pneg %p10309_p3  ;;  %p10314_p13 = por %p10313_p8, %p10312_p12 }
  0xa3   : > { %p10316_p1 = por %p10315_p0, %p10314_p13 }
  0xa5   : > { %p10317_p4 = pnand %p10316_p1, %p10310_p11 }
  0xa7   : > { %10320 = shalt.err (!%p10317_p4)
}
  0xa8   : > { %s10321_s27 = scalar_lea.vmem %s10700_s15, 131072  ;;  %s10420_s13 = smov [#allocation3]  }
  0xa9   : > { %p10322_p2 = scmp.ne.s32.totalorder %s10700_s15, %s10321_s27  ;;  %s10326_s22 = sshll.u32 %s10420_s13, 4  ;;  %s10327_s22 = int_to_ptr.vmem [resolvable:$false] %s10326_s22 }
  0xaa   : > { %s10328_s17 = scalar_lea.vmem %s10327_s22, 262144  ;;  %p10329_p3 = scmp.lt.s32.totalorder %s10700_s15, %s10327_s22 }
  0xab   : > { %p10324_p5 = pnand %p10322_p2, %p10308_p10  ;;  %p10330_p12 = scmp.lt.s32.totalorder %s10328_s17, %s10321_s27 }
  0xad   : > { %p10325_p9 = pneg %p10324_p5  ;;  %p10331_p8 = por %p10330_p12, %p10329_p3 }
  0xaf   : > { %p10332_p13 = pnand %p10331_p8, %p10325_p9 }
  0xb1   : > { %10335 = shalt.err (!%p10332_p13)
}
  0xb2   : > { %s10421_s28 = smov 512   ;;  %s10422_s11 = smov 32  }
  0xb3   : > { %10057 = dma.hbm_to_vmem [thread:$0]  (!%p10696_p6), %s10694_s26, 131072, %s10700_s15, %s10702_s20, %s10421_s28, %s10421_s28, %s10422_s11  }
  0xb4   : > { %p13790_p10 = scmp.ne.s32.totalorder %s13784_s24, 0 }
  0xb5   : > { %s417_s29 = sand.u32 (!%p13790_p10), 1, %s10404_s18  }
  0xb6   : > { %415 = sbr.rel (%p13790_p10) target bundleno = 3551 (0xddf), region = 64  ;;  %s8717_s6 = sshll.u32 (!%p13790_p10), %s417_s29, 13 }
  0xb7   : > { %s418_s14 = scalar_lea.sflag (!%p13790_p10), [#allocation4], %s417_s29  ;;  %s10733_s30 = scalar_lea.vmem (!%p13790_p10), [#allocation3], %s8717_s6 }
  0xbd   : > { %10379 = dma.done.wait (%p10685_p7), %s418_s14, 131072  }
  0xbe   : > { %10381 = vsyncadd (%p10685_p7), %s418_s14, 4294836224  ;;  %p13791_p11 = scmp.eq.s32.totalorder %s10511_s23, 0 }
  0xc0   : > { %10383 = dma.done.wait (%p13791_p11), [#allocation7], 128   ;;  %p13792_p6 = pmov %p13791_p11 }
  0xc2   : > { %10385 = vsyncadd (%p13792_p6), [#allocation7], 4294967168  ;;  %p13793_p0 = pmov %p13792_p6 }
  0xc4   : > { %10387 = dma.done.wait (%p13793_p0), [#allocation10], 32   ;;  %p13794_p1 = pmov %p13793_p0 }
  0xc5   : > { %p13795_p4 = pmov %p13793_p0 }
  0xc6   : > { %10389 = vsyncadd (%p13794_p1), [#allocation10], 4294967264 }
  0xc7   : > { %10391 = dma.done.wait (%p13795_p4), [#allocation13], 848   ;;  %p13796_p2 = pmov %p13793_p0 }
  0xc8   : > { %s8724_s24 = sshll.u32 %s10511_s23, 6  ;;  %p13797_p5 = scmp.ne.s32.totalorder %s10511_s23, 0 }
  0xc9   : > { %10393 = vsyncadd (%p13796_p2), [#allocation13], 4294966448  ;;  %p484_p7 = scmp.lt.s32.totalorder %s8724_s24, 383  ;;  %v10423_v0 = vmov (!%p13797_p5), 0.0  }
  0xca   : > { %492 = sbr.rel (%p13797_p5) target bundleno = 209 (0xd1), region = 96  ;;  %493 = vst [vmem:[#allocation2] sm:$0xff] (!%p13797_p5), %v10423_v0 }
  0xcb   : > { %s13805_s24 = smov (!%p484_p7, %s8724_s24), 383 }
  0xcc   : > { %s10755_s15 = scalar_lea.vmem %s13766_s0, %s13805_s24 }
  0xd1 PF: > { %v495_v1 = vld [vmem:[%s10733_s30 + $0x8] sm:$0xff]  ;;  %v497_v2 = vld [vmem:[%s10733_s30 + $0x18] sm:$0xff]  ;;  %v494_v3 = vld [vmem:[%s10733_s30] sm:$0xff]  ;;  %v3587_v31 = vlaneseq  ;;  %v10424_v36 = vmov 1966171168   ;;  %p8726_p9 = scmp.ne.s32.totalorder %s10511_s23, 5 }
  0xd2   : > { %v1519_v4 = vunpack.c.l.s8.bf16 %v495_v1  ;;  %v1523_v5 = vunpack.c.h.s8.bf16 %v495_v1  ;;  %v1521_v6 = vunpack.c.l.s8.bf16 %v497_v2  ;;  %v1525_v7 = vunpack.c.h.s8.bf16 %v497_v2  ;;  %v496_v8 = vld [vmem:[%s10733_s30 + $0x10] sm:$0xff]  ;;  %v499_v11 = vld [vmem:[%s10733_s30 + $0x28] sm:$0xff]  ;;  %v501_v12 = vld [vmem:[%s10733_s30 + $0x38] sm:$0xff]  ;;  %s13798_s14 = sld [smem:[#allocation21_spill]] (!%p8726_p9) }
  0xd3   : > { %v1518_v9 = vunpack.c.l.s8.bf16 %v494_v3  ;;  %v1520_v10 = vunpack.c.l.s8.bf16 %v496_v8  ;;  %v1522_v13 = vunpack.c.h.s8.bf16 %v494_v3  ;;  %v1524_v14 = vunpack.c.h.s8.bf16 %v496_v8  ;;  %v498_v17 = vld [vmem:[%s10733_s30 + $0x20] sm:$0xff]  ;;  %v500_v18 = vld [vmem:[%s10733_s30 + $0x30] sm:$0xff]  ;;  %v503_v23 = vld [vmem:[%s10733_s30 + $0x48] sm:$0xff] }
  0xd4   : > { %4039 = vmatprep.subr.bf16.mxu0 %v1519_v4  ;;  %5351 = vmatprep.subr.bf16.mxu1 %v1521_v6  ;;  %v1527_v15 = vunpack.c.l.s8.bf16 %v499_v11  ;;  %v1529_v16 = vunpack.c.l.s8.bf16 %v501_v12  ;;  %v1526_v19 = vunpack.c.l.s8.bf16 %v498_v17  ;;  %v1528_v20 = vunpack.c.l.s8.bf16 %v500_v18  ;;  %v505_v24 = vld [vmem:[%s10733_s30 + $0x58] sm:$0xff]  ;;  %v502_v29 = vld [vmem:[%s10733_s30 + $0x40] sm:$0xff]  ;;  %v504_v30 = vld [vmem:[%s10733_s30 + $0x50] sm:$0xff] }
  0xd5   : > { %4040 = vmatpush1.bf16.msra.mxu0 %v1518_v9  ;;  %5352 = vmatpush1.bf16.msra.mxu1 %v1520_v10  ;;  %v1531_v21 = vunpack.c.h.s8.bf16 %v499_v11  ;;  %v1533_v22 = vunpack.c.h.s8.bf16 %v501_v12  ;;  %v1530_v25 = vunpack.c.h.s8.bf16 %v498_v17  ;;  %v1532_v26 = vunpack.c.h.s8.bf16 %v500_v18  ;;  %v507_v39 = vld [vmem:[%s10733_s30 + $0x68] sm:$0xff]  ;;  %v509_v40 = vld [vmem:[%s10733_s30 + $0x78] sm:$0xff]  ;;  %v506_v47 = vld [vmem:[%s10733_s30 + $0x60] sm:$0xff] }
  0xd6   : > { %4041 = vmatprep.subr.bf16.mxu0 %v1523_v5  ;;  %5353 = vmatprep.subr.bf16.mxu1 %v1525_v7  ;;  %v1535_v27 = vunpack.c.l.s8.bf16 %v503_v23  ;;  %v1537_v28 = vunpack.c.l.s8.bf16 %v505_v24  ;;  %v1534_v32 = vunpack.c.l.s8.bf16 %v502_v29  ;;  %v1536_v33 = vunpack.c.l.s8.bf16 %v504_v30  ;;  %v10776_v44 = vld [vmem:[%s10755_s15] sm:$0xff]  ;;  %v508_v48 = vld [vmem:[%s10733_s30 + $0x70] sm:$0xff]  ;;  %v511_v56 = vld [vmem:[%s10733_s30 + $0x88] sm:$0xff] }
  0xd7   : > { %v1539_v34 = vunpack.c.h.s8.bf16 %v503_v23  ;;  %v1541_v35 = vunpack.c.h.s8.bf16 %v505_v24  ;;  %v3585_v37 = vunpack.c.l.s4 %v10424_v36  ;;  %v10771_v38 = vshrl.u32 %v3587_v31, 7  ;;  %v513_v57 = vld [vmem:[%s10733_s30 + $0x98] sm:$0xff]  ;;  %v510_v63 = vld [vmem:[%s10733_s30 + $0x80] sm:$0xff]  ;;  %v512_v0 = vld [vmem:[%s10733_s30 + $0x90] sm:$0xff] }
  0xd8   : > { %v1538_v42 = vunpack.c.h.s8.bf16 %v502_v29  ;;  %v1540_v43 = vunpack.c.h.s8.bf16 %v504_v30  ;;  %v1543_v45 = vunpack.c.l.s8.bf16 %v507_v39  ;;  %v1545_v46 = vunpack.c.l.s8.bf16 %v509_v40  ;;  %v515_v5 = vld [vmem:[%s10733_s30 + $0xa8] sm:$0xff]  ;;  %v517_v6 = vld [vmem:[%s10733_s30 + $0xb8] sm:$0xff]  ;;  %v514_v11 = vld [vmem:[%s10733_s30 + $0xa0] sm:$0xff] }
  0xd9   : > { %4042 = vmatpush1.bf16.msra.mxu0 %v1522_v13  ;;  %5354 = vmatpush1.bf16.msra.mxu1 %v1524_v14  ;;  %v3586_v41 = vunpack.c.0.s8 %v3585_v37  ;;  %v1542_v51 = vunpack.c.l.s8.bf16 %v506_v47  ;;  %v1544_v52 = vunpack.c.l.s8.bf16 %v508_v48  ;;  %v1547_v53 = vunpack.c.h.s8.bf16 %v507_v39  ;;  %v516_v12 = vld [vmem:[%s10733_s30 + $0xb0] sm:$0xff]  ;;  %v519_v17 = vld [vmem:[%s10733_s30 + $0xc8] sm:$0xff]  ;;  %v521_v18 = vld [vmem:[%s10733_s30 + $0xd8] sm:$0xff] }
  0xda   : > { %4043 = vmatprep.subr.bf16.mxu0 %v1527_v15  ;;  %5355 = vmatprep.subr.bf16.mxu1 %v1529_v16  ;;  %v1549_v54 = vunpack.c.h.s8.bf16 %v509_v40  ;;  %v1546_v59 = vunpack.c.h.s8.bf16 %v506_v47  ;;  %v1548_v60 = vunpack.c.h.s8.bf16 %v508_v48  ;;  %v1551_v61 = vunpack.c.l.s8.bf16 %v511_v56  ;;  %v518_v23 = vld [vmem:[%s10733_s30 + $0xc0] sm:$0xff]  ;;  %v520_v24 = vld [vmem:[%s10733_s30 + $0xd0] sm:$0xff]  ;;  %v523_v29 = vld [vmem:[%s10733_s30 + $0xe8] sm:$0xff] }
  0xdb   : > { %v10781_v49 = vsub.s32 %v3586_v41, %v10771_v38  ;;  %v1553_v62 = vunpack.c.l.s8.bf16 %v513_v57  ;;  %v1550_v1 = vunpack.c.l.s8.bf16 %v510_v63  ;;  %v1552_v2 = vunpack.c.l.s8.bf16 %v512_v0  ;;  %v525_v30 = vld [vmem:[%s10733_s30 + $0xf8] sm:$0xff]  ;;  %v524_v36 = vld [vmem:[%s10733_s30 + $0xf0] sm:$0xff] }
  0xdc   : > { %v1555_v3 = vunpack.c.h.s8.bf16 %v511_v56  ;;  %v1557_v4 = vunpack.c.h.s8.bf16 %v513_v57  ;;  %v1554_v7 = vunpack.c.h.s8.bf16 %v510_v63  ;;  %v1556_v8 = vunpack.c.h.s8.bf16 %v512_v0 }
  0xdd   : > { %4044 = vmatpush1.bf16.msra.mxu0 %v1526_v19  ;;  %5356 = vmatpush1.bf16.msra.mxu1 %v1528_v20  ;;  %v10785_v50 = vrot.slane %v10776_v44, %v10781_v49  ;;  %v1559_v9 = vunpack.c.l.s8.bf16 %v515_v5  ;;  %v1561_v10 = vunpack.c.l.s8.bf16 %v517_v6  ;;  %v1558_v13 = vunpack.c.l.s8.bf16 %v514_v11 }
  0xde   : > { %4045 = vmatprep.subr.bf16.mxu0 %v1531_v21  ;;  %5357 = vmatprep.subr.bf16.mxu1 %v1533_v22  ;;  %v1560_v14 = vunpack.c.l.s8.bf16 %v516_v12  ;;  %v1563_v15 = vunpack.c.h.s8.bf16 %v515_v5  ;;  %v1565_v16 = vunpack.c.h.s8.bf16 %v517_v6  ;;  %v1562_v19 = vunpack.c.h.s8.bf16 %v514_v11  ;;  %v535_v6 = vld [vmem:[%s10733_s30 + $0x148] sm:$0xff] }
  0xdf   : > { %v3598_v55 = vcombine.high %v10785_v50, %v10785_v50  ;;  %v1564_v20 = vunpack.c.h.s8.bf16 %v516_v12  ;;  %v1567_v21 = vunpack.c.l.s8.bf16 %v519_v17  ;;  %v1569_v22 = vunpack.c.l.s8.bf16 %v521_v18  ;;  %v534_v12 = vld [vmem:[%s10733_s30 + $0x140] sm:$0xff] }
  0xe0   : > { %v1570_v31 = vunpack.c.h.s8.bf16 %v518_v23  ;;  %v1576_v39 = vunpack.c.l.s8.bf16 %v524_v36  ;;  %v1579_v40 = vunpack.c.h.s8.bf16 %v523_v29  ;;  %v1581_v41 = vunpack.c.h.s8.bf16 %v525_v30 }
  0xe1   : > { %4046 = vmatpush1.bf16.msra.mxu0 %v1530_v25  ;;  %5358 = vmatpush1.bf16.msra.mxu1 %v1532_v26  ;;  %v10792_v58 = vrot.slane %v3598_v55, %v10781_v49  ;;  %v1566_v25 = vunpack.c.l.s8.bf16 %v518_v23  ;;  %v1568_v26 = vunpack.c.l.s8.bf16 %v520_v24  ;;  %vm10427_vm0 = vmmov (!%p8726_p9), 0  }
  0xe2   : > { %4047 = vmatprep.subr.bf16.mxu0 %v1535_v27  ;;  %5359 = vmatprep.subr.bf16.mxu1 %v1537_v28  ;;  %v1571_v27 = vunpack.c.h.s8.bf16 %v519_v17  ;;  %v1573_v28 = vunpack.c.h.s8.bf16 %v521_v18  ;;  %v539_v18 = vld [vmem:[%s10733_s30 + $0x168] sm:$0xff]  ;;  %vm7014_vm1 = vcmask (!%p8726_p9), 523264   ;;  %vm8565_vm2 = vcmask (!%p8726_p9), 74752  }
  0xe3   : > { %4071 = vmatprep.mubr.bf16.mxu0 %v10792_v58  ;;  %5383 = vmatprep.mubr.bf16.mxu1 %v10792_v58 }
  0xe5   : > { %4048 = vmatpush1.bf16.msra.mxu0 %v1534_v32  ;;  %5360 = vmatpush1.bf16.msra.mxu1 %v1536_v33  ;;  %v1572_v32 = vunpack.c.h.s8.bf16 %v520_v24  ;;  %v1575_v33 = vunpack.c.l.s8.bf16 %v523_v29  ;;  %v538_v24 = vld [vmem:[%s10733_s30 + $0x160] sm:$0xff] }
  0xe6   : > { %4049 = vmatprep.subr.bf16.mxu0 %v1539_v34  ;;  %5361 = vmatprep.subr.bf16.mxu1 %v1541_v35  ;;  %v1577_v34 = vunpack.c.l.s8.bf16 %v525_v30  ;;  %v522_v35 = vld [vmem:[%s10733_s30 + $0xe0] sm:$0xff]  ;;  %v543_v30 = vld [vmem:[%s10733_s30 + $0x188] sm:$0xff] }
  0xe7   : > { %v1574_v37 = vunpack.c.l.s8.bf16 %v522_v35 }
  0xe9   : > { %4050 = vmatpush1.bf16.msra.mxu0 %v1538_v42  ;;  %5362 = vmatpush1.bf16.msra.mxu1 %v1540_v43  ;;  %v527_v42 = vld [vmem:[%s10733_s30 + $0x108] sm:$0xff]  ;;  %v529_v43 = vld [vmem:[%s10733_s30 + $0x118] sm:$0xff] }
  0xea   : > { %4051 = vmatprep.subr.bf16.mxu0 %v1543_v45  ;;  %5363 = vmatprep.subr.bf16.mxu1 %v1545_v46  ;;  %v1578_v45 = vunpack.c.h.s8.bf16 %v522_v35  ;;  %v1580_v46 = vunpack.c.h.s8.bf16 %v524_v36  ;;  %v1583_v47 = vunpack.c.l.s8.bf16 %v527_v42  ;;  %v1585_v48 = vunpack.c.l.s8.bf16 %v529_v43  ;;  %v542_v36 = vld [vmem:[%s10733_s30 + $0x180] sm:$0xff] }
  0xeb   : > { %v1587_v56 = vunpack.c.h.s8.bf16 %v527_v42  ;;  %v1589_v57 = vunpack.c.h.s8.bf16 %v529_v43  ;;  %v547_v43 = vld [vmem:[%s10733_s30 + $0x1a8] sm:$0xff] }
  0xed   : > { %4052 = vmatpush1.bf16.msra.mxu0 %v1542_v51  ;;  %5364 = vmatpush1.bf16.msra.mxu1 %v1544_v52  ;;  %v526_v51 = vld [vmem:[%s10733_s30 + $0x100] sm:$0xff]  ;;  %v528_v52 = vld [vmem:[%s10733_s30 + $0x110] sm:$0xff] }
  0xee   : > { %4053 = vmatprep.subr.bf16.mxu0 %v1547_v53  ;;  %5365 = vmatprep.subr.bf16.mxu1 %v1549_v54  ;;  %v10816_v53 = vrot.slane %v10785_v50, %v10781_v49  ;;  %v1582_v54 = vunpack.c.l.s8.bf16 %v526_v51  ;;  %v1584_v55 = vunpack.c.l.s8.bf16 %v528_v52  ;;  %v1586_v50 = vunpack.c.h.s8.bf16 %v526_v51 }
  0xf1   : > { %4054 = vmatpush1.bf16.msra.mxu0 %v1546_v59  ;;  %5366 = vmatpush1.bf16.msra.mxu1 %v1548_v60  ;;  %v531_v59 = vld [vmem:[%s10733_s30 + $0x128] sm:$0xff]  ;;  %v533_v60 = vld [vmem:[%s10733_s30 + $0x138] sm:$0xff] }
  0xf2   : > { %4055 = vmatprep.subr.bf16.mxu0 %v1551_v61  ;;  %5367 = vmatprep.subr.bf16.mxu1 %v1553_v62  ;;  %v3630_v61 = vcombine.high %v10792_v58, %v10792_v58  ;;  %v1588_v62 = vunpack.c.h.s8.bf16 %v528_v52  ;;  %v1591_v63 = vunpack.c.l.s8.bf16 %v531_v59  ;;  %v1593_v0 = vunpack.c.l.s8.bf16 %v533_v60  ;;  %v546_v52 = vld [vmem:[%s10733_s30 + $0x1a0] sm:$0xff] }
  0xf3   : > { %v1597_v5 = vunpack.c.h.s8.bf16 %v533_v60  ;;  %v551_v60 = vld [vmem:[%s10733_s30 + $0x1c8] sm:$0xff] }
  0xf5   : > { %4056 = vmatpush1.bf16.msra.mxu0 %v1550_v1  ;;  %5368 = vmatpush1.bf16.msra.mxu1 %v1552_v2  ;;  %v530_v1 = vld [vmem:[%s10733_s30 + $0x120] sm:$0xff]  ;;  %v532_v2 = vld [vmem:[%s10733_s30 + $0x130] sm:$0xff] }
  0xf6   : > { %4057 = vmatprep.subr.bf16.mxu0 %v1555_v3  ;;  %5369 = vmatprep.subr.bf16.mxu1 %v1557_v4  ;;  %v1590_v58 = vunpack.c.l.s8.bf16 %v530_v1  ;;  %v1592_v3 = vunpack.c.l.s8.bf16 %v532_v2  ;;  %v1595_v4 = vunpack.c.h.s8.bf16 %v531_v59 }
  0xf9   : > { %4058 = vmatpush1.bf16.msra.mxu0 %v1554_v7  ;;  %5370 = vmatpush1.bf16.msra.mxu1 %v1556_v8  ;;  %v537_v7 = vld [vmem:[%s10733_s30 + $0x158] sm:$0xff]  ;;  %v1594_v8 = vunpack.c.h.s8.bf16 %v530_v1  ;;  %v550_v1 = vld [vmem:[%s10733_s30 + $0x1c0] sm:$0xff] }
  0xfa   : > { %4059 = vmatprep.subr.bf16.mxu0 %v1559_v9  ;;  %5371 = vmatprep.subr.bf16.mxu1 %v1561_v10  ;;  %v1596_v9 = vunpack.c.h.s8.bf16 %v532_v2  ;;  %v1599_v10 = vunpack.c.l.s8.bf16 %v535_v6  ;;  %v1601_v11 = vunpack.c.l.s8.bf16 %v537_v7  ;;  %v1605_v17 = vunpack.c.h.s8.bf16 %v537_v7  ;;  %v552_v2 = vld [vmem:[%s10733_s30 + $0x1d0] sm:$0xff]  ;;  %v557_v7 = vld [vmem:[%s10733_s30 + $0x1f8] sm:$0xff] }
  0xfd   : > { %4060 = vmatpush1.bf16.msra.mxu0 %v1558_v13  ;;  %5372 = vmatpush1.bf16.msra.mxu1 %v1560_v14  ;;  %v536_v13 = vld [vmem:[%s10733_s30 + $0x150] sm:$0xff]  ;;  %v1598_v14 = vunpack.c.l.s8.bf16 %v534_v12 }
  0xfe   : > { %4061 = vmatprep.subr.bf16.mxu0 %v1563_v15  ;;  %5373 = vmatprep.subr.bf16.mxu1 %v1565_v16  ;;  %v1600_v15 = vunpack.c.l.s8.bf16 %v536_v13  ;;  %v1603_v16 = vunpack.c.h.s8.bf16 %v535_v6  ;;  %v555_v6 = vld [vmem:[%s10733_s30 + $0x1e8] sm:$0xff] }
 0x101   : > { %4062 = vmatpush1.bf16.msra.mxu0 %v1562_v19  ;;  %5374 = vmatpush1.bf16.msra.mxu1 %v1564_v20  ;;  %v541_v19 = vld [vmem:[%s10733_s30 + $0x178] sm:$0xff]  ;;  %v1602_v20 = vunpack.c.h.s8.bf16 %v534_v12  ;;  %v554_v12 = vld [vmem:[%s10733_s30 + $0x1e0] sm:$0xff] }
 0x102   : > { %4063 = vmatprep.subr.bf16.mxu0 %v1567_v21  ;;  %5375 = vmatprep.subr.bf16.mxu1 %v1569_v22  ;;  %v1604_v21 = vunpack.c.h.s8.bf16 %v536_v13  ;;  %v1607_v22 = vunpack.c.l.s8.bf16 %v539_v18  ;;  %v1609_v23 = vunpack.c.l.s8.bf16 %v541_v19  ;;  %v1613_v29 = vunpack.c.h.s8.bf16 %v541_v19  ;;  %v556_v13 = vld [vmem:[%s10733_s30 + $0x1f0] sm:$0xff]  ;;  %v559_v19 = vld [vmem:[%s10733_s30 + $0x208] sm:$0xff] }
 0x105   : > { %4064 = vmatpush1.bf16.msra.mxu0 %v1566_v25  ;;  %5376 = vmatpush1.bf16.msra.mxu1 %v1568_v26  ;;  %v540_v25 = vld [vmem:[%s10733_s30 + $0x170] sm:$0xff]  ;;  %v1606_v26 = vunpack.c.l.s8.bf16 %v538_v24 }
 0x106   : > { %4065 = vmatprep.subr.bf16.mxu0 %v1571_v27  ;;  %5377 = vmatprep.subr.bf16.mxu1 %v1573_v28  ;;  %v1608_v27 = vunpack.c.l.s8.bf16 %v540_v25  ;;  %v1611_v28 = vunpack.c.h.s8.bf16 %v539_v18  ;;  %v1645_v18 = vunpack.c.h.s8.bf16 %v557_v7 }
 0x109   : > { %4066 = vmatpush1.bf16.msra.mxu0 %v1570_v31  ;;  %5378 = vmatpush1.bf16.msra.mxu1 %v1572_v32  ;;  %v545_v31 = vld [vmem:[%s10733_s30 + $0x198] sm:$0xff]  ;;  %v1610_v32 = vunpack.c.h.s8.bf16 %v538_v24 }
 0x10a   : > { %4067 = vmatprep.subr.bf16.mxu0 %v1575_v33  ;;  %5379 = vmatprep.subr.bf16.mxu1 %v1577_v34  ;;  %v1612_v33 = vunpack.c.h.s8.bf16 %v540_v25  ;;  %v1615_v34 = vunpack.c.l.s8.bf16 %v543_v30  ;;  %v1617_v35 = vunpack.c.l.s8.bf16 %v545_v31  ;;  %v1621_v42 = vunpack.c.h.s8.bf16 %v545_v31  ;;  %v558_v25 = vld [vmem:[%s10733_s30 + $0x200] sm:$0xff] }
 0x10b   : > { %v1651_v31 = vunpack.c.h.s8.bf16 %v559_v19 }
 0x10d   : > { %4068 = vmatpush1.bf16.msra.mxu0 %v1574_v37  ;;  %5380 = vmatpush1.bf16.msra.mxu1 %v1576_v39  ;;  %v544_v37 = vld [vmem:[%s10733_s30 + $0x190] sm:$0xff]  ;;  %v1614_v39 = vunpack.c.l.s8.bf16 %v542_v36 }
 0x10e   : > { %4069 = vmatprep.subr.bf16.mxu0 %v1579_v40  ;;  %5381 = vmatprep.subr.bf16.mxu1 %v1581_v41  ;;  %v1616_v40 = vunpack.c.l.s8.bf16 %v544_v37  ;;  %v1619_v41 = vunpack.c.h.s8.bf16 %v543_v30 }
 0x111   : > { %4070 = vmatpush1.bf16.msra.mxu0 %v1578_v45  ;;  %5382 = vmatpush1.bf16.msra.mxu1 %v1580_v46  ;;  %v549_v45 = vld [vmem:[%s10733_s30 + $0x1b8] sm:$0xff]  ;;  %v1618_v46 = vunpack.c.h.s8.bf16 %v542_v36 }
 0x112   : > { %4080 = vmatprep.subr.bf16.mxu0 %v1583_v47  ;;  %5392 = vmatprep.subr.bf16.mxu1 %v1585_v48  ;;  %v1620_v47 = vunpack.c.h.s8.bf16 %v544_v37  ;;  %v1623_v48 = vunpack.c.l.s8.bf16 %v547_v43  ;;  %v1625_v51 = vunpack.c.l.s8.bf16 %v549_v45  ;;  %v1629_v59 = vunpack.c.h.s8.bf16 %v549_v45 }
 0x114   : > { %4072 = vmatmul.mubr.bf16.vlgmr.msra.gmra.mrb[0].mxu0 %v10816_v53  ;;  %5384 = vmatmul.mubr.bf16.vlgmr.msra.gmra.mrb[0].mxu1 %v10816_v53 }
 0x115   : > { %4081 = vmatpush1.bf16.msra.mxu0 %v1582_v54  ;;  %5393 = vmatpush1.bf16.msra.mxu1 %v1584_v55  ;;  %v548_v54 = vld [vmem:[%s10733_s30 + $0x1b0] sm:$0xff]  ;;  %v1622_v55 = vunpack.c.l.s8.bf16 %v546_v52 }
 0x116   : > { %4082 = vmatprep.subr.bf16.mxu0 %v1587_v56  ;;  %5394 = vmatprep.subr.bf16.mxu1 %v1589_v57  ;;  %v1624_v56 = vunpack.c.l.s8.bf16 %v548_v54  ;;  %v1627_v57 = vunpack.c.h.s8.bf16 %v547_v43 }
 0x117   : > { %4112 = vmatprep.mubr.bf16.mxu0 %v3630_v61  ;;  %5424 = vmatprep.mubr.bf16.mxu1 %v3630_v61  ;;  %v553_v61 = vld [vmem:[%s10733_s30 + $0x1d8] sm:$0xff] }
 0x119   : > { %4083 = vmatpush1.bf16.msra.mxu0 %v1586_v50  ;;  %5395 = vmatpush1.bf16.msra.mxu1 %v1588_v62  ;;  %v1626_v50 = vunpack.c.h.s8.bf16 %v546_v52  ;;  %v1628_v62 = vunpack.c.h.s8.bf16 %v548_v54 }
 0x11a   : > { %4084 = vmatprep.subr.bf16.mxu0 %v1591_v63  ;;  %5396 = vmatprep.subr.bf16.mxu1 %v1593_v0  ;;  %v1631_v63 = vunpack.c.l.s8.bf16 %v551_v60  ;;  %v1633_v0 = vunpack.c.l.s8.bf16 %v553_v61 }
 0x11d   : > { %4085 = vmatpush1.bf16.msra.mxu0 %v1590_v58  ;;  %5397 = vmatpush1.bf16.msra.mxu1 %v1592_v3  ;;  %v1630_v58 = vunpack.c.l.s8.bf16 %v550_v1  ;;  %v1632_v3 = vunpack.c.l.s8.bf16 %v552_v2 }
 0x11e   : > { %4086 = vmatprep.subr.bf16.mxu0 %v1595_v4  ;;  %5398 = vmatprep.subr.bf16.mxu1 %v1597_v5  ;;  %v1635_v4 = vunpack.c.h.s8.bf16 %v551_v60  ;;  %v1637_v5 = vunpack.c.h.s8.bf16 %v553_v61 }
 0x121   : > { %4087 = vmatpush1.bf16.msra.mxu0 %v1594_v8  ;;  %5399 = vmatpush1.bf16.msra.mxu1 %v1596_v9  ;;  %v1634_v8 = vunpack.c.h.s8.bf16 %v550_v1  ;;  %v1636_v9 = vunpack.c.h.s8.bf16 %v552_v2 }
 0x122   : > { %4088 = vmatprep.subr.bf16.mxu0 %v1599_v10  ;;  %5400 = vmatprep.subr.bf16.mxu1 %v1601_v11  ;;  %v1639_v10 = vunpack.c.l.s8.bf16 %v555_v6  ;;  %v1641_v11 = vunpack.c.l.s8.bf16 %v557_v7 }
 0x125   : > { %4089 = vmatpush1.bf16.msra.mxu0 %v1598_v14  ;;  %5401 = vmatpush1.bf16.msra.mxu1 %v1600_v15  ;;  %v3583_v14 = vcombine.high %v10776_v44, %v10776_v44  ;;  %v1638_v15 = vunpack.c.l.s8.bf16 %v554_v12  ;;  %v1647_v44 = vunpack.c.l.s8.bf16 %v559_v19 }
 0x126   : > { %4090 = vmatprep.subr.bf16.mxu0 %v1603_v16  ;;  %5402 = vmatprep.subr.bf16.mxu1 %v1605_v17  ;;  %v1640_v16 = vunpack.c.l.s8.bf16 %v556_v13  ;;  %v1643_v17 = vunpack.c.h.s8.bf16 %v555_v6 }
 0x129   : > { %4091 = vmatpush1.bf16.msra.mxu0 %v1602_v20  ;;  %5403 = vmatpush1.bf16.msra.mxu1 %v1604_v21  ;;  %v561_v20 = vld [vmem:[%s10733_s30 + $0x218] sm:$0xff]  ;;  %v10855_v21 = vrot.slane %v3583_v14, %v10781_v49 }
 0x12a   : > { %4092 = vmatprep.subr.bf16.mxu0 %v1607_v22  ;;  %5404 = vmatprep.subr.bf16.mxu1 %v1609_v23  ;;  %v1642_v22 = vunpack.c.h.s8.bf16 %v554_v12  ;;  %v1644_v23 = vunpack.c.h.s8.bf16 %v556_v13  ;;  %v1649_v24 = vunpack.c.l.s8.bf16 %v561_v20 }
 0x12d   : > { %4093 = vmatpush1.bf16.msra.mxu0 %v1606_v26  ;;  %5405 = vmatpush1.bf16.msra.mxu1 %v1608_v27  ;;  %v560_v26 = vld [vmem:[%s10733_s30 + $0x210] sm:$0xff]  ;;  %v3599_v27 = vcombine.high %v10855_v21, %v10855_v21 }
 0x12e   : > { %4094 = vmatprep.subr.bf16.mxu0 %v1611_v28  ;;  %5406 = vmatprep.subr.bf16.mxu1 %v1613_v29  ;;  %v3628_v28 = vcombine.high %v10816_v53, %v10816_v53  ;;  %v1646_v29 = vunpack.c.l.s8.bf16 %v558_v25  ;;  %v1648_v30 = vunpack.c.l.s8.bf16 %v560_v26  ;;  %v1650_v53 = vunpack.c.h.s8.bf16 %v558_v25 }
 0x12f   : > { %v1652_v36 = vunpack.c.h.s8.bf16 %v560_v26 }
 0x131   : > { %4095 = vmatpush1.bf16.msra.mxu0 %v1610_v32  ;;  %5407 = vmatpush1.bf16.msra.mxu1 %v1612_v33  ;;  %v1653_v32 = vunpack.c.h.s8.bf16 %v561_v20  ;;  %v563_v33 = vld [vmem:[%s10733_s30 + $0x228] sm:$0xff] }
 0x132   : > { %4096 = vmatprep.subr.bf16.mxu0 %v1615_v34  ;;  %5408 = vmatprep.subr.bf16.mxu1 %v1617_v35  ;;  %v565_v34 = vld [vmem:[%s10733_s30 + $0x238] sm:$0xff]  ;;  %v10866_v35 = vrot.slane %v3599_v27, %v10781_v49  ;;  %v1655_v37 = vunpack.c.l.s8.bf16 %v563_v33  ;;  %v1659_v45 = vunpack.c.h.s8.bf16 %v563_v33  ;;  %v578_v27 = vld [vmem:[%s10733_s30 + $0x2a0] sm:$0xff]  ;;  %v583_v33 = vld [vmem:[%s10733_s30 + $0x2c8] sm:$0xff] }
 0x135   : > { %4097 = vmatpush1.bf16.msra.mxu0 %v1614_v39  ;;  %5409 = vmatpush1.bf16.msra.mxu1 %v1616_v40  ;;  %v1657_v39 = vunpack.c.l.s8.bf16 %v565_v34  ;;  %v562_v40 = vld [vmem:[%s10733_s30 + $0x220] sm:$0xff] }
 0x136   : > { %4098 = vmatprep.subr.bf16.mxu0 %v1619_v41  ;;  %5410 = vmatprep.subr.bf16.mxu1 %v1621_v42  ;;  %v564_v41 = vld [vmem:[%s10733_s30 + $0x230] sm:$0xff]  ;;  %v1654_v42 = vunpack.c.l.s8.bf16 %v562_v40 }
 0x137   : > { %v1656_v43 = vunpack.c.l.s8.bf16 %v564_v41  ;;  %v1660_v52 = vunpack.c.h.s8.bf16 %v564_v41  ;;  %v584_v41 = vld [vmem:[%s10733_s30 + $0x2d0] sm:$0xff] }
 0x139   : > { %4099 = vmatpush1.bf16.msra.mxu0 %v1618_v46  ;;  %5411 = vmatpush1.bf16.msra.mxu1 %v1620_v47  ;;  %v1661_v46 = vunpack.c.h.s8.bf16 %v565_v34  ;;  %v567_v47 = vld [vmem:[%s10733_s30 + $0x248] sm:$0xff]  ;;  %v585_v34 = vld [vmem:[%s10733_s30 + $0x2d8] sm:$0xff] }
 0x13a   : > { %4100 = vmatprep.subr.bf16.mxu0 %v1623_v48  ;;  %5412 = vmatprep.subr.bf16.mxu1 %v1625_v51  ;;  %v569_v48 = vld [vmem:[%s10733_s30 + $0x258] sm:$0xff]  ;;  %v1658_v51 = vunpack.c.h.s8.bf16 %v562_v40  ;;  %v1663_v54 = vunpack.c.l.s8.bf16 %v567_v47  ;;  %v1667_v61 = vunpack.c.h.s8.bf16 %v567_v47  ;;  %v582_v40 = vld [vmem:[%s10733_s30 + $0x2c0] sm:$0xff]  ;;  %v587_v47 = vld [vmem:[%s10733_s30 + $0x2e8] sm:$0xff] }
 0x13d   : > { %4101 = vmatpush1.bf16.msra.mxu0 %v1622_v55  ;;  %5413 = vmatpush1.bf16.msra.mxu1 %v1624_v56  ;;  %v1665_v55 = vunpack.c.l.s8.bf16 %v569_v48  ;;  %v566_v56 = vld [vmem:[%s10733_s30 + $0x240] sm:$0xff] }
 0x13e   : > { %4102 = vmatprep.subr.bf16.mxu0 %v1627_v57  ;;  %5414 = vmatprep.subr.bf16.mxu1 %v1629_v59  ;;  %v568_v57 = vld [vmem:[%s10733_s30 + $0x250] sm:$0xff]  ;;  %v1662_v59 = vunpack.c.l.s8.bf16 %v566_v56 }
 0x13f   : > { %v1664_v60 = vunpack.c.l.s8.bf16 %v568_v57  ;;  %v1668_v1 = vunpack.c.h.s8.bf16 %v568_v57  ;;  %v588_v57 = vld [vmem:[%s10733_s30 + $0x2f0] sm:$0xff] }
 0x141   : > { %4103 = vmatpush1.bf16.msra.mxu0 %v1626_v50  ;;  %5415 = vmatpush1.bf16.msra.mxu1 %v1628_v62  ;;  %v1669_v50 = vunpack.c.h.s8.bf16 %v569_v48  ;;  %v571_v62 = vld [vmem:[%s10733_s30 + $0x268] sm:$0xff]  ;;  %v589_v48 = vld [vmem:[%s10733_s30 + $0x2f8] sm:$0xff] }
 0x142   : > { %4104 = vmatprep.subr.bf16.mxu0 %v1631_v63  ;;  %5416 = vmatprep.subr.bf16.mxu1 %v1633_v0  ;;  %v573_v63 = vld [vmem:[%s10733_s30 + $0x278] sm:$0xff]  ;;  %v1666_v0 = vunpack.c.h.s8.bf16 %v566_v56  ;;  %v1671_v2 = vunpack.c.l.s8.bf16 %v571_v62  ;;  %v1675_v7 = vunpack.c.h.s8.bf16 %v571_v62  ;;  %v586_v56 = vld [vmem:[%s10733_s30 + $0x2e0] sm:$0xff]  ;;  %v591_v62 = vld [vmem:[%s10733_s30 + $0x308] sm:$0xff] }
 0x145   : > { %4105 = vmatpush1.bf16.msra.mxu0 %v1630_v58  ;;  %5417 = vmatpush1.bf16.msra.mxu1 %v1632_v3  ;;  %v1673_v58 = vunpack.c.l.s8.bf16 %v573_v63  ;;  %v570_v3 = vld [vmem:[%s10733_s30 + $0x260] sm:$0xff] }
 0x146   : > { %4106 = vmatprep.subr.bf16.mxu0 %v1635_v4  ;;  %5418 = vmatprep.subr.bf16.mxu1 %v1637_v5  ;;  %v572_v4 = vld [vmem:[%s10733_s30 + $0x270] sm:$0xff]  ;;  %v1670_v5 = vunpack.c.l.s8.bf16 %v570_v3 }
 0x147   : > { %v1672_v6 = vunpack.c.l.s8.bf16 %v572_v4  ;;  %v1676_v12 = vunpack.c.h.s8.bf16 %v572_v4  ;;  %v592_v4 = vld [vmem:[%s10733_s30 + $0x310] sm:$0xff] }
 0x149   : > { %4107 = vmatpush1.bf16.msra.mxu0 %v1634_v8  ;;  %5419 = vmatpush1.bf16.msra.mxu1 %v1636_v9  ;;  %v1677_v8 = vunpack.c.h.s8.bf16 %v573_v63  ;;  %v575_v9 = vld [vmem:[%s10733_s30 + $0x288] sm:$0xff]  ;;  %v593_v63 = vld [vmem:[%s10733_s30 + $0x318] sm:$0xff] }
 0x14a   : > { %4108 = vmatprep.subr.bf16.mxu0 %v1639_v10  ;;  %5420 = vmatprep.subr.bf16.mxu1 %v1641_v11  ;;  %v577_v10 = vld [vmem:[%s10733_s30 + $0x298] sm:$0xff]  ;;  %v1674_v11 = vunpack.c.h.s8.bf16 %v570_v3  ;;  %v1679_v13 = vunpack.c.l.s8.bf16 %v575_v9  ;;  %v1683_v19 = vunpack.c.h.s8.bf16 %v575_v9  ;;  %v590_v3 = vld [vmem:[%s10733_s30 + $0x300] sm:$0xff]  ;;  %v1717_v9 = vunpack.c.h.s8.bf16 %v593_v63 }
 0x14b   : > { %v1681_v14 = vunpack.c.l.s8.bf16 %v577_v10  ;;  %v1685_v20 = vunpack.c.h.s8.bf16 %v577_v10  ;;  %v595_v10 = vld [vmem:[%s10733_s30 + $0x328] sm:$0xff] }
 0x14d   : > { %4109 = vmatpush1.bf16.msra.mxu0 %v1638_v15  ;;  %5421 = vmatpush1.bf16.msra.mxu1 %v1640_v16  ;;  %v574_v15 = vld [vmem:[%s10733_s30 + $0x280] sm:$0xff]  ;;  %v576_v16 = vld [vmem:[%s10733_s30 + $0x290] sm:$0xff] }
 0x14e   : > { %4110 = vmatprep.subr.bf16.mxu0 %v1643_v17  ;;  %5422 = vmatprep.subr.bf16.mxu1 %v1645_v18  ;;  %v1678_v17 = vunpack.c.l.s8.bf16 %v574_v15  ;;  %v1680_v18 = vunpack.c.l.s8.bf16 %v576_v16 }
 0x151   : > { %4111 = vmatpush1.bf16.msra.mxu0 %v1642_v22  ;;  %5423 = vmatpush1.bf16.msra.mxu1 %v1644_v23  ;;  %v579_v22 = vld [vmem:[%s10733_s30 + $0x2a8] sm:$0xff]  ;;  %v581_v23 = vld [vmem:[%s10733_s30 + $0x2b8] sm:$0xff] }
 0x152   : > { %4121 = vmatprep.subr.bf16.mxu0 %v1647_v44  ;;  %5433 = vmatprep.subr.bf16.mxu1 %v1649_v24  ;;  %v1682_v44 = vunpack.c.h.s8.bf16 %v574_v15  ;;  %v1684_v24 = vunpack.c.h.s8.bf16 %v576_v16  ;;  %v1687_v25 = vunpack.c.l.s8.bf16 %v579_v22  ;;  %v1689_v26 = vunpack.c.l.s8.bf16 %v581_v23  ;;  %v594_v16 = vld [vmem:[%s10733_s30 + $0x320] sm:$0xff] }
 0x154   : > { %4113 = vmatmul.mubr.bf16.vlgmr.msra.gmra.mrb[0].mxu0 %v3628_v28  ;;  %5425 = vmatmul.mubr.bf16.vlgmr.msra.gmra.mrb[0].mxu1 %v3628_v28  ;;  %v580_v28 = vld [vmem:[%s10733_s30 + $0x2b0] sm:$0xff] }
 0x155   : > { %4122 = vmatpush1.bf16.msra.mxu0 %v1646_v29  ;;  %5434 = vmatpush1.bf16.msra.mxu1 %v1648_v30  ;;  %v1686_v29 = vunpack.c.l.s8.bf16 %v578_v27  ;;  %v1688_v30 = vunpack.c.l.s8.bf16 %v580_v28 }
 0x156   : > { %4123 = vmatprep.subr.bf16.mxu0 %v1651_v31  ;;  %5435 = vmatprep.subr.bf16.mxu1 %v1653_v32  ;;  %v1691_v31 = vunpack.c.h.s8.bf16 %v579_v22  ;;  %v1693_v32 = vunpack.c.h.s8.bf16 %v581_v23  ;;  %v599_v22 = vld [vmem:[%s10733_s30 + $0x348] sm:$0xff]  ;;  %v601_v23 = vld [vmem:[%s10733_s30 + $0x358] sm:$0xff] }
 0x157   : > { %4153 = vmatprep.mubr.bf16.mxu0 %v10866_v35  ;;  %5465 = vmatprep.mubr.bf16.mxu1 %v10866_v35 }
 0x159   : > { %4124 = vmatpush1.bf16.msra.mxu0 %v1650_v53  ;;  %5436 = vmatpush1.bf16.msra.mxu1 %v1652_v36  ;;  %v1690_v53 = vunpack.c.h.s8.bf16 %v578_v27  ;;  %v1692_v36 = vunpack.c.h.s8.bf16 %v580_v28  ;;  %v598_v27 = vld [vmem:[%s10733_s30 + $0x340] sm:$0xff]  ;;  %v600_v28 = vld [vmem:[%s10733_s30 + $0x350] sm:$0xff] }
 0x15a   : > { %4125 = vmatprep.subr.bf16.mxu0 %v1655_v37  ;;  %5437 = vmatprep.subr.bf16.mxu1 %v1657_v39  ;;  %v1695_v37 = vunpack.c.l.s8.bf16 %v583_v33  ;;  %v1697_v39 = vunpack.c.l.s8.bf16 %v585_v34 }
 0x15d   : > { %4126 = vmatpush1.bf16.msra.mxu0 %v1654_v42  ;;  %5438 = vmatpush1.bf16.msra.mxu1 %v1656_v43  ;;  %v1694_v42 = vunpack.c.l.s8.bf16 %v582_v40  ;;  %v1696_v43 = vunpack.c.l.s8.bf16 %v584_v41 }
 0x15e   : > { %4127 = vmatprep.subr.bf16.mxu0 %v1659_v45  ;;  %5439 = vmatprep.subr.bf16.mxu1 %v1661_v46  ;;  %v1699_v45 = vunpack.c.h.s8.bf16 %v583_v33  ;;  %v1701_v46 = vunpack.c.h.s8.bf16 %v585_v34  ;;  %v603_v33 = vld [vmem:[%s10733_s30 + $0x368] sm:$0xff]  ;;  %v605_v34 = vld [vmem:[%s10733_s30 + $0x378] sm:$0xff] }
 0x161   : > { %4128 = vmatpush1.bf16.msra.mxu0 %v1658_v51  ;;  %5440 = vmatpush1.bf16.msra.mxu1 %v1660_v52  ;;  %v1698_v51 = vunpack.c.h.s8.bf16 %v582_v40  ;;  %v1700_v52 = vunpack.c.h.s8.bf16 %v584_v41  ;;  %v602_v40 = vld [vmem:[%s10733_s30 + $0x360] sm:$0xff]  ;;  %v604_v41 = vld [vmem:[%s10733_s30 + $0x370] sm:$0xff] }
 0x162   : > { %4129 = vmatprep.subr.bf16.mxu0 %v1663_v54  ;;  %5441 = vmatprep.subr.bf16.mxu1 %v1665_v55  ;;  %v1703_v54 = vunpack.c.l.s8.bf16 %v587_v47  ;;  %v1705_v55 = vunpack.c.l.s8.bf16 %v589_v48 }
 0x165   : > { %4130 = vmatpush1.bf16.msra.mxu0 %v1662_v59  ;;  %5442 = vmatpush1.bf16.msra.mxu1 %v1664_v60  ;;  %v1702_v59 = vunpack.c.l.s8.bf16 %v586_v56  ;;  %v1704_v60 = vunpack.c.l.s8.bf16 %v588_v57 }
 0x166   : > { %4131 = vmatprep.subr.bf16.mxu0 %v1667_v61  ;;  %5443 = vmatprep.subr.bf16.mxu1 %v1669_v50  ;;  %v1707_v61 = vunpack.c.h.s8.bf16 %v587_v47  ;;  %v1709_v50 = vunpack.c.h.s8.bf16 %v589_v48  ;;  %v607_v47 = vld [vmem:[%s10733_s30 + $0x388] sm:$0xff]  ;;  %v609_v48 = vld [vmem:[%s10733_s30 + $0x398] sm:$0xff] }
 0x169   : > { %4132 = vmatpush1.bf16.msra.mxu0 %v1666_v0  ;;  %5444 = vmatpush1.bf16.msra.mxu1 %v1668_v1  ;;  %v1706_v0 = vunpack.c.h.s8.bf16 %v586_v56  ;;  %v1708_v1 = vunpack.c.h.s8.bf16 %v588_v57  ;;  %v606_v56 = vld [vmem:[%s10733_s30 + $0x380] sm:$0xff]  ;;  %v608_v57 = vld [vmem:[%s10733_s30 + $0x390] sm:$0xff] }
 0x16a   : > { %4133 = vmatprep.subr.bf16.mxu0 %v1671_v2  ;;  %5445 = vmatprep.subr.bf16.mxu1 %v1673_v58  ;;  %v1711_v2 = vunpack.c.l.s8.bf16 %v591_v62  ;;  %v1713_v58 = vunpack.c.l.s8.bf16 %v593_v63  ;;  %v613_v63 = vld [vmem:[%s10733_s30 + $0x3b8] sm:$0xff] }
 0x16d   : > { %4134 = vmatpush1.bf16.msra.mxu0 %v1670_v5  ;;  %5446 = vmatpush1.bf16.msra.mxu1 %v1672_v6  ;;  %v10902_v5 = vrot.slane %v10855_v21, %v10781_v49  ;;  %v1710_v6 = vunpack.c.l.s8.bf16 %v590_v3  ;;  %v1714_v21 = vunpack.c.h.s8.bf16 %v590_v3  ;;  %v610_v3 = vld [vmem:[%s10733_s30 + $0x3a0] sm:$0xff] }
 0x16e   : > { %4135 = vmatprep.subr.bf16.mxu0 %v1675_v7  ;;  %5447 = vmatprep.subr.bf16.mxu1 %v1677_v8  ;;  %v1712_v7 = vunpack.c.l.s8.bf16 %v592_v4  ;;  %v1715_v8 = vunpack.c.h.s8.bf16 %v591_v62  ;;  %v611_v62 = vld [vmem:[%s10733_s30 + $0x3a8] sm:$0xff] }
 0x171   : > { %4136 = vmatpush1.bf16.msra.mxu0 %v1674_v11  ;;  %5448 = vmatpush1.bf16.msra.mxu1 %v1676_v12  ;;  %v597_v11 = vld [vmem:[%s10733_s30 + $0x338] sm:$0xff]  ;;  %v3631_v12 = vcombine.high %v10866_v35, %v10866_v35  ;;  %v1718_v35 = vunpack.c.l.s8.bf16 %v594_v16 }
 0x172   : > { %4137 = vmatprep.subr.bf16.mxu0 %v1679_v13  ;;  %5449 = vmatprep.subr.bf16.mxu1 %v1681_v14  ;;  %v1716_v13 = vunpack.c.h.s8.bf16 %v592_v4  ;;  %v1719_v14 = vunpack.c.l.s8.bf16 %v595_v10  ;;  %v1721_v15 = vunpack.c.l.s8.bf16 %v597_v11  ;;  %v612_v4 = vld [vmem:[%s10733_s30 + $0x3b0] sm:$0xff] }
 0x175   : > { %4138 = vmatpush1.bf16.msra.mxu0 %v1678_v17  ;;  %5450 = vmatpush1.bf16.msra.mxu1 %v1680_v18  ;;  %v596_v17 = vld [vmem:[%s10733_s30 + $0x330] sm:$0xff] }
 0x176   : > { %4139 = vmatprep.subr.bf16.mxu0 %v1683_v19  ;;  %5451 = vmatprep.subr.bf16.mxu1 %v1685_v20  ;;  %v1720_v18 = vunpack.c.l.s8.bf16 %v596_v17  ;;  %v1723_v19 = vunpack.c.h.s8.bf16 %v595_v10  ;;  %v1725_v20 = vunpack.c.h.s8.bf16 %v597_v11  ;;  %v615_v10 = vld [vmem:[%s10733_s30 + $0x3c8] sm:$0xff]  ;;  %v617_v11 = vld [vmem:[%s10733_s30 + $0x3d8] sm:$0xff] }
 0x179   : > { %4140 = vmatpush1.bf16.msra.mxu0 %v1682_v44  ;;  %5452 = vmatpush1.bf16.msra.mxu1 %v1684_v24  ;;  %v1722_v44 = vunpack.c.h.s8.bf16 %v594_v16  ;;  %v1724_v24 = vunpack.c.h.s8.bf16 %v596_v17  ;;  %v616_v16 = vld [vmem:[%s10733_s30 + $0x3d0] sm:$0xff] }
 0x17a   : > { %4141 = vmatprep.subr.bf16.mxu0 %v1687_v25  ;;  %5453 = vmatprep.subr.bf16.mxu1 %v1689_v26  ;;  %v1727_v25 = vunpack.c.l.s8.bf16 %v599_v22  ;;  %v1729_v26 = vunpack.c.l.s8.bf16 %v601_v23 }
 0x17d   : > { %4142 = vmatpush1.bf16.msra.mxu0 %v1686_v29  ;;  %5454 = vmatpush1.bf16.msra.mxu1 %v1688_v30  ;;  %v1726_v29 = vunpack.c.l.s8.bf16 %v598_v27  ;;  %v1728_v30 = vunpack.c.l.s8.bf16 %v600_v28 }
 0x17e   : > { %4143 = vmatprep.subr.bf16.mxu0 %v1691_v31  ;;  %5455 = vmatprep.subr.bf16.mxu1 %v1693_v32  ;;  %v1731_v31 = vunpack.c.h.s8.bf16 %v599_v22  ;;  %v1733_v32 = vunpack.c.h.s8.bf16 %v601_v23  ;;  %v621_v22 = vld [vmem:[%s10733_s30 + $0x3f8] sm:$0xff] }
 0x181   : > { %4144 = vmatpush1.bf16.msra.mxu0 %v1690_v53  ;;  %5456 = vmatpush1.bf16.msra.mxu1 %v1692_v36  ;;  %v1730_v53 = vunpack.c.h.s8.bf16 %v598_v27  ;;  %v1732_v36 = vunpack.c.h.s8.bf16 %v600_v28  ;;  %v620_v27 = vld [vmem:[%s10733_s30 + $0x3f0] sm:$0xff]  ;;  %v10937_v28 = vld [vmem:[%s10755_s15 + $0x8] sm:$0xff] }
 0x182   : > { %4145 = vmatprep.subr.bf16.mxu0 %v1695_v37  ;;  %5457 = vmatprep.subr.bf16.mxu1 %v1697_v39  ;;  %v1735_v37 = vunpack.c.l.s8.bf16 %v603_v33  ;;  %v1737_v39 = vunpack.c.l.s8.bf16 %v605_v34 }
 0x185   : > { %4146 = vmatpush1.bf16.msra.mxu0 %v1694_v42  ;;  %5458 = vmatpush1.bf16.msra.mxu1 %v1696_v43  ;;  %v1734_v42 = vunpack.c.l.s8.bf16 %v602_v40  ;;  %v1736_v43 = vunpack.c.l.s8.bf16 %v604_v41 }
 0x186   : > { %4147 = vmatprep.subr.bf16.mxu0 %v1699_v45  ;;  %5459 = vmatprep.subr.bf16.mxu1 %v1701_v46  ;;  %v1739_v45 = vunpack.c.h.s8.bf16 %v603_v33  ;;  %v1741_v46 = vunpack.c.h.s8.bf16 %v605_v34  ;;  %v623_v33 = vld [vmem:[%s10733_s30 + $0x408] sm:$0xff]  ;;  %v625_v34 = vld [vmem:[%s10733_s30 + $0x418] sm:$0xff] }
 0x189   : > { %4148 = vmatpush1.bf16.msra.mxu0 %v1698_v51  ;;  %5460 = vmatpush1.bf16.msra.mxu1 %v1700_v52  ;;  %v1738_v51 = vunpack.c.h.s8.bf16 %v602_v40  ;;  %v1740_v52 = vunpack.c.h.s8.bf16 %v604_v41  ;;  %v1777_v40 = vunpack.c.l.s8.bf16 %v625_v34  ;;  %v622_v41 = vld [vmem:[%s10733_s30 + $0x400] sm:$0xff] }
 0x18a   : > { %4149 = vmatprep.subr.bf16.mxu0 %v1703_v54  ;;  %5461 = vmatprep.subr.bf16.mxu1 %v1705_v55  ;;  %v1743_v54 = vunpack.c.l.s8.bf16 %v607_v47  ;;  %v1745_v55 = vunpack.c.l.s8.bf16 %v609_v48 }
 0x18d   : > { %4150 = vmatpush1.bf16.msra.mxu0 %v1702_v59  ;;  %5462 = vmatpush1.bf16.msra.mxu1 %v1704_v60  ;;  %v1742_v59 = vunpack.c.l.s8.bf16 %v606_v56  ;;  %v1744_v60 = vunpack.c.l.s8.bf16 %v608_v57 }
 0x18e   : > { %4151 = vmatprep.subr.bf16.mxu0 %v1707_v61  ;;  %5463 = vmatprep.subr.bf16.mxu1 %v1709_v50  ;;  %v1747_v61 = vunpack.c.h.s8.bf16 %v607_v47  ;;  %v1749_v50 = vunpack.c.h.s8.bf16 %v609_v48  ;;  %v1779_v48 = vunpack.c.h.s8.bf16 %v623_v33 }
 0x191   : > { %4152 = vmatpush1.bf16.msra.mxu0 %v1706_v0  ;;  %5464 = vmatpush1.bf16.msra.mxu1 %v1708_v1  ;;  %v1746_v0 = vunpack.c.h.s8.bf16 %v606_v56  ;;  %v1748_v1 = vunpack.c.h.s8.bf16 %v608_v57 }
 0x192   : > { %4162 = vmatprep.subr.bf16.mxu0 %v1711_v2  ;;  %5474 = vmatprep.subr.bf16.mxu1 %v1713_v58  ;;  %v1751_v2 = vunpack.c.l.s8.bf16 %v611_v62  ;;  %v1753_v58 = vunpack.c.l.s8.bf16 %v613_v63 }
 0x194   : > { %4154 = vmatmul.mubr.bf16.vlgmr.msra.gmra.mrb[0].mxu0 %v10902_v5  ;;  %5466 = vmatmul.mubr.bf16.vlgmr.msra.gmra.mrb[0].mxu1 %v10902_v5 }
 0x195   : > { %4163 = vmatpush1.bf16.msra.mxu0 %v1710_v6  ;;  %5475 = vmatpush1.bf16.msra.mxu1 %v1712_v7  ;;  %v1750_v6 = vunpack.c.l.s8.bf16 %v610_v3  ;;  %v1752_v7 = vunpack.c.l.s8.bf16 %v612_v4 }
 0x196   : > { %4164 = vmatprep.subr.bf16.mxu0 %v1715_v8  ;;  %5476 = vmatprep.subr.bf16.mxu1 %v1717_v9  ;;  %v1755_v8 = vunpack.c.h.s8.bf16 %v611_v62  ;;  %v1757_v9 = vunpack.c.h.s8.bf16 %v613_v63 }
 0x197   : > { %4194 = vmatprep.mubr.bf16.mxu0 %v3631_v12  ;;  %5506 = vmatprep.mubr.bf16.mxu1 %v3631_v12  ;;  %v1754_v12 = vunpack.c.h.s8.bf16 %v610_v3 }
 0x199   : > { %4165 = vmatpush1.bf16.msra.mxu0 %v1714_v21  ;;  %5477 = vmatpush1.bf16.msra.mxu1 %v1716_v13  ;;  %v1756_v21 = vunpack.c.h.s8.bf16 %v612_v4  ;;  %v1759_v13 = vunpack.c.l.s8.bf16 %v615_v10 }
 0x19a   : > { %4166 = vmatprep.subr.bf16.mxu0 %v1719_v14  ;;  %5478 = vmatprep.subr.bf16.mxu1 %v1721_v15  ;;  %v1761_v14 = vunpack.c.l.s8.bf16 %v617_v11  ;;  %v614_v15 = vld [vmem:[%s10733_s30 + $0x3c0] sm:$0xff] }
 0x19b   : > { %v1758_v17 = vunpack.c.l.s8.bf16 %v614_v15  ;;  %v1762_v23 = vunpack.c.h.s8.bf16 %v614_v15 }
 0x19d   : > { %4167 = vmatpush1.bf16.msra.mxu0 %v1718_v35  ;;  %5479 = vmatpush1.bf16.msra.mxu1 %v1720_v18  ;;  %v1760_v35 = vunpack.c.l.s8.bf16 %v616_v16  ;;  %v1763_v18 = vunpack.c.h.s8.bf16 %v615_v10 }
 0x19e   : > { %4168 = vmatprep.subr.bf16.mxu0 %v1723_v19  ;;  %5480 = vmatprep.subr.bf16.mxu1 %v1725_v20  ;;  %v1765_v19 = vunpack.c.h.s8.bf16 %v617_v11  ;;  %v619_v20 = vld [vmem:[%s10733_s30 + $0x3e8] sm:$0xff] }
 0x1a1   : > { %4169 = vmatpush1.bf16.msra.mxu0 %v1722_v44  ;;  %5481 = vmatpush1.bf16.msra.mxu1 %v1724_v24  ;;  %v1764_v44 = vunpack.c.h.s8.bf16 %v616_v16  ;;  %v1767_v24 = vunpack.c.l.s8.bf16 %v619_v20 }
 0x1a2   : > { %4170 = vmatprep.subr.bf16.mxu0 %v1727_v25  ;;  %5482 = vmatprep.subr.bf16.mxu1 %v1729_v26  ;;  %v1769_v25 = vunpack.c.l.s8.bf16 %v621_v22  ;;  %v618_v26 = vld [vmem:[%s10733_s30 + $0x3e0] sm:$0xff] }
 0x1a5   : > { %4171 = vmatpush1.bf16.msra.mxu0 %v1726_v29  ;;  %5483 = vmatpush1.bf16.msra.mxu1 %v1728_v30  ;;  %v1766_v29 = vunpack.c.l.s8.bf16 %v618_v26  ;;  %v1768_v30 = vunpack.c.l.s8.bf16 %v620_v27 }
 0x1a6   : > { %4172 = vmatprep.subr.bf16.mxu0 %v1731_v31  ;;  %5484 = vmatprep.subr.bf16.mxu1 %v1733_v32  ;;  %v1771_v31 = vunpack.c.h.s8.bf16 %v619_v20  ;;  %v1773_v32 = vunpack.c.h.s8.bf16 %v621_v22 }
 0x1a9   : > { %4173 = vmatpush1.bf16.msra.mxu0 %v1730_v53  ;;  %5485 = vmatpush1.bf16.msra.mxu1 %v1732_v36  ;;  %v10943_v53 = vrot.slane %v10937_v28, %v10781_v49  ;;  %v1770_v36 = vunpack.c.h.s8.bf16 %v618_v26 }
 0x1aa   : > { %4174 = vmatprep.subr.bf16.mxu0 %v1735_v37  ;;  %5486 = vmatprep.subr.bf16.mxu1 %v1737_v39  ;;  %v1772_v37 = vunpack.c.h.s8.bf16 %v620_v27  ;;  %v1775_v39 = vunpack.c.l.s8.bf16 %v623_v33 }
 0x1ad   : > { %4175 = vmatpush1.bf16.msra.mxu0 %v1734_v42  ;;  %5487 = vmatpush1.bf16.msra.mxu1 %v1736_v43  ;;  %v624_v42 = vld [vmem:[%s10733_s30 + $0x410] sm:$0xff]  ;;  %v3647_v43 = vcombine.high %v10943_v53, %v10943_v53 }
 0x1ae   : > { %4176 = vmatprep.subr.bf16.mxu0 %v1739_v45  ;;  %5488 = vmatprep.subr.bf16.mxu1 %v1741_v46  ;;  %v3629_v45 = vcombine.high %v10902_v5, %v10902_v5  ;;  %v1774_v46 = vunpack.c.l.s8.bf16 %v622_v41  ;;  %v1776_v47 = vunpack.c.l.s8.bf16 %v624_v42  ;;  %v1778_v5 = vunpack.c.h.s8.bf16 %v622_v41 }
 0x1af   : > { %v1780_v56 = vunpack.c.h.s8.bf16 %v624_v42 }
 0x1b1   : > { %4177 = vmatpush1.bf16.msra.mxu0 %v1738_v51  ;;  %5489 = vmatpush1.bf16.msra.mxu1 %v1740_v52  ;;  %v1781_v51 = vunpack.c.h.s8.bf16 %v625_v34  ;;  %v627_v52 = vld [vmem:[%s10733_s30 + $0x428] sm:$0xff] }
 0x1b2   : > { %4178 = vmatprep.subr.bf16.mxu0 %v1743_v54  ;;  %5490 = vmatprep.subr.bf16.mxu1 %v1745_v55  ;;  %v629_v54 = vld [vmem:[%s10733_s30 + $0x438] sm:$0xff]  ;;  %v10954_v55 = vrot.slane %v3647_v43, %v10781_v49  ;;  %v1783_v57 = vunpack.c.l.s8.bf16 %v627_v52  ;;  %v1787_v63 = vunpack.c.h.s8.bf16 %v627_v52 }
 0x1b5   : > { %4179 = vmatpush1.bf16.msra.mxu0 %v1742_v59  ;;  %5491 = vmatpush1.bf16.msra.mxu1 %v1744_v60  ;;  %v1785_v59 = vunpack.c.l.s8.bf16 %v629_v54  ;;  %v626_v60 = vld [vmem:[%s10733_s30 + $0x420] sm:$0xff] }
 0x1b6   : > { %4180 = vmatprep.subr.bf16.mxu0 %v1747_v61  ;;  %5492 = vmatprep.subr.bf16.mxu1 %v1749_v50  ;;  %v628_v61 = vld [vmem:[%s10733_s30 + $0x430] sm:$0xff]  ;;  %v1782_v50 = vunpack.c.l.s8.bf16 %v626_v60 }
 0x1b7   : > { %v1784_v62 = vunpack.c.l.s8.bf16 %v628_v61  ;;  %v1788_v3 = vunpack.c.h.s8.bf16 %v628_v61  ;;  %v646_v61 = vld [vmem:[%s10733_s30 + $0x4c0] sm:$0xff] }
 0x1b9   : > { %4181 = vmatpush1.bf16.msra.mxu0 %v1746_v0  ;;  %5493 = vmatpush1.bf16.msra.mxu1 %v1748_v1  ;;  %v1789_v0 = vunpack.c.h.s8.bf16 %v629_v54  ;;  %v631_v1 = vld [vmem:[%s10733_s30 + $0x448] sm:$0xff] }
 0x1ba   : > { %4182 = vmatprep.subr.bf16.mxu0 %v1751_v2  ;;  %5494 = vmatprep.subr.bf16.mxu1 %v1753_v58  ;;  %v633_v2 = vld [vmem:[%s10733_s30 + $0x458] sm:$0xff]  ;;  %v1786_v58 = vunpack.c.h.s8.bf16 %v626_v60  ;;  %v1791_v4 = vunpack.c.l.s8.bf16 %v631_v1  ;;  %v1795_v11 = vunpack.c.h.s8.bf16 %v631_v1  ;;  %v647_v54 = vld [vmem:[%s10733_s30 + $0x4c8] sm:$0xff] }
 0x1bd   : > { %4183 = vmatpush1.bf16.msra.mxu0 %v1750_v6  ;;  %5495 = vmatpush1.bf16.msra.mxu1 %v1752_v7  ;;  %v1793_v6 = vunpack.c.l.s8.bf16 %v633_v2  ;;  %v630_v7 = vld [vmem:[%s10733_s30 + $0x440] sm:$0xff] }
 0x1be   : > { %4184 = vmatprep.subr.bf16.mxu0 %v1755_v8  ;;  %5496 = vmatprep.subr.bf16.mxu1 %v1757_v9  ;;  %v632_v8 = vld [vmem:[%s10733_s30 + $0x450] sm:$0xff]  ;;  %v1790_v9 = vunpack.c.l.s8.bf16 %v630_v7 }
 0x1bf   : > { %v1792_v10 = vunpack.c.l.s8.bf16 %v632_v8  ;;  %v1796_v15 = vunpack.c.h.s8.bf16 %v632_v8  ;;  %v650_v8 = vld [vmem:[%s10733_s30 + $0x4e0] sm:$0xff] }
 0x1c1   : > { %4185 = vmatpush1.bf16.msra.mxu0 %v1754_v12  ;;  %5497 = vmatpush1.bf16.msra.mxu1 %v1756_v21  ;;  %v1797_v12 = vunpack.c.h.s8.bf16 %v633_v2  ;;  %v635_v21 = vld [vmem:[%s10733_s30 + $0x468] sm:$0xff] }
 0x1c2   : > { %4186 = vmatprep.subr.bf16.mxu0 %v1759_v13  ;;  %5498 = vmatprep.subr.bf16.mxu1 %v1761_v14  ;;  %v637_v13 = vld [vmem:[%s10733_s30 + $0x478] sm:$0xff]  ;;  %v1794_v14 = vunpack.c.h.s8.bf16 %v630_v7  ;;  %v1799_v16 = vunpack.c.l.s8.bf16 %v635_v21  ;;  %v1803_v22 = vunpack.c.h.s8.bf16 %v635_v21  ;;  %v651_v2 = vld [vmem:[%s10733_s30 + $0x4e8] sm:$0xff] }
 0x1c5   : > { %4187 = vmatpush1.bf16.msra.mxu0 %v1758_v17  ;;  %5499 = vmatpush1.bf16.msra.mxu1 %v1760_v35  ;;  %v1801_v17 = vunpack.c.l.s8.bf16 %v637_v13  ;;  %v634_v35 = vld [vmem:[%s10733_s30 + $0x460] sm:$0xff] }
 0x1c6   : > { %4188 = vmatprep.subr.bf16.mxu0 %v1763_v18  ;;  %5500 = vmatprep.subr.bf16.mxu1 %v1765_v19  ;;  %v636_v18 = vld [vmem:[%s10733_s30 + $0x470] sm:$0xff]  ;;  %v1798_v19 = vunpack.c.l.s8.bf16 %v634_v35 }
 0x1c7   : > { %v1800_v20 = vunpack.c.l.s8.bf16 %v636_v18  ;;  %v1804_v26 = vunpack.c.h.s8.bf16 %v636_v18  ;;  %v654_v18 = vld [vmem:[%s10733_s30 + $0x500] sm:$0xff] }
 0x1c9   : > { %4189 = vmatpush1.bf16.msra.mxu0 %v1762_v23  ;;  %5501 = vmatpush1.bf16.msra.mxu1 %v1764_v44  ;;  %v1805_v23 = vunpack.c.h.s8.bf16 %v637_v13  ;;  %v639_v44 = vld [vmem:[%s10733_s30 + $0x488] sm:$0xff] }
 0x1ca   : > { %4190 = vmatprep.subr.bf16.mxu0 %v1767_v24  ;;  %5502 = vmatprep.subr.bf16.mxu1 %v1769_v25  ;;  %v641_v24 = vld [vmem:[%s10733_s30 + $0x498] sm:$0xff]  ;;  %v1802_v25 = vunpack.c.h.s8.bf16 %v634_v35  ;;  %v1807_v27 = vunpack.c.l.s8.bf16 %v639_v44  ;;  %v1811_v34 = vunpack.c.h.s8.bf16 %v639_v44  ;;  %v655_v13 = vld [vmem:[%s10733_s30 + $0x508] sm:$0xff] }
 0x1cb   : > { %v1843_v44 = vunpack.c.h.s8.bf16 %v655_v13 }
 0x1cd   : > { %4191 = vmatpush1.bf16.msra.mxu0 %v1766_v29  ;;  %5503 = vmatpush1.bf16.msra.mxu1 %v1768_v30  ;;  %v1809_v29 = vunpack.c.l.s8.bf16 %v641_v24  ;;  %v638_v30 = vld [vmem:[%s10733_s30 + $0x480] sm:$0xff] }
 0x1ce   : > { %4192 = vmatprep.subr.bf16.mxu0 %v1771_v31  ;;  %5504 = vmatprep.subr.bf16.mxu1 %v1773_v32  ;;  %v640_v31 = vld [vmem:[%s10733_s30 + $0x490] sm:$0xff]  ;;  %v1806_v32 = vunpack.c.l.s8.bf16 %v638_v30 }
 0x1cf   : > { %v1808_v33 = vunpack.c.l.s8.bf16 %v640_v31  ;;  %v1812_v41 = vunpack.c.h.s8.bf16 %v640_v31 }
 0x1d1   : > { %4193 = vmatpush1.bf16.msra.mxu0 %v1770_v36  ;;  %5505 = vmatpush1.bf16.msra.mxu1 %v1772_v37  ;;  %v1813_v36 = vunpack.c.h.s8.bf16 %v641_v24  ;;  %v643_v37 = vld [vmem:[%s10733_s30 + $0x4a8] sm:$0xff] }
 0x1d2   : > { %4203 = vmatprep.subr.bf16.mxu0 %v1775_v39  ;;  %5515 = vmatprep.subr.bf16.mxu1 %v1777_v40  ;;  %v645_v39 = vld [vmem:[%s10733_s30 + $0x4b8] sm:$0xff]  ;;  %v1810_v40 = vunpack.c.h.s8.bf16 %v638_v30  ;;  %v1815_v42 = vunpack.c.l.s8.bf16 %v643_v37 }
 0x1d3   : > { %v1817_v43 = vunpack.c.l.s8.bf16 %v645_v39  ;;  %v1821_v52 = vunpack.c.h.s8.bf16 %v645_v39  ;;  %v663_v39 = vld [vmem:[%s10733_s30 + $0x548] sm:$0xff] }
 0x1d4   : > { %4195 = vmatmul.mubr.bf16.vlgmr.msra.gmra.mrb[0].mxu0 %v3629_v45  ;;  %5507 = vmatmul.mubr.bf16.vlgmr.msra.gmra.mrb[0].mxu1 %v3629_v45  ;;  %v642_v45 = vld [vmem:[%s10733_s30 + $0x4a0] sm:$0xff] }
 0x1d5   : > { %4204 = vmatpush1.bf16.msra.mxu0 %v1774_v46  ;;  %5516 = vmatpush1.bf16.msra.mxu1 %v1776_v47  ;;  %v644_v46 = vld [vmem:[%s10733_s30 + $0x4b0] sm:$0xff]  ;;  %v1814_v47 = vunpack.c.l.s8.bf16 %v642_v45 }
 0x1d6   : > { %4205 = vmatprep.subr.bf16.mxu0 %v1779_v48  ;;  %5517 = vmatprep.subr.bf16.mxu1 %v1781_v51  ;;  %v1816_v48 = vunpack.c.l.s8.bf16 %v644_v46  ;;  %v1819_v51 = vunpack.c.h.s8.bf16 %v643_v37 }
 0x1d7   : > { %4235 = vmatprep.mubr.bf16.mxu0 %v10954_v55  ;;  %5547 = vmatprep.mubr.bf16.mxu1 %v10954_v55 }
 0x1d9   : > { %4206 = vmatpush1.bf16.msra.mxu0 %v1778_v5  ;;  %5518 = vmatpush1.bf16.msra.mxu1 %v1780_v56  ;;  %v649_v5 = vld [vmem:[%s10733_s30 + $0x4d8] sm:$0xff]  ;;  %v1818_v56 = vunpack.c.h.s8.bf16 %v642_v45 }
 0x1da   : > { %4207 = vmatprep.subr.bf16.mxu0 %v1783_v57  ;;  %5519 = vmatprep.subr.bf16.mxu1 %v1785_v59  ;;  %v1820_v57 = vunpack.c.h.s8.bf16 %v644_v46  ;;  %v1823_v59 = vunpack.c.l.s8.bf16 %v647_v54  ;;  %v1825_v60 = vunpack.c.l.s8.bf16 %v649_v5  ;;  %v1829_v1 = vunpack.c.h.s8.bf16 %v649_v5  ;;  %v662_v46 = vld [vmem:[%s10733_s30 + $0x540] sm:$0xff]  ;;  %v667_v5 = vld [vmem:[%s10733_s30 + $0x568] sm:$0xff] }
 0x1dd   : > { %4208 = vmatpush1.bf16.msra.mxu0 %v1782_v50  ;;  %5520 = vmatpush1.bf16.msra.mxu1 %v1784_v62  ;;  %v648_v50 = vld [vmem:[%s10733_s30 + $0x4d0] sm:$0xff]  ;;  %v1822_v62 = vunpack.c.l.s8.bf16 %v646_v61 }
 0x1de   : > { %4209 = vmatprep.subr.bf16.mxu0 %v1787_v63  ;;  %5521 = vmatprep.subr.bf16.mxu1 %v1789_v0  ;;  %v1824_v63 = vunpack.c.l.s8.bf16 %v648_v50  ;;  %v1827_v0 = vunpack.c.h.s8.bf16 %v647_v54 }
 0x1e1   : > { %4210 = vmatpush1.bf16.msra.mxu0 %v1786_v58  ;;  %5522 = vmatpush1.bf16.msra.mxu1 %v1788_v3  ;;  %v653_v58 = vld [vmem:[%s10733_s30 + $0x4f8] sm:$0xff]  ;;  %v1826_v3 = vunpack.c.h.s8.bf16 %v646_v61 }
 0x1e2   : > { %4211 = vmatprep.subr.bf16.mxu0 %v1791_v4  ;;  %5523 = vmatprep.subr.bf16.mxu1 %v1793_v6  ;;  %v1828_v4 = vunpack.c.h.s8.bf16 %v648_v50  ;;  %v1831_v6 = vunpack.c.l.s8.bf16 %v651_v2  ;;  %v1833_v7 = vunpack.c.l.s8.bf16 %v653_v58  ;;  %v1837_v21 = vunpack.c.h.s8.bf16 %v653_v58  ;;  %v666_v50 = vld [vmem:[%s10733_s30 + $0x560] sm:$0xff]  ;;  %v671_v58 = vld [vmem:[%s10733_s30 + $0x588] sm:$0xff] }
 0x1e5   : > { %4212 = vmatpush1.bf16.msra.mxu0 %v1790_v9  ;;  %5524 = vmatpush1.bf16.msra.mxu1 %v1792_v10  ;;  %v652_v9 = vld [vmem:[%s10733_s30 + $0x4f0] sm:$0xff]  ;;  %v1830_v10 = vunpack.c.l.s8.bf16 %v650_v8 }
 0x1e6   : > { %4213 = vmatprep.subr.bf16.mxu0 %v1795_v11  ;;  %5525 = vmatprep.subr.bf16.mxu1 %v1797_v12  ;;  %v1832_v11 = vunpack.c.l.s8.bf16 %v652_v9  ;;  %v1835_v12 = vunpack.c.h.s8.bf16 %v651_v2 }
 0x1e9   : > { %4214 = vmatpush1.bf16.msra.mxu0 %v1794_v14  ;;  %5526 = vmatpush1.bf16.msra.mxu1 %v1796_v15  ;;  %v657_v14 = vld [vmem:[%s10733_s30 + $0x518] sm:$0xff]  ;;  %v1834_v15 = vunpack.c.h.s8.bf16 %v650_v8 }
 0x1ea   : > { %4215 = vmatprep.subr.bf16.mxu0 %v1799_v16  ;;  %5527 = vmatprep.subr.bf16.mxu1 %v1801_v17  ;;  %v1836_v16 = vunpack.c.h.s8.bf16 %v652_v9  ;;  %v1839_v17 = vunpack.c.l.s8.bf16 %v655_v13  ;;  %v1841_v35 = vunpack.c.l.s8.bf16 %v657_v14  ;;  %v1845_v24 = vunpack.c.h.s8.bf16 %v657_v14  ;;  %v670_v9 = vld [vmem:[%s10733_s30 + $0x580] sm:$0xff]  ;;  %v675_v14 = vld [vmem:[%s10733_s30 + $0x5a8] sm:$0xff] }
 0x1ed   : > { %4216 = vmatpush1.bf16.msra.mxu0 %v1798_v19  ;;  %5528 = vmatpush1.bf16.msra.mxu1 %v1800_v20  ;;  %v656_v19 = vld [vmem:[%s10733_s30 + $0x510] sm:$0xff]  ;;  %v10990_v20 = vrot.slane %v10943_v53, %v10781_v49  ;;  %v1842_v53 = vunpack.c.h.s8.bf16 %v654_v18 }
 0x1ee   : > { %4217 = vmatprep.subr.bf16.mxu0 %v1803_v22  ;;  %5529 = vmatprep.subr.bf16.mxu1 %v1805_v23  ;;  %v1838_v22 = vunpack.c.l.s8.bf16 %v654_v18  ;;  %v1840_v23 = vunpack.c.l.s8.bf16 %v656_v19 }
 0x1f1   : > { %4218 = vmatpush1.bf16.msra.mxu0 %v1802_v25  ;;  %5530 = vmatpush1.bf16.msra.mxu1 %v1804_v26  ;;  %v659_v25 = vld [vmem:[%s10733_s30 + $0x528] sm:$0xff]  ;;  %v661_v26 = vld [vmem:[%s10733_s30 + $0x538] sm:$0xff] }
 0x1f2   : > { %4219 = vmatprep.subr.bf16.mxu0 %v1807_v27  ;;  %5531 = vmatprep.subr.bf16.mxu1 %v1809_v29  ;;  %v3679_v27 = vcombine.high %v10954_v55, %v10954_v55  ;;  %v1844_v29 = vunpack.c.h.s8.bf16 %v656_v19  ;;  %v1847_v30 = vunpack.c.l.s8.bf16 %v659_v25  ;;  %v1849_v31 = vunpack.c.l.s8.bf16 %v661_v26  ;;  %v674_v19 = vld [vmem:[%s10733_s30 + $0x5a0] sm:$0xff] }
 0x1f3   : > { %v1853_v37 = vunpack.c.h.s8.bf16 %v661_v26  ;;  %v679_v26 = vld [vmem:[%s10733_s30 + $0x5c8] sm:$0xff] }
 0x1f5   : > { %4220 = vmatpush1.bf16.msra.mxu0 %v1806_v32  ;;  %5532 = vmatpush1.bf16.msra.mxu1 %v1808_v33  ;;  %v658_v32 = vld [vmem:[%s10733_s30 + $0x520] sm:$0xff]  ;;  %v660_v33 = vld [vmem:[%s10733_s30 + $0x530] sm:$0xff] }
 0x1f6   : > { %4221 = vmatprep.subr.bf16.mxu0 %v1811_v34  ;;  %5533 = vmatprep.subr.bf16.mxu1 %v1813_v36  ;;  %v1846_v55 = vunpack.c.l.s8.bf16 %v658_v32  ;;  %v1848_v34 = vunpack.c.l.s8.bf16 %v660_v33  ;;  %v1851_v36 = vunpack.c.h.s8.bf16 %v659_v25 }
 0x1f9   : > { %4222 = vmatpush1.bf16.msra.mxu0 %v1810_v40  ;;  %5534 = vmatpush1.bf16.msra.mxu1 %v1812_v41  ;;  %v665_v40 = vld [vmem:[%s10733_s30 + $0x558] sm:$0xff]  ;;  %v1850_v41 = vunpack.c.h.s8.bf16 %v658_v32  ;;  %v678_v32 = vld [vmem:[%s10733_s30 + $0x5c0] sm:$0xff] }
 0x1fa   : > { %4223 = vmatprep.subr.bf16.mxu0 %v1815_v42  ;;  %5535 = vmatprep.subr.bf16.mxu1 %v1817_v43  ;;  %v1852_v42 = vunpack.c.h.s8.bf16 %v660_v33  ;;  %v1855_v43 = vunpack.c.l.s8.bf16 %v663_v39  ;;  %v1857_v45 = vunpack.c.l.s8.bf16 %v665_v40  ;;  %v1861_v54 = vunpack.c.h.s8.bf16 %v665_v40  ;;  %v680_v33 = vld [vmem:[%s10733_s30 + $0x5d0] sm:$0xff]  ;;  %v685_v40 = vld [vmem:[%s10733_s30 + $0x5f8] sm:$0xff] }
 0x1fd   : > { %4224 = vmatpush1.bf16.msra.mxu0 %v1814_v47  ;;  %5536 = vmatpush1.bf16.msra.mxu1 %v1816_v48  ;;  %v664_v47 = vld [vmem:[%s10733_s30 + $0x550] sm:$0xff]  ;;  %v1854_v48 = vunpack.c.l.s8.bf16 %v662_v46 }
 0x1fe   : > { %4225 = vmatprep.subr.bf16.mxu0 %v1819_v51  ;;  %5537 = vmatprep.subr.bf16.mxu1 %v1821_v52  ;;  %v1856_v51 = vunpack.c.l.s8.bf16 %v664_v47  ;;  %v1859_v52 = vunpack.c.h.s8.bf16 %v663_v39  ;;  %v683_v39 = vld [vmem:[%s10733_s30 + $0x5e8] sm:$0xff] }
 0x201   : > { %4226 = vmatpush1.bf16.msra.mxu0 %v1818_v56  ;;  %5538 = vmatpush1.bf16.msra.mxu1 %v1820_v57  ;;  %v669_v56 = vld [vmem:[%s10733_s30 + $0x578] sm:$0xff]  ;;  %v1858_v57 = vunpack.c.h.s8.bf16 %v662_v46  ;;  %v682_v46 = vld [vmem:[%s10733_s30 + $0x5e0] sm:$0xff] }
 0x202   : > { %4227 = vmatprep.subr.bf16.mxu0 %v1823_v59  ;;  %5539 = vmatprep.subr.bf16.mxu1 %v1825_v60  ;;  %v1860_v59 = vunpack.c.h.s8.bf16 %v664_v47  ;;  %v1863_v60 = vunpack.c.l.s8.bf16 %v667_v5  ;;  %v1865_v61 = vunpack.c.l.s8.bf16 %v669_v56  ;;  %v1869_v2 = vunpack.c.h.s8.bf16 %v669_v56  ;;  %v684_v47 = vld [vmem:[%s10733_s30 + $0x5f0] sm:$0xff]  ;;  %v687_v56 = vld [vmem:[%s10733_s30 + $0x608] sm:$0xff] }
 0x205   : > { %4228 = vmatpush1.bf16.msra.mxu0 %v1822_v62  ;;  %5540 = vmatpush1.bf16.msra.mxu1 %v1824_v63  ;;  %v668_v62 = vld [vmem:[%s10733_s30 + $0x570] sm:$0xff]  ;;  %v1862_v63 = vunpack.c.l.s8.bf16 %v666_v50 }
 0x206   : > { %4229 = vmatprep.subr.bf16.mxu0 %v1827_v0  ;;  %5541 = vmatprep.subr.bf16.mxu1 %v1829_v1  ;;  %v1864_v0 = vunpack.c.l.s8.bf16 %v668_v62  ;;  %v1867_v1 = vunpack.c.h.s8.bf16 %v667_v5  ;;  %v1901_v5 = vunpack.c.h.s8.bf16 %v685_v40 }
 0x209   : > { %4230 = vmatpush1.bf16.msra.mxu0 %v1826_v3  ;;  %5542 = vmatpush1.bf16.msra.mxu1 %v1828_v4  ;;  %v673_v3 = vld [vmem:[%s10733_s30 + $0x598] sm:$0xff]  ;;  %v1866_v4 = vunpack.c.h.s8.bf16 %v666_v50 }
 0x20a   : > { %4231 = vmatprep.subr.bf16.mxu0 %v1831_v6  ;;  %5543 = vmatprep.subr.bf16.mxu1 %v1833_v7  ;;  %v1868_v6 = vunpack.c.h.s8.bf16 %v668_v62  ;;  %v1871_v7 = vunpack.c.l.s8.bf16 %v671_v58  ;;  %v1873_v8 = vunpack.c.l.s8.bf16 %v673_v3  ;;  %v1877_v13 = vunpack.c.h.s8.bf16 %v673_v3  ;;  %v686_v62 = vld [vmem:[%s10733_s30 + $0x600] sm:$0xff] }
 0x20b   : > { %v1907_v3 = vunpack.c.h.s8.bf16 %v687_v56 }
 0x20d   : > { %4232 = vmatpush1.bf16.msra.mxu0 %v1830_v10  ;;  %5544 = vmatpush1.bf16.msra.mxu1 %v1832_v11  ;;  %v672_v10 = vld [vmem:[%s10733_s30 + $0x590] sm:$0xff]  ;;  %v1870_v11 = vunpack.c.l.s8.bf16 %v670_v9 }
 0x20e   : > { %4233 = vmatprep.subr.bf16.mxu0 %v1835_v12  ;;  %5545 = vmatprep.subr.bf16.mxu1 %v1837_v21  ;;  %v1872_v12 = vunpack.c.l.s8.bf16 %v672_v10  ;;  %v1875_v21 = vunpack.c.h.s8.bf16 %v671_v58 }
 0x211   : > { %4234 = vmatpush1.bf16.msra.mxu0 %v1834_v15  ;;  %5546 = vmatpush1.bf16.msra.mxu1 %v1836_v16  ;;  %v677_v15 = vld [vmem:[%s10733_s30 + $0x5b8] sm:$0xff]  ;;  %v1874_v16 = vunpack.c.h.s8.bf16 %v670_v9 }
 0x212   : > { %4244 = vmatprep.subr.bf16.mxu0 %v1839_v17  ;;  %5556 = vmatprep.subr.bf16.mxu1 %v1841_v35  ;;  %v1876_v17 = vunpack.c.h.s8.bf16 %v672_v10  ;;  %v1879_v35 = vunpack.c.l.s8.bf16 %v675_v14  ;;  %v1881_v18 = vunpack.c.l.s8.bf16 %v677_v15  ;;  %v1885_v25 = vunpack.c.h.s8.bf16 %v677_v15 }
 0x214   : > { %4236 = vmatmul.mubr.bf16.vlgmr.msra.gmra.mrb[0].mxu0 %v10990_v20  ;;  %5548 = vmatmul.mubr.bf16.vlgmr.msra.gmra.mrb[0].mxu1 %v10990_v20 }
 0x215   : > { %4245 = vmatpush1.bf16.msra.mxu0 %v1838_v22  ;;  %5557 = vmatpush1.bf16.msra.mxu1 %v1840_v23  ;;  %v676_v22 = vld [vmem:[%s10733_s30 + $0x5b0] sm:$0xff]  ;;  %v1878_v23 = vunpack.c.l.s8.bf16 %v674_v19 }
 0x216   : > { %4246 = vmatprep.subr.bf16.mxu0 %v1843_v44  ;;  %5558 = vmatprep.subr.bf16.mxu1 %v1845_v24  ;;  %v1880_v44 = vunpack.c.l.s8.bf16 %v676_v22  ;;  %v1883_v24 = vunpack.c.h.s8.bf16 %v675_v14 }
 0x217   : > { %4276 = vmatprep.mubr.bf16.mxu0 %v3679_v27  ;;  %5588 = vmatprep.mubr.bf16.mxu1 %v3679_v27  ;;  %v681_v27 = vld [vmem:[%s10733_s30 + $0x5d8] sm:$0xff] }
 0x219   : > { %4247 = vmatpush1.bf16.msra.mxu0 %v1842_v53  ;;  %5559 = vmatpush1.bf16.msra.mxu1 %v1844_v29  ;;  %v1882_v53 = vunpack.c.h.s8.bf16 %v674_v19  ;;  %v1884_v29 = vunpack.c.h.s8.bf16 %v676_v22 }
 0x21a   : > { %4248 = vmatprep.subr.bf16.mxu0 %v1847_v30  ;;  %5560 = vmatprep.subr.bf16.mxu1 %v1849_v31  ;;  %v1887_v30 = vunpack.c.l.s8.bf16 %v679_v26  ;;  %v1889_v31 = vunpack.c.l.s8.bf16 %v681_v27 }
 0x21d   : > { %4249 = vmatpush1.bf16.msra.mxu0 %v1846_v55  ;;  %5561 = vmatpush1.bf16.msra.mxu1 %v1848_v34  ;;  %v1886_v55 = vunpack.c.l.s8.bf16 %v678_v32  ;;  %v1888_v34 = vunpack.c.l.s8.bf16 %v680_v33 }
 0x21e   : > { %4250 = vmatprep.subr.bf16.mxu0 %v1851_v36  ;;  %5562 = vmatprep.subr.bf16.mxu1 %v1853_v37  ;;  %v1891_v36 = vunpack.c.h.s8.bf16 %v679_v26  ;;  %v1893_v37 = vunpack.c.h.s8.bf16 %v681_v27 }
 0x221   : > { %4251 = vmatpush1.bf16.msra.mxu0 %v1850_v41  ;;  %5563 = vmatpush1.bf16.msra.mxu1 %v1852_v42  ;;  %v1890_v41 = vunpack.c.h.s8.bf16 %v678_v32  ;;  %v1892_v42 = vunpack.c.h.s8.bf16 %v680_v33 }
 0x222   : > { %4252 = vmatprep.subr.bf16.mxu0 %v1855_v43  ;;  %5564 = vmatprep.subr.bf16.mxu1 %v1857_v45  ;;  %v1895_v43 = vunpack.c.l.s8.bf16 %v683_v39  ;;  %v1897_v45 = vunpack.c.l.s8.bf16 %v685_v40 }
 0x225   : > { %4253 = vmatpush1.bf16.msra.mxu0 %v1854_v48  ;;  %5565 = vmatpush1.bf16.msra.mxu1 %v1856_v51  ;;  %v3632_v48 = vcombine.high %v10937_v28, %v10937_v28  ;;  %v1894_v51 = vunpack.c.l.s8.bf16 %v682_v46  ;;  %v1903_v28 = vunpack.c.l.s8.bf16 %v687_v56 }
 0x226   : > { %4254 = vmatprep.subr.bf16.mxu0 %v1859_v52  ;;  %5566 = vmatprep.subr.bf16.mxu1 %v1861_v54  ;;  %v1896_v52 = vunpack.c.l.s8.bf16 %v684_v47  ;;  %v1899_v54 = vunpack.c.h.s8.bf16 %v683_v39 }
 0x229   : > { %4255 = vmatpush1.bf16.msra.mxu0 %v1858_v57  ;;  %5567 = vmatpush1.bf16.msra.mxu1 %v1860_v59  ;;  %v689_v57 = vld [vmem:[%s10733_s30 + $0x618] sm:$0xff]  ;;  %v11029_v59 = vrot.slane %v3632_v48, %v10781_v49 }
 0x22a   : > { %4256 = vmatprep.subr.bf16.mxu0 %v1863_v60  ;;  %5568 = vmatprep.subr.bf16.mxu1 %v1865_v61  ;;  %v1898_v60 = vunpack.c.h.s8.bf16 %v682_v46  ;;  %v1900_v61 = vunpack.c.h.s8.bf16 %v684_v47  ;;  %v1905_v50 = vunpack.c.l.s8.bf16 %v689_v57 }
 0x22d   : > { %4257 = vmatpush1.bf16.msra.mxu0 %v1862_v63  ;;  %5569 = vmatpush1.bf16.msra.mxu1 %v1864_v0  ;;  %v688_v63 = vld [vmem:[%s10733_s30 + $0x610] sm:$0xff]  ;;  %v3648_v0 = vcombine.high %v11029_v59, %v11029_v59 }
 0x22e   : > { %4258 = vmatprep.subr.bf16.mxu0 %v1867_v1  ;;  %5570 = vmatprep.subr.bf16.mxu1 %v1869_v2  ;;  %v3677_v1 = vcombine.high %v10990_v20, %v10990_v20  ;;  %v1902_v2 = vunpack.c.l.s8.bf16 %v686_v62  ;;  %v1904_v58 = vunpack.c.l.s8.bf16 %v688_v63  ;;  %v1906_v20 = vunpack.c.h.s8.bf16 %v686_v62 }
 0x22f   : > { %v1908_v9 = vunpack.c.h.s8.bf16 %v688_v63 }
 0x231   : > { %4259 = vmatpush1.bf16.msra.mxu0 %v1866_v4  ;;  %5571 = vmatpush1.bf16.msra.mxu1 %v1868_v6  ;;  %v1909_v4 = vunpack.c.h.s8.bf16 %v689_v57  ;;  %v691_v6 = vld [vmem:[%s10733_s30 + $0x628] sm:$0xff] }
 0x232   : > { %4260 = vmatprep.subr.bf16.mxu0 %v1871_v7  ;;  %5572 = vmatprep.subr.bf16.mxu1 %v1873_v8  ;;  %v693_v7 = vld [vmem:[%s10733_s30 + $0x638] sm:$0xff]  ;;  %v11040_v8 = vrot.slane %v3648_v0, %v10781_v49  ;;  %v1911_v10 = vunpack.c.l.s8.bf16 %v691_v6  ;;  %v1915_v15 = vunpack.c.h.s8.bf16 %v691_v6  ;;  %v706_v0 = vld [vmem:[%s10733_s30 + $0x6a0] sm:$0xff]  ;;  %v711_v6 = vld [vmem:[%s10733_s30 + $0x6c8] sm:$0xff] }
 0x235   : > { %4261 = vmatpush1.bf16.msra.mxu0 %v1870_v11  ;;  %5573 = vmatpush1.bf16.msra.mxu1 %v1872_v12  ;;  %v1913_v11 = vunpack.c.l.s8.bf16 %v693_v7  ;;  %v690_v12 = vld [vmem:[%s10733_s30 + $0x620] sm:$0xff] }
 0x236   : > { %4262 = vmatprep.subr.bf16.mxu0 %v1875_v21  ;;  %5574 = vmatprep.subr.bf16.mxu1 %v1877_v13  ;;  %v692_v21 = vld [vmem:[%s10733_s30 + $0x630] sm:$0xff]  ;;  %v1910_v13 = vunpack.c.l.s8.bf16 %v690_v12 }
 0x237   : > { %v1912_v14 = vunpack.c.l.s8.bf16 %v692_v21  ;;  %v1916_v19 = vunpack.c.h.s8.bf16 %v692_v21  ;;  %v712_v21 = vld [vmem:[%s10733_s30 + $0x6d0] sm:$0xff] }
 0x239   : > { %4263 = vmatpush1.bf16.msra.mxu0 %v1874_v16  ;;  %5575 = vmatpush1.bf16.msra.mxu1 %v1876_v17  ;;  %v1917_v16 = vunpack.c.h.s8.bf16 %v693_v7  ;;  %v695_v17 = vld [vmem:[%s10733_s30 + $0x648] sm:$0xff]  ;;  %v713_v7 = vld [vmem:[%s10733_s30 + $0x6d8] sm:$0xff] }
 0x23a   : > { %4264 = vmatprep.subr.bf16.mxu0 %v1879_v35  ;;  %5576 = vmatprep.subr.bf16.mxu1 %v1881_v18  ;;  %v697_v35 = vld [vmem:[%s10733_s30 + $0x658] sm:$0xff]  ;;  %v1914_v18 = vunpack.c.h.s8.bf16 %v690_v12  ;;  %v1919_v22 = vunpack.c.l.s8.bf16 %v695_v17  ;;  %v1923_v27 = vunpack.c.h.s8.bf16 %v695_v17  ;;  %v710_v12 = vld [vmem:[%s10733_s30 + $0x6c0] sm:$0xff]  ;;  %v715_v17 = vld [vmem:[%s10733_s30 + $0x6e8] sm:$0xff] }
 0x23d   : > { %4265 = vmatpush1.bf16.msra.mxu0 %v1878_v23  ;;  %5577 = vmatpush1.bf16.msra.mxu1 %v1880_v44  ;;  %v1921_v23 = vunpack.c.l.s8.bf16 %v697_v35  ;;  %v694_v44 = vld [vmem:[%s10733_s30 + $0x640] sm:$0xff] }
 0x23e   : > { %4266 = vmatprep.subr.bf16.mxu0 %v1883_v24  ;;  %5578 = vmatprep.subr.bf16.mxu1 %v1885_v25  ;;  %v696_v24 = vld [vmem:[%s10733_s30 + $0x650] sm:$0xff]  ;;  %v1918_v25 = vunpack.c.l.s8.bf16 %v694_v44 }
 0x23f   : > { %v1920_v26 = vunpack.c.l.s8.bf16 %v696_v24  ;;  %v1924_v32 = vunpack.c.h.s8.bf16 %v696_v24  ;;  %v716_v24 = vld [vmem:[%s10733_s30 + $0x6f0] sm:$0xff] }
 0x241   : > { %4267 = vmatpush1.bf16.msra.mxu0 %v1882_v53  ;;  %5579 = vmatpush1.bf16.msra.mxu1 %v1884_v29  ;;  %v1925_v53 = vunpack.c.h.s8.bf16 %v697_v35  ;;  %v699_v29 = vld [vmem:[%s10733_s30 + $0x668] sm:$0xff]  ;;  %v717_v35 = vld [vmem:[%s10733_s30 + $0x6f8] sm:$0xff] }
 0x242   : > { %4268 = vmatprep.subr.bf16.mxu0 %v1887_v30  ;;  %5580 = vmatprep.subr.bf16.mxu1 %v1889_v31  ;;  %v701_v30 = vld [vmem:[%s10733_s30 + $0x678] sm:$0xff]  ;;  %v1922_v31 = vunpack.c.h.s8.bf16 %v694_v44  ;;  %v1927_v33 = vunpack.c.l.s8.bf16 %v699_v29  ;;  %v1931_v40 = vunpack.c.h.s8.bf16 %v699_v29  ;;  %v714_v44 = vld [vmem:[%s10733_s30 + $0x6e0] sm:$0xff]  ;;  %v719_v29 = vld [vmem:[%s10733_s30 + $0x708] sm:$0xff] }
 0x245   : > { %4269 = vmatpush1.bf16.msra.mxu0 %v1886_v55  ;;  %5581 = vmatpush1.bf16.msra.mxu1 %v1888_v34  ;;  %v1929_v55 = vunpack.c.l.s8.bf16 %v701_v30  ;;  %v698_v34 = vld [vmem:[%s10733_s30 + $0x660] sm:$0xff] }
 0x246   : > { %4270 = vmatprep.subr.bf16.mxu0 %v1891_v36  ;;  %5582 = vmatprep.subr.bf16.mxu1 %v1893_v37  ;;  %v700_v36 = vld [vmem:[%s10733_s30 + $0x670] sm:$0xff]  ;;  %v1926_v37 = vunpack.c.l.s8.bf16 %v698_v34 }
 0x247   : > { %v1928_v39 = vunpack.c.l.s8.bf16 %v700_v36  ;;  %v1932_v46 = vunpack.c.h.s8.bf16 %v700_v36  ;;  %v720_v36 = vld [vmem:[%s10733_s30 + $0x710] sm:$0xff] }
 0x249   : > { %4271 = vmatpush1.bf16.msra.mxu0 %v1890_v41  ;;  %5583 = vmatpush1.bf16.msra.mxu1 %v1892_v42  ;;  %v1933_v41 = vunpack.c.h.s8.bf16 %v701_v30  ;;  %v703_v42 = vld [vmem:[%s10733_s30 + $0x688] sm:$0xff]  ;;  %v721_v30 = vld [vmem:[%s10733_s30 + $0x718] sm:$0xff] }
 0x24a   : > { %4272 = vmatprep.subr.bf16.mxu0 %v1895_v43  ;;  %5584 = vmatprep.subr.bf16.mxu1 %v1897_v45  ;;  %v705_v43 = vld [vmem:[%s10733_s30 + $0x698] sm:$0xff]  ;;  %v1930_v45 = vunpack.c.h.s8.bf16 %v698_v34  ;;  %v1935_v47 = vunpack.c.l.s8.bf16 %v703_v42  ;;  %v1939_v56 = vunpack.c.h.s8.bf16 %v703_v42  ;;  %v718_v34 = vld [vmem:[%s10733_s30 + $0x700] sm:$0xff]  ;;  %v1973_v42 = vunpack.c.h.s8.bf16 %v721_v30 }
 0x24b   : > { %v1937_v48 = vunpack.c.l.s8.bf16 %v705_v43  ;;  %v1941_v57 = vunpack.c.h.s8.bf16 %v705_v43  ;;  %v723_v43 = vld [vmem:[%s10733_s30 + $0x728] sm:$0xff] }
 0x24d   : > { %4273 = vmatpush1.bf16.msra.mxu0 %v1894_v51  ;;  %5585 = vmatpush1.bf16.msra.mxu1 %v1896_v52  ;;  %v702_v51 = vld [vmem:[%s10733_s30 + $0x680] sm:$0xff]  ;;  %v704_v52 = vld [vmem:[%s10733_s30 + $0x690] sm:$0xff] }
 0x24e   : > { %4274 = vmatprep.subr.bf16.mxu0 %v1899_v54  ;;  %5586 = vmatprep.subr.bf16.mxu1 %v1901_v5  ;;  %v1934_v54 = vunpack.c.l.s8.bf16 %v702_v51  ;;  %v1936_v5 = vunpack.c.l.s8.bf16 %v704_v52 }
 0x251   : > { %4275 = vmatpush1.bf16.msra.mxu0 %v1898_v60  ;;  %5587 = vmatpush1.bf16.msra.mxu1 %v1900_v61  ;;  %v707_v60 = vld [vmem:[%s10733_s30 + $0x6a8] sm:$0xff]  ;;  %v709_v61 = vld [vmem:[%s10733_s30 + $0x6b8] sm:$0xff] }
 0x252   : > { %4285 = vmatprep.subr.bf16.mxu0 %v1903_v28  ;;  %5597 = vmatprep.subr.bf16.mxu1 %v1905_v50  ;;  %v1938_v28 = vunpack.c.h.s8.bf16 %v702_v51  ;;  %v1940_v50 = vunpack.c.h.s8.bf16 %v704_v52  ;;  %v1943_v62 = vunpack.c.l.s8.bf16 %v707_v60  ;;  %v1945_v63 = vunpack.c.l.s8.bf16 %v709_v61  ;;  %v722_v52 = vld [vmem:[%s10733_s30 + $0x720] sm:$0xff] }
 0x254   : > { %4277 = vmatmul.mubr.bf16.vlgmr.msra.gmra.mrb[0].mxu0 %v3677_v1  ;;  %5589 = vmatmul.mubr.bf16.vlgmr.msra.gmra.mrb[0].mxu1 %v3677_v1  ;;  %v708_v1 = vld [vmem:[%s10733_s30 + $0x6b0] sm:$0xff] }
 0x255   : > { %4286 = vmatpush1.bf16.msra.mxu0 %v1902_v2  ;;  %5598 = vmatpush1.bf16.msra.mxu1 %v1904_v58  ;;  %v1942_v2 = vunpack.c.l.s8.bf16 %v706_v0  ;;  %v1944_v58 = vunpack.c.l.s8.bf16 %v708_v1 }
 0x256   : > { %4287 = vmatprep.subr.bf16.mxu0 %v1907_v3  ;;  %5599 = vmatprep.subr.bf16.mxu1 %v1909_v4  ;;  %v1947_v3 = vunpack.c.h.s8.bf16 %v707_v60  ;;  %v1949_v4 = vunpack.c.h.s8.bf16 %v709_v61  ;;  %v727_v60 = vld [vmem:[%s10733_s30 + $0x748] sm:$0xff]  ;;  %v729_v61 = vld [vmem:[%s10733_s30 + $0x758] sm:$0xff] }
 0x257   : > { %4317 = vmatprep.mubr.bf16.mxu0 %v11040_v8  ;;  %5629 = vmatprep.mubr.bf16.mxu1 %v11040_v8 }
 0x259   : > { %4288 = vmatpush1.bf16.msra.mxu0 %v1906_v20  ;;  %5600 = vmatpush1.bf16.msra.mxu1 %v1908_v9  ;;  %v1946_v20 = vunpack.c.h.s8.bf16 %v706_v0  ;;  %v1948_v9 = vunpack.c.h.s8.bf16 %v708_v1  ;;  %v726_v0 = vld [vmem:[%s10733_s30 + $0x740] sm:$0xff]  ;;  %v728_v1 = vld [vmem:[%s10733_s30 + $0x750] sm:$0xff] }
 0x25a   : > { %4289 = vmatprep.subr.bf16.mxu0 %v1911_v10  ;;  %5601 = vmatprep.subr.bf16.mxu1 %v1913_v11  ;;  %v1951_v10 = vunpack.c.l.s8.bf16 %v711_v6  ;;  %v1953_v11 = vunpack.c.l.s8.bf16 %v713_v7 }
 0x25d   : > { %4290 = vmatpush1.bf16.msra.mxu0 %v1910_v13  ;;  %5602 = vmatpush1.bf16.msra.mxu1 %v1912_v14  ;;  %v1950_v13 = vunpack.c.l.s8.bf16 %v710_v12  ;;  %v1952_v14 = vunpack.c.l.s8.bf16 %v712_v21 }
 0x25e   : > { %4291 = vmatprep.subr.bf16.mxu0 %v1915_v15  ;;  %5603 = vmatprep.subr.bf16.mxu1 %v1917_v16  ;;  %v1955_v15 = vunpack.c.h.s8.bf16 %v711_v6  ;;  %v1957_v16 = vunpack.c.h.s8.bf16 %v713_v7  ;;  %v731_v6 = vld [vmem:[%s10733_s30 + $0x768] sm:$0xff]  ;;  %v733_v7 = vld [vmem:[%s10733_s30 + $0x778] sm:$0xff] }
 0x261   : > { %4292 = vmatpush1.bf16.msra.mxu0 %v1914_v18  ;;  %5604 = vmatpush1.bf16.msra.mxu1 %v1916_v19  ;;  %v1954_v18 = vunpack.c.h.s8.bf16 %v710_v12  ;;  %v1956_v19 = vunpack.c.h.s8.bf16 %v712_v21  ;;  %v730_v12 = vld [vmem:[%s10733_s30 + $0x760] sm:$0xff]  ;;  %v732_v21 = vld [vmem:[%s10733_s30 + $0x770] sm:$0xff] }
 0x262   : > { %4293 = vmatprep.subr.bf16.mxu0 %v1919_v22  ;;  %5605 = vmatprep.subr.bf16.mxu1 %v1921_v23  ;;  %v1959_v22 = vunpack.c.l.s8.bf16 %v715_v17  ;;  %v1961_v23 = vunpack.c.l.s8.bf16 %v717_v35 }
 0x265   : > { %4294 = vmatpush1.bf16.msra.mxu0 %v1918_v25  ;;  %5606 = vmatpush1.bf16.msra.mxu1 %v1920_v26  ;;  %v1958_v25 = vunpack.c.l.s8.bf16 %v714_v44  ;;  %v1960_v26 = vunpack.c.l.s8.bf16 %v716_v24 }
 0x266   : > { %4295 = vmatprep.subr.bf16.mxu0 %v1923_v27  ;;  %5607 = vmatprep.subr.bf16.mxu1 %v1925_v53  ;;  %v1963_v27 = vunpack.c.h.s8.bf16 %v715_v17  ;;  %v1965_v53 = vunpack.c.h.s8.bf16 %v717_v35  ;;  %v735_v17 = vld [vmem:[%s10733_s30 + $0x788] sm:$0xff]  ;;  %v737_v35 = vld [vmem:[%s10733_s30 + $0x798] sm:$0xff] }
 0x269   : > { %4296 = vmatpush1.bf16.msra.mxu0 %v1922_v31  ;;  %5608 = vmatpush1.bf16.msra.mxu1 %v1924_v32  ;;  %v1962_v31 = vunpack.c.h.s8.bf16 %v714_v44  ;;  %v1964_v32 = vunpack.c.h.s8.bf16 %v716_v24  ;;  %v734_v44 = vld [vmem:[%s10733_s30 + $0x780] sm:$0xff]  ;;  %v736_v24 = vld [vmem:[%s10733_s30 + $0x790] sm:$0xff] }
 0x26a   : > { %4297 = vmatprep.subr.bf16.mxu0 %v1927_v33  ;;  %5609 = vmatprep.subr.bf16.mxu1 %v1929_v55  ;;  %v1967_v33 = vunpack.c.l.s8.bf16 %v719_v29  ;;  %v1969_v55 = vunpack.c.l.s8.bf16 %v721_v30  ;;  %v741_v30 = vld [vmem:[%s10733_s30 + $0x7b8] sm:$0xff] }
 0x26d   : > { %4298 = vmatpush1.bf16.msra.mxu0 %v1926_v37  ;;  %5610 = vmatpush1.bf16.msra.mxu1 %v1928_v39  ;;  %v11076_v37 = vrot.slane %v11029_v59, %v10781_v49  ;;  %v1966_v39 = vunpack.c.l.s8.bf16 %v718_v34  ;;  %v1970_v59 = vunpack.c.h.s8.bf16 %v718_v34  ;;  %v738_v34 = vld [vmem:[%s10733_s30 + $0x7a0] sm:$0xff] }
 0x26e   : > { %4299 = vmatprep.subr.bf16.mxu0 %v1931_v40  ;;  %5611 = vmatprep.subr.bf16.mxu1 %v1933_v41  ;;  %v1968_v40 = vunpack.c.l.s8.bf16 %v720_v36  ;;  %v1971_v41 = vunpack.c.h.s8.bf16 %v719_v29  ;;  %v739_v29 = vld [vmem:[%s10733_s30 + $0x7a8] sm:$0xff] }
 0x271   : > { %4300 = vmatpush1.bf16.msra.mxu0 %v1930_v45  ;;  %5612 = vmatpush1.bf16.msra.mxu1 %v1932_v46  ;;  %v725_v45 = vld [vmem:[%s10733_s30 + $0x738] sm:$0xff]  ;;  %v3680_v46 = vcombine.high %v11040_v8, %v11040_v8  ;;  %v1974_v8 = vunpack.c.l.s8.bf16 %v722_v52 }
 0x272   : > { %4301 = vmatprep.subr.bf16.mxu0 %v1935_v47  ;;  %5613 = vmatprep.subr.bf16.mxu1 %v1937_v48  ;;  %v1972_v47 = vunpack.c.h.s8.bf16 %v720_v36  ;;  %v1975_v48 = vunpack.c.l.s8.bf16 %v723_v43  ;;  %v1977_v51 = vunpack.c.l.s8.bf16 %v725_v45  ;;  %v740_v36 = vld [vmem:[%s10733_s30 + $0x7b0] sm:$0xff] }
 0x275   : > { %4302 = vmatpush1.bf16.msra.mxu0 %v1934_v54  ;;  %5614 = vmatpush1.bf16.msra.mxu1 %v1936_v5  ;;  %v724_v54 = vld [vmem:[%s10733_s30 + $0x730] sm:$0xff] }
 0x276   : > { %4303 = vmatprep.subr.bf16.mxu0 %v1939_v56  ;;  %5615 = vmatprep.subr.bf16.mxu1 %v1941_v57  ;;  %v1976_v5 = vunpack.c.l.s8.bf16 %v724_v54  ;;  %v1979_v56 = vunpack.c.h.s8.bf16 %v723_v43  ;;  %v1981_v57 = vunpack.c.h.s8.bf16 %v725_v45  ;;  %v743_v43 = vld [vmem:[%s10733_s30 + $0x7c8] sm:$0xff]  ;;  %v745_v45 = vld [vmem:[%s10733_s30 + $0x7d8] sm:$0xff] }
 0x279   : > { %4304 = vmatpush1.bf16.msra.mxu0 %v1938_v28  ;;  %5616 = vmatpush1.bf16.msra.mxu1 %v1940_v50  ;;  %v1978_v28 = vunpack.c.h.s8.bf16 %v722_v52  ;;  %v1980_v50 = vunpack.c.h.s8.bf16 %v724_v54  ;;  %v744_v52 = vld [vmem:[%s10733_s30 + $0x7d0] sm:$0xff] }
 0x27a   : > { %4305 = vmatprep.subr.bf16.mxu0 %v1943_v62  ;;  %5617 = vmatprep.subr.bf16.mxu1 %v1945_v63  ;;  %v1983_v62 = vunpack.c.l.s8.bf16 %v727_v60  ;;  %v1985_v63 = vunpack.c.l.s8.bf16 %v729_v61 }
 0x27d   : > { %4306 = vmatpush1.bf16.msra.mxu0 %v1942_v2  ;;  %5618 = vmatpush1.bf16.msra.mxu1 %v1944_v58  ;;  %v1982_v2 = vunpack.c.l.s8.bf16 %v726_v0  ;;  %v1984_v58 = vunpack.c.l.s8.bf16 %v728_v1 }
 0x27e   : > { %4307 = vmatprep.subr.bf16.mxu0 %v1947_v3  ;;  %5619 = vmatprep.subr.bf16.mxu1 %v1949_v4  ;;  %v1987_v3 = vunpack.c.h.s8.bf16 %v727_v60  ;;  %v1989_v4 = vunpack.c.h.s8.bf16 %v729_v61  ;;  %v749_v60 = vld [vmem:[%s10733_s30 + $0x7f8] sm:$0xff] }
 0x281   : > { %4308 = vmatpush1.bf16.msra.mxu0 %v1946_v20  ;;  %5620 = vmatpush1.bf16.msra.mxu1 %v1948_v9  ;;  %v1986_v20 = vunpack.c.h.s8.bf16 %v726_v0  ;;  %v1988_v9 = vunpack.c.h.s8.bf16 %v728_v1  ;;  %v748_v0 = vld [vmem:[%s10733_s30 + $0x7f0] sm:$0xff]  ;;  %v11111_v1 = vld [vmem:[%s10755_s15 + $0x10] sm:$0xff] }
 0x282   : > { %4309 = vmatprep.subr.bf16.mxu0 %v1951_v10  ;;  %5621 = vmatprep.subr.bf16.mxu1 %v1953_v11  ;;  %v1991_v10 = vunpack.c.l.s8.bf16 %v731_v6  ;;  %v1993_v11 = vunpack.c.l.s8.bf16 %v733_v7 }
 0x285   : > { %4310 = vmatpush1.bf16.msra.mxu0 %v1950_v13  ;;  %5622 = vmatpush1.bf16.msra.mxu1 %v1952_v14  ;;  %v1990_v13 = vunpack.c.l.s8.bf16 %v730_v12  ;;  %v1992_v14 = vunpack.c.l.s8.bf16 %v732_v21 }
 0x286   : > { %4311 = vmatprep.subr.bf16.mxu0 %v1955_v15  ;;  %5623 = vmatprep.subr.bf16.mxu1 %v1957_v16  ;;  %v1995_v15 = vunpack.c.h.s8.bf16 %v731_v6  ;;  %v1997_v16 = vunpack.c.h.s8.bf16 %v733_v7  ;;  %v751_v6 = vld [vmem:[%s10733_s30 + $0x808] sm:$0xff]  ;;  %v753_v7 = vld [vmem:[%s10733_s30 + $0x818] sm:$0xff] }
 0x289   : > { %4312 = vmatpush1.bf16.msra.mxu0 %v1954_v18  ;;  %5624 = vmatpush1.bf16.msra.mxu1 %v1956_v19  ;;  %v1994_v18 = vunpack.c.h.s8.bf16 %v730_v12  ;;  %v1996_v19 = vunpack.c.h.s8.bf16 %v732_v21  ;;  %v2033_v12 = vunpack.c.l.s8.bf16 %v753_v7  ;;  %v750_v21 = vld [vmem:[%s10733_s30 + $0x800] sm:$0xff] }
 0x28a   : > { %4313 = vmatprep.subr.bf16.mxu0 %v1959_v22  ;;  %5625 = vmatprep.subr.bf16.mxu1 %v1961_v23  ;;  %v1999_v22 = vunpack.c.l.s8.bf16 %v735_v17  ;;  %v2001_v23 = vunpack.c.l.s8.bf16 %v737_v35 }
 0x28d   : > { %4314 = vmatpush1.bf16.msra.mxu0 %v1958_v25  ;;  %5626 = vmatpush1.bf16.msra.mxu1 %v1960_v26  ;;  %v1998_v25 = vunpack.c.l.s8.bf16 %v734_v44  ;;  %v2000_v26 = vunpack.c.l.s8.bf16 %v736_v24 }
 0x28e   : > { %4315 = vmatprep.subr.bf16.mxu0 %v1963_v27  ;;  %5627 = vmatprep.subr.bf16.mxu1 %v1965_v53  ;;  %v2003_v27 = vunpack.c.h.s8.bf16 %v735_v17  ;;  %v2005_v53 = vunpack.c.h.s8.bf16 %v737_v35  ;;  %v2035_v35 = vunpack.c.h.s8.bf16 %v751_v6 }
 0x291   : > { %4316 = vmatpush1.bf16.msra.mxu0 %v1962_v31  ;;  %5628 = vmatpush1.bf16.msra.mxu1 %v1964_v32  ;;  %v2002_v31 = vunpack.c.h.s8.bf16 %v734_v44  ;;  %v2004_v32 = vunpack.c.h.s8.bf16 %v736_v24 }
 0x292   : > { %4326 = vmatprep.subr.bf16.mxu0 %v1967_v33  ;;  %5638 = vmatprep.subr.bf16.mxu1 %v1969_v55  ;;  %v2007_v33 = vunpack.c.l.s8.bf16 %v739_v29  ;;  %v2009_v55 = vunpack.c.l.s8.bf16 %v741_v30 }
 0x294   : > { %4318 = vmatmul.mubr.bf16.vlgmr.msra.gmra.mrb[0].mxu0 %v11076_v37  ;;  %5630 = vmatmul.mubr.bf16.vlgmr.msra.gmra.mrb[0].mxu1 %v11076_v37 }
 0x295   : > { %4327 = vmatpush1.bf16.msra.mxu0 %v1966_v39  ;;  %5639 = vmatpush1.bf16.msra.mxu1 %v1968_v40  ;;  %v2006_v39 = vunpack.c.l.s8.bf16 %v738_v34  ;;  %v2008_v40 = vunpack.c.l.s8.bf16 %v740_v36 }
 0x296   : > { %4328 = vmatprep.subr.bf16.mxu0 %v1971_v41  ;;  %5640 = vmatprep.subr.bf16.mxu1 %v1973_v42  ;;  %v2011_v41 = vunpack.c.h.s8.bf16 %v739_v29  ;;  %v2013_v42 = vunpack.c.h.s8.bf16 %v741_v30 }
 0x297   : > { %4358 = vmatprep.mubr.bf16.mxu0 %v3680_v46  ;;  %5670 = vmatprep.mubr.bf16.mxu1 %v3680_v46  ;;  %v2010_v46 = vunpack.c.h.s8.bf16 %v738_v34 }
 0x299   : > { %4329 = vmatpush1.bf16.msra.mxu0 %v1970_v59  ;;  %5641 = vmatpush1.bf16.msra.mxu1 %v1972_v47  ;;  %v2012_v59 = vunpack.c.h.s8.bf16 %v740_v36  ;;  %v2015_v47 = vunpack.c.l.s8.bf16 %v743_v43 }
 0x29a   : > { %4330 = vmatprep.subr.bf16.mxu0 %v1975_v48  ;;  %5642 = vmatprep.subr.bf16.mxu1 %v1977_v51  ;;  %v2017_v48 = vunpack.c.l.s8.bf16 %v745_v45  ;;  %v742_v51 = vld [vmem:[%s10733_s30 + $0x7c0] sm:$0xff] }
 0x29b   : > { %v2014_v54 = vunpack.c.l.s8.bf16 %v742_v51  ;;  %v2018_v61 = vunpack.c.h.s8.bf16 %v742_v51 }
 0x29d   : > { %4331 = vmatpush1.bf16.msra.mxu0 %v1974_v8  ;;  %5643 = vmatpush1.bf16.msra.mxu1 %v1976_v5  ;;  %v2016_v8 = vunpack.c.l.s8.bf16 %v744_v52  ;;  %v2019_v5 = vunpack.c.h.s8.bf16 %v743_v43 }
 0x29e   : > { %4332 = vmatprep.subr.bf16.mxu0 %v1979_v56  ;;  %5644 = vmatprep.subr.bf16.mxu1 %v1981_v57  ;;  %v2021_v56 = vunpack.c.h.s8.bf16 %v745_v45  ;;  %v747_v57 = vld [vmem:[%s10733_s30 + $0x7e8] sm:$0xff] }
 0x2a1   : > { %4333 = vmatpush1.bf16.msra.mxu0 %v1978_v28  ;;  %5645 = vmatpush1.bf16.msra.mxu1 %v1980_v50  ;;  %v2020_v28 = vunpack.c.h.s8.bf16 %v744_v52  ;;  %v2023_v50 = vunpack.c.l.s8.bf16 %v747_v57 }
 0x2a2   : > { %4334 = vmatprep.subr.bf16.mxu0 %v1983_v62  ;;  %5646 = vmatprep.subr.bf16.mxu1 %v1985_v63  ;;  %v2025_v62 = vunpack.c.l.s8.bf16 %v749_v60  ;;  %v746_v63 = vld [vmem:[%s10733_s30 + $0x7e0] sm:$0xff] }
 0x2a5   : > { %4335 = vmatpush1.bf16.msra.mxu0 %v1982_v2  ;;  %5647 = vmatpush1.bf16.msra.mxu1 %v1984_v58  ;;  %v2022_v2 = vunpack.c.l.s8.bf16 %v746_v63  ;;  %v2024_v58 = vunpack.c.l.s8.bf16 %v748_v0 }
 0x2a6   : > { %4336 = vmatprep.subr.bf16.mxu0 %v1987_v3  ;;  %5648 = vmatprep.subr.bf16.mxu1 %v1989_v4  ;;  %v2027_v3 = vunpack.c.h.s8.bf16 %v747_v57  ;;  %v2029_v4 = vunpack.c.h.s8.bf16 %v749_v60 }
 0x2a9   : > { %4337 = vmatpush1.bf16.msra.mxu0 %v1986_v20  ;;  %5649 = vmatpush1.bf16.msra.mxu1 %v1988_v9  ;;  %v11117_v20 = vrot.slane %v11111_v1, %v10781_v49  ;;  %v2026_v9 = vunpack.c.h.s8.bf16 %v746_v63 }
 0x2aa   : > { %4338 = vmatprep.subr.bf16.mxu0 %v1991_v10  ;;  %5650 = vmatprep.subr.bf16.mxu1 %v1993_v11  ;;  %v2028_v10 = vunpack.c.h.s8.bf16 %v748_v0  ;;  %v2031_v11 = vunpack.c.l.s8.bf16 %v751_v6 }
 0x2ad   : > { %4339 = vmatpush1.bf16.msra.mxu0 %v1990_v13  ;;  %5651 = vmatpush1.bf16.msra.mxu1 %v1992_v14  ;;  %v752_v13 = vld [vmem:[%s10733_s30 + $0x810] sm:$0xff]  ;;  %v3696_v14 = vcombine.high %v11117_v20, %v11117_v20 }
 0x2ae   : > { %4340 = vmatprep.subr.bf16.mxu0 %v1995_v15  ;;  %5652 = vmatprep.subr.bf16.mxu1 %v1997_v16  ;;  %v3678_v15 = vcombine.high %v11076_v37, %v11076_v37  ;;  %v2030_v16 = vunpack.c.l.s8.bf16 %v750_v21  ;;  %v2032_v17 = vunpack.c.l.s8.bf16 %v752_v13  ;;  %v2034_v37 = vunpack.c.h.s8.bf16 %v750_v21 }
 0x2af   : > { %v2036_v44 = vunpack.c.h.s8.bf16 %v752_v13 }
 0x2b1   : > { %4341 = vmatpush1.bf16.msra.mxu0 %v1994_v18  ;;  %5653 = vmatpush1.bf16.msra.mxu1 %v1996_v19  ;;  %v2037_v18 = vunpack.c.h.s8.bf16 %v753_v7  ;;  %v755_v19 = vld [vmem:[%s10733_s30 + $0x828] sm:$0xff] }
 0x2b2   : > { %4342 = vmatprep.subr.bf16.mxu0 %v1999_v22  ;;  %5654 = vmatprep.subr.bf16.mxu1 %v2001_v23  ;;  %v757_v22 = vld [vmem:[%s10733_s30 + $0x838] sm:$0xff]  ;;  %v11128_v23 = vrot.slane %v3696_v14, %v10781_v49  ;;  %v2039_v24 = vunpack.c.l.s8.bf16 %v755_v19  ;;  %v2043_v30 = vunpack.c.h.s8.bf16 %v755_v19 }
 0x2b5   : > { %4343 = vmatpush1.bf16.msra.mxu0 %v1998_v25  ;;  %5655 = vmatpush1.bf16.msra.mxu1 %v2000_v26  ;;  %v2041_v25 = vunpack.c.l.s8.bf16 %v757_v22  ;;  %v754_v26 = vld [vmem:[%s10733_s30 + $0x820] sm:$0xff] }
 0x2b6   : > { %4344 = vmatprep.subr.bf16.mxu0 %v2003_v27  ;;  %5656 = vmatprep.subr.bf16.mxu1 %v2005_v53  ;;  %v756_v27 = vld [vmem:[%s10733_s30 + $0x830] sm:$0xff]  ;;  %v2038_v53 = vunpack.c.l.s8.bf16 %v754_v26 }
 0x2b7   : > { %v2040_v29 = vunpack.c.l.s8.bf16 %v756_v27  ;;  %v2044_v34 = vunpack.c.h.s8.bf16 %v756_v27  ;;  %v774_v27 = vld [vmem:[%s10733_s30 + $0x8c0] sm:$0xff] }
 0x2b9   : > { %4345 = vmatpush1.bf16.msra.mxu0 %v2002_v31  ;;  %5657 = vmatpush1.bf16.msra.mxu1 %v2004_v32  ;;  %v2045_v31 = vunpack.c.h.s8.bf16 %v757_v22  ;;  %v759_v32 = vld [vmem:[%s10733_s30 + $0x848] sm:$0xff] }
 0x2ba   : > { %4346 = vmatprep.subr.bf16.mxu0 %v2007_v33  ;;  %5658 = vmatprep.subr.bf16.mxu1 %v2009_v55  ;;  %v761_v33 = vld [vmem:[%s10733_s30 + $0x858] sm:$0xff]  ;;  %v2042_v55 = vunpack.c.h.s8.bf16 %v754_v26  ;;  %v2047_v36 = vunpack.c.l.s8.bf16 %v759_v32  ;;  %v2051_v45 = vunpack.c.h.s8.bf16 %v759_v32  ;;  %v775_v22 = vld [vmem:[%s10733_s30 + $0x8c8] sm:$0xff] }
 0x2bd   : > { %4347 = vmatpush1.bf16.msra.mxu0 %v2006_v39  ;;  %5659 = vmatpush1.bf16.msra.mxu1 %v2008_v40  ;;  %v2049_v39 = vunpack.c.l.s8.bf16 %v761_v33  ;;  %v758_v40 = vld [vmem:[%s10733_s30 + $0x840] sm:$0xff] }
 0x2be   : > { %4348 = vmatprep.subr.bf16.mxu0 %v2011_v41  ;;  %5660 = vmatprep.subr.bf16.mxu1 %v2013_v42  ;;  %v760_v41 = vld [vmem:[%s10733_s30 + $0x850] sm:$0xff]  ;;  %v2046_v42 = vunpack.c.l.s8.bf16 %v758_v40 }
 0x2bf   : > { %v2048_v43 = vunpack.c.l.s8.bf16 %v760_v41  ;;  %v2052_v51 = vunpack.c.h.s8.bf16 %v760_v41  ;;  %v778_v41 = vld [vmem:[%s10733_s30 + $0x8e0] sm:$0xff] }
 0x2c1   : > { %4349 = vmatpush1.bf16.msra.mxu0 %v2010_v46  ;;  %5661 = vmatpush1.bf16.msra.mxu1 %v2012_v59  ;;  %v2053_v46 = vunpack.c.h.s8.bf16 %v761_v33  ;;  %v763_v59 = vld [vmem:[%s10733_s30 + $0x868] sm:$0xff] }
 0x2c2   : > { %4350 = vmatprep.subr.bf16.mxu0 %v2015_v47  ;;  %5662 = vmatprep.subr.bf16.mxu1 %v2017_v48  ;;  %v765_v47 = vld [vmem:[%s10733_s30 + $0x878] sm:$0xff]  ;;  %v2050_v48 = vunpack.c.h.s8.bf16 %v758_v40  ;;  %v2055_v52 = vunpack.c.l.s8.bf16 %v763_v59  ;;  %v2059_v60 = vunpack.c.h.s8.bf16 %v763_v59  ;;  %v779_v33 = vld [vmem:[%s10733_s30 + $0x8e8] sm:$0xff] }
 0x2c5   : > { %4351 = vmatpush1.bf16.msra.mxu0 %v2014_v54  ;;  %5663 = vmatpush1.bf16.msra.mxu1 %v2016_v8  ;;  %v2057_v54 = vunpack.c.l.s8.bf16 %v765_v47  ;;  %v762_v8 = vld [vmem:[%s10733_s30 + $0x860] sm:$0xff] }
 0x2c6   : > { %4352 = vmatprep.subr.bf16.mxu0 %v2019_v5  ;;  %5664 = vmatprep.subr.bf16.mxu1 %v2021_v56  ;;  %v764_v5 = vld [vmem:[%s10733_s30 + $0x870] sm:$0xff]  ;;  %v2054_v56 = vunpack.c.l.s8.bf16 %v762_v8 }
 0x2c7   : > { %v2056_v57 = vunpack.c.l.s8.bf16 %v764_v5  ;;  %v2060_v63 = vunpack.c.h.s8.bf16 %v764_v5  ;;  %v782_v5 = vld [vmem:[%s10733_s30 + $0x900] sm:$0xff] }
 0x2c9   : > { %4353 = vmatpush1.bf16.msra.mxu0 %v2018_v61  ;;  %5665 = vmatpush1.bf16.msra.mxu1 %v2020_v28  ;;  %v2061_v61 = vunpack.c.h.s8.bf16 %v765_v47  ;;  %v767_v28 = vld [vmem:[%s10733_s30 + $0x888] sm:$0xff] }
 0x2ca   : > { %4354 = vmatprep.subr.bf16.mxu0 %v2023_v50  ;;  %5666 = vmatprep.subr.bf16.mxu1 %v2025_v62  ;;  %v769_v50 = vld [vmem:[%s10733_s30 + $0x898] sm:$0xff]  ;;  %v2058_v62 = vunpack.c.h.s8.bf16 %v762_v8  ;;  %v2063_v0 = vunpack.c.l.s8.bf16 %v767_v28  ;;  %v2067_v7 = vunpack.c.h.s8.bf16 %v767_v28  ;;  %v783_v47 = vld [vmem:[%s10733_s30 + $0x908] sm:$0xff] }
 0x2cb   : > { %v2099_v28 = vunpack.c.h.s8.bf16 %v783_v47 }
 0x2cd   : > { %4355 = vmatpush1.bf16.msra.mxu0 %v2022_v2  ;;  %5667 = vmatpush1.bf16.msra.mxu1 %v2024_v58  ;;  %v2065_v2 = vunpack.c.l.s8.bf16 %v769_v50  ;;  %v766_v58 = vld [vmem:[%s10733_s30 + $0x880] sm:$0xff] }
 0x2ce   : > { %4356 = vmatprep.subr.bf16.mxu0 %v2027_v3  ;;  %5668 = vmatprep.subr.bf16.mxu1 %v2029_v4  ;;  %v768_v3 = vld [vmem:[%s10733_s30 + $0x890] sm:$0xff]  ;;  %v2062_v4 = vunpack.c.l.s8.bf16 %v766_v58 }
 0x2cf   : > { %v2064_v6 = vunpack.c.l.s8.bf16 %v768_v3  ;;  %v2068_v21 = vunpack.c.h.s8.bf16 %v768_v3 }
 0x2d1   : > { %4357 = vmatpush1.bf16.msra.mxu0 %v2026_v9  ;;  %5669 = vmatpush1.bf16.msra.mxu1 %v2028_v10  ;;  %v2069_v9 = vunpack.c.h.s8.bf16 %v769_v50  ;;  %v771_v10 = vld [vmem:[%s10733_s30 + $0x8a8] sm:$0xff] }
 0x2d2   : > { %4367 = vmatprep.subr.bf16.mxu0 %v2031_v11  ;;  %5679 = vmatprep.subr.bf16.mxu1 %v2033_v12  ;;  %v773_v11 = vld [vmem:[%s10733_s30 + $0x8b8] sm:$0xff]  ;;  %v2066_v12 = vunpack.c.h.s8.bf16 %v766_v58  ;;  %v2071_v13 = vunpack.c.l.s8.bf16 %v771_v10 }
 0x2d3   : > { %v2073_v14 = vunpack.c.l.s8.bf16 %v773_v11  ;;  %v2077_v19 = vunpack.c.h.s8.bf16 %v773_v11  ;;  %v791_v11 = vld [vmem:[%s10733_s30 + $0x948] sm:$0xff] }
 0x2d4   : > { %4359 = vmatmul.mubr.bf16.vlgmr.msra.gmra.mrb[0].mxu0 %v3678_v15  ;;  %5671 = vmatmul.mubr.bf16.vlgmr.msra.gmra.mrb[0].mxu1 %v3678_v15  ;;  %v770_v15 = vld [vmem:[%s10733_s30 + $0x8a0] sm:$0xff] }
 0x2d5   : > { %4368 = vmatpush1.bf16.msra.mxu0 %v2030_v16  ;;  %5680 = vmatpush1.bf16.msra.mxu1 %v2032_v17  ;;  %v772_v16 = vld [vmem:[%s10733_s30 + $0x8b0] sm:$0xff]  ;;  %v2070_v17 = vunpack.c.l.s8.bf16 %v770_v15 }
 0x2d6   : > { %4369 = vmatprep.subr.bf16.mxu0 %v2035_v35  ;;  %5681 = vmatprep.subr.bf16.mxu1 %v2037_v18  ;;  %v2072_v35 = vunpack.c.l.s8.bf16 %v772_v16  ;;  %v2075_v18 = vunpack.c.h.s8.bf16 %v771_v10 }
 0x2d7   : > { %4399 = vmatprep.mubr.bf16.mxu0 %v11128_v23  ;;  %5711 = vmatprep.mubr.bf16.mxu1 %v11128_v23 }
 0x2d9   : > { %4370 = vmatpush1.bf16.msra.mxu0 %v2034_v37  ;;  %5682 = vmatpush1.bf16.msra.mxu1 %v2036_v44  ;;  %v777_v37 = vld [vmem:[%s10733_s30 + $0x8d8] sm:$0xff]  ;;  %v2074_v44 = vunpack.c.h.s8.bf16 %v770_v15 }
 0x2da   : > { %4371 = vmatprep.subr.bf16.mxu0 %v2039_v24  ;;  %5683 = vmatprep.subr.bf16.mxu1 %v2041_v25  ;;  %v2076_v24 = vunpack.c.h.s8.bf16 %v772_v16  ;;  %v2079_v25 = vunpack.c.l.s8.bf16 %v775_v22  ;;  %v2081_v26 = vunpack.c.l.s8.bf16 %v777_v37  ;;  %v2085_v32 = vunpack.c.h.s8.bf16 %v777_v37  ;;  %v790_v16 = vld [vmem:[%s10733_s30 + $0x940] sm:$0xff]  ;;  %v795_v37 = vld [vmem:[%s10733_s30 + $0x968] sm:$0xff] }
 0x2dd   : > { %4372 = vmatpush1.bf16.msra.mxu0 %v2038_v53  ;;  %5684 = vmatpush1.bf16.msra.mxu1 %v2040_v29  ;;  %v776_v53 = vld [vmem:[%s10733_s30 + $0x8d0] sm:$0xff]  ;;  %v2078_v29 = vunpack.c.l.s8.bf16 %v774_v27 }
 0x2de   : > { %4373 = vmatprep.subr.bf16.mxu0 %v2043_v30  ;;  %5685 = vmatprep.subr.bf16.mxu1 %v2045_v31  ;;  %v2080_v30 = vunpack.c.l.s8.bf16 %v776_v53  ;;  %v2083_v31 = vunpack.c.h.s8.bf16 %v775_v22 }
 0x2e1   : > { %4374 = vmatpush1.bf16.msra.mxu0 %v2042_v55  ;;  %5686 = vmatpush1.bf16.msra.mxu1 %v2044_v34  ;;  %v781_v55 = vld [vmem:[%s10733_s30 + $0x8f8] sm:$0xff]  ;;  %v2082_v34 = vunpack.c.h.s8.bf16 %v774_v27 }
 0x2e2   : > { %4375 = vmatprep.subr.bf16.mxu0 %v2047_v36  ;;  %5687 = vmatprep.subr.bf16.mxu1 %v2049_v39  ;;  %v2084_v36 = vunpack.c.h.s8.bf16 %v776_v53  ;;  %v2087_v39 = vunpack.c.l.s8.bf16 %v779_v33  ;;  %v2089_v40 = vunpack.c.l.s8.bf16 %v781_v55  ;;  %v2093_v59 = vunpack.c.h.s8.bf16 %v781_v55  ;;  %v794_v53 = vld [vmem:[%s10733_s30 + $0x960] sm:$0xff]  ;;  %v799_v55 = vld [vmem:[%s10733_s30 + $0x988] sm:$0xff] }
 0x2e5   : > { %4376 = vmatpush1.bf16.msra.mxu0 %v2046_v42  ;;  %5688 = vmatpush1.bf16.msra.mxu1 %v2048_v43  ;;  %v780_v42 = vld [vmem:[%s10733_s30 + $0x8f0] sm:$0xff]  ;;  %v2086_v43 = vunpack.c.l.s8.bf16 %v778_v41 }
 0x2e6   : > { %4377 = vmatprep.subr.bf16.mxu0 %v2051_v45  ;;  %5689 = vmatprep.subr.bf16.mxu1 %v2053_v46  ;;  %v2088_v45 = vunpack.c.l.s8.bf16 %v780_v42  ;;  %v2091_v46 = vunpack.c.h.s8.bf16 %v779_v33 }
 0x2e9   : > { %4378 = vmatpush1.bf16.msra.mxu0 %v2050_v48  ;;  %5690 = vmatpush1.bf16.msra.mxu1 %v2052_v51  ;;  %v785_v48 = vld [vmem:[%s10733_s30 + $0x918] sm:$0xff]  ;;  %v2090_v51 = vunpack.c.h.s8.bf16 %v778_v41 }
 0x2ea   : > { %4379 = vmatprep.subr.bf16.mxu0 %v2055_v52  ;;  %5691 = vmatprep.subr.bf16.mxu1 %v2057_v54  ;;  %v2092_v52 = vunpack.c.h.s8.bf16 %v780_v42  ;;  %v2095_v54 = vunpack.c.l.s8.bf16 %v783_v47  ;;  %v2097_v8 = vunpack.c.l.s8.bf16 %v785_v48  ;;  %v2101_v50 = vunpack.c.h.s8.bf16 %v785_v48  ;;  %v798_v42 = vld [vmem:[%s10733_s30 + $0x980] sm:$0xff]  ;;  %v803_v48 = vld [vmem:[%s10733_s30 + $0x9a8] sm:$0xff] }
 0x2ed   : > { %4380 = vmatpush1.bf16.msra.mxu0 %v2054_v56  ;;  %5692 = vmatpush1.bf16.msra.mxu1 %v2056_v57  ;;  %v784_v56 = vld [vmem:[%s10733_s30 + $0x910] sm:$0xff]  ;;  %v11164_v57 = vrot.slane %v11117_v20, %v10781_v49  ;;  %v2098_v20 = vunpack.c.h.s8.bf16 %v782_v5 }
 0x2ee   : > { %4381 = vmatprep.subr.bf16.mxu0 %v2059_v60  ;;  %5693 = vmatprep.subr.bf16.mxu1 %v2061_v61  ;;  %v2094_v60 = vunpack.c.l.s8.bf16 %v782_v5  ;;  %v2096_v61 = vunpack.c.l.s8.bf16 %v784_v56 }
 0x2f1   : > { %4382 = vmatpush1.bf16.msra.mxu0 %v2058_v62  ;;  %5694 = vmatpush1.bf16.msra.mxu1 %v2060_v63  ;;  %v787_v62 = vld [vmem:[%s10733_s30 + $0x928] sm:$0xff]  ;;  %v789_v63 = vld [vmem:[%s10733_s30 + $0x938] sm:$0xff] }
 0x2f2   : > { %4383 = vmatprep.subr.bf16.mxu0 %v2063_v0  ;;  %5695 = vmatprep.subr.bf16.mxu1 %v2065_v2  ;;  %v3728_v0 = vcombine.high %v11128_v23, %v11128_v23  ;;  %v2100_v2 = vunpack.c.h.s8.bf16 %v784_v56  ;;  %v2103_v58 = vunpack.c.l.s8.bf16 %v787_v62  ;;  %v2105_v3 = vunpack.c.l.s8.bf16 %v789_v63  ;;  %v802_v56 = vld [vmem:[%s10733_s30 + $0x9a0] sm:$0xff] }
 0x2f3   : > { %v2109_v10 = vunpack.c.h.s8.bf16 %v789_v63  ;;  %v807_v63 = vld [vmem:[%s10733_s30 + $0x9c8] sm:$0xff] }
 0x2f5   : > { %4384 = vmatpush1.bf16.msra.mxu0 %v2062_v4  ;;  %5696 = vmatpush1.bf16.msra.mxu1 %v2064_v6  ;;  %v786_v4 = vld [vmem:[%s10733_s30 + $0x920] sm:$0xff]  ;;  %v788_v6 = vld [vmem:[%s10733_s30 + $0x930] sm:$0xff] }
 0x2f6   : > { %4385 = vmatprep.subr.bf16.mxu0 %v2067_v7  ;;  %5697 = vmatprep.subr.bf16.mxu1 %v2069_v9  ;;  %v2102_v23 = vunpack.c.l.s8.bf16 %v786_v4  ;;  %v2104_v7 = vunpack.c.l.s8.bf16 %v788_v6  ;;  %v2107_v9 = vunpack.c.h.s8.bf16 %v787_v62 }
 0x2f9   : > { %4386 = vmatpush1.bf16.msra.mxu0 %v2066_v12  ;;  %5698 = vmatpush1.bf16.msra.mxu1 %v2068_v21  ;;  %v793_v12 = vld [vmem:[%s10733_s30 + $0x958] sm:$0xff]  ;;  %v2106_v21 = vunpack.c.h.s8.bf16 %v786_v4  ;;  %v806_v4 = vld [vmem:[%s10733_s30 + $0x9c0] sm:$0xff] }
 0x2fa   : > { %4387 = vmatprep.subr.bf16.mxu0 %v2071_v13  ;;  %5699 = vmatprep.subr.bf16.mxu1 %v2073_v14  ;;  %v2108_v13 = vunpack.c.h.s8.bf16 %v788_v6  ;;  %v2111_v14 = vunpack.c.l.s8.bf16 %v791_v11  ;;  %v2113_v15 = vunpack.c.l.s8.bf16 %v793_v12  ;;  %v2117_v22 = vunpack.c.h.s8.bf16 %v793_v12  ;;  %v808_v6 = vld [vmem:[%s10733_s30 + $0x9d0] sm:$0xff]  ;;  %v813_v12 = vld [vmem:[%s10733_s30 + $0x9f8] sm:$0xff] }
 0x2fd   : > { %4388 = vmatpush1.bf16.msra.mxu0 %v2070_v17  ;;  %5700 = vmatpush1.bf16.msra.mxu1 %v2072_v35  ;;  %v792_v17 = vld [vmem:[%s10733_s30 + $0x950] sm:$0xff]  ;;  %v2110_v35 = vunpack.c.l.s8.bf16 %v790_v16 }
 0x2fe   : > { %4389 = vmatprep.subr.bf16.mxu0 %v2075_v18  ;;  %5701 = vmatprep.subr.bf16.mxu1 %v2077_v19  ;;  %v2112_v18 = vunpack.c.l.s8.bf16 %v792_v17  ;;  %v2115_v19 = vunpack.c.h.s8.bf16 %v791_v11  ;;  %v811_v11 = vld [vmem:[%s10733_s30 + $0x9e8] sm:$0xff] }
 0x301   : > { %4390 = vmatpush1.bf16.msra.mxu0 %v2074_v44  ;;  %5702 = vmatpush1.bf16.msra.mxu1 %v2076_v24  ;;  %v797_v44 = vld [vmem:[%s10733_s30 + $0x978] sm:$0xff]  ;;  %v2114_v24 = vunpack.c.h.s8.bf16 %v790_v16  ;;  %v810_v16 = vld [vmem:[%s10733_s30 + $0x9e0] sm:$0xff] }
 0x302   : > { %4391 = vmatprep.subr.bf16.mxu0 %v2079_v25  ;;  %5703 = vmatprep.subr.bf16.mxu1 %v2081_v26  ;;  %v2116_v25 = vunpack.c.h.s8.bf16 %v792_v17  ;;  %v2119_v26 = vunpack.c.l.s8.bf16 %v795_v37  ;;  %v2121_v27 = vunpack.c.l.s8.bf16 %v797_v44  ;;  %v2125_v33 = vunpack.c.h.s8.bf16 %v797_v44  ;;  %v812_v17 = vld [vmem:[%s10733_s30 + $0x9f0] sm:$0xff]  ;;  %v815_v44 = vld [vmem:[%s10733_s30 + $0xa08] sm:$0xff] }
 0x305   : > { %4392 = vmatpush1.bf16.msra.mxu0 %v2078_v29  ;;  %5704 = vmatpush1.bf16.msra.mxu1 %v2080_v30  ;;  %v796_v29 = vld [vmem:[%s10733_s30 + $0x970] sm:$0xff]  ;;  %v2118_v30 = vunpack.c.l.s8.bf16 %v794_v53 }
 0x306   : > { %4393 = vmatprep.subr.bf16.mxu0 %v2083_v31  ;;  %5705 = vmatprep.subr.bf16.mxu1 %v2085_v32  ;;  %v2120_v31 = vunpack.c.l.s8.bf16 %v796_v29  ;;  %v2123_v32 = vunpack.c.h.s8.bf16 %v795_v37  ;;  %v2157_v37 = vunpack.c.h.s8.bf16 %v813_v12 }
 0x309   : > { %4394 = vmatpush1.bf16.msra.mxu0 %v2082_v34  ;;  %5706 = vmatpush1.bf16.msra.mxu1 %v2084_v36  ;;  %v801_v34 = vld [vmem:[%s10733_s30 + $0x998] sm:$0xff]  ;;  %v2122_v36 = vunpack.c.h.s8.bf16 %v794_v53 }
 0x30a   : > { %4395 = vmatprep.subr.bf16.mxu0 %v2087_v39  ;;  %5707 = vmatprep.subr.bf16.mxu1 %v2089_v40  ;;  %v2124_v39 = vunpack.c.h.s8.bf16 %v796_v29  ;;  %v2127_v40 = vunpack.c.l.s8.bf16 %v799_v55  ;;  %v2129_v41 = vunpack.c.l.s8.bf16 %v801_v34  ;;  %v2133_v47 = vunpack.c.h.s8.bf16 %v801_v34  ;;  %v814_v29 = vld [vmem:[%s10733_s30 + $0xa00] sm:$0xff] }
 0x30b   : > { %v2163_v34 = vunpack.c.h.s8.bf16 %v815_v44 }
 0x30d   : > { %4396 = vmatpush1.bf16.msra.mxu0 %v2086_v43  ;;  %5708 = vmatpush1.bf16.msra.mxu1 %v2088_v45  ;;  %v800_v43 = vld [vmem:[%s10733_s30 + $0x990] sm:$0xff]  ;;  %v2126_v45 = vunpack.c.l.s8.bf16 %v798_v42 }
 0x30e   : > { %4397 = vmatprep.subr.bf16.mxu0 %v2091_v46  ;;  %5709 = vmatprep.subr.bf16.mxu1 %v2093_v59  ;;  %v2128_v46 = vunpack.c.l.s8.bf16 %v800_v43  ;;  %v2131_v59 = vunpack.c.h.s8.bf16 %v799_v55 }
 0x311   : > { %4398 = vmatpush1.bf16.msra.mxu0 %v2090_v51  ;;  %5710 = vmatpush1.bf16.msra.mxu1 %v2092_v52  ;;  %v805_v51 = vld [vmem:[%s10733_s30 + $0x9b8] sm:$0xff]  ;;  %v2130_v52 = vunpack.c.h.s8.bf16 %v798_v42 }
 0x312   : > { %4408 = vmatprep.subr.bf16.mxu0 %v2095_v54  ;;  %5720 = vmatprep.subr.bf16.mxu1 %v2097_v8  ;;  %v2132_v54 = vunpack.c.h.s8.bf16 %v800_v43  ;;  %v2135_v8 = vunpack.c.l.s8.bf16 %v803_v48  ;;  %v2137_v5 = vunpack.c.l.s8.bf16 %v805_v51  ;;  %v2141_v62 = vunpack.c.h.s8.bf16 %v805_v51 }
 0x314   : > { %4400 = vmatmul.mubr.bf16.vlgmr.msra.gmra.mrb[0].mxu0 %v11164_v57  ;;  %5712 = vmatmul.mubr.bf16.vlgmr.msra.gmra.mrb[0].mxu1 %v11164_v57 }
 0x315   : > { %4409 = vmatpush1.bf16.msra.mxu0 %v2094_v60  ;;  %5721 = vmatpush1.bf16.msra.mxu1 %v2096_v61  ;;  %v804_v60 = vld [vmem:[%s10733_s30 + $0x9b0] sm:$0xff]  ;;  %v2134_v61 = vunpack.c.l.s8.bf16 %v802_v56 }
 0x316   : > { %4410 = vmatprep.subr.bf16.mxu0 %v2099_v28  ;;  %5722 = vmatprep.subr.bf16.mxu1 %v2101_v50  ;;  %v2136_v28 = vunpack.c.l.s8.bf16 %v804_v60  ;;  %v2139_v50 = vunpack.c.h.s8.bf16 %v803_v48 }
 0x317   : > { %4440 = vmatprep.mubr.bf16.mxu0 %v3728_v0  ;;  %5752 = vmatprep.mubr.bf16.mxu1 %v3728_v0  ;;  %v809_v0 = vld [vmem:[%s10733_s30 + $0x9d8] sm:$0xff] }
 0x319   : > { %4411 = vmatpush1.bf16.msra.mxu0 %v2098_v20  ;;  %5723 = vmatpush1.bf16.msra.mxu1 %v2100_v2  ;;  %v2138_v20 = vunpack.c.h.s8.bf16 %v802_v56  ;;  %v2140_v2 = vunpack.c.h.s8.bf16 %v804_v60 }
 0x31a   : > { %4412 = vmatprep.subr.bf16.mxu0 %v2103_v58  ;;  %5724 = vmatprep.subr.bf16.mxu1 %v2105_v3  ;;  %v2143_v58 = vunpack.c.l.s8.bf16 %v807_v63  ;;  %v2145_v3 = vunpack.c.l.s8.bf16 %v809_v0 }
 0x31d   : > { %4413 = vmatpush1.bf16.msra.mxu0 %v2102_v23  ;;  %5725 = vmatpush1.bf16.msra.mxu1 %v2104_v7  ;;  %v2142_v23 = vunpack.c.l.s8.bf16 %v806_v4  ;;  %v2144_v7 = vunpack.c.l.s8.bf16 %v808_v6 }
 0x31e   : > { %4414 = vmatprep.subr.bf16.mxu0 %v2107_v9  ;;  %5726 = vmatprep.subr.bf16.mxu1 %v2109_v10  ;;  %v2147_v9 = vunpack.c.h.s8.bf16 %v807_v63  ;;  %v2149_v10 = vunpack.c.h.s8.bf16 %v809_v0 }
 0x321   : > { %4415 = vmatpush1.bf16.msra.mxu0 %v2106_v21  ;;  %5727 = vmatpush1.bf16.msra.mxu1 %v2108_v13  ;;  %v2146_v21 = vunpack.c.h.s8.bf16 %v806_v4  ;;  %v2148_v13 = vunpack.c.h.s8.bf16 %v808_v6 }
 0x322   : > { %4416 = vmatprep.subr.bf16.mxu0 %v2111_v14  ;;  %5728 = vmatprep.subr.bf16.mxu1 %v2113_v15  ;;  %v2151_v14 = vunpack.c.l.s8.bf16 %v811_v11  ;;  %v2153_v15 = vunpack.c.l.s8.bf16 %v813_v12 }
 0x325   : > { %4417 = vmatpush1.bf16.msra.mxu0 %v2110_v35  ;;  %5729 = vmatpush1.bf16.msra.mxu1 %v2112_v18  ;;  %v3681_v35 = vcombine.high %v11111_v1, %v11111_v1  ;;  %v2150_v18 = vunpack.c.l.s8.bf16 %v810_v16  ;;  %v2159_v1 = vunpack.c.l.s8.bf16 %v815_v44 }
 0x326   : > { %4418 = vmatprep.subr.bf16.mxu0 %v2115_v19  ;;  %5730 = vmatprep.subr.bf16.mxu1 %v2117_v22  ;;  %v2152_v19 = vunpack.c.l.s8.bf16 %v812_v17  ;;  %v2155_v22 = vunpack.c.h.s8.bf16 %v811_v11 }
 0x329   : > { %4419 = vmatpush1.bf16.msra.mxu0 %v2114_v24  ;;  %5731 = vmatpush1.bf16.msra.mxu1 %v2116_v25  ;;  %v817_v24 = vld [vmem:[%s10733_s30 + $0xa18] sm:$0xff]  ;;  %v11203_v25 = vrot.slane %v3681_v35, %v10781_v49 }
 0x32a   : > { %4420 = vmatprep.subr.bf16.mxu0 %v2119_v26  ;;  %5732 = vmatprep.subr.bf16.mxu1 %v2121_v27  ;;  %v2154_v26 = vunpack.c.h.s8.bf16 %v810_v16  ;;  %v2156_v27 = vunpack.c.h.s8.bf16 %v812_v17  ;;  %v2161_v53 = vunpack.c.l.s8.bf16 %v817_v24 }
 0x32d   : > { %4421 = vmatpush1.bf16.msra.mxu0 %v2118_v30  ;;  %5733 = vmatpush1.bf16.msra.mxu1 %v2120_v31  ;;  %v816_v30 = vld [vmem:[%s10733_s30 + $0xa10] sm:$0xff]  ;;  %v3697_v31 = vcombine.high %v11203_v25, %v11203_v25 }
 0x32e   : > { %4422 = vmatprep.subr.bf16.mxu0 %v2123_v32  ;;  %5734 = vmatprep.subr.bf16.mxu1 %v2125_v33  ;;  %v3726_v32 = vcombine.high %v11164_v57, %v11164_v57  ;;  %v2158_v33 = vunpack.c.l.s8.bf16 %v814_v29  ;;  %v2160_v55 = vunpack.c.l.s8.bf16 %v816_v30  ;;  %v2162_v57 = vunpack.c.h.s8.bf16 %v814_v29 }
 0x32f   : > { %v2164_v42 = vunpack.c.h.s8.bf16 %v816_v30 }
 0x331   : > { %4423 = vmatpush1.bf16.msra.mxu0 %v2122_v36  ;;  %5735 = vmatpush1.bf16.msra.mxu1 %v2124_v39  ;;  %v2165_v36 = vunpack.c.h.s8.bf16 %v817_v24  ;;  %v819_v39 = vld [vmem:[%s10733_s30 + $0xa28] sm:$0xff] }
 0x332   : > { %4424 = vmatprep.subr.bf16.mxu0 %v2127_v40  ;;  %5736 = vmatprep.subr.bf16.mxu1 %v2129_v41  ;;  %v821_v40 = vld [vmem:[%s10733_s30 + $0xa38] sm:$0xff]  ;;  %v11214_v41 = vrot.slane %v3697_v31, %v10781_v49  ;;  %v2167_v43 = vunpack.c.l.s8.bf16 %v819_v39  ;;  %v2171_v51 = vunpack.c.h.s8.bf16 %v819_v39  ;;  %v834_v31 = vld [vmem:[%s10733_s30 + $0xaa0] sm:$0xff]  ;;  %v839_v39 = vld [vmem:[%s10733_s30 + $0xac8] sm:$0xff] }
 0x335   : > { %4425 = vmatpush1.bf16.msra.mxu0 %v2126_v45  ;;  %5737 = vmatpush1.bf16.msra.mxu1 %v2128_v46  ;;  %v2169_v45 = vunpack.c.l.s8.bf16 %v821_v40  ;;  %v818_v46 = vld [vmem:[%s10733_s30 + $0xa20] sm:$0xff] }
 0x336   : > { %4426 = vmatprep.subr.bf16.mxu0 %v2131_v59  ;;  %5738 = vmatprep.subr.bf16.mxu1 %v2133_v47  ;;  %v820_v59 = vld [vmem:[%s10733_s30 + $0xa30] sm:$0xff]  ;;  %v2166_v47 = vunpack.c.l.s8.bf16 %v818_v46 }
 0x337   : > { %v2168_v48 = vunpack.c.l.s8.bf16 %v820_v59  ;;  %v2172_v56 = vunpack.c.h.s8.bf16 %v820_v59  ;;  %v840_v59 = vld [vmem:[%s10733_s30 + $0xad0] sm:$0xff] }
 0x339   : > { %4427 = vmatpush1.bf16.msra.mxu0 %v2130_v52  ;;  %5739 = vmatpush1.bf16.msra.mxu1 %v2132_v54  ;;  %v2173_v52 = vunpack.c.h.s8.bf16 %v821_v40  ;;  %v823_v54 = vld [vmem:[%s10733_s30 + $0xa48] sm:$0xff]  ;;  %v841_v40 = vld [vmem:[%s10733_s30 + $0xad8] sm:$0xff] }
 0x33a   : > { %4428 = vmatprep.subr.bf16.mxu0 %v2135_v8  ;;  %5740 = vmatprep.subr.bf16.mxu1 %v2137_v5  ;;  %v825_v8 = vld [vmem:[%s10733_s30 + $0xa58] sm:$0xff]  ;;  %v2170_v5 = vunpack.c.h.s8.bf16 %v818_v46  ;;  %v2175_v60 = vunpack.c.l.s8.bf16 %v823_v54  ;;  %v2179_v0 = vunpack.c.h.s8.bf16 %v823_v54  ;;  %v838_v46 = vld [vmem:[%s10733_s30 + $0xac0] sm:$0xff]  ;;  %v843_v54 = vld [vmem:[%s10733_s30 + $0xae8] sm:$0xff] }
 0x33d   : > { %4429 = vmatpush1.bf16.msra.mxu0 %v2134_v61  ;;  %5741 = vmatpush1.bf16.msra.mxu1 %v2136_v28  ;;  %v2177_v61 = vunpack.c.l.s8.bf16 %v825_v8  ;;  %v822_v28 = vld [vmem:[%s10733_s30 + $0xa40] sm:$0xff] }
 0x33e   : > { %4430 = vmatprep.subr.bf16.mxu0 %v2139_v50  ;;  %5742 = vmatprep.subr.bf16.mxu1 %v2141_v62  ;;  %v824_v50 = vld [vmem:[%s10733_s30 + $0xa50] sm:$0xff]  ;;  %v2174_v62 = vunpack.c.l.s8.bf16 %v822_v28 }
 0x33f   : > { %v2176_v63 = vunpack.c.l.s8.bf16 %v824_v50  ;;  %v2180_v4 = vunpack.c.h.s8.bf16 %v824_v50  ;;  %v844_v50 = vld [vmem:[%s10733_s30 + $0xaf0] sm:$0xff] }
 0x341   : > { %4431 = vmatpush1.bf16.msra.mxu0 %v2138_v20  ;;  %5743 = vmatpush1.bf16.msra.mxu1 %v2140_v2  ;;  %v2181_v20 = vunpack.c.h.s8.bf16 %v825_v8  ;;  %v827_v2 = vld [vmem:[%s10733_s30 + $0xa68] sm:$0xff]  ;;  %v845_v8 = vld [vmem:[%s10733_s30 + $0xaf8] sm:$0xff] }
 0x342   : > { %4432 = vmatprep.subr.bf16.mxu0 %v2143_v58  ;;  %5744 = vmatprep.subr.bf16.mxu1 %v2145_v3  ;;  %v829_v58 = vld [vmem:[%s10733_s30 + $0xa78] sm:$0xff]  ;;  %v2178_v3 = vunpack.c.h.s8.bf16 %v822_v28  ;;  %v2183_v6 = vunpack.c.l.s8.bf16 %v827_v2  ;;  %v2187_v12 = vunpack.c.h.s8.bf16 %v827_v2  ;;  %v842_v28 = vld [vmem:[%s10733_s30 + $0xae0] sm:$0xff]  ;;  %v847_v2 = vld [vmem:[%s10733_s30 + $0xb08] sm:$0xff] }
 0x345   : > { %4433 = vmatpush1.bf16.msra.mxu0 %v2142_v23  ;;  %5745 = vmatpush1.bf16.msra.mxu1 %v2144_v7  ;;  %v2185_v23 = vunpack.c.l.s8.bf16 %v829_v58  ;;  %v826_v7 = vld [vmem:[%s10733_s30 + $0xa60] sm:$0xff] }
 0x346   : > { %4434 = vmatprep.subr.bf16.mxu0 %v2147_v9  ;;  %5746 = vmatprep.subr.bf16.mxu1 %v2149_v10  ;;  %v828_v9 = vld [vmem:[%s10733_s30 + $0xa70] sm:$0xff]  ;;  %v2182_v10 = vunpack.c.l.s8.bf16 %v826_v7 }
 0x347   : > { %v2184_v11 = vunpack.c.l.s8.bf16 %v828_v9  ;;  %v2188_v16 = vunpack.c.h.s8.bf16 %v828_v9  ;;  %v848_v9 = vld [vmem:[%s10733_s30 + $0xb10] sm:$0xff] }
 0x349   : > { %4435 = vmatpush1.bf16.msra.mxu0 %v2146_v21  ;;  %5747 = vmatpush1.bf16.msra.mxu1 %v2148_v13  ;;  %v2189_v21 = vunpack.c.h.s8.bf16 %v829_v58  ;;  %v831_v13 = vld [vmem:[%s10733_s30 + $0xa88] sm:$0xff]  ;;  %v849_v58 = vld [vmem:[%s10733_s30 + $0xb18] sm:$0xff] }
 0x34a   : > { %4436 = vmatprep.subr.bf16.mxu0 %v2151_v14  ;;  %5748 = vmatprep.subr.bf16.mxu1 %v2153_v15  ;;  %v833_v14 = vld [vmem:[%s10733_s30 + $0xa98] sm:$0xff]  ;;  %v2186_v15 = vunpack.c.h.s8.bf16 %v826_v7  ;;  %v2191_v17 = vunpack.c.l.s8.bf16 %v831_v13  ;;  %v2195_v44 = vunpack.c.h.s8.bf16 %v831_v13  ;;  %v846_v7 = vld [vmem:[%s10733_s30 + $0xb00] sm:$0xff]  ;;  %v2229_v13 = vunpack.c.h.s8.bf16 %v849_v58 }
 0x34b   : > { %v2193_v35 = vunpack.c.l.s8.bf16 %v833_v14  ;;  %v2197_v24 = vunpack.c.h.s8.bf16 %v833_v14  ;;  %v851_v14 = vld [vmem:[%s10733_s30 + $0xb28] sm:$0xff] }
 0x34d   : > { %4437 = vmatpush1.bf16.msra.mxu0 %v2150_v18  ;;  %5749 = vmatpush1.bf16.msra.mxu1 %v2152_v19  ;;  %v830_v18 = vld [vmem:[%s10733_s30 + $0xa80] sm:$0xff]  ;;  %v832_v19 = vld [vmem:[%s10733_s30 + $0xa90] sm:$0xff] }
 0x34e   : > { %4438 = vmatprep.subr.bf16.mxu0 %v2155_v22  ;;  %5750 = vmatprep.subr.bf16.mxu1 %v2157_v37  ;;  %v2190_v22 = vunpack.c.l.s8.bf16 %v830_v18  ;;  %v2192_v37 = vunpack.c.l.s8.bf16 %v832_v19 }
 0x351   : > { %4439 = vmatpush1.bf16.msra.mxu0 %v2154_v26  ;;  %5751 = vmatpush1.bf16.msra.mxu1 %v2156_v27  ;;  %v835_v26 = vld [vmem:[%s10733_s30 + $0xaa8] sm:$0xff]  ;;  %v837_v27 = vld [vmem:[%s10733_s30 + $0xab8] sm:$0xff] }
 0x352   : > { %4449 = vmatprep.subr.bf16.mxu0 %v2159_v1  ;;  %5761 = vmatprep.subr.bf16.mxu1 %v2161_v53  ;;  %v2194_v1 = vunpack.c.h.s8.bf16 %v830_v18  ;;  %v2196_v53 = vunpack.c.h.s8.bf16 %v832_v19  ;;  %v2199_v29 = vunpack.c.l.s8.bf16 %v835_v26  ;;  %v2201_v30 = vunpack.c.l.s8.bf16 %v837_v27  ;;  %v850_v19 = vld [vmem:[%s10733_s30 + $0xb20] sm:$0xff] }
 0x354   : > { %4441 = vmatmul.mubr.bf16.vlgmr.msra.gmra.mrb[0].mxu0 %v3726_v32  ;;  %5753 = vmatmul.mubr.bf16.vlgmr.msra.gmra.mrb[0].mxu1 %v3726_v32  ;;  %v836_v32 = vld [vmem:[%s10733_s30 + $0xab0] sm:$0xff] }
 0x355   : > { %4450 = vmatpush1.bf16.msra.mxu0 %v2158_v33  ;;  %5762 = vmatpush1.bf16.msra.mxu1 %v2160_v55  ;;  %v2198_v33 = vunpack.c.l.s8.bf16 %v834_v31  ;;  %v2200_v55 = vunpack.c.l.s8.bf16 %v836_v32 }
 0x356   : > { %4451 = vmatprep.subr.bf16.mxu0 %v2163_v34  ;;  %5763 = vmatprep.subr.bf16.mxu1 %v2165_v36  ;;  %v2203_v34 = vunpack.c.h.s8.bf16 %v835_v26  ;;  %v2205_v36 = vunpack.c.h.s8.bf16 %v837_v27  ;;  %v855_v26 = vld [vmem:[%s10733_s30 + $0xb48] sm:$0xff]  ;;  %v857_v27 = vld [vmem:[%s10733_s30 + $0xb58] sm:$0xff] }
 0x357   : > { %4481 = vmatprep.mubr.bf16.mxu0 %v11214_v41  ;;  %5793 = vmatprep.mubr.bf16.mxu1 %v11214_v41 }
 0x359   : > { %4452 = vmatpush1.bf16.msra.mxu0 %v2162_v57  ;;  %5764 = vmatpush1.bf16.msra.mxu1 %v2164_v42  ;;  %v2202_v57 = vunpack.c.h.s8.bf16 %v834_v31  ;;  %v2204_v42 = vunpack.c.h.s8.bf16 %v836_v32  ;;  %v854_v31 = vld [vmem:[%s10733_s30 + $0xb40] sm:$0xff]  ;;  %v856_v32 = vld [vmem:[%s10733_s30 + $0xb50] sm:$0xff] }
 0x35a   : > { %4453 = vmatprep.subr.bf16.mxu0 %v2167_v43  ;;  %5765 = vmatprep.subr.bf16.mxu1 %v2169_v45  ;;  %v2207_v43 = vunpack.c.l.s8.bf16 %v839_v39  ;;  %v2209_v45 = vunpack.c.l.s8.bf16 %v841_v40 }
 0x35d   : > { %4454 = vmatpush1.bf16.msra.mxu0 %v2166_v47  ;;  %5766 = vmatpush1.bf16.msra.mxu1 %v2168_v48  ;;  %v2206_v47 = vunpack.c.l.s8.bf16 %v838_v46  ;;  %v2208_v48 = vunpack.c.l.s8.bf16 %v840_v59 }
 0x35e   : > { %4455 = vmatprep.subr.bf16.mxu0 %v2171_v51  ;;  %5767 = vmatprep.subr.bf16.mxu1 %v2173_v52  ;;  %v2211_v51 = vunpack.c.h.s8.bf16 %v839_v39  ;;  %v2213_v52 = vunpack.c.h.s8.bf16 %v841_v40  ;;  %v859_v39 = vld [vmem:[%s10733_s30 + $0xb68] sm:$0xff]  ;;  %v861_v40 = vld [vmem:[%s10733_s30 + $0xb78] sm:$0xff] }
 0x361   : > { %4456 = vmatpush1.bf16.msra.mxu0 %v2170_v5  ;;  %5768 = vmatpush1.bf16.msra.mxu1 %v2172_v56  ;;  %v2210_v5 = vunpack.c.h.s8.bf16 %v838_v46  ;;  %v2212_v56 = vunpack.c.h.s8.bf16 %v840_v59  ;;  %v858_v46 = vld [vmem:[%s10733_s30 + $0xb60] sm:$0xff]  ;;  %v860_v59 = vld [vmem:[%s10733_s30 + $0xb70] sm:$0xff] }
 0x362   : > { %4457 = vmatprep.subr.bf16.mxu0 %v2175_v60  ;;  %5769 = vmatprep.subr.bf16.mxu1 %v2177_v61  ;;  %v2215_v60 = vunpack.c.l.s8.bf16 %v843_v54  ;;  %v2217_v61 = vunpack.c.l.s8.bf16 %v845_v8 }
 0x365   : > { %4458 = vmatpush1.bf16.msra.mxu0 %v2174_v62  ;;  %5770 = vmatpush1.bf16.msra.mxu1 %v2176_v63  ;;  %v2214_v62 = vunpack.c.l.s8.bf16 %v842_v28  ;;  %v2216_v63 = vunpack.c.l.s8.bf16 %v844_v50 }
 0x366   : > { %4459 = vmatprep.subr.bf16.mxu0 %v2179_v0  ;;  %5771 = vmatprep.subr.bf16.mxu1 %v2181_v20  ;;  %v2219_v0 = vunpack.c.h.s8.bf16 %v843_v54  ;;  %v2221_v20 = vunpack.c.h.s8.bf16 %v845_v8  ;;  %v863_v54 = vld [vmem:[%s10733_s30 + $0xb88] sm:$0xff]  ;;  %v865_v8 = vld [vmem:[%s10733_s30 + $0xb98] sm:$0xff] }
 0x369   : > { %4460 = vmatpush1.bf16.msra.mxu0 %v2178_v3  ;;  %5772 = vmatpush1.bf16.msra.mxu1 %v2180_v4  ;;  %v2218_v3 = vunpack.c.h.s8.bf16 %v842_v28  ;;  %v2220_v4 = vunpack.c.h.s8.bf16 %v844_v50  ;;  %v862_v28 = vld [vmem:[%s10733_s30 + $0xb80] sm:$0xff]  ;;  %v864_v50 = vld [vmem:[%s10733_s30 + $0xb90] sm:$0xff] }
 0x36a   : > { %4461 = vmatprep.subr.bf16.mxu0 %v2183_v6  ;;  %5773 = vmatprep.subr.bf16.mxu1 %v2185_v23  ;;  %v2223_v6 = vunpack.c.l.s8.bf16 %v847_v2  ;;  %v2225_v23 = vunpack.c.l.s8.bf16 %v849_v58  ;;  %v869_v58 = vld [vmem:[%s10733_s30 + $0xbb8] sm:$0xff] }
 0x36d   : > { %4462 = vmatpush1.bf16.msra.mxu0 %v2182_v10  ;;  %5774 = vmatpush1.bf16.msra.mxu1 %v2184_v11  ;;  %v11250_v10 = vrot.slane %v11203_v25, %v10781_v49  ;;  %v2222_v11 = vunpack.c.l.s8.bf16 %v846_v7  ;;  %v2226_v25 = vunpack.c.h.s8.bf16 %v846_v7  ;;  %v866_v7 = vld [vmem:[%s10733_s30 + $0xba0] sm:$0xff] }
 0x36e   : > { %4463 = vmatprep.subr.bf16.mxu0 %v2187_v12  ;;  %5775 = vmatprep.subr.bf16.mxu1 %v2189_v21  ;;  %v2224_v12 = vunpack.c.l.s8.bf16 %v848_v9  ;;  %v2227_v21 = vunpack.c.h.s8.bf16 %v847_v2  ;;  %v867_v2 = vld [vmem:[%s10733_s30 + $0xba8] sm:$0xff] }
 0x371   : > { %4464 = vmatpush1.bf16.msra.mxu0 %v2186_v15  ;;  %5776 = vmatpush1.bf16.msra.mxu1 %v2188_v16  ;;  %v853_v15 = vld [vmem:[%s10733_s30 + $0xb38] sm:$0xff]  ;;  %v3729_v16 = vcombine.high %v11214_v41, %v11214_v41  ;;  %v2230_v41 = vunpack.c.l.s8.bf16 %v850_v19 }
 0x372   : > { %4465 = vmatprep.subr.bf16.mxu0 %v2191_v17  ;;  %5777 = vmatprep.subr.bf16.mxu1 %v2193_v35  ;;  %v2228_v17 = vunpack.c.h.s8.bf16 %v848_v9  ;;  %v2231_v35 = vunpack.c.l.s8.bf16 %v851_v14  ;;  %v2233_v18 = vunpack.c.l.s8.bf16 %v853_v15  ;;  %v868_v9 = vld [vmem:[%s10733_s30 + $0xbb0] sm:$0xff] }
 0x375   : > { %4466 = vmatpush1.bf16.msra.mxu0 %v2190_v22  ;;  %5778 = vmatpush1.bf16.msra.mxu1 %v2192_v37  ;;  %v852_v22 = vld [vmem:[%s10733_s30 + $0xb30] sm:$0xff] }
 0x376   : > { %4467 = vmatprep.subr.bf16.mxu0 %v2195_v44  ;;  %5779 = vmatprep.subr.bf16.mxu1 %v2197_v24  ;;  %v2232_v37 = vunpack.c.l.s8.bf16 %v852_v22  ;;  %v2235_v44 = vunpack.c.h.s8.bf16 %v851_v14  ;;  %v2237_v24 = vunpack.c.h.s8.bf16 %v853_v15  ;;  %v871_v14 = vld [vmem:[%s10733_s30 + $0xbc8] sm:$0xff]  ;;  %v873_v15 = vld [vmem:[%s10733_s30 + $0xbd8] sm:$0xff] }
 0x379   : > { %4468 = vmatpush1.bf16.msra.mxu0 %v2194_v1  ;;  %5780 = vmatpush1.bf16.msra.mxu1 %v2196_v53  ;;  %v2234_v1 = vunpack.c.h.s8.bf16 %v850_v19  ;;  %v2236_v53 = vunpack.c.h.s8.bf16 %v852_v22  ;;  %v872_v19 = vld [vmem:[%s10733_s30 + $0xbd0] sm:$0xff] }
 0x37a   : > { %4469 = vmatprep.subr.bf16.mxu0 %v2199_v29  ;;  %5781 = vmatprep.subr.bf16.mxu1 %v2201_v30  ;;  %v2239_v29 = vunpack.c.l.s8.bf16 %v855_v26  ;;  %v2241_v30 = vunpack.c.l.s8.bf16 %v857_v27 }
 0x37d   : > { %4470 = vmatpush1.bf16.msra.mxu0 %v2198_v33  ;;  %5782 = vmatpush1.bf16.msra.mxu1 %v2200_v55  ;;  %v2238_v33 = vunpack.c.l.s8.bf16 %v854_v31  ;;  %v2240_v55 = vunpack.c.l.s8.bf16 %v856_v32 }
 0x37e   : > { %4471 = vmatprep.subr.bf16.mxu0 %v2203_v34  ;;  %5783 = vmatprep.subr.bf16.mxu1 %v2205_v36  ;;  %v2243_v34 = vunpack.c.h.s8.bf16 %v855_v26  ;;  %v2245_v36 = vunpack.c.h.s8.bf16 %v857_v27  ;;  %v877_v26 = vld [vmem:[%s10733_s30 + $0xbf8] sm:$0xff] }
 0x381   : > { %4472 = vmatpush1.bf16.msra.mxu0 %v2202_v57  ;;  %5784 = vmatpush1.bf16.msra.mxu1 %v2204_v42  ;;  %v2242_v57 = vunpack.c.h.s8.bf16 %v854_v31  ;;  %v2244_v42 = vunpack.c.h.s8.bf16 %v856_v32  ;;  %v876_v31 = vld [vmem:[%s10733_s30 + $0xbf0] sm:$0xff] }
 0x382   : > { %4473 = vmatprep.subr.bf16.mxu0 %v2207_v43  ;;  %5785 = vmatprep.subr.bf16.mxu1 %v2209_v45  ;;  %v2247_v43 = vunpack.c.l.s8.bf16 %v859_v39  ;;  %v2249_v45 = vunpack.c.l.s8.bf16 %v861_v40  ;;  %v11285_v32 = vld [vmem:[%s10755_s15 + $0x18] sm:$0xff] }
 0x385   : > { %4474 = vmatpush1.bf16.msra.mxu0 %v2206_v47  ;;  %5786 = vmatpush1.bf16.msra.mxu1 %v2208_v48  ;;  %v2246_v47 = vunpack.c.l.s8.bf16 %v858_v46  ;;  %v2248_v48 = vunpack.c.l.s8.bf16 %v860_v59 }
 0x386   : > { %4475 = vmatprep.subr.bf16.mxu0 %v2211_v51  ;;  %5787 = vmatprep.subr.bf16.mxu1 %v2213_v52  ;;  %v2251_v51 = vunpack.c.h.s8.bf16 %v859_v39  ;;  %v2253_v52 = vunpack.c.h.s8.bf16 %v861_v40  ;;  %v879_v39 = vld [vmem:[%s10733_s30 + $0xc08] sm:$0xff]  ;;  %v881_v40 = vld [vmem:[%s10733_s30 + $0xc18] sm:$0xff] }
 0x389   : > { %4476 = vmatpush1.bf16.msra.mxu0 %v2210_v5  ;;  %5788 = vmatpush1.bf16.msra.mxu1 %v2212_v56  ;;  %v2250_v5 = vunpack.c.h.s8.bf16 %v858_v46  ;;  %v2252_v56 = vunpack.c.h.s8.bf16 %v860_v59  ;;  %v2289_v46 = vunpack.c.l.s8.bf16 %v881_v40  ;;  %v878_v59 = vld [vmem:[%s10733_s30 + $0xc00] sm:$0xff] }
 0x38a   : > { %4477 = vmatprep.subr.bf16.mxu0 %v2215_v60  ;;  %5789 = vmatprep.subr.bf16.mxu1 %v2217_v61  ;;  %v2255_v60 = vunpack.c.l.s8.bf16 %v863_v54  ;;  %v2257_v61 = vunpack.c.l.s8.bf16 %v865_v8 }
 0x38d   : > { %4478 = vmatpush1.bf16.msra.mxu0 %v2214_v62  ;;  %5790 = vmatpush1.bf16.msra.mxu1 %v2216_v63  ;;  %v2254_v62 = vunpack.c.l.s8.bf16 %v862_v28  ;;  %v2256_v63 = vunpack.c.l.s8.bf16 %v864_v50 }
 0x38e   : > { %4479 = vmatprep.subr.bf16.mxu0 %v2219_v0  ;;  %5791 = vmatprep.subr.bf16.mxu1 %v2221_v20  ;;  %v2259_v0 = vunpack.c.h.s8.bf16 %v863_v54  ;;  %v2261_v20 = vunpack.c.h.s8.bf16 %v865_v8  ;;  %v2291_v8 = vunpack.c.h.s8.bf16 %v879_v39 }
 0x391   : > { %4480 = vmatpush1.bf16.msra.mxu0 %v2218_v3  ;;  %5792 = vmatpush1.bf16.msra.mxu1 %v2220_v4  ;;  %v2258_v3 = vunpack.c.h.s8.bf16 %v862_v28  ;;  %v2260_v4 = vunpack.c.h.s8.bf16 %v864_v50 }
 0x392   : > { %4490 = vmatprep.subr.bf16.mxu0 %v2223_v6  ;;  %5802 = vmatprep.subr.bf16.mxu1 %v2225_v23  ;;  %v2263_v6 = vunpack.c.l.s8.bf16 %v867_v2  ;;  %v2265_v23 = vunpack.c.l.s8.bf16 %v869_v58 }
 0x394   : > { %4482 = vmatmul.mubr.bf16.vlgmr.msra.gmra.mrb[0].mxu0 %v11250_v10  ;;  %5794 = vmatmul.mubr.bf16.vlgmr.msra.gmra.mrb[0].mxu1 %v11250_v10 }
 0x395   : > { %4491 = vmatpush1.bf16.msra.mxu0 %v2222_v11  ;;  %5803 = vmatpush1.bf16.msra.mxu1 %v2224_v12  ;;  %v2262_v11 = vunpack.c.l.s8.bf16 %v866_v7  ;;  %v2264_v12 = vunpack.c.l.s8.bf16 %v868_v9 }
 0x396   : > { %4492 = vmatprep.subr.bf16.mxu0 %v2227_v21  ;;  %5804 = vmatprep.subr.bf16.mxu1 %v2229_v13  ;;  %v2267_v21 = vunpack.c.h.s8.bf16 %v867_v2  ;;  %v2269_v13 = vunpack.c.h.s8.bf16 %v869_v58 }
 0x397   : > { %4522 = vmatprep.mubr.bf16.mxu0 %v3729_v16  ;;  %5834 = vmatprep.mubr.bf16.mxu1 %v3729_v16  ;;  %v2266_v16 = vunpack.c.h.s8.bf16 %v866_v7 }
 0x399   : > { %4493 = vmatpush1.bf16.msra.mxu0 %v2226_v25  ;;  %5805 = vmatpush1.bf16.msra.mxu1 %v2228_v17  ;;  %v2268_v25 = vunpack.c.h.s8.bf16 %v868_v9  ;;  %v2271_v17 = vunpack.c.l.s8.bf16 %v871_v14 }
 0x39a   : > { %4494 = vmatprep.subr.bf16.mxu0 %v2231_v35  ;;  %5806 = vmatprep.subr.bf16.mxu1 %v2233_v18  ;;  %v2273_v35 = vunpack.c.l.s8.bf16 %v873_v15  ;;  %v870_v18 = vld [vmem:[%s10733_s30 + $0xbc0] sm:$0xff] }
 0x39b   : > { %v2270_v22 = vunpack.c.l.s8.bf16 %v870_v18  ;;  %v2274_v27 = vunpack.c.h.s8.bf16 %v870_v18 }
 0x39d   : > { %4495 = vmatpush1.bf16.msra.mxu0 %v2230_v41  ;;  %5807 = vmatpush1.bf16.msra.mxu1 %v2232_v37  ;;  %v2272_v41 = vunpack.c.l.s8.bf16 %v872_v19  ;;  %v2275_v37 = vunpack.c.h.s8.bf16 %v871_v14 }
 0x39e   : > { %4496 = vmatprep.subr.bf16.mxu0 %v2235_v44  ;;  %5808 = vmatprep.subr.bf16.mxu1 %v2237_v24  ;;  %v2277_v44 = vunpack.c.h.s8.bf16 %v873_v15  ;;  %v875_v24 = vld [vmem:[%s10733_s30 + $0xbe8] sm:$0xff] }
 0x3a1   : > { %4497 = vmatpush1.bf16.msra.mxu0 %v2234_v1  ;;  %5809 = vmatpush1.bf16.msra.mxu1 %v2236_v53  ;;  %v2276_v1 = vunpack.c.h.s8.bf16 %v872_v19  ;;  %v2279_v53 = vunpack.c.l.s8.bf16 %v875_v24 }
 0x3a2   : > { %4498 = vmatprep.subr.bf16.mxu0 %v2239_v29  ;;  %5810 = vmatprep.subr.bf16.mxu1 %v2241_v30  ;;  %v2281_v29 = vunpack.c.l.s8.bf16 %v877_v26  ;;  %v874_v30 = vld [vmem:[%s10733_s30 + $0xbe0] sm:$0xff] }
 0x3a5   : > { %4499 = vmatpush1.bf16.msra.mxu0 %v2238_v33  ;;  %5811 = vmatpush1.bf16.msra.mxu1 %v2240_v55  ;;  %v2278_v33 = vunpack.c.l.s8.bf16 %v874_v30  ;;  %v2280_v55 = vunpack.c.l.s8.bf16 %v876_v31 }
 0x3a6   : > { %4500 = vmatprep.subr.bf16.mxu0 %v2243_v34  ;;  %5812 = vmatprep.subr.bf16.mxu1 %v2245_v36  ;;  %v2283_v34 = vunpack.c.h.s8.bf16 %v875_v24  ;;  %v2285_v36 = vunpack.c.h.s8.bf16 %v877_v26 }
 0x3a9   : > { %4501 = vmatpush1.bf16.msra.mxu0 %v2242_v57  ;;  %5813 = vmatpush1.bf16.msra.mxu1 %v2244_v42  ;;  %v11291_v57 = vrot.slane %v11285_v32, %v10781_v49  ;;  %v2282_v42 = vunpack.c.h.s8.bf16 %v874_v30 }
 0x3aa   : > { %4502 = vmatprep.subr.bf16.mxu0 %v2247_v43  ;;  %5814 = vmatprep.subr.bf16.mxu1 %v2249_v45  ;;  %v2284_v43 = vunpack.c.h.s8.bf16 %v876_v31  ;;  %v2287_v45 = vunpack.c.l.s8.bf16 %v879_v39 }
 0x3ad   : > { %4503 = vmatpush1.bf16.msra.mxu0 %v2246_v47  ;;  %5815 = vmatpush1.bf16.msra.mxu1 %v2248_v48  ;;  %v880_v47 = vld [vmem:[%s10733_s30 + $0xc10] sm:$0xff]  ;;  %v3745_v48 = vcombine.high %v11291_v57, %v11291_v57 }
 0x3ae   : > { %4504 = vmatprep.subr.bf16.mxu0 %v2251_v51  ;;  %5816 = vmatprep.subr.bf16.mxu1 %v2253_v52  ;;  %v3727_v51 = vcombine.high %v11250_v10, %v11250_v10  ;;  %v2286_v52 = vunpack.c.l.s8.bf16 %v878_v59  ;;  %v2288_v54 = vunpack.c.l.s8.bf16 %v880_v47  ;;  %v2290_v10 = vunpack.c.h.s8.bf16 %v878_v59 }
 0x3af   : > { %v2292_v28 = vunpack.c.h.s8.bf16 %v880_v47 }
 0x3b1   : > { %4505 = vmatpush1.bf16.msra.mxu0 %v2250_v5  ;;  %5817 = vmatpush1.bf16.msra.mxu1 %v2252_v56  ;;  %v2293_v5 = vunpack.c.h.s8.bf16 %v881_v40  ;;  %v883_v56 = vld [vmem:[%s10733_s30 + $0xc28] sm:$0xff] }
 0x3b2   : > { %4506 = vmatprep.subr.bf16.mxu0 %v2255_v60  ;;  %5818 = vmatprep.subr.bf16.mxu1 %v2257_v61  ;;  %v885_v60 = vld [vmem:[%s10733_s30 + $0xc38] sm:$0xff]  ;;  %v11302_v61 = vrot.slane %v3745_v48, %v10781_v49  ;;  %v2295_v50 = vunpack.c.l.s8.bf16 %v883_v56  ;;  %v2299_v58 = vunpack.c.h.s8.bf16 %v883_v56 }
 0x3b5   : > { %4507 = vmatpush1.bf16.msra.mxu0 %v2254_v62  ;;  %5819 = vmatpush1.bf16.msra.mxu1 %v2256_v63  ;;  %v2297_v62 = vunpack.c.l.s8.bf16 %v885_v60  ;;  %v882_v63 = vld [vmem:[%s10733_s30 + $0xc20] sm:$0xff] }
 0x3b6   : > { %4508 = vmatprep.subr.bf16.mxu0 %v2259_v0  ;;  %5820 = vmatprep.subr.bf16.mxu1 %v2261_v20  ;;  %v884_v0 = vld [vmem:[%s10733_s30 + $0xc30] sm:$0xff]  ;;  %v2294_v20 = vunpack.c.l.s8.bf16 %v882_v63 }
 0x3b7   : > { %v2296_v2 = vunpack.c.l.s8.bf16 %v884_v0  ;;  %v2300_v7 = vunpack.c.h.s8.bf16 %v884_v0  ;;  %v902_v0 = vld [vmem:[%s10733_s30 + $0xcc0] sm:$0xff] }
 0x3b9   : > { %4509 = vmatpush1.bf16.msra.mxu0 %v2258_v3  ;;  %5821 = vmatpush1.bf16.msra.mxu1 %v2260_v4  ;;  %v2301_v3 = vunpack.c.h.s8.bf16 %v885_v60  ;;  %v887_v4 = vld [vmem:[%s10733_s30 + $0xc48] sm:$0xff] }
 0x3ba   : > { %4510 = vmatprep.subr.bf16.mxu0 %v2263_v6  ;;  %5822 = vmatprep.subr.bf16.mxu1 %v2265_v23  ;;  %v889_v6 = vld [vmem:[%s10733_s30 + $0xc58] sm:$0xff]  ;;  %v2298_v23 = vunpack.c.h.s8.bf16 %v882_v63  ;;  %v2303_v9 = vunpack.c.l.s8.bf16 %v887_v4  ;;  %v2307_v15 = vunpack.c.h.s8.bf16 %v887_v4  ;;  %v903_v60 = vld [vmem:[%s10733_s30 + $0xcc8] sm:$0xff] }
 0x3bd   : > { %4511 = vmatpush1.bf16.msra.mxu0 %v2262_v11  ;;  %5823 = vmatpush1.bf16.msra.mxu1 %v2264_v12  ;;  %v2305_v11 = vunpack.c.l.s8.bf16 %v889_v6  ;;  %v886_v12 = vld [vmem:[%s10733_s30 + $0xc40] sm:$0xff] }
 0x3be   : > { %4512 = vmatprep.subr.bf16.mxu0 %v2267_v21  ;;  %5824 = vmatprep.subr.bf16.mxu1 %v2269_v13  ;;  %v888_v21 = vld [vmem:[%s10733_s30 + $0xc50] sm:$0xff]  ;;  %v2302_v13 = vunpack.c.l.s8.bf16 %v886_v12 }
 0x3bf   : > { %v2304_v14 = vunpack.c.l.s8.bf16 %v888_v21  ;;  %v2308_v18 = vunpack.c.h.s8.bf16 %v888_v21  ;;  %v906_v21 = vld [vmem:[%s10733_s30 + $0xce0] sm:$0xff] }
 0x3c1   : > { %4513 = vmatpush1.bf16.msra.mxu0 %v2266_v16  ;;  %5825 = vmatpush1.bf16.msra.mxu1 %v2268_v25  ;;  %v2309_v16 = vunpack.c.h.s8.bf16 %v889_v6  ;;  %v891_v25 = vld [vmem:[%s10733_s30 + $0xc68] sm:$0xff] }
 0x3c2   : > { %4514 = vmatprep.subr.bf16.mxu0 %v2271_v17  ;;  %5826 = vmatprep.subr.bf16.mxu1 %v2273_v35  ;;  %v893_v17 = vld [vmem:[%s10733_s30 + $0xc78] sm:$0xff]  ;;  %v2306_v35 = vunpack.c.h.s8.bf16 %v886_v12  ;;  %v2311_v19 = vunpack.c.l.s8.bf16 %v891_v25  ;;  %v2315_v26 = vunpack.c.h.s8.bf16 %v891_v25  ;;  %v907_v6 = vld [vmem:[%s10733_s30 + $0xce8] sm:$0xff] }
 0x3c5   : > { %4515 = vmatpush1.bf16.msra.mxu0 %v2270_v22  ;;  %5827 = vmatpush1.bf16.msra.mxu1 %v2272_v41  ;;  %v2313_v22 = vunpack.c.l.s8.bf16 %v893_v17  ;;  %v890_v41 = vld [vmem:[%s10733_s30 + $0xc60] sm:$0xff] }
 0x3c6   : > { %4516 = vmatprep.subr.bf16.mxu0 %v2275_v37  ;;  %5828 = vmatprep.subr.bf16.mxu1 %v2277_v44  ;;  %v892_v37 = vld [vmem:[%s10733_s30 + $0xc70] sm:$0xff]  ;;  %v2310_v44 = vunpack.c.l.s8.bf16 %v890_v41 }
 0x3c7   : > { %v2312_v24 = vunpack.c.l.s8.bf16 %v892_v37  ;;  %v2316_v30 = vunpack.c.h.s8.bf16 %v892_v37  ;;  %v910_v37 = vld [vmem:[%s10733_s30 + $0xd00] sm:$0xff] }
 0x3c9   : > { %4517 = vmatpush1.bf16.msra.mxu0 %v2274_v27  ;;  %5829 = vmatpush1.bf16.msra.mxu1 %v2276_v1  ;;  %v2317_v27 = vunpack.c.h.s8.bf16 %v893_v17  ;;  %v895_v1 = vld [vmem:[%s10733_s30 + $0xc88] sm:$0xff] }
 0x3ca   : > { %4518 = vmatprep.subr.bf16.mxu0 %v2279_v53  ;;  %5830 = vmatprep.subr.bf16.mxu1 %v2281_v29  ;;  %v897_v53 = vld [vmem:[%s10733_s30 + $0xc98] sm:$0xff]  ;;  %v2314_v29 = vunpack.c.h.s8.bf16 %v890_v41  ;;  %v2319_v31 = vunpack.c.l.s8.bf16 %v895_v1  ;;  %v2323_v40 = vunpack.c.h.s8.bf16 %v895_v1  ;;  %v911_v17 = vld [vmem:[%s10733_s30 + $0xd08] sm:$0xff] }
 0x3cb   : > { %v2355_v1 = vunpack.c.h.s8.bf16 %v911_v17 }
 0x3cd   : > { %4519 = vmatpush1.bf16.msra.mxu0 %v2278_v33  ;;  %5831 = vmatpush1.bf16.msra.mxu1 %v2280_v55  ;;  %v2321_v33 = vunpack.c.l.s8.bf16 %v897_v53  ;;  %v894_v55 = vld [vmem:[%s10733_s30 + $0xc80] sm:$0xff] }
 0x3ce   : > { %4520 = vmatprep.subr.bf16.mxu0 %v2283_v34  ;;  %5832 = vmatprep.subr.bf16.mxu1 %v2285_v36  ;;  %v896_v34 = vld [vmem:[%s10733_s30 + $0xc90] sm:$0xff]  ;;  %v2318_v36 = vunpack.c.l.s8.bf16 %v894_v55 }
 0x3cf   : > { %v2320_v39 = vunpack.c.l.s8.bf16 %v896_v34  ;;  %v2324_v59 = vunpack.c.h.s8.bf16 %v896_v34 }
 0x3d1   : > { %4521 = vmatpush1.bf16.msra.mxu0 %v2282_v42  ;;  %5833 = vmatpush1.bf16.msra.mxu1 %v2284_v43  ;;  %v2325_v42 = vunpack.c.h.s8.bf16 %v897_v53  ;;  %v899_v43 = vld [vmem:[%s10733_s30 + $0xca8] sm:$0xff] }
 0x3d2   : > { %4531 = vmatprep.subr.bf16.mxu0 %v2287_v45  ;;  %5843 = vmatprep.subr.bf16.mxu1 %v2289_v46  ;;  %v901_v45 = vld [vmem:[%s10733_s30 + $0xcb8] sm:$0xff]  ;;  %v2322_v46 = vunpack.c.h.s8.bf16 %v894_v55  ;;  %v2327_v47 = vunpack.c.l.s8.bf16 %v899_v43 }
 0x3d3   : > { %v2329_v48 = vunpack.c.l.s8.bf16 %v901_v45  ;;  %v2333_v56 = vunpack.c.h.s8.bf16 %v901_v45  ;;  %v919_v45 = vld [vmem:[%s10733_s30 + $0xd48] sm:$0xff] }
 0x3d4   : > { %4523 = vmatmul.mubr.bf16.vlgmr.msra.gmra.mrb[0].mxu0 %v3727_v51  ;;  %5835 = vmatmul.mubr.bf16.vlgmr.msra.gmra.mrb[0].mxu1 %v3727_v51  ;;  %v898_v51 = vld [vmem:[%s10733_s30 + $0xca0] sm:$0xff] }
 0x3d5   : > { %4532 = vmatpush1.bf16.msra.mxu0 %v2286_v52  ;;  %5844 = vmatpush1.bf16.msra.mxu1 %v2288_v54  ;;  %v900_v52 = vld [vmem:[%s10733_s30 + $0xcb0] sm:$0xff]  ;;  %v2326_v54 = vunpack.c.l.s8.bf16 %v898_v51 }
 0x3d6   : > { %4533 = vmatprep.subr.bf16.mxu0 %v2291_v8  ;;  %5845 = vmatprep.subr.bf16.mxu1 %v2293_v5  ;;  %v2328_v8 = vunpack.c.l.s8.bf16 %v900_v52  ;;  %v2331_v5 = vunpack.c.h.s8.bf16 %v899_v43 }
 0x3d7   : > { %4563 = vmatprep.mubr.bf16.mxu0 %v11302_v61  ;;  %5875 = vmatprep.mubr.bf16.mxu1 %v11302_v61 }
 0x3d9   : > { %4534 = vmatpush1.bf16.msra.mxu0 %v2290_v10  ;;  %5846 = vmatpush1.bf16.msra.mxu1 %v2292_v28  ;;  %v905_v10 = vld [vmem:[%s10733_s30 + $0xcd8] sm:$0xff]  ;;  %v2330_v28 = vunpack.c.h.s8.bf16 %v898_v51 }
 0x3da   : > { %4535 = vmatprep.subr.bf16.mxu0 %v2295_v50  ;;  %5847 = vmatprep.subr.bf16.mxu1 %v2297_v62  ;;  %v2332_v50 = vunpack.c.h.s8.bf16 %v900_v52  ;;  %v2335_v62 = vunpack.c.l.s8.bf16 %v903_v60  ;;  %v2337_v63 = vunpack.c.l.s8.bf16 %v905_v10  ;;  %v2341_v4 = vunpack.c.h.s8.bf16 %v905_v10  ;;  %v918_v52 = vld [vmem:[%s10733_s30 + $0xd40] sm:$0xff]  ;;  %v923_v10 = vld [vmem:[%s10733_s30 + $0xd68] sm:$0xff] }
 0x3dd   : > { %4536 = vmatpush1.bf16.msra.mxu0 %v2294_v20  ;;  %5848 = vmatpush1.bf16.msra.mxu1 %v2296_v2  ;;  %v904_v20 = vld [vmem:[%s10733_s30 + $0xcd0] sm:$0xff]  ;;  %v2334_v2 = vunpack.c.l.s8.bf16 %v902_v0 }
 0x3de   : > { %4537 = vmatprep.subr.bf16.mxu0 %v2299_v58  ;;  %5849 = vmatprep.subr.bf16.mxu1 %v2301_v3  ;;  %v2336_v58 = vunpack.c.l.s8.bf16 %v904_v20  ;;  %v2339_v3 = vunpack.c.h.s8.bf16 %v903_v60 }
 0x3e1   : > { %4538 = vmatpush1.bf16.msra.mxu0 %v2298_v23  ;;  %5850 = vmatpush1.bf16.msra.mxu1 %v2300_v7  ;;  %v909_v23 = vld [vmem:[%s10733_s30 + $0xcf8] sm:$0xff]  ;;  %v2338_v7 = vunpack.c.h.s8.bf16 %v902_v0 }
 0x3e2   : > { %4539 = vmatprep.subr.bf16.mxu0 %v2303_v9  ;;  %5851 = vmatprep.subr.bf16.mxu1 %v2305_v11  ;;  %v2340_v9 = vunpack.c.h.s8.bf16 %v904_v20  ;;  %v2343_v11 = vunpack.c.l.s8.bf16 %v907_v6  ;;  %v2345_v12 = vunpack.c.l.s8.bf16 %v909_v23  ;;  %v2349_v25 = vunpack.c.h.s8.bf16 %v909_v23  ;;  %v922_v20 = vld [vmem:[%s10733_s30 + $0xd60] sm:$0xff]  ;;  %v927_v23 = vld [vmem:[%s10733_s30 + $0xd88] sm:$0xff] }
 0x3e5   : > { %4540 = vmatpush1.bf16.msra.mxu0 %v2302_v13  ;;  %5852 = vmatpush1.bf16.msra.mxu1 %v2304_v14  ;;  %v908_v13 = vld [vmem:[%s10733_s30 + $0xcf0] sm:$0xff]  ;;  %v2342_v14 = vunpack.c.l.s8.bf16 %v906_v21 }
 0x3e6   : > { %4541 = vmatprep.subr.bf16.mxu0 %v2307_v15  ;;  %5853 = vmatprep.subr.bf16.mxu1 %v2309_v16  ;;  %v2344_v15 = vunpack.c.l.s8.bf16 %v908_v13  ;;  %v2347_v16 = vunpack.c.h.s8.bf16 %v907_v6 }
 0x3e9   : > { %4542 = vmatpush1.bf16.msra.mxu0 %v2306_v35  ;;  %5854 = vmatpush1.bf16.msra.mxu1 %v2308_v18  ;;  %v913_v35 = vld [vmem:[%s10733_s30 + $0xd18] sm:$0xff]  ;;  %v2346_v18 = vunpack.c.h.s8.bf16 %v906_v21 }
 0x3ea   : > { %4543 = vmatprep.subr.bf16.mxu0 %v2311_v19  ;;  %5855 = vmatprep.subr.bf16.mxu1 %v2313_v22  ;;  %v2348_v19 = vunpack.c.h.s8.bf16 %v908_v13  ;;  %v2351_v22 = vunpack.c.l.s8.bf16 %v911_v17  ;;  %v2353_v41 = vunpack.c.l.s8.bf16 %v913_v35  ;;  %v2357_v53 = vunpack.c.h.s8.bf16 %v913_v35  ;;  %v926_v13 = vld [vmem:[%s10733_s30 + $0xd80] sm:$0xff]  ;;  %v931_v35 = vld [vmem:[%s10733_s30 + $0xda8] sm:$0xff] }
 0x3ed   : > { %4544 = vmatpush1.bf16.msra.mxu0 %v2310_v44  ;;  %5856 = vmatpush1.bf16.msra.mxu1 %v2312_v24  ;;  %v912_v44 = vld [vmem:[%s10733_s30 + $0xd10] sm:$0xff]  ;;  %v11338_v24 = vrot.slane %v11291_v57, %v10781_v49  ;;  %v2354_v57 = vunpack.c.h.s8.bf16 %v910_v37 }
 0x3ee   : > { %4545 = vmatprep.subr.bf16.mxu0 %v2315_v26  ;;  %5857 = vmatprep.subr.bf16.mxu1 %v2317_v27  ;;  %v2350_v26 = vunpack.c.l.s8.bf16 %v910_v37  ;;  %v2352_v27 = vunpack.c.l.s8.bf16 %v912_v44 }
 0x3f1   : > { %4546 = vmatpush1.bf16.msra.mxu0 %v2314_v29  ;;  %5858 = vmatpush1.bf16.msra.mxu1 %v2316_v30  ;;  %v915_v29 = vld [vmem:[%s10733_s30 + $0xd28] sm:$0xff]  ;;  %v917_v30 = vld [vmem:[%s10733_s30 + $0xd38] sm:$0xff] }
 0x3f2   : > { %4547 = vmatprep.subr.bf16.mxu0 %v2319_v31  ;;  %5859 = vmatprep.subr.bf16.mxu1 %v2321_v33  ;;  %v3777_v31 = vcombine.high %v11302_v61, %v11302_v61  ;;  %v2356_v33 = vunpack.c.h.s8.bf16 %v912_v44  ;;  %v2359_v55 = vunpack.c.l.s8.bf16 %v915_v29  ;;  %v2361_v34 = vunpack.c.l.s8.bf16 %v917_v30  ;;  %v930_v44 = vld [vmem:[%s10733_s30 + $0xda0] sm:$0xff] }
 0x3f3   : > { %v2365_v43 = vunpack.c.h.s8.bf16 %v917_v30  ;;  %v935_v30 = vld [vmem:[%s10733_s30 + $0xdc8] sm:$0xff] }
 0x3f5   : > { %4548 = vmatpush1.bf16.msra.mxu0 %v2318_v36  ;;  %5860 = vmatpush1.bf16.msra.mxu1 %v2320_v39  ;;  %v914_v36 = vld [vmem:[%s10733_s30 + $0xd20] sm:$0xff]  ;;  %v916_v39 = vld [vmem:[%s10733_s30 + $0xd30] sm:$0xff] }
 0x3f6   : > { %4549 = vmatprep.subr.bf16.mxu0 %v2323_v40  ;;  %5861 = vmatprep.subr.bf16.mxu1 %v2325_v42  ;;  %v2358_v61 = vunpack.c.l.s8.bf16 %v914_v36  ;;  %v2360_v40 = vunpack.c.l.s8.bf16 %v916_v39  ;;  %v2363_v42 = vunpack.c.h.s8.bf16 %v915_v29 }
 0x3f9   : > { %4550 = vmatpush1.bf16.msra.mxu0 %v2322_v46  ;;  %5862 = vmatpush1.bf16.msra.mxu1 %v2324_v59  ;;  %v921_v46 = vld [vmem:[%s10733_s30 + $0xd58] sm:$0xff]  ;;  %v2362_v59 = vunpack.c.h.s8.bf16 %v914_v36  ;;  %v934_v36 = vld [vmem:[%s10733_s30 + $0xdc0] sm:$0xff] }
 0x3fa   : > { %4551 = vmatprep.subr.bf16.mxu0 %v2327_v47  ;;  %5863 = vmatprep.subr.bf16.mxu1 %v2329_v48  ;;  %v2364_v47 = vunpack.c.h.s8.bf16 %v916_v39  ;;  %v2367_v48 = vunpack.c.l.s8.bf16 %v919_v45  ;;  %v2369_v51 = vunpack.c.l.s8.bf16 %v921_v46  ;;  %v2373_v60 = vunpack.c.h.s8.bf16 %v921_v46  ;;  %v936_v39 = vld [vmem:[%s10733_s30 + $0xdd0] sm:$0xff]  ;;  %v941_v46 = vld [vmem:[%s10733_s30 + $0xdf8] sm:$0xff] }
 0x3fd   : > { %4552 = vmatpush1.bf16.msra.mxu0 %v2326_v54  ;;  %5864 = vmatpush1.bf16.msra.mxu1 %v2328_v8  ;;  %v920_v54 = vld [vmem:[%s10733_s30 + $0xd50] sm:$0xff]  ;;  %v2366_v8 = vunpack.c.l.s8.bf16 %v918_v52 }
 0x3fe   : > { %4553 = vmatprep.subr.bf16.mxu0 %v2331_v5  ;;  %5865 = vmatprep.subr.bf16.mxu1 %v2333_v56  ;;  %v2368_v5 = vunpack.c.l.s8.bf16 %v920_v54  ;;  %v2371_v56 = vunpack.c.h.s8.bf16 %v919_v45  ;;  %v939_v45 = vld [vmem:[%s10733_s30 + $0xde8] sm:$0xff] }
 0x401   : > { %4554 = vmatpush1.bf16.msra.mxu0 %v2330_v28  ;;  %5866 = vmatpush1.bf16.msra.mxu1 %v2332_v50  ;;  %v925_v28 = vld [vmem:[%s10733_s30 + $0xd78] sm:$0xff]  ;;  %v2370_v50 = vunpack.c.h.s8.bf16 %v918_v52  ;;  %v938_v52 = vld [vmem:[%s10733_s30 + $0xde0] sm:$0xff] }
 0x402   : > { %4555 = vmatprep.subr.bf16.mxu0 %v2335_v62  ;;  %5867 = vmatprep.subr.bf16.mxu1 %v2337_v63  ;;  %v2372_v62 = vunpack.c.h.s8.bf16 %v920_v54  ;;  %v2375_v63 = vunpack.c.l.s8.bf16 %v923_v10  ;;  %v2377_v0 = vunpack.c.l.s8.bf16 %v925_v28  ;;  %v2381_v6 = vunpack.c.h.s8.bf16 %v925_v28  ;;  %v940_v54 = vld [vmem:[%s10733_s30 + $0xdf0] sm:$0xff]  ;;  %v943_v28 = vld [vmem:[%s10733_s30 + $0xe08] sm:$0xff] }
 0x405   : > { %4556 = vmatpush1.bf16.msra.mxu0 %v2334_v2  ;;  %5868 = vmatpush1.bf16.msra.mxu1 %v2336_v58  ;;  %v924_v2 = vld [vmem:[%s10733_s30 + $0xd70] sm:$0xff]  ;;  %v2374_v58 = vunpack.c.l.s8.bf16 %v922_v20 }
 0x406   : > { %4557 = vmatprep.subr.bf16.mxu0 %v2339_v3  ;;  %5869 = vmatprep.subr.bf16.mxu1 %v2341_v4  ;;  %v2376_v3 = vunpack.c.l.s8.bf16 %v924_v2  ;;  %v2379_v4 = vunpack.c.h.s8.bf16 %v923_v10  ;;  %v2413_v10 = vunpack.c.h.s8.bf16 %v941_v46 }
 0x409   : > { %4558 = vmatpush1.bf16.msra.mxu0 %v2338_v7  ;;  %5870 = vmatpush1.bf16.msra.mxu1 %v2340_v9  ;;  %v929_v7 = vld [vmem:[%s10733_s30 + $0xd98] sm:$0xff]  ;;  %v2378_v9 = vunpack.c.h.s8.bf16 %v922_v20 }
 0x40a   : > { %4559 = vmatprep.subr.bf16.mxu0 %v2343_v11  ;;  %5871 = vmatprep.subr.bf16.mxu1 %v2345_v12  ;;  %v2380_v11 = vunpack.c.h.s8.bf16 %v924_v2  ;;  %v2383_v12 = vunpack.c.l.s8.bf16 %v927_v23  ;;  %v2385_v21 = vunpack.c.l.s8.bf16 %v929_v7  ;;  %v2389_v17 = vunpack.c.h.s8.bf16 %v929_v7  ;;  %v942_v2 = vld [vmem:[%s10733_s30 + $0xe00] sm:$0xff] }
 0x40b   : > { %v2419_v7 = vunpack.c.h.s8.bf16 %v943_v28 }
 0x40d   : > { %4560 = vmatpush1.bf16.msra.mxu0 %v2342_v14  ;;  %5872 = vmatpush1.bf16.msra.mxu1 %v2344_v15  ;;  %v928_v14 = vld [vmem:[%s10733_s30 + $0xd90] sm:$0xff]  ;;  %v2382_v15 = vunpack.c.l.s8.bf16 %v926_v13 }
 0x40e   : > { %4561 = vmatprep.subr.bf16.mxu0 %v2347_v16  ;;  %5873 = vmatprep.subr.bf16.mxu1 %v2349_v25  ;;  %v2384_v16 = vunpack.c.l.s8.bf16 %v928_v14  ;;  %v2387_v25 = vunpack.c.h.s8.bf16 %v927_v23 }
 0x411   : > { %4562 = vmatpush1.bf16.msra.mxu0 %v2346_v18  ;;  %5874 = vmatpush1.bf16.msra.mxu1 %v2348_v19  ;;  %v933_v18 = vld [vmem:[%s10733_s30 + $0xdb8] sm:$0xff]  ;;  %v2386_v19 = vunpack.c.h.s8.bf16 %v926_v13 }
 0x412   : > { %4572 = vmatprep.subr.bf16.mxu0 %v2351_v22  ;;  %5884 = vmatprep.subr.bf16.mxu1 %v2353_v41  ;;  %v2388_v22 = vunpack.c.h.s8.bf16 %v928_v14  ;;  %v2391_v41 = vunpack.c.l.s8.bf16 %v931_v35  ;;  %v2393_v37 = vunpack.c.l.s8.bf16 %v933_v18  ;;  %v2397_v29 = vunpack.c.h.s8.bf16 %v933_v18 }
 0x414   : > { %4564 = vmatmul.mubr.bf16.vlgmr.msra.gmra.mrb[0].mxu0 %v11338_v24  ;;  %5876 = vmatmul.mubr.bf16.vlgmr.msra.gmra.mrb[0].mxu1 %v11338_v24 }
 0x415   : > { %4573 = vmatpush1.bf16.msra.mxu0 %v2350_v26  ;;  %5885 = vmatpush1.bf16.msra.mxu1 %v2352_v27  ;;  %v932_v26 = vld [vmem:[%s10733_s30 + $0xdb0] sm:$0xff]  ;;  %v2390_v27 = vunpack.c.l.s8.bf16 %v930_v44 }
 0x416   : > { %4574 = vmatprep.subr.bf16.mxu0 %v2355_v1  ;;  %5886 = vmatprep.subr.bf16.mxu1 %v2357_v53  ;;  %v2392_v1 = vunpack.c.l.s8.bf16 %v932_v26  ;;  %v2395_v53 = vunpack.c.h.s8.bf16 %v931_v35 }
 0x417   : > { %4604 = vmatprep.mubr.bf16.mxu0 %v3777_v31  ;;  %5916 = vmatprep.mubr.bf16.mxu1 %v3777_v31  ;;  %v937_v31 = vld [vmem:[%s10733_s30 + $0xdd8] sm:$0xff] }
 0x419   : > { %4575 = vmatpush1.bf16.msra.mxu0 %v2354_v57  ;;  %5887 = vmatpush1.bf16.msra.mxu1 %v2356_v33  ;;  %v2394_v57 = vunpack.c.h.s8.bf16 %v930_v44  ;;  %v2396_v33 = vunpack.c.h.s8.bf16 %v932_v26 }
 0x41a   : > { %4576 = vmatprep.subr.bf16.mxu0 %v2359_v55  ;;  %5888 = vmatprep.subr.bf16.mxu1 %v2361_v34  ;;  %v2399_v55 = vunpack.c.l.s8.bf16 %v935_v30  ;;  %v2401_v34 = vunpack.c.l.s8.bf16 %v937_v31 }
 0x41d   : > { %4577 = vmatpush1.bf16.msra.mxu0 %v2358_v61  ;;  %5889 = vmatpush1.bf16.msra.mxu1 %v2360_v40  ;;  %v2398_v61 = vunpack.c.l.s8.bf16 %v934_v36  ;;  %v2400_v40 = vunpack.c.l.s8.bf16 %v936_v39 }
 0x41e   : > { %4578 = vmatprep.subr.bf16.mxu0 %v2363_v42  ;;  %5890 = vmatprep.subr.bf16.mxu1 %v2365_v43  ;;  %v2403_v42 = vunpack.c.h.s8.bf16 %v935_v30  ;;  %v2405_v43 = vunpack.c.h.s8.bf16 %v937_v31 }
 0x421   : > { %4579 = vmatpush1.bf16.msra.mxu0 %v2362_v59  ;;  %5891 = vmatpush1.bf16.msra.mxu1 %v2364_v47  ;;  %v2402_v59 = vunpack.c.h.s8.bf16 %v934_v36  ;;  %v2404_v47 = vunpack.c.h.s8.bf16 %v936_v39 }
 0x422   : > { %4580 = vmatprep.subr.bf16.mxu0 %v2367_v48  ;;  %5892 = vmatprep.subr.bf16.mxu1 %v2369_v51  ;;  %v2407_v48 = vunpack.c.l.s8.bf16 %v939_v45  ;;  %v2409_v51 = vunpack.c.l.s8.bf16 %v941_v46 }
 0x425   : > { %4581 = vmatpush1.bf16.msra.mxu0 %v2366_v8  ;;  %5893 = vmatpush1.bf16.msra.mxu1 %v2368_v5  ;;  %v3730_v8 = vcombine.high %v11285_v32, %v11285_v32  ;;  %v2406_v5 = vunpack.c.l.s8.bf16 %v938_v52  ;;  %v2415_v32 = vunpack.c.l.s8.bf16 %v943_v28 }
 0x426   : > { %4582 = vmatprep.subr.bf16.mxu0 %v2371_v56  ;;  %5894 = vmatprep.subr.bf16.mxu1 %v2373_v60  ;;  %v2408_v56 = vunpack.c.l.s8.bf16 %v940_v54  ;;  %v2411_v60 = vunpack.c.h.s8.bf16 %v939_v45 }
 0x429   : > { %4583 = vmatpush1.bf16.msra.mxu0 %v2370_v50  ;;  %5895 = vmatpush1.bf16.msra.mxu1 %v2372_v62  ;;  %v945_v50 = vld [vmem:[%s10733_s30 + $0xe18] sm:$0xff]  ;;  %v11377_v62 = vrot.slane %v3730_v8, %v10781_v49 }
 0x42a   : > { %4584 = vmatprep.subr.bf16.mxu0 %v2375_v63  ;;  %5896 = vmatprep.subr.bf16.mxu1 %v2377_v0  ;;  %v2410_v63 = vunpack.c.h.s8.bf16 %v938_v52  ;;  %v2412_v0 = vunpack.c.h.s8.bf16 %v940_v54  ;;  %v2417_v20 = vunpack.c.l.s8.bf16 %v945_v50 }
 0x42d   : > { %4585 = vmatpush1.bf16.msra.mxu0 %v2374_v58  ;;  %5897 = vmatpush1.bf16.msra.mxu1 %v2376_v3  ;;  %v944_v58 = vld [vmem:[%s10733_s30 + $0xe10] sm:$0xff]  ;;  %v3746_v3 = vcombine.high %v11377_v62, %v11377_v62 }
 0x42e   : > { %4586 = vmatprep.subr.bf16.mxu0 %v2379_v4  ;;  %5898 = vmatprep.subr.bf16.mxu1 %v2381_v6  ;;  %v3775_v4 = vcombine.high %v11338_v24, %v11338_v24  ;;  %v2414_v6 = vunpack.c.l.s8.bf16 %v942_v2  ;;  %v2416_v23 = vunpack.c.l.s8.bf16 %v944_v58  ;;  %v2418_v24 = vunpack.c.h.s8.bf16 %v942_v2 }
 0x42f   : > { %v2420_v13 = vunpack.c.h.s8.bf16 %v944_v58 }
 0x431   : > { %4587 = vmatpush1.bf16.msra.mxu0 %v2378_v9  ;;  %5899 = vmatpush1.bf16.msra.mxu1 %v2380_v11  ;;  %v2421_v9 = vunpack.c.h.s8.bf16 %v945_v50  ;;  %v947_v11 = vld [vmem:[%s10733_s30 + $0xe28] sm:$0xff] }
 0x432   : > { %4588 = vmatprep.subr.bf16.mxu0 %v2383_v12  ;;  %5900 = vmatprep.subr.bf16.mxu1 %v2385_v21  ;;  %v949_v12 = vld [vmem:[%s10733_s30 + $0xe38] sm:$0xff]  ;;  %v11388_v21 = vrot.slane %v3746_v3, %v10781_v49  ;;  %v2423_v14 = vunpack.c.l.s8.bf16 %v947_v11  ;;  %v2427_v18 = vunpack.c.h.s8.bf16 %v947_v11  ;;  %v962_v3 = vld [vmem:[%s10733_s30 + $0xea0] sm:$0xff]  ;;  %v967_v11 = vld [vmem:[%s10733_s30 + $0xec8] sm:$0xff] }
 0x435   : > { %4589 = vmatpush1.bf16.msra.mxu0 %v2382_v15  ;;  %5901 = vmatpush1.bf16.msra.mxu1 %v2384_v16  ;;  %v2425_v15 = vunpack.c.l.s8.bf16 %v949_v12  ;;  %v946_v16 = vld [vmem:[%s10733_s30 + $0xe20] sm:$0xff] }
 0x436   : > { %4590 = vmatprep.subr.bf16.mxu0 %v2387_v25  ;;  %5902 = vmatprep.subr.bf16.mxu1 %v2389_v17  ;;  %v948_v25 = vld [vmem:[%s10733_s30 + $0xe30] sm:$0xff]  ;;  %v2422_v17 = vunpack.c.l.s8.bf16 %v946_v16 }
 0x437   : > { %v2424_v35 = vunpack.c.l.s8.bf16 %v948_v25  ;;  %v2428_v44 = vunpack.c.h.s8.bf16 %v948_v25  ;;  %v968_v25 = vld [vmem:[%s10733_s30 + $0xed0] sm:$0xff] }
 0x439   : > { %4591 = vmatpush1.bf16.msra.mxu0 %v2386_v19  ;;  %5903 = vmatpush1.bf16.msra.mxu1 %v2388_v22  ;;  %v2429_v19 = vunpack.c.h.s8.bf16 %v949_v12  ;;  %v951_v22 = vld [vmem:[%s10733_s30 + $0xe48] sm:$0xff]  ;;  %v969_v12 = vld [vmem:[%s10733_s30 + $0xed8] sm:$0xff] }
 0x43a   : > { %4592 = vmatprep.subr.bf16.mxu0 %v2391_v41  ;;  %5904 = vmatprep.subr.bf16.mxu1 %v2393_v37  ;;  %v953_v41 = vld [vmem:[%s10733_s30 + $0xe58] sm:$0xff]  ;;  %v2426_v37 = vunpack.c.h.s8.bf16 %v946_v16  ;;  %v2431_v26 = vunpack.c.l.s8.bf16 %v951_v22  ;;  %v2435_v31 = vunpack.c.h.s8.bf16 %v951_v22  ;;  %v966_v16 = vld [vmem:[%s10733_s30 + $0xec0] sm:$0xff]  ;;  %v971_v22 = vld [vmem:[%s10733_s30 + $0xee8] sm:$0xff] }
 0x43d   : > { %4593 = vmatpush1.bf16.msra.mxu0 %v2390_v27  ;;  %5905 = vmatpush1.bf16.msra.mxu1 %v2392_v1  ;;  %v2433_v27 = vunpack.c.l.s8.bf16 %v953_v41  ;;  %v950_v1 = vld [vmem:[%s10733_s30 + $0xe40] sm:$0xff] }
 0x43e   : > { %4594 = vmatprep.subr.bf16.mxu0 %v2395_v53  ;;  %5906 = vmatprep.subr.bf16.mxu1 %v2397_v29  ;;  %v952_v53 = vld [vmem:[%s10733_s30 + $0xe50] sm:$0xff]  ;;  %v2430_v29 = vunpack.c.l.s8.bf16 %v950_v1 }
 0x43f   : > { %v2432_v30 = vunpack.c.l.s8.bf16 %v952_v53  ;;  %v2436_v36 = vunpack.c.h.s8.bf16 %v952_v53  ;;  %v972_v53 = vld [vmem:[%s10733_s30 + $0xef0] sm:$0xff] }
 0x441   : > { %4595 = vmatpush1.bf16.msra.mxu0 %v2394_v57  ;;  %5907 = vmatpush1.bf16.msra.mxu1 %v2396_v33  ;;  %v2437_v57 = vunpack.c.h.s8.bf16 %v953_v41  ;;  %v955_v33 = vld [vmem:[%s10733_s30 + $0xe68] sm:$0xff]  ;;  %v973_v41 = vld [vmem:[%s10733_s30 + $0xef8] sm:$0xff] }
 0x442   : > { %4596 = vmatprep.subr.bf16.mxu0 %v2399_v55  ;;  %5908 = vmatprep.subr.bf16.mxu1 %v2401_v34  ;;  %v957_v55 = vld [vmem:[%s10733_s30 + $0xe78] sm:$0xff]  ;;  %v2434_v34 = vunpack.c.h.s8.bf16 %v950_v1  ;;  %v2439_v39 = vunpack.c.l.s8.bf16 %v955_v33  ;;  %v2443_v46 = vunpack.c.h.s8.bf16 %v955_v33  ;;  %v970_v1 = vld [vmem:[%s10733_s30 + $0xee0] sm:$0xff]  ;;  %v975_v33 = vld [vmem:[%s10733_s30 + $0xf08] sm:$0xff] }
 0x445   : > { %4597 = vmatpush1.bf16.msra.mxu0 %v2398_v61  ;;  %5909 = vmatpush1.bf16.msra.mxu1 %v2400_v40  ;;  %v2441_v61 = vunpack.c.l.s8.bf16 %v957_v55  ;;  %v954_v40 = vld [vmem:[%s10733_s30 + $0xe60] sm:$0xff] }
 0x446   : > { %4598 = vmatprep.subr.bf16.mxu0 %v2403_v42  ;;  %5910 = vmatprep.subr.bf16.mxu1 %v2405_v43  ;;  %v956_v42 = vld [vmem:[%s10733_s30 + $0xe70] sm:$0xff]  ;;  %v2438_v43 = vunpack.c.l.s8.bf16 %v954_v40 }
 0x447   : > { %v2440_v45 = vunpack.c.l.s8.bf16 %v956_v42  ;;  %v2444_v52 = vunpack.c.h.s8.bf16 %v956_v42  ;;  %v976_v42 = vld [vmem:[%s10733_s30 + $0xf10] sm:$0xff] }
 0x449   : > { %4599 = vmatpush1.bf16.msra.mxu0 %v2402_v59  ;;  %5911 = vmatpush1.bf16.msra.mxu1 %v2404_v47  ;;  %v2445_v59 = vunpack.c.h.s8.bf16 %v957_v55  ;;  %v959_v47 = vld [vmem:[%s10733_s30 + $0xe88] sm:$0xff]  ;;  %v977_v55 = vld [vmem:[%s10733_s30 + $0xf18] sm:$0xff] }
 0x44a   : > { %4600 = vmatprep.subr.bf16.mxu0 %v2407_v48  ;;  %5912 = vmatprep.subr.bf16.mxu1 %v2409_v51  ;;  %v961_v48 = vld [vmem:[%s10733_s30 + $0xe98] sm:$0xff]  ;;  %v2442_v51 = vunpack.c.h.s8.bf16 %v954_v40  ;;  %v2447_v54 = vunpack.c.l.s8.bf16 %v959_v47  ;;  %v2451_v28 = vunpack.c.h.s8.bf16 %v959_v47  ;;  %v974_v40 = vld [vmem:[%s10733_s30 + $0xf00] sm:$0xff]  ;;  %v2485_v47 = vunpack.c.h.s8.bf16 %v977_v55 }
 0x44b   : > { %v2449_v8 = vunpack.c.l.s8.bf16 %v961_v48  ;;  %v2453_v50 = vunpack.c.h.s8.bf16 %v961_v48  ;;  %v979_v48 = vld [vmem:[%s10733_s30 + $0xf28] sm:$0xff] }
 0x44d   : > { %4601 = vmatpush1.bf16.msra.mxu0 %v2406_v5  ;;  %5913 = vmatpush1.bf16.msra.mxu1 %v2408_v56  ;;  %v958_v5 = vld [vmem:[%s10733_s30 + $0xe80] sm:$0xff]  ;;  %v960_v56 = vld [vmem:[%s10733_s30 + $0xe90] sm:$0xff] }
 0x44e   : > { %4602 = vmatprep.subr.bf16.mxu0 %v2411_v60  ;;  %5914 = vmatprep.subr.bf16.mxu1 %v2413_v10  ;;  %v2446_v60 = vunpack.c.l.s8.bf16 %v958_v5  ;;  %v2448_v10 = vunpack.c.l.s8.bf16 %v960_v56 }
 0x451   : > { %4603 = vmatpush1.bf16.msra.mxu0 %v2410_v63  ;;  %5915 = vmatpush1.bf16.msra.mxu1 %v2412_v0  ;;  %v963_v63 = vld [vmem:[%s10733_s30 + $0xea8] sm:$0xff]  ;;  %v965_v0 = vld [vmem:[%s10733_s30 + $0xeb8] sm:$0xff] }
 0x452   : > { %4613 = vmatprep.subr.bf16.mxu0 %v2415_v32  ;;  %5925 = vmatprep.subr.bf16.mxu1 %v2417_v20  ;;  %v2450_v32 = vunpack.c.h.s8.bf16 %v958_v5  ;;  %v2452_v20 = vunpack.c.h.s8.bf16 %v960_v56  ;;  %v2455_v2 = vunpack.c.l.s8.bf16 %v963_v63  ;;  %v2457_v58 = vunpack.c.l.s8.bf16 %v965_v0  ;;  %v978_v56 = vld [vmem:[%s10733_s30 + $0xf20] sm:$0xff] }
 0x454   : > { %4605 = vmatmul.mubr.bf16.vlgmr.msra.gmra.mrb[0].mxu0 %v3775_v4  ;;  %5917 = vmatmul.mubr.bf16.vlgmr.msra.gmra.mrb[0].mxu1 %v3775_v4  ;;  %v964_v4 = vld [vmem:[%s10733_s30 + $0xeb0] sm:$0xff] }
 0x455   : > { %4614 = vmatpush1.bf16.msra.mxu0 %v2414_v6  ;;  %5926 = vmatpush1.bf16.msra.mxu1 %v2416_v23  ;;  %v2454_v6 = vunpack.c.l.s8.bf16 %v962_v3  ;;  %v2456_v23 = vunpack.c.l.s8.bf16 %v964_v4 }
 0x456   : > { %4615 = vmatprep.subr.bf16.mxu0 %v2419_v7  ;;  %5927 = vmatprep.subr.bf16.mxu1 %v2421_v9  ;;  %v2459_v7 = vunpack.c.h.s8.bf16 %v963_v63  ;;  %v2461_v9 = vunpack.c.h.s8.bf16 %v965_v0  ;;  %v983_v63 = vld [vmem:[%s10733_s30 + $0xf48] sm:$0xff]  ;;  %v985_v0 = vld [vmem:[%s10733_s30 + $0xf58] sm:$0xff] }
 0x457   : > { %4645 = vmatprep.mubr.bf16.mxu0 %v11388_v21  ;;  %5957 = vmatprep.mubr.bf16.mxu1 %v11388_v21 }
 0x459   : > { %4616 = vmatpush1.bf16.msra.mxu0 %v2418_v24  ;;  %5928 = vmatpush1.bf16.msra.mxu1 %v2420_v13  ;;  %v2458_v24 = vunpack.c.h.s8.bf16 %v962_v3  ;;  %v2460_v13 = vunpack.c.h.s8.bf16 %v964_v4  ;;  %v982_v3 = vld [vmem:[%s10733_s30 + $0xf40] sm:$0xff]  ;;  %v984_v4 = vld [vmem:[%s10733_s30 + $0xf50] sm:$0xff] }
 0x45a   : > { %4617 = vmatprep.subr.bf16.mxu0 %v2423_v14  ;;  %5929 = vmatprep.subr.bf16.mxu1 %v2425_v15  ;;  %v2463_v14 = vunpack.c.l.s8.bf16 %v967_v11  ;;  %v2465_v15 = vunpack.c.l.s8.bf16 %v969_v12 }
 0x45d   : > { %4618 = vmatpush1.bf16.msra.mxu0 %v2422_v17  ;;  %5930 = vmatpush1.bf16.msra.mxu1 %v2424_v35  ;;  %v2462_v17 = vunpack.c.l.s8.bf16 %v966_v16  ;;  %v2464_v35 = vunpack.c.l.s8.bf16 %v968_v25 }
 0x45e   : > { %4619 = vmatprep.subr.bf16.mxu0 %v2427_v18  ;;  %5931 = vmatprep.subr.bf16.mxu1 %v2429_v19  ;;  %v2467_v18 = vunpack.c.h.s8.bf16 %v967_v11  ;;  %v2469_v19 = vunpack.c.h.s8.bf16 %v969_v12  ;;  %v987_v11 = vld [vmem:[%s10733_s30 + $0xf68] sm:$0xff]  ;;  %v989_v12 = vld [vmem:[%s10733_s30 + $0xf78] sm:$0xff] }
 0x461   : > { %4620 = vmatpush1.bf16.msra.mxu0 %v2426_v37  ;;  %5932 = vmatpush1.bf16.msra.mxu1 %v2428_v44  ;;  %v2466_v37 = vunpack.c.h.s8.bf16 %v966_v16  ;;  %v2468_v44 = vunpack.c.h.s8.bf16 %v968_v25  ;;  %v986_v16 = vld [vmem:[%s10733_s30 + $0xf60] sm:$0xff]  ;;  %v988_v25 = vld [vmem:[%s10733_s30 + $0xf70] sm:$0xff] }
 0x462   : > { %4621 = vmatprep.subr.bf16.mxu0 %v2431_v26  ;;  %5933 = vmatprep.subr.bf16.mxu1 %v2433_v27  ;;  %v2471_v26 = vunpack.c.l.s8.bf16 %v971_v22  ;;  %v2473_v27 = vunpack.c.l.s8.bf16 %v973_v41 }
 0x465   : > { %4622 = vmatpush1.bf16.msra.mxu0 %v2430_v29  ;;  %5934 = vmatpush1.bf16.msra.mxu1 %v2432_v30  ;;  %v2470_v29 = vunpack.c.l.s8.bf16 %v970_v1  ;;  %v2472_v30 = vunpack.c.l.s8.bf16 %v972_v53 }
 0x466   : > { %4623 = vmatprep.subr.bf16.mxu0 %v2435_v31  ;;  %5935 = vmatprep.subr.bf16.mxu1 %v2437_v57  ;;  %v2475_v31 = vunpack.c.h.s8.bf16 %v971_v22  ;;  %v2477_v57 = vunpack.c.h.s8.bf16 %v973_v41  ;;  %v991_v22 = vld [vmem:[%s10733_s30 + $0xf88] sm:$0xff]  ;;  %v993_v41 = vld [vmem:[%s10733_s30 + $0xf98] sm:$0xff] }
 0x469   : > { %4624 = vmatpush1.bf16.msra.mxu0 %v2434_v34  ;;  %5936 = vmatpush1.bf16.msra.mxu1 %v2436_v36  ;;  %v2474_v34 = vunpack.c.h.s8.bf16 %v970_v1  ;;  %v2476_v36 = vunpack.c.h.s8.bf16 %v972_v53  ;;  %v990_v1 = vld [vmem:[%s10733_s30 + $0xf80] sm:$0xff]  ;;  %v992_v53 = vld [vmem:[%s10733_s30 + $0xf90] sm:$0xff] }
 0x46a   : > { %4625 = vmatprep.subr.bf16.mxu0 %v2439_v39  ;;  %5937 = vmatprep.subr.bf16.mxu1 %v2441_v61  ;;  %v2479_v39 = vunpack.c.l.s8.bf16 %v975_v33  ;;  %v2481_v61 = vunpack.c.l.s8.bf16 %v977_v55  ;;  %v997_v55 = vld [vmem:[%s10733_s30 + $0xfb8] sm:$0xff] }
 0x46d   : > { %4626 = vmatpush1.bf16.msra.mxu0 %v2438_v43  ;;  %5938 = vmatpush1.bf16.msra.mxu1 %v2440_v45  ;;  %v11424_v43 = vrot.slane %v11377_v62, %v10781_v49  ;;  %v2478_v45 = vunpack.c.l.s8.bf16 %v974_v40  ;;  %v2482_v62 = vunpack.c.h.s8.bf16 %v974_v40  ;;  %v994_v40 = vld [vmem:[%s10733_s30 + $0xfa0] sm:$0xff] }
 0x46e   : > { %4627 = vmatprep.subr.bf16.mxu0 %v2443_v46  ;;  %5939 = vmatprep.subr.bf16.mxu1 %v2445_v59  ;;  %v2480_v46 = vunpack.c.l.s8.bf16 %v976_v42  ;;  %v2483_v59 = vunpack.c.h.s8.bf16 %v975_v33  ;;  %v995_v33 = vld [vmem:[%s10733_s30 + $0xfa8] sm:$0xff] }
 0x471   : > { %4628 = vmatpush1.bf16.msra.mxu0 %v2442_v51  ;;  %5940 = vmatpush1.bf16.msra.mxu1 %v2444_v52  ;;  %v981_v51 = vld [vmem:[%s10733_s30 + $0xf38] sm:$0xff]  ;;  %v3778_v52 = vcombine.high %v11388_v21, %v11388_v21  ;;  %v2486_v21 = vunpack.c.l.s8.bf16 %v978_v56 }
 0x472   : > { %4629 = vmatprep.subr.bf16.mxu0 %v2447_v54  ;;  %5941 = vmatprep.subr.bf16.mxu1 %v2449_v8  ;;  %v2484_v54 = vunpack.c.h.s8.bf16 %v976_v42  ;;  %v2487_v8 = vunpack.c.l.s8.bf16 %v979_v48  ;;  %v2489_v5 = vunpack.c.l.s8.bf16 %v981_v51  ;;  %v996_v42 = vld [vmem:[%s10733_s30 + $0xfb0] sm:$0xff] }
 0x475   : > { %4630 = vmatpush1.bf16.msra.mxu0 %v2446_v60  ;;  %5942 = vmatpush1.bf16.msra.mxu1 %v2448_v10  ;;  %v980_v60 = vld [vmem:[%s10733_s30 + $0xf30] sm:$0xff] }
 0x476   : > { %4631 = vmatprep.subr.bf16.mxu0 %v2451_v28  ;;  %5943 = vmatprep.subr.bf16.mxu1 %v2453_v50  ;;  %v2488_v10 = vunpack.c.l.s8.bf16 %v980_v60  ;;  %v2491_v28 = vunpack.c.h.s8.bf16 %v979_v48  ;;  %v2493_v50 = vunpack.c.h.s8.bf16 %v981_v51  ;;  %v999_v48 = vld [vmem:[%s10733_s30 + $0xfc8] sm:$0xff]  ;;  %v1001_v51 = vld [vmem:[%s10733_s30 + $0xfd8] sm:$0xff] }
 0x479   : > { %4632 = vmatpush1.bf16.msra.mxu0 %v2450_v32  ;;  %5944 = vmatpush1.bf16.msra.mxu1 %v2452_v20  ;;  %v2490_v32 = vunpack.c.h.s8.bf16 %v978_v56  ;;  %v2492_v20 = vunpack.c.h.s8.bf16 %v980_v60  ;;  %v1000_v56 = vld [vmem:[%s10733_s30 + $0xfd0] sm:$0xff] }
 0x47a   : > { %4633 = vmatprep.subr.bf16.mxu0 %v2455_v2  ;;  %5945 = vmatprep.subr.bf16.mxu1 %v2457_v58  ;;  %v2495_v2 = vunpack.c.l.s8.bf16 %v983_v63  ;;  %v2497_v58 = vunpack.c.l.s8.bf16 %v985_v0 }
 0x47d   : > { %4634 = vmatpush1.bf16.msra.mxu0 %v2454_v6  ;;  %5946 = vmatpush1.bf16.msra.mxu1 %v2456_v23  ;;  %v2494_v6 = vunpack.c.l.s8.bf16 %v982_v3  ;;  %v2496_v23 = vunpack.c.l.s8.bf16 %v984_v4 }
 0x47e   : > { %4635 = vmatprep.subr.bf16.mxu0 %v2459_v7  ;;  %5947 = vmatprep.subr.bf16.mxu1 %v2461_v9  ;;  %v2499_v7 = vunpack.c.h.s8.bf16 %v983_v63  ;;  %v2501_v9 = vunpack.c.h.s8.bf16 %v985_v0  ;;  %v1005_v63 = vld [vmem:[%s10733_s30 + $0xff8] sm:$0xff] }
 0x481   : > { %4636 = vmatpush1.bf16.msra.mxu0 %v2458_v24  ;;  %5948 = vmatpush1.bf16.msra.mxu1 %v2460_v13  ;;  %v2498_v24 = vunpack.c.h.s8.bf16 %v982_v3  ;;  %v2500_v13 = vunpack.c.h.s8.bf16 %v984_v4  ;;  %v1004_v3 = vld [vmem:[%s10733_s30 + $0xff0] sm:$0xff]  ;;  %v11459_v4 = vld [vmem:[%s10755_s15 + $0x20] sm:$0xff] }
 0x482   : > { %4637 = vmatprep.subr.bf16.mxu0 %v2463_v14  ;;  %5949 = vmatprep.subr.bf16.mxu1 %v2465_v15  ;;  %v2503_v14 = vunpack.c.l.s8.bf16 %v987_v11  ;;  %v2505_v15 = vunpack.c.l.s8.bf16 %v989_v12 }
 0x485   : > { %4638 = vmatpush1.bf16.msra.mxu0 %v2462_v17  ;;  %5950 = vmatpush1.bf16.msra.mxu1 %v2464_v35  ;;  %v2502_v17 = vunpack.c.l.s8.bf16 %v986_v16  ;;  %v2504_v35 = vunpack.c.l.s8.bf16 %v988_v25 }
 0x486   : > { %4639 = vmatprep.subr.bf16.mxu0 %v2467_v18  ;;  %5951 = vmatprep.subr.bf16.mxu1 %v2469_v19  ;;  %v2507_v18 = vunpack.c.h.s8.bf16 %v987_v11  ;;  %v2509_v19 = vunpack.c.h.s8.bf16 %v989_v12  ;;  %v1007_v11 = vld [vmem:[%s10733_s30 + $0x1008] sm:$0xff]  ;;  %v1009_v12 = vld [vmem:[%s10733_s30 + $0x1018] sm:$0xff] }
 0x489   : > { %4640 = vmatpush1.bf16.msra.mxu0 %v2466_v37  ;;  %5952 = vmatpush1.bf16.msra.mxu1 %v2468_v44  ;;  %v2506_v37 = vunpack.c.h.s8.bf16 %v986_v16  ;;  %v2508_v44 = vunpack.c.h.s8.bf16 %v988_v25  ;;  %v2545_v16 = vunpack.c.l.s8.bf16 %v1009_v12  ;;  %v1006_v25 = vld [vmem:[%s10733_s30 + $0x1000] sm:$0xff] }
 0x48a   : > { %4641 = vmatprep.subr.bf16.mxu0 %v2471_v26  ;;  %5953 = vmatprep.subr.bf16.mxu1 %v2473_v27  ;;  %v2511_v26 = vunpack.c.l.s8.bf16 %v991_v22  ;;  %v2513_v27 = vunpack.c.l.s8.bf16 %v993_v41 }
 0x48d   : > { %4642 = vmatpush1.bf16.msra.mxu0 %v2470_v29  ;;  %5954 = vmatpush1.bf16.msra.mxu1 %v2472_v30  ;;  %v2510_v29 = vunpack.c.l.s8.bf16 %v990_v1  ;;  %v2512_v30 = vunpack.c.l.s8.bf16 %v992_v53 }
 0x48e   : > { %4643 = vmatprep.subr.bf16.mxu0 %v2475_v31  ;;  %5955 = vmatprep.subr.bf16.mxu1 %v2477_v57  ;;  %v2515_v31 = vunpack.c.h.s8.bf16 %v991_v22  ;;  %v2517_v57 = vunpack.c.h.s8.bf16 %v993_v41  ;;  %v2547_v41 = vunpack.c.h.s8.bf16 %v1007_v11 }
 0x491   : > { %4644 = vmatpush1.bf16.msra.mxu0 %v2474_v34  ;;  %5956 = vmatpush1.bf16.msra.mxu1 %v2476_v36  ;;  %v2514_v34 = vunpack.c.h.s8.bf16 %v990_v1  ;;  %v2516_v36 = vunpack.c.h.s8.bf16 %v992_v53 }
 0x492   : > { %4654 = vmatprep.subr.bf16.mxu0 %v2479_v39  ;;  %5966 = vmatprep.subr.bf16.mxu1 %v2481_v61  ;;  %v2519_v39 = vunpack.c.l.s8.bf16 %v995_v33  ;;  %v2521_v61 = vunpack.c.l.s8.bf16 %v997_v55 }
 0x494   : > { %4646 = vmatmul.mubr.bf16.vlgmr.msra.gmra.mrb[0].mxu0 %v11424_v43  ;;  %5958 = vmatmul.mubr.bf16.vlgmr.msra.gmra.mrb[0].mxu1 %v11424_v43 }
 0x495   : > { %4655 = vmatpush1.bf16.msra.mxu0 %v2478_v45  ;;  %5967 = vmatpush1.bf16.msra.mxu1 %v2480_v46  ;;  %v2518_v45 = vunpack.c.l.s8.bf16 %v994_v40  ;;  %v2520_v46 = vunpack.c.l.s8.bf16 %v996_v42 }
 0x496   : > { %4656 = vmatprep.subr.bf16.mxu0 %v2483_v59  ;;  %5968 = vmatprep.subr.bf16.mxu1 %v2485_v47  ;;  %v2523_v59 = vunpack.c.h.s8.bf16 %v995_v33  ;;  %v2525_v47 = vunpack.c.h.s8.bf16 %v997_v55 }
 0x497   : > { %4686 = vmatprep.mubr.bf16.mxu0 %v3778_v52  ;;  %5998 = vmatprep.mubr.bf16.mxu1 %v3778_v52  ;;  %v2522_v52 = vunpack.c.h.s8.bf16 %v994_v40 }
 0x499   : > { %4657 = vmatpush1.bf16.msra.mxu0 %v2482_v62  ;;  %5969 = vmatpush1.bf16.msra.mxu1 %v2484_v54  ;;  %v2524_v62 = vunpack.c.h.s8.bf16 %v996_v42  ;;  %v2527_v54 = vunpack.c.l.s8.bf16 %v999_v48 }
 0x49a   : > { %4658 = vmatprep.subr.bf16.mxu0 %v2487_v8  ;;  %5970 = vmatprep.subr.bf16.mxu1 %v2489_v5  ;;  %v2529_v8 = vunpack.c.l.s8.bf16 %v1001_v51  ;;  %v998_v5 = vld [vmem:[%s10733_s30 + $0xfc0] sm:$0xff] }
 0x49b   : > { %v2526_v60 = vunpack.c.l.s8.bf16 %v998_v5  ;;  %v2530_v0 = vunpack.c.h.s8.bf16 %v998_v5 }
 0x49d   : > { %4659 = vmatpush1.bf16.msra.mxu0 %v2486_v21  ;;  %5971 = vmatpush1.bf16.msra.mxu1 %v2488_v10  ;;  %v2528_v21 = vunpack.c.l.s8.bf16 %v1000_v56  ;;  %v2531_v10 = vunpack.c.h.s8.bf16 %v999_v48 }
 0x49e   : > { %4660 = vmatprep.subr.bf16.mxu0 %v2491_v28  ;;  %5972 = vmatprep.subr.bf16.mxu1 %v2493_v50  ;;  %v2533_v28 = vunpack.c.h.s8.bf16 %v1001_v51  ;;  %v1003_v50 = vld [vmem:[%s10733_s30 + $0xfe8] sm:$0xff] }
 0x4a1   : > { %4661 = vmatpush1.bf16.msra.mxu0 %v2490_v32  ;;  %5973 = vmatpush1.bf16.msra.mxu1 %v2492_v20  ;;  %v2532_v32 = vunpack.c.h.s8.bf16 %v1000_v56  ;;  %v2535_v20 = vunpack.c.l.s8.bf16 %v1003_v50 }
 0x4a2   : > { %4662 = vmatprep.subr.bf16.mxu0 %v2495_v2  ;;  %5974 = vmatprep.subr.bf16.mxu1 %v2497_v58  ;;  %v2537_v2 = vunpack.c.l.s8.bf16 %v1005_v63  ;;  %v1002_v58 = vld [vmem:[%s10733_s30 + $0xfe0] sm:$0xff] }
 0x4a5   : > { %4663 = vmatpush1.bf16.msra.mxu0 %v2494_v6  ;;  %5975 = vmatpush1.bf16.msra.mxu1 %v2496_v23  ;;  %v2534_v6 = vunpack.c.l.s8.bf16 %v1002_v58  ;;  %v2536_v23 = vunpack.c.l.s8.bf16 %v1004_v3 }
 0x4a6   : > { %4664 = vmatprep.subr.bf16.mxu0 %v2499_v7  ;;  %5976 = vmatprep.subr.bf16.mxu1 %v2501_v9  ;;  %v2539_v7 = vunpack.c.h.s8.bf16 %v1003_v50  ;;  %v2541_v9 = vunpack.c.h.s8.bf16 %v1005_v63 }
 0x4a9   : > { %4665 = vmatpush1.bf16.msra.mxu0 %v2498_v24  ;;  %5977 = vmatpush1.bf16.msra.mxu1 %v2500_v13  ;;  %v11465_v24 = vrot.slane %v11459_v4, %v10781_v49  ;;  %v2538_v13 = vunpack.c.h.s8.bf16 %v1002_v58 }
 0x4aa   : > { %4666 = vmatprep.subr.bf16.mxu0 %v2503_v14  ;;  %5978 = vmatprep.subr.bf16.mxu1 %v2505_v15  ;;  %v2540_v14 = vunpack.c.h.s8.bf16 %v1004_v3  ;;  %v2543_v15 = vunpack.c.l.s8.bf16 %v1007_v11 }
 0x4ad   : > { %4667 = vmatpush1.bf16.msra.mxu0 %v2502_v17  ;;  %5979 = vmatpush1.bf16.msra.mxu1 %v2504_v35  ;;  %v1008_v17 = vld [vmem:[%s10733_s30 + $0x1010] sm:$0xff]  ;;  %v3794_v35 = vcombine.high %v11465_v24, %v11465_v24 }
 0x4ae   : > { %4668 = vmatprep.subr.bf16.mxu0 %v2507_v18  ;;  %5980 = vmatprep.subr.bf16.mxu1 %v2509_v19  ;;  %v3776_v18 = vcombine.high %v11424_v43, %v11424_v43  ;;  %v2542_v19 = vunpack.c.l.s8.bf16 %v1006_v25  ;;  %v2544_v22 = vunpack.c.l.s8.bf16 %v1008_v17  ;;  %v2546_v43 = vunpack.c.h.s8.bf16 %v1006_v25 }
 0x4af   : > { %v2548_v1 = vunpack.c.h.s8.bf16 %v1008_v17 }
 0x4b1   : > { %4669 = vmatpush1.bf16.msra.mxu0 %v2506_v37  ;;  %5981 = vmatpush1.bf16.msra.mxu1 %v2508_v44  ;;  %v2549_v37 = vunpack.c.h.s8.bf16 %v1009_v12  ;;  %v1011_v44 = vld [vmem:[%s10733_s30 + $0x1028] sm:$0xff] }
 0x4b2   : > { %4670 = vmatprep.subr.bf16.mxu0 %v2511_v26  ;;  %5982 = vmatprep.subr.bf16.mxu1 %v2513_v27  ;;  %v1013_v26 = vld [vmem:[%s10733_s30 + $0x1038] sm:$0xff]  ;;  %v11476_v27 = vrot.slane %v3794_v35, %v10781_v49  ;;  %v2551_v53 = vunpack.c.l.s8.bf16 %v1011_v44  ;;  %v2555_v55 = vunpack.c.h.s8.bf16 %v1011_v44 }
 0x4b5   : > { %4671 = vmatpush1.bf16.msra.mxu0 %v2510_v29  ;;  %5983 = vmatpush1.bf16.msra.mxu1 %v2512_v30  ;;  %v2553_v29 = vunpack.c.l.s8.bf16 %v1013_v26  ;;  %v1010_v30 = vld [vmem:[%s10733_s30 + $0x1020] sm:$0xff] }
 0x4b6   : > { %4672 = vmatprep.subr.bf16.mxu0 %v2515_v31  ;;  %5984 = vmatprep.subr.bf16.mxu1 %v2517_v57  ;;  %v1012_v31 = vld [vmem:[%s10733_s30 + $0x1030] sm:$0xff]  ;;  %v2550_v57 = vunpack.c.l.s8.bf16 %v1010_v30 }
 0x4b7   : > { %v2552_v33 = vunpack.c.l.s8.bf16 %v1012_v31  ;;  %v2556_v40 = vunpack.c.h.s8.bf16 %v1012_v31  ;;  %v1030_v31 = vld [vmem:[%s10733_s30 + $0x10c0] sm:$0xff] }
 0x4b9   : > { %4673 = vmatpush1.bf16.msra.mxu0 %v2514_v34  ;;  %5985 = vmatpush1.bf16.msra.mxu1 %v2516_v36  ;;  %v2557_v34 = vunpack.c.h.s8.bf16 %v1013_v26  ;;  %v1015_v36 = vld [vmem:[%s10733_s30 + $0x1048] sm:$0xff] }
 0x4ba   : > { %4674 = vmatprep.subr.bf16.mxu0 %v2519_v39  ;;  %5986 = vmatprep.subr.bf16.mxu1 %v2521_v61  ;;  %v1017_v39 = vld [vmem:[%s10733_s30 + $0x1058] sm:$0xff]  ;;  %v2554_v61 = vunpack.c.h.s8.bf16 %v1010_v30  ;;  %v2559_v42 = vunpack.c.l.s8.bf16 %v1015_v36  ;;  %v2563_v51 = vunpack.c.h.s8.bf16 %v1015_v36  ;;  %v1031_v26 = vld [vmem:[%s10733_s30 + $0x10c8] sm:$0xff] }
 0x4bd   : > { %4675 = vmatpush1.bf16.msra.mxu0 %v2518_v45  ;;  %5987 = vmatpush1.bf16.msra.mxu1 %v2520_v46  ;;  %v2561_v45 = vunpack.c.l.s8.bf16 %v1017_v39  ;;  %v1014_v46 = vld [vmem:[%s10733_s30 + $0x1040] sm:$0xff] }
 0x4be   : > { %4676 = vmatprep.subr.bf16.mxu0 %v2523_v59  ;;  %5988 = vmatprep.subr.bf16.mxu1 %v2525_v47  ;;  %v1016_v59 = vld [vmem:[%s10733_s30 + $0x1050] sm:$0xff]  ;;  %v2558_v47 = vunpack.c.l.s8.bf16 %v1014_v46 }
 0x4bf   : > { %v2560_v48 = vunpack.c.l.s8.bf16 %v1016_v59  ;;  %v2564_v5 = vunpack.c.h.s8.bf16 %v1016_v59  ;;  %v1034_v59 = vld [vmem:[%s10733_s30 + $0x10e0] sm:$0xff] }
 0x4c1   : > { %4677 = vmatpush1.bf16.msra.mxu0 %v2522_v52  ;;  %5989 = vmatpush1.bf16.msra.mxu1 %v2524_v62  ;;  %v2565_v52 = vunpack.c.h.s8.bf16 %v1017_v39  ;;  %v1019_v62 = vld [vmem:[%s10733_s30 + $0x1068] sm:$0xff] }
 0x4c2   : > { %4678 = vmatprep.subr.bf16.mxu0 %v2527_v54  ;;  %5990 = vmatprep.subr.bf16.mxu1 %v2529_v8  ;;  %v1021_v54 = vld [vmem:[%s10733_s30 + $0x1078] sm:$0xff]  ;;  %v2562_v8 = vunpack.c.h.s8.bf16 %v1014_v46  ;;  %v2567_v56 = vunpack.c.l.s8.bf16 %v1019_v62  ;;  %v2571_v63 = vunpack.c.h.s8.bf16 %v1019_v62  ;;  %v1035_v39 = vld [vmem:[%s10733_s30 + $0x10e8] sm:$0xff] }
 0x4c5   : > { %4679 = vmatpush1.bf16.msra.mxu0 %v2526_v60  ;;  %5991 = vmatpush1.bf16.msra.mxu1 %v2528_v21  ;;  %v2569_v60 = vunpack.c.l.s8.bf16 %v1021_v54  ;;  %v1018_v21 = vld [vmem:[%s10733_s30 + $0x1060] sm:$0xff] }
 0x4c6   : > { %4680 = vmatprep.subr.bf16.mxu0 %v2531_v10  ;;  %5992 = vmatprep.subr.bf16.mxu1 %v2533_v28  ;;  %v1020_v10 = vld [vmem:[%s10733_s30 + $0x1070] sm:$0xff]  ;;  %v2566_v28 = vunpack.c.l.s8.bf16 %v1018_v21 }
 0x4c7   : > { %v2568_v50 = vunpack.c.l.s8.bf16 %v1020_v10  ;;  %v2572_v58 = vunpack.c.h.s8.bf16 %v1020_v10  ;;  %v1038_v10 = vld [vmem:[%s10733_s30 + $0x1100] sm:$0xff] }
 0x4c9   : > { %4681 = vmatpush1.bf16.msra.mxu0 %v2530_v0  ;;  %5993 = vmatpush1.bf16.msra.mxu1 %v2532_v32  ;;  %v2573_v0 = vunpack.c.h.s8.bf16 %v1021_v54  ;;  %v1023_v32 = vld [vmem:[%s10733_s30 + $0x1088] sm:$0xff] }
 0x4ca   : > { %4682 = vmatprep.subr.bf16.mxu0 %v2535_v20  ;;  %5994 = vmatprep.subr.bf16.mxu1 %v2537_v2  ;;  %v1025_v20 = vld [vmem:[%s10733_s30 + $0x1098] sm:$0xff]  ;;  %v2570_v2 = vunpack.c.h.s8.bf16 %v1018_v21  ;;  %v2575_v3 = vunpack.c.l.s8.bf16 %v1023_v32  ;;  %v2579_v12 = vunpack.c.h.s8.bf16 %v1023_v32  ;;  %v1039_v54 = vld [vmem:[%s10733_s30 + $0x1108] sm:$0xff] }
 0x4cb   : > { %v2611_v32 = vunpack.c.h.s8.bf16 %v1039_v54 }
 0x4cd   : > { %4683 = vmatpush1.bf16.msra.mxu0 %v2534_v6  ;;  %5995 = vmatpush1.bf16.msra.mxu1 %v2536_v23  ;;  %v2577_v6 = vunpack.c.l.s8.bf16 %v1025_v20  ;;  %v1022_v23 = vld [vmem:[%s10733_s30 + $0x1080] sm:$0xff] }
 0x4ce   : > { %4684 = vmatprep.subr.bf16.mxu0 %v2539_v7  ;;  %5996 = vmatprep.subr.bf16.mxu1 %v2541_v9  ;;  %v1024_v7 = vld [vmem:[%s10733_s30 + $0x1090] sm:$0xff]  ;;  %v2574_v9 = vunpack.c.l.s8.bf16 %v1022_v23 }
 0x4cf   : > { %v2576_v11 = vunpack.c.l.s8.bf16 %v1024_v7  ;;  %v2580_v25 = vunpack.c.h.s8.bf16 %v1024_v7 }
 0x4d1   : > { %4685 = vmatpush1.bf16.msra.mxu0 %v2538_v13  ;;  %5997 = vmatpush1.bf16.msra.mxu1 %v2540_v14  ;;  %v2581_v13 = vunpack.c.h.s8.bf16 %v1025_v20  ;;  %v1027_v14 = vld [vmem:[%s10733_s30 + $0x10a8] sm:$0xff] }
 0x4d2   : > { %4695 = vmatprep.subr.bf16.mxu0 %v2543_v15  ;;  %6007 = vmatprep.subr.bf16.mxu1 %v2545_v16  ;;  %v1029_v15 = vld [vmem:[%s10733_s30 + $0x10b8] sm:$0xff]  ;;  %v2578_v16 = vunpack.c.h.s8.bf16 %v1022_v23  ;;  %v2583_v17 = vunpack.c.l.s8.bf16 %v1027_v14 }
 0x4d3   : > { %v2585_v35 = vunpack.c.l.s8.bf16 %v1029_v15  ;;  %v2589_v44 = vunpack.c.h.s8.bf16 %v1029_v15  ;;  %v1047_v15 = vld [vmem:[%s10733_s30 + $0x1148] sm:$0xff] }
 0x4d4   : > { %4687 = vmatmul.mubr.bf16.vlgmr.msra.gmra.mrb[0].mxu0 %v3776_v18  ;;  %5999 = vmatmul.mubr.bf16.vlgmr.msra.gmra.mrb[0].mxu1 %v3776_v18  ;;  %v1026_v18 = vld [vmem:[%s10733_s30 + $0x10a0] sm:$0xff] }
 0x4d5   : > { %4696 = vmatpush1.bf16.msra.mxu0 %v2542_v19  ;;  %6008 = vmatpush1.bf16.msra.mxu1 %v2544_v22  ;;  %v1028_v19 = vld [vmem:[%s10733_s30 + $0x10b0] sm:$0xff]  ;;  %v2582_v22 = vunpack.c.l.s8.bf16 %v1026_v18 }
 0x4d6   : > { %4697 = vmatprep.subr.bf16.mxu0 %v2547_v41  ;;  %6009 = vmatprep.subr.bf16.mxu1 %v2549_v37  ;;  %v2584_v41 = vunpack.c.l.s8.bf16 %v1028_v19  ;;  %v2587_v37 = vunpack.c.h.s8.bf16 %v1027_v14 }
 0x4d7   : > { %4727 = vmatprep.mubr.bf16.mxu0 %v11476_v27  ;;  %6039 = vmatprep.mubr.bf16.mxu1 %v11476_v27 }
 0x4d9   : > { %4698 = vmatpush1.bf16.msra.mxu0 %v2546_v43  ;;  %6010 = vmatpush1.bf16.msra.mxu1 %v2548_v1  ;;  %v1033_v43 = vld [vmem:[%s10733_s30 + $0x10d8] sm:$0xff]  ;;  %v2586_v1 = vunpack.c.h.s8.bf16 %v1026_v18 }
 0x4da   : > { %4699 = vmatprep.subr.bf16.mxu0 %v2551_v53  ;;  %6011 = vmatprep.subr.bf16.mxu1 %v2553_v29  ;;  %v2588_v53 = vunpack.c.h.s8.bf16 %v1028_v19  ;;  %v2591_v29 = vunpack.c.l.s8.bf16 %v1031_v26  ;;  %v2593_v30 = vunpack.c.l.s8.bf16 %v1033_v43  ;;  %v2597_v36 = vunpack.c.h.s8.bf16 %v1033_v43  ;;  %v1046_v19 = vld [vmem:[%s10733_s30 + $0x1140] sm:$0xff]  ;;  %v1051_v43 = vld [vmem:[%s10733_s30 + $0x1168] sm:$0xff] }
 0x4dd   : > { %4700 = vmatpush1.bf16.msra.mxu0 %v2550_v57  ;;  %6012 = vmatpush1.bf16.msra.mxu1 %v2552_v33  ;;  %v1032_v57 = vld [vmem:[%s10733_s30 + $0x10d0] sm:$0xff]  ;;  %v2590_v33 = vunpack.c.l.s8.bf16 %v1030_v31 }
 0x4de   : > { %4701 = vmatprep.subr.bf16.mxu0 %v2555_v55  ;;  %6013 = vmatprep.subr.bf16.mxu1 %v2557_v34  ;;  %v2592_v55 = vunpack.c.l.s8.bf16 %v1032_v57  ;;  %v2595_v34 = vunpack.c.h.s8.bf16 %v1031_v26 }
 0x4e1   : > { %4702 = vmatpush1.bf16.msra.mxu0 %v2554_v61  ;;  %6014 = vmatpush1.bf16.msra.mxu1 %v2556_v40  ;;  %v1037_v61 = vld [vmem:[%s10733_s30 + $0x10f8] sm:$0xff]  ;;  %v2594_v40 = vunpack.c.h.s8.bf16 %v1030_v31 }
 0x4e2   : > { %4703 = vmatprep.subr.bf16.mxu0 %v2559_v42  ;;  %6015 = vmatprep.subr.bf16.mxu1 %v2561_v45  ;;  %v2596_v42 = vunpack.c.h.s8.bf16 %v1032_v57  ;;  %v2599_v45 = vunpack.c.l.s8.bf16 %v1035_v39  ;;  %v2601_v46 = vunpack.c.l.s8.bf16 %v1037_v61  ;;  %v2605_v62 = vunpack.c.h.s8.bf16 %v1037_v61  ;;  %v1050_v57 = vld [vmem:[%s10733_s30 + $0x1160] sm:$0xff]  ;;  %v1055_v61 = vld [vmem:[%s10733_s30 + $0x1188] sm:$0xff] }
 0x4e5   : > { %4704 = vmatpush1.bf16.msra.mxu0 %v2558_v47  ;;  %6016 = vmatpush1.bf16.msra.mxu1 %v2560_v48  ;;  %v1036_v47 = vld [vmem:[%s10733_s30 + $0x10f0] sm:$0xff]  ;;  %v2598_v48 = vunpack.c.l.s8.bf16 %v1034_v59 }
 0x4e6   : > { %4705 = vmatprep.subr.bf16.mxu0 %v2563_v51  ;;  %6017 = vmatprep.subr.bf16.mxu1 %v2565_v52  ;;  %v2600_v51 = vunpack.c.l.s8.bf16 %v1036_v47  ;;  %v2603_v52 = vunpack.c.h.s8.bf16 %v1035_v39 }
 0x4e9   : > { %4706 = vmatpush1.bf16.msra.mxu0 %v2562_v8  ;;  %6018 = vmatpush1.bf16.msra.mxu1 %v2564_v5  ;;  %v1041_v8 = vld [vmem:[%s10733_s30 + $0x1118] sm:$0xff]  ;;  %v2602_v5 = vunpack.c.h.s8.bf16 %v1034_v59 }
 0x4ea   : > { %4707 = vmatprep.subr.bf16.mxu0 %v2567_v56  ;;  %6019 = vmatprep.subr.bf16.mxu1 %v2569_v60  ;;  %v2604_v56 = vunpack.c.h.s8.bf16 %v1036_v47  ;;  %v2607_v60 = vunpack.c.l.s8.bf16 %v1039_v54  ;;  %v2609_v21 = vunpack.c.l.s8.bf16 %v1041_v8  ;;  %v2613_v20 = vunpack.c.h.s8.bf16 %v1041_v8  ;;  %v1054_v47 = vld [vmem:[%s10733_s30 + $0x1180] sm:$0xff]  ;;  %v1059_v8 = vld [vmem:[%s10733_s30 + $0x11a8] sm:$0xff] }
 0x4ed   : > { %4708 = vmatpush1.bf16.msra.mxu0 %v2566_v28  ;;  %6020 = vmatpush1.bf16.msra.mxu1 %v2568_v50  ;;  %v1040_v28 = vld [vmem:[%s10733_s30 + $0x1110] sm:$0xff]  ;;  %v11512_v50 = vrot.slane %v11465_v24, %v10781_v49  ;;  %v2610_v24 = vunpack.c.h.s8.bf16 %v1038_v10 }
 0x4ee   : > { %4709 = vmatprep.subr.bf16.mxu0 %v2571_v63  ;;  %6021 = vmatprep.subr.bf16.mxu1 %v2573_v0  ;;  %v2606_v63 = vunpack.c.l.s8.bf16 %v1038_v10  ;;  %v2608_v0 = vunpack.c.l.s8.bf16 %v1040_v28 }
 0x4f1   : > { %4710 = vmatpush1.bf16.msra.mxu0 %v2570_v2  ;;  %6022 = vmatpush1.bf16.msra.mxu1 %v2572_v58  ;;  %v1043_v2 = vld [vmem:[%s10733_s30 + $0x1128] sm:$0xff]  ;;  %v1045_v58 = vld [vmem:[%s10733_s30 + $0x1138] sm:$0xff] }
 0x4f2   : > { %4711 = vmatprep.subr.bf16.mxu0 %v2575_v3  ;;  %6023 = vmatprep.subr.bf16.mxu1 %v2577_v6  ;;  %v3826_v3 = vcombine.high %v11476_v27, %v11476_v27  ;;  %v2612_v6 = vunpack.c.h.s8.bf16 %v1040_v28  ;;  %v2615_v23 = vunpack.c.l.s8.bf16 %v1043_v2  ;;  %v2617_v7 = vunpack.c.l.s8.bf16 %v1045_v58  ;;  %v1058_v28 = vld [vmem:[%s10733_s30 + $0x11a0] sm:$0xff] }
 0x4f3   : > { %v2621_v14 = vunpack.c.h.s8.bf16 %v1045_v58  ;;  %v1063_v58 = vld [vmem:[%s10733_s30 + $0x11c8] sm:$0xff] }
 0x4f5   : > { %4712 = vmatpush1.bf16.msra.mxu0 %v2574_v9  ;;  %6024 = vmatpush1.bf16.msra.mxu1 %v2576_v11  ;;  %v1042_v9 = vld [vmem:[%s10733_s30 + $0x1120] sm:$0xff]  ;;  %v1044_v11 = vld [vmem:[%s10733_s30 + $0x1130] sm:$0xff] }
 0x4f6   : > { %4713 = vmatprep.subr.bf16.mxu0 %v2579_v12  ;;  %6025 = vmatprep.subr.bf16.mxu1 %v2581_v13  ;;  %v2614_v27 = vunpack.c.l.s8.bf16 %v1042_v9  ;;  %v2616_v12 = vunpack.c.l.s8.bf16 %v1044_v11  ;;  %v2619_v13 = vunpack.c.h.s8.bf16 %v1043_v2 }
 0x4f9   : > { %4714 = vmatpush1.bf16.msra.mxu0 %v2578_v16  ;;  %6026 = vmatpush1.bf16.msra.mxu1 %v2580_v25  ;;  %v1049_v16 = vld [vmem:[%s10733_s30 + $0x1158] sm:$0xff]  ;;  %v2618_v25 = vunpack.c.h.s8.bf16 %v1042_v9  ;;  %v1062_v9 = vld [vmem:[%s10733_s30 + $0x11c0] sm:$0xff] }
 0x4fa   : > { %4715 = vmatprep.subr.bf16.mxu0 %v2583_v17  ;;  %6027 = vmatprep.subr.bf16.mxu1 %v2585_v35  ;;  %v2620_v17 = vunpack.c.h.s8.bf16 %v1044_v11  ;;  %v2623_v35 = vunpack.c.l.s8.bf16 %v1047_v15  ;;  %v2625_v18 = vunpack.c.l.s8.bf16 %v1049_v16  ;;  %v2629_v26 = vunpack.c.h.s8.bf16 %v1049_v16  ;;  %v1064_v11 = vld [vmem:[%s10733_s30 + $0x11d0] sm:$0xff]  ;;  %v1069_v16 = vld [vmem:[%s10733_s30 + $0x11f8] sm:$0xff] }
 0x4fd   : > { %4716 = vmatpush1.bf16.msra.mxu0 %v2582_v22  ;;  %6028 = vmatpush1.bf16.msra.mxu1 %v2584_v41  ;;  %v1048_v22 = vld [vmem:[%s10733_s30 + $0x1150] sm:$0xff]  ;;  %v2622_v41 = vunpack.c.l.s8.bf16 %v1046_v19 }
 0x4fe   : > { %4717 = vmatprep.subr.bf16.mxu0 %v2587_v37  ;;  %6029 = vmatprep.subr.bf16.mxu1 %v2589_v44  ;;  %v2624_v37 = vunpack.c.l.s8.bf16 %v1048_v22  ;;  %v2627_v44 = vunpack.c.h.s8.bf16 %v1047_v15  ;;  %v1067_v15 = vld [vmem:[%s10733_s30 + $0x11e8] sm:$0xff] }
 0x501   : > { %4718 = vmatpush1.bf16.msra.mxu0 %v2586_v1  ;;  %6030 = vmatpush1.bf16.msra.mxu1 %v2588_v53  ;;  %v1053_v1 = vld [vmem:[%s10733_s30 + $0x1178] sm:$0xff]  ;;  %v2626_v53 = vunpack.c.h.s8.bf16 %v1046_v19  ;;  %v1066_v19 = vld [vmem:[%s10733_s30 + $0x11e0] sm:$0xff] }
 0x502   : > { %4719 = vmatprep.subr.bf16.mxu0 %v2591_v29  ;;  %6031 = vmatprep.subr.bf16.mxu1 %v2593_v30  ;;  %v2628_v29 = vunpack.c.h.s8.bf16 %v1048_v22  ;;  %v2631_v30 = vunpack.c.l.s8.bf16 %v1051_v43  ;;  %v2633_v31 = vunpack.c.l.s8.bf16 %v1053_v1  ;;  %v2637_v39 = vunpack.c.h.s8.bf16 %v1053_v1  ;;  %v1068_v22 = vld [vmem:[%s10733_s30 + $0x11f0] sm:$0xff]  ;;  %v1071_v1 = vld [vmem:[%s10733_s30 + $0x1208] sm:$0xff] }
 0x505   : > { %4720 = vmatpush1.bf16.msra.mxu0 %v2590_v33  ;;  %6032 = vmatpush1.bf16.msra.mxu1 %v2592_v55  ;;  %v1052_v33 = vld [vmem:[%s10733_s30 + $0x1170] sm:$0xff]  ;;  %v2630_v55 = vunpack.c.l.s8.bf16 %v1050_v57 }
 0x506   : > { %4721 = vmatprep.subr.bf16.mxu0 %v2595_v34  ;;  %6033 = vmatprep.subr.bf16.mxu1 %v2597_v36  ;;  %v2632_v34 = vunpack.c.l.s8.bf16 %v1052_v33  ;;  %v2635_v36 = vunpack.c.h.s8.bf16 %v1051_v43  ;;  %v2669_v43 = vunpack.c.h.s8.bf16 %v1069_v16 }
 0x509   : > { %4722 = vmatpush1.bf16.msra.mxu0 %v2594_v40  ;;  %6034 = vmatpush1.bf16.msra.mxu1 %v2596_v42  ;;  %v1057_v40 = vld [vmem:[%s10733_s30 + $0x1198] sm:$0xff]  ;;  %v2634_v42 = vunpack.c.h.s8.bf16 %v1050_v57 }
 0x50a   : > { %4723 = vmatprep.subr.bf16.mxu0 %v2599_v45  ;;  %6035 = vmatprep.subr.bf16.mxu1 %v2601_v46  ;;  %v2636_v45 = vunpack.c.h.s8.bf16 %v1052_v33  ;;  %v2639_v46 = vunpack.c.l.s8.bf16 %v1055_v61  ;;  %v2641_v59 = vunpack.c.l.s8.bf16 %v1057_v40  ;;  %v2645_v54 = vunpack.c.h.s8.bf16 %v1057_v40  ;;  %v1070_v33 = vld [vmem:[%s10733_s30 + $0x1200] sm:$0xff] }
 0x50b   : > { %v2675_v40 = vunpack.c.h.s8.bf16 %v1071_v1 }
 0x50d   : > { %4724 = vmatpush1.bf16.msra.mxu0 %v2598_v48  ;;  %6036 = vmatpush1.bf16.msra.mxu1 %v2600_v51  ;;  %v1056_v48 = vld [vmem:[%s10733_s30 + $0x1190] sm:$0xff]  ;;  %v2638_v51 = vunpack.c.l.s8.bf16 %v1054_v47 }
 0x50e   : > { %4725 = vmatprep.subr.bf16.mxu0 %v2603_v52  ;;  %6037 = vmatprep.subr.bf16.mxu1 %v2605_v62  ;;  %v2640_v52 = vunpack.c.l.s8.bf16 %v1056_v48  ;;  %v2643_v62 = vunpack.c.h.s8.bf16 %v1055_v61 }
 0x511   : > { %4726 = vmatpush1.bf16.msra.mxu0 %v2602_v5  ;;  %6038 = vmatpush1.bf16.msra.mxu1 %v2604_v56  ;;  %v1061_v5 = vld [vmem:[%s10733_s30 + $0x11b8] sm:$0xff]  ;;  %v2642_v56 = vunpack.c.h.s8.bf16 %v1054_v47 }
 0x512   : > { %4736 = vmatprep.subr.bf16.mxu0 %v2607_v60  ;;  %6048 = vmatprep.subr.bf16.mxu1 %v2609_v21  ;;  %v2644_v60 = vunpack.c.h.s8.bf16 %v1056_v48  ;;  %v2647_v21 = vunpack.c.l.s8.bf16 %v1059_v8  ;;  %v2649_v10 = vunpack.c.l.s8.bf16 %v1061_v5  ;;  %v2653_v2 = vunpack.c.h.s8.bf16 %v1061_v5 }
 0x514   : > { %4728 = vmatmul.mubr.bf16.vlgmr.msra.gmra.mrb[0].mxu0 %v11512_v50  ;;  %6040 = vmatmul.mubr.bf16.vlgmr.msra.gmra.mrb[0].mxu1 %v11512_v50 }
 0x515   : > { %4737 = vmatpush1.bf16.msra.mxu0 %v2606_v63  ;;  %6049 = vmatpush1.bf16.msra.mxu1 %v2608_v0  ;;  %v1060_v63 = vld [vmem:[%s10733_s30 + $0x11b0] sm:$0xff]  ;;  %v2646_v0 = vunpack.c.l.s8.bf16 %v1058_v28 }
 0x516   : > { %4738 = vmatprep.subr.bf16.mxu0 %v2611_v32  ;;  %6050 = vmatprep.subr.bf16.mxu1 %v2613_v20  ;;  %v2648_v32 = vunpack.c.l.s8.bf16 %v1060_v63  ;;  %v2651_v20 = vunpack.c.h.s8.bf16 %v1059_v8 }
 0x517   : > { %4768 = vmatprep.mubr.bf16.mxu0 %v3826_v3  ;;  %6080 = vmatprep.mubr.bf16.mxu1 %v3826_v3  ;;  %v1065_v3 = vld [vmem:[%s10733_s30 + $0x11d8] sm:$0xff] }
 0x519   : > { %4739 = vmatpush1.bf16.msra.mxu0 %v2610_v24  ;;  %6051 = vmatpush1.bf16.msra.mxu1 %v2612_v6  ;;  %v2650_v24 = vunpack.c.h.s8.bf16 %v1058_v28  ;;  %v2652_v6 = vunpack.c.h.s8.bf16 %v1060_v63 }
 0x51a   : > { %4740 = vmatprep.subr.bf16.mxu0 %v2615_v23  ;;  %6052 = vmatprep.subr.bf16.mxu1 %v2617_v7  ;;  %v2655_v23 = vunpack.c.l.s8.bf16 %v1063_v58  ;;  %v2657_v7 = vunpack.c.l.s8.bf16 %v1065_v3 }
 0x51d   : > { %4741 = vmatpush1.bf16.msra.mxu0 %v2614_v27  ;;  %6053 = vmatpush1.bf16.msra.mxu1 %v2616_v12  ;;  %v2654_v27 = vunpack.c.l.s8.bf16 %v1062_v9  ;;  %v2656_v12 = vunpack.c.l.s8.bf16 %v1064_v11 }
 0x51e   : > { %4742 = vmatprep.subr.bf16.mxu0 %v2619_v13  ;;  %6054 = vmatprep.subr.bf16.mxu1 %v2621_v14  ;;  %v2659_v13 = vunpack.c.h.s8.bf16 %v1063_v58  ;;  %v2661_v14 = vunpack.c.h.s8.bf16 %v1065_v3 }
 0x521   : > { %4743 = vmatpush1.bf16.msra.mxu0 %v2618_v25  ;;  %6055 = vmatpush1.bf16.msra.mxu1 %v2620_v17  ;;  %v2658_v25 = vunpack.c.h.s8.bf16 %v1062_v9  ;;  %v2660_v17 = vunpack.c.h.s8.bf16 %v1064_v11 }
 0x522   : > { %4744 = vmatprep.subr.bf16.mxu0 %v2623_v35  ;;  %6056 = vmatprep.subr.bf16.mxu1 %v2625_v18  ;;  %v2663_v35 = vunpack.c.l.s8.bf16 %v1067_v15  ;;  %v2665_v18 = vunpack.c.l.s8.bf16 %v1069_v16 }
 0x525   : > { %4745 = vmatpush1.bf16.msra.mxu0 %v2622_v41  ;;  %6057 = vmatpush1.bf16.msra.mxu1 %v2624_v37  ;;  %v3779_v41 = vcombine.high %v11459_v4, %v11459_v4  ;;  %v2662_v37 = vunpack.c.l.s8.bf16 %v1066_v19  ;;  %v2671_v4 = vunpack.c.l.s8.bf16 %v1071_v1 }
 0x526   : > { %4746 = vmatprep.subr.bf16.mxu0 %v2627_v44  ;;  %6058 = vmatprep.subr.bf16.mxu1 %v2629_v26  ;;  %v2664_v44 = vunpack.c.l.s8.bf16 %v1068_v22  ;;  %v2667_v26 = vunpack.c.h.s8.bf16 %v1067_v15 }
 0x529   : > { %4747 = vmatpush1.bf16.msra.mxu0 %v2626_v53  ;;  %6059 = vmatpush1.bf16.msra.mxu1 %v2628_v29  ;;  %v1073_v53 = vld [vmem:[%s10733_s30 + $0x1218] sm:$0xff]  ;;  %v11551_v29 = vrot.slane %v3779_v41, %v10781_v49 }
 0x52a   : > { %4748 = vmatprep.subr.bf16.mxu0 %v2631_v30  ;;  %6060 = vmatprep.subr.bf16.mxu1 %v2633_v31  ;;  %v2666_v30 = vunpack.c.h.s8.bf16 %v1066_v19  ;;  %v2668_v31 = vunpack.c.h.s8.bf16 %v1068_v22  ;;  %v2673_v57 = vunpack.c.l.s8.bf16 %v1073_v53 }
 0x52d   : > { %4749 = vmatpush1.bf16.msra.mxu0 %v2630_v55  ;;  %6061 = vmatpush1.bf16.msra.mxu1 %v2632_v34  ;;  %v1072_v55 = vld [vmem:[%s10733_s30 + $0x1210] sm:$0xff]  ;;  %v3795_v34 = vcombine.high %v11551_v29, %v11551_v29 }
 0x52e   : > { %4750 = vmatprep.subr.bf16.mxu0 %v2635_v36  ;;  %6062 = vmatprep.subr.bf16.mxu1 %v2637_v39  ;;  %v3824_v36 = vcombine.high %v11512_v50, %v11512_v50  ;;  %v2670_v39 = vunpack.c.l.s8.bf16 %v1070_v33  ;;  %v2672_v61 = vunpack.c.l.s8.bf16 %v1072_v55  ;;  %v2674_v50 = vunpack.c.h.s8.bf16 %v1070_v33 }
 0x52f   : > { %v2676_v47 = vunpack.c.h.s8.bf16 %v1072_v55 }
 0x531   : > { %4751 = vmatpush1.bf16.msra.mxu0 %v2634_v42  ;;  %6063 = vmatpush1.bf16.msra.mxu1 %v2636_v45  ;;  %v2677_v42 = vunpack.c.h.s8.bf16 %v1073_v53  ;;  %v1075_v45 = vld [vmem:[%s10733_s30 + $0x1228] sm:$0xff] }
 0x532   : > { %4752 = vmatprep.subr.bf16.mxu0 %v2639_v46  ;;  %6064 = vmatprep.subr.bf16.mxu1 %v2641_v59  ;;  %v1077_v46 = vld [vmem:[%s10733_s30 + $0x1238] sm:$0xff]  ;;  %v11562_v59 = vrot.slane %v3795_v34, %v10781_v49  ;;  %v2679_v48 = vunpack.c.l.s8.bf16 %v1075_v45  ;;  %v2683_v5 = vunpack.c.h.s8.bf16 %v1075_v45  ;;  %v1090_v34 = vld [vmem:[%s10733_s30 + $0x12a0] sm:$0xff]  ;;  %v1095_v45 = vld [vmem:[%s10733_s30 + $0x12c8] sm:$0xff] }
 0x535   : > { %4753 = vmatpush1.bf16.msra.mxu0 %v2638_v51  ;;  %6065 = vmatpush1.bf16.msra.mxu1 %v2640_v52  ;;  %v2681_v51 = vunpack.c.l.s8.bf16 %v1077_v46  ;;  %v1074_v52 = vld [vmem:[%s10733_s30 + $0x1220] sm:$0xff] }
 0x536   : > { %4754 = vmatprep.subr.bf16.mxu0 %v2643_v62  ;;  %6066 = vmatprep.subr.bf16.mxu1 %v2645_v54  ;;  %v1076_v62 = vld [vmem:[%s10733_s30 + $0x1230] sm:$0xff]  ;;  %v2678_v54 = vunpack.c.l.s8.bf16 %v1074_v52 }
 0x537   : > { %v2680_v8 = vunpack.c.l.s8.bf16 %v1076_v62  ;;  %v2684_v28 = vunpack.c.h.s8.bf16 %v1076_v62  ;;  %v1096_v62 = vld [vmem:[%s10733_s30 + $0x12d0] sm:$0xff] }
 0x539   : > { %4755 = vmatpush1.bf16.msra.mxu0 %v2642_v56  ;;  %6067 = vmatpush1.bf16.msra.mxu1 %v2644_v60  ;;  %v2685_v56 = vunpack.c.h.s8.bf16 %v1077_v46  ;;  %v1079_v60 = vld [vmem:[%s10733_s30 + $0x1248] sm:$0xff]  ;;  %v1097_v46 = vld [vmem:[%s10733_s30 + $0x12d8] sm:$0xff] }
 0x53a   : > { %4756 = vmatprep.subr.bf16.mxu0 %v2647_v21  ;;  %6068 = vmatprep.subr.bf16.mxu1 %v2649_v10  ;;  %v1081_v21 = vld [vmem:[%s10733_s30 + $0x1258] sm:$0xff]  ;;  %v2682_v10 = vunpack.c.h.s8.bf16 %v1074_v52  ;;  %v2687_v63 = vunpack.c.l.s8.bf16 %v1079_v60  ;;  %v2691_v3 = vunpack.c.h.s8.bf16 %v1079_v60  ;;  %v1094_v52 = vld [vmem:[%s10733_s30 + $0x12c0] sm:$0xff]  ;;  %v1099_v60 = vld [vmem:[%s10733_s30 + $0x12e8] sm:$0xff] }
 0x53d   : > { %4757 = vmatpush1.bf16.msra.mxu0 %v2646_v0  ;;  %6069 = vmatpush1.bf16.msra.mxu1 %v2648_v32  ;;  %v2689_v0 = vunpack.c.l.s8.bf16 %v1081_v21  ;;  %v1078_v32 = vld [vmem:[%s10733_s30 + $0x1240] sm:$0xff] }
 0x53e   : > { %4758 = vmatprep.subr.bf16.mxu0 %v2651_v20  ;;  %6070 = vmatprep.subr.bf16.mxu1 %v2653_v2  ;;  %v1080_v20 = vld [vmem:[%s10733_s30 + $0x1250] sm:$0xff]  ;;  %v2686_v2 = vunpack.c.l.s8.bf16 %v1078_v32 }
 0x53f   : > { %v2688_v58 = vunpack.c.l.s8.bf16 %v1080_v20  ;;  %v2692_v9 = vunpack.c.h.s8.bf16 %v1080_v20  ;;  %v1100_v20 = vld [vmem:[%s10733_s30 + $0x12f0] sm:$0xff] }
 0x541   : > { %4759 = vmatpush1.bf16.msra.mxu0 %v2650_v24  ;;  %6071 = vmatpush1.bf16.msra.mxu1 %v2652_v6  ;;  %v2693_v24 = vunpack.c.h.s8.bf16 %v1081_v21  ;;  %v1083_v6 = vld [vmem:[%s10733_s30 + $0x1268] sm:$0xff]  ;;  %v1101_v21 = vld [vmem:[%s10733_s30 + $0x12f8] sm:$0xff] }
 0x542   : > { %4760 = vmatprep.subr.bf16.mxu0 %v2655_v23  ;;  %6072 = vmatprep.subr.bf16.mxu1 %v2657_v7  ;;  %v1085_v23 = vld [vmem:[%s10733_s30 + $0x1278] sm:$0xff]  ;;  %v2690_v7 = vunpack.c.h.s8.bf16 %v1078_v32  ;;  %v2695_v11 = vunpack.c.l.s8.bf16 %v1083_v6  ;;  %v2699_v16 = vunpack.c.h.s8.bf16 %v1083_v6  ;;  %v1098_v32 = vld [vmem:[%s10733_s30 + $0x12e0] sm:$0xff]  ;;  %v1103_v6 = vld [vmem:[%s10733_s30 + $0x1308] sm:$0xff] }
 0x545   : > { %4761 = vmatpush1.bf16.msra.mxu0 %v2654_v27  ;;  %6073 = vmatpush1.bf16.msra.mxu1 %v2656_v12  ;;  %v2697_v27 = vunpack.c.l.s8.bf16 %v1085_v23  ;;  %v1082_v12 = vld [vmem:[%s10733_s30 + $0x1260] sm:$0xff] }
 0x546   : > { %4762 = vmatprep.subr.bf16.mxu0 %v2659_v13  ;;  %6074 = vmatprep.subr.bf16.mxu1 %v2661_v14  ;;  %v1084_v13 = vld [vmem:[%s10733_s30 + $0x1270] sm:$0xff]  ;;  %v2694_v14 = vunpack.c.l.s8.bf16 %v1082_v12 }
 0x547   : > { %v2696_v15 = vunpack.c.l.s8.bf16 %v1084_v13  ;;  %v2700_v19 = vunpack.c.h.s8.bf16 %v1084_v13  ;;  %v1104_v13 = vld [vmem:[%s10733_s30 + $0x1310] sm:$0xff] }
 0x549   : > { %4763 = vmatpush1.bf16.msra.mxu0 %v2658_v25  ;;  %6075 = vmatpush1.bf16.msra.mxu1 %v2660_v17  ;;  %v2701_v25 = vunpack.c.h.s8.bf16 %v1085_v23  ;;  %v1087_v17 = vld [vmem:[%s10733_s30 + $0x1288] sm:$0xff]  ;;  %v1105_v23 = vld [vmem:[%s10733_s30 + $0x1318] sm:$0xff] }
 0x54a   : > { %4764 = vmatprep.subr.bf16.mxu0 %v2663_v35  ;;  %6076 = vmatprep.subr.bf16.mxu1 %v2665_v18  ;;  %v1089_v35 = vld [vmem:[%s10733_s30 + $0x1298] sm:$0xff]  ;;  %v2698_v18 = vunpack.c.h.s8.bf16 %v1082_v12  ;;  %v2703_v22 = vunpack.c.l.s8.bf16 %v1087_v17  ;;  %v2707_v1 = vunpack.c.h.s8.bf16 %v1087_v17  ;;  %v1102_v12 = vld [vmem:[%s10733_s30 + $0x1300] sm:$0xff]  ;;  %v2741_v17 = vunpack.c.h.s8.bf16 %v1105_v23 }
 0x54b   : > { %v2705_v41 = vunpack.c.l.s8.bf16 %v1089_v35  ;;  %v2709_v53 = vunpack.c.h.s8.bf16 %v1089_v35  ;;  %v1107_v35 = vld [vmem:[%s10733_s30 + $0x1328] sm:$0xff] }
 0x54d   : > { %4765 = vmatpush1.bf16.msra.mxu0 %v2662_v37  ;;  %6077 = vmatpush1.bf16.msra.mxu1 %v2664_v44  ;;  %v1086_v37 = vld [vmem:[%s10733_s30 + $0x1280] sm:$0xff]  ;;  %v1088_v44 = vld [vmem:[%s10733_s30 + $0x1290] sm:$0xff] }
 0x54e   : > { %4766 = vmatprep.subr.bf16.mxu0 %v2667_v26  ;;  %6078 = vmatprep.subr.bf16.mxu1 %v2669_v43  ;;  %v2702_v26 = vunpack.c.l.s8.bf16 %v1086_v37  ;;  %v2704_v43 = vunpack.c.l.s8.bf16 %v1088_v44 }
 0x551   : > { %4767 = vmatpush1.bf16.msra.mxu0 %v2666_v30  ;;  %6079 = vmatpush1.bf16.msra.mxu1 %v2668_v31  ;;  %v1091_v30 = vld [vmem:[%s10733_s30 + $0x12a8] sm:$0xff]  ;;  %v1093_v31 = vld [vmem:[%s10733_s30 + $0x12b8] sm:$0xff] }
 0x552   : > { %4777 = vmatprep.subr.bf16.mxu0 %v2671_v4  ;;  %6089 = vmatprep.subr.bf16.mxu1 %v2673_v57  ;;  %v2706_v4 = vunpack.c.h.s8.bf16 %v1086_v37  ;;  %v2708_v57 = vunpack.c.h.s8.bf16 %v1088_v44  ;;  %v2711_v33 = vunpack.c.l.s8.bf16 %v1091_v30  ;;  %v2713_v55 = vunpack.c.l.s8.bf16 %v1093_v31  ;;  %v1106_v44 = vld [vmem:[%s10733_s30 + $0x1320] sm:$0xff] }
 0x554   : > { %4769 = vmatmul.mubr.bf16.vlgmr.msra.gmra.mrb[0].mxu0 %v3824_v36  ;;  %6081 = vmatmul.mubr.bf16.vlgmr.msra.gmra.mrb[0].mxu1 %v3824_v36  ;;  %v1092_v36 = vld [vmem:[%s10733_s30 + $0x12b0] sm:$0xff] }
 0x555   : > { %4778 = vmatpush1.bf16.msra.mxu0 %v2670_v39  ;;  %6090 = vmatpush1.bf16.msra.mxu1 %v2672_v61  ;;  %v2710_v39 = vunpack.c.l.s8.bf16 %v1090_v34  ;;  %v2712_v61 = vunpack.c.l.s8.bf16 %v1092_v36 }
 0x556   : > { %4779 = vmatprep.subr.bf16.mxu0 %v2675_v40  ;;  %6091 = vmatprep.subr.bf16.mxu1 %v2677_v42  ;;  %v2715_v40 = vunpack.c.h.s8.bf16 %v1091_v30  ;;  %v2717_v42 = vunpack.c.h.s8.bf16 %v1093_v31  ;;  %v1111_v30 = vld [vmem:[%s10733_s30 + $0x1348] sm:$0xff]  ;;  %v1113_v31 = vld [vmem:[%s10733_s30 + $0x1358] sm:$0xff] }
 0x557   : > { %4809 = vmatprep.mubr.bf16.mxu0 %v11562_v59  ;;  %6121 = vmatprep.mubr.bf16.mxu1 %v11562_v59 }
 0x559   : > { %4780 = vmatpush1.bf16.msra.mxu0 %v2674_v50  ;;  %6092 = vmatpush1.bf16.msra.mxu1 %v2676_v47  ;;  %v2714_v50 = vunpack.c.h.s8.bf16 %v1090_v34  ;;  %v2716_v47 = vunpack.c.h.s8.bf16 %v1092_v36  ;;  %v1110_v34 = vld [vmem:[%s10733_s30 + $0x1340] sm:$0xff]  ;;  %v1112_v36 = vld [vmem:[%s10733_s30 + $0x1350] sm:$0xff] }
 0x55a   : > { %4781 = vmatprep.subr.bf16.mxu0 %v2679_v48  ;;  %6093 = vmatprep.subr.bf16.mxu1 %v2681_v51  ;;  %v2719_v48 = vunpack.c.l.s8.bf16 %v1095_v45  ;;  %v2721_v51 = vunpack.c.l.s8.bf16 %v1097_v46 }
 0x55d   : > { %4782 = vmatpush1.bf16.msra.mxu0 %v2678_v54  ;;  %6094 = vmatpush1.bf16.msra.mxu1 %v2680_v8  ;;  %v2718_v54 = vunpack.c.l.s8.bf16 %v1094_v52  ;;  %v2720_v8 = vunpack.c.l.s8.bf16 %v1096_v62 }
 0x55e   : > { %4783 = vmatprep.subr.bf16.mxu0 %v2683_v5  ;;  %6095 = vmatprep.subr.bf16.mxu1 %v2685_v56  ;;  %v2723_v5 = vunpack.c.h.s8.bf16 %v1095_v45  ;;  %v2725_v56 = vunpack.c.h.s8.bf16 %v1097_v46  ;;  %v1115_v45 = vld [vmem:[%s10733_s30 + $0x1368] sm:$0xff]  ;;  %v1117_v46 = vld [vmem:[%s10733_s30 + $0x1378] sm:$0xff] }
 0x561   : > { %4784 = vmatpush1.bf16.msra.mxu0 %v2682_v10  ;;  %6096 = vmatpush1.bf16.msra.mxu1 %v2684_v28  ;;  %v2722_v10 = vunpack.c.h.s8.bf16 %v1094_v52  ;;  %v2724_v28 = vunpack.c.h.s8.bf16 %v1096_v62  ;;  %v1114_v52 = vld [vmem:[%s10733_s30 + $0x1360] sm:$0xff]  ;;  %v1116_v62 = vld [vmem:[%s10733_s30 + $0x1370] sm:$0xff] }
 0x562   : > { %4785 = vmatprep.subr.bf16.mxu0 %v2687_v63  ;;  %6097 = vmatprep.subr.bf16.mxu1 %v2689_v0  ;;  %v2727_v63 = vunpack.c.l.s8.bf16 %v1099_v60  ;;  %v2729_v0 = vunpack.c.l.s8.bf16 %v1101_v21 }
 0x565   : > { %4786 = vmatpush1.bf16.msra.mxu0 %v2686_v2  ;;  %6098 = vmatpush1.bf16.msra.mxu1 %v2688_v58  ;;  %v2726_v2 = vunpack.c.l.s8.bf16 %v1098_v32  ;;  %v2728_v58 = vunpack.c.l.s8.bf16 %v1100_v20 }
 0x566   : > { %4787 = vmatprep.subr.bf16.mxu0 %v2691_v3  ;;  %6099 = vmatprep.subr.bf16.mxu1 %v2693_v24  ;;  %v2731_v3 = vunpack.c.h.s8.bf16 %v1099_v60  ;;  %v2733_v24 = vunpack.c.h.s8.bf16 %v1101_v21  ;;  %v1119_v60 = vld [vmem:[%s10733_s30 + $0x1388] sm:$0xff]  ;;  %v1121_v21 = vld [vmem:[%s10733_s30 + $0x1398] sm:$0xff] }
 0x569   : > { %4788 = vmatpush1.bf16.msra.mxu0 %v2690_v7  ;;  %6100 = vmatpush1.bf16.msra.mxu1 %v2692_v9  ;;  %v2730_v7 = vunpack.c.h.s8.bf16 %v1098_v32  ;;  %v2732_v9 = vunpack.c.h.s8.bf16 %v1100_v20  ;;  %v1118_v32 = vld [vmem:[%s10733_s30 + $0x1380] sm:$0xff]  ;;  %v1120_v20 = vld [vmem:[%s10733_s30 + $0x1390] sm:$0xff] }
 0x56a   : > { %4789 = vmatprep.subr.bf16.mxu0 %v2695_v11  ;;  %6101 = vmatprep.subr.bf16.mxu1 %v2697_v27  ;;  %v2735_v11 = vunpack.c.l.s8.bf16 %v1103_v6  ;;  %v2737_v27 = vunpack.c.l.s8.bf16 %v1105_v23  ;;  %v1125_v23 = vld [vmem:[%s10733_s30 + $0x13b8] sm:$0xff] }
 0x56d   : > { %4790 = vmatpush1.bf16.msra.mxu0 %v2694_v14  ;;  %6102 = vmatpush1.bf16.msra.mxu1 %v2696_v15  ;;  %v11598_v14 = vrot.slane %v11551_v29, %v10781_v49  ;;  %v2734_v15 = vunpack.c.l.s8.bf16 %v1102_v12  ;;  %v2738_v29 = vunpack.c.h.s8.bf16 %v1102_v12  ;;  %v1122_v12 = vld [vmem:[%s10733_s30 + $0x13a0] sm:$0xff] }
 0x56e   : > { %4791 = vmatprep.subr.bf16.mxu0 %v2699_v16  ;;  %6103 = vmatprep.subr.bf16.mxu1 %v2701_v25  ;;  %v2736_v16 = vunpack.c.l.s8.bf16 %v1104_v13  ;;  %v2739_v25 = vunpack.c.h.s8.bf16 %v1103_v6  ;;  %v1123_v6 = vld [vmem:[%s10733_s30 + $0x13a8] sm:$0xff] }
 0x571   : > { %4792 = vmatpush1.bf16.msra.mxu0 %v2698_v18  ;;  %6104 = vmatpush1.bf16.msra.mxu1 %v2700_v19  ;;  %v1109_v18 = vld [vmem:[%s10733_s30 + $0x1338] sm:$0xff]  ;;  %v3827_v19 = vcombine.high %v11562_v59, %v11562_v59  ;;  %v2742_v59 = vunpack.c.l.s8.bf16 %v1106_v44 }
 0x572   : > { %4793 = vmatprep.subr.bf16.mxu0 %v2703_v22  ;;  %6105 = vmatprep.subr.bf16.mxu1 %v2705_v41  ;;  %v2740_v22 = vunpack.c.h.s8.bf16 %v1104_v13  ;;  %v2743_v41 = vunpack.c.l.s8.bf16 %v1107_v35  ;;  %v2745_v37 = vunpack.c.l.s8.bf16 %v1109_v18  ;;  %v1124_v13 = vld [vmem:[%s10733_s30 + $0x13b0] sm:$0xff] }
 0x575   : > { %4794 = vmatpush1.bf16.msra.mxu0 %v2702_v26  ;;  %6106 = vmatpush1.bf16.msra.mxu1 %v2704_v43  ;;  %v1108_v26 = vld [vmem:[%s10733_s30 + $0x1330] sm:$0xff] }
 0x576   : > { %4795 = vmatprep.subr.bf16.mxu0 %v2707_v1  ;;  %6107 = vmatprep.subr.bf16.mxu1 %v2709_v53  ;;  %v2744_v43 = vunpack.c.l.s8.bf16 %v1108_v26  ;;  %v2747_v1 = vunpack.c.h.s8.bf16 %v1107_v35  ;;  %v2749_v53 = vunpack.c.h.s8.bf16 %v1109_v18  ;;  %v1127_v35 = vld [vmem:[%s10733_s30 + $0x13c8] sm:$0xff]  ;;  %v1129_v18 = vld [vmem:[%s10733_s30 + $0x13d8] sm:$0xff] }
 0x579   : > { %4796 = vmatpush1.bf16.msra.mxu0 %v2706_v4  ;;  %6108 = vmatpush1.bf16.msra.mxu1 %v2708_v57  ;;  %v2746_v4 = vunpack.c.h.s8.bf16 %v1106_v44  ;;  %v2748_v57 = vunpack.c.h.s8.bf16 %v1108_v26  ;;  %v1128_v44 = vld [vmem:[%s10733_s30 + $0x13d0] sm:$0xff] }
 0x57a   : > { %4797 = vmatprep.subr.bf16.mxu0 %v2711_v33  ;;  %6109 = vmatprep.subr.bf16.mxu1 %v2713_v55  ;;  %v2751_v33 = vunpack.c.l.s8.bf16 %v1111_v30  ;;  %v2753_v55 = vunpack.c.l.s8.bf16 %v1113_v31 }
 0x57d   : > { %4798 = vmatpush1.bf16.msra.mxu0 %v2710_v39  ;;  %6110 = vmatpush1.bf16.msra.mxu1 %v2712_v61  ;;  %v2750_v39 = vunpack.c.l.s8.bf16 %v1110_v34  ;;  %v2752_v61 = vunpack.c.l.s8.bf16 %v1112_v36 }
 0x57e   : > { %4799 = vmatprep.subr.bf16.mxu0 %v2715_v40  ;;  %6111 = vmatprep.subr.bf16.mxu1 %v2717_v42  ;;  %v2755_v40 = vunpack.c.h.s8.bf16 %v1111_v30  ;;  %v2757_v42 = vunpack.c.h.s8.bf16 %v1113_v31  ;;  %v1133_v30 = vld [vmem:[%s10733_s30 + $0x13f8] sm:$0xff] }
 0x581   : > { %4800 = vmatpush1.bf16.msra.mxu0 %v2714_v50  ;;  %6112 = vmatpush1.bf16.msra.mxu1 %v2716_v47  ;;  %v2754_v50 = vunpack.c.h.s8.bf16 %v1110_v34  ;;  %v2756_v47 = vunpack.c.h.s8.bf16 %v1112_v36  ;;  %v1132_v34 = vld [vmem:[%s10733_s30 + $0x13f0] sm:$0xff]  ;;  %v11633_v36 = vld [vmem:[%s10755_s15 + $0x28] sm:$0xff] }
 0x582   : > { %4801 = vmatprep.subr.bf16.mxu0 %v2719_v48  ;;  %6113 = vmatprep.subr.bf16.mxu1 %v2721_v51  ;;  %v2759_v48 = vunpack.c.l.s8.bf16 %v1115_v45  ;;  %v2761_v51 = vunpack.c.l.s8.bf16 %v1117_v46 }
 0x585   : > { %4802 = vmatpush1.bf16.msra.mxu0 %v2718_v54  ;;  %6114 = vmatpush1.bf16.msra.mxu1 %v2720_v8  ;;  %v2758_v54 = vunpack.c.l.s8.bf16 %v1114_v52  ;;  %v2760_v8 = vunpack.c.l.s8.bf16 %v1116_v62 }
 0x586   : > { %4803 = vmatprep.subr.bf16.mxu0 %v2723_v5  ;;  %6115 = vmatprep.subr.bf16.mxu1 %v2725_v56  ;;  %v2763_v5 = vunpack.c.h.s8.bf16 %v1115_v45  ;;  %v2765_v56 = vunpack.c.h.s8.bf16 %v1117_v46  ;;  %v1135_v45 = vld [vmem:[%s10733_s30 + $0x1408] sm:$0xff]  ;;  %v1137_v46 = vld [vmem:[%s10733_s30 + $0x1418] sm:$0xff] }
 0x589   : > { %4804 = vmatpush1.bf16.msra.mxu0 %v2722_v10  ;;  %6116 = vmatpush1.bf16.msra.mxu1 %v2724_v28  ;;  %v2762_v10 = vunpack.c.h.s8.bf16 %v1114_v52  ;;  %v2764_v28 = vunpack.c.h.s8.bf16 %v1116_v62  ;;  %v2801_v52 = vunpack.c.l.s8.bf16 %v1137_v46  ;;  %v1134_v62 = vld [vmem:[%s10733_s30 + $0x1400] sm:$0xff] }
 0x58a   : > { %4805 = vmatprep.subr.bf16.mxu0 %v2727_v63  ;;  %6117 = vmatprep.subr.bf16.mxu1 %v2729_v0  ;;  %v2767_v63 = vunpack.c.l.s8.bf16 %v1119_v60  ;;  %v2769_v0 = vunpack.c.l.s8.bf16 %v1121_v21 }
 0x58d   : > { %4806 = vmatpush1.bf16.msra.mxu0 %v2726_v2  ;;  %6118 = vmatpush1.bf16.msra.mxu1 %v2728_v58  ;;  %v2766_v2 = vunpack.c.l.s8.bf16 %v1118_v32  ;;  %v2768_v58 = vunpack.c.l.s8.bf16 %v1120_v20 }
 0x58e   : > { %4807 = vmatprep.subr.bf16.mxu0 %v2731_v3  ;;  %6119 = vmatprep.subr.bf16.mxu1 %v2733_v24  ;;  %v2771_v3 = vunpack.c.h.s8.bf16 %v1119_v60  ;;  %v2773_v24 = vunpack.c.h.s8.bf16 %v1121_v21  ;;  %v2803_v21 = vunpack.c.h.s8.bf16 %v1135_v45 }
 0x591   : > { %4808 = vmatpush1.bf16.msra.mxu0 %v2730_v7  ;;  %6120 = vmatpush1.bf16.msra.mxu1 %v2732_v9  ;;  %v2770_v7 = vunpack.c.h.s8.bf16 %v1118_v32  ;;  %v2772_v9 = vunpack.c.h.s8.bf16 %v1120_v20 }
 0x592   : > { %4818 = vmatprep.subr.bf16.mxu0 %v2735_v11  ;;  %6130 = vmatprep.subr.bf16.mxu1 %v2737_v27  ;;  %v2775_v11 = vunpack.c.l.s8.bf16 %v1123_v6  ;;  %v2777_v27 = vunpack.c.l.s8.bf16 %v1125_v23 }
 0x594   : > { %4810 = vmatmul.mubr.bf16.vlgmr.msra.gmra.mrb[0].mxu0 %v11598_v14  ;;  %6122 = vmatmul.mubr.bf16.vlgmr.msra.gmra.mrb[0].mxu1 %v11598_v14 }
 0x595   : > { %4819 = vmatpush1.bf16.msra.mxu0 %v2734_v15  ;;  %6131 = vmatpush1.bf16.msra.mxu1 %v2736_v16  ;;  %v2774_v15 = vunpack.c.l.s8.bf16 %v1122_v12  ;;  %v2776_v16 = vunpack.c.l.s8.bf16 %v1124_v13 }
 0x596   : > { %4820 = vmatprep.subr.bf16.mxu0 %v2739_v25  ;;  %6132 = vmatprep.subr.bf16.mxu1 %v2741_v17  ;;  %v2779_v25 = vunpack.c.h.s8.bf16 %v1123_v6  ;;  %v2781_v17 = vunpack.c.h.s8.bf16 %v1125_v23 }
 0x597   : > { %4850 = vmatprep.mubr.bf16.mxu0 %v3827_v19  ;;  %6162 = vmatprep.mubr.bf16.mxu1 %v3827_v19  ;;  %v2778_v19 = vunpack.c.h.s8.bf16 %v1122_v12 }
 0x599   : > { %4821 = vmatpush1.bf16.msra.mxu0 %v2738_v29  ;;  %6133 = vmatpush1.bf16.msra.mxu1 %v2740_v22  ;;  %v2780_v29 = vunpack.c.h.s8.bf16 %v1124_v13  ;;  %v2783_v22 = vunpack.c.l.s8.bf16 %v1127_v35 }
 0x59a   : > { %4822 = vmatprep.subr.bf16.mxu0 %v2743_v41  ;;  %6134 = vmatprep.subr.bf16.mxu1 %v2745_v37  ;;  %v2785_v41 = vunpack.c.l.s8.bf16 %v1129_v18  ;;  %v1126_v37 = vld [vmem:[%s10733_s30 + $0x13c0] sm:$0xff] }
 0x59b   : > { %v2782_v26 = vunpack.c.l.s8.bf16 %v1126_v37  ;;  %v2786_v31 = vunpack.c.h.s8.bf16 %v1126_v37 }
 0x59d   : > { %4823 = vmatpush1.bf16.msra.mxu0 %v2742_v59  ;;  %6135 = vmatpush1.bf16.msra.mxu1 %v2744_v43  ;;  %v2784_v59 = vunpack.c.l.s8.bf16 %v1128_v44  ;;  %v2787_v43 = vunpack.c.h.s8.bf16 %v1127_v35 }
 0x59e   : > { %4824 = vmatprep.subr.bf16.mxu0 %v2747_v1  ;;  %6136 = vmatprep.subr.bf16.mxu1 %v2749_v53  ;;  %v2789_v1 = vunpack.c.h.s8.bf16 %v1129_v18  ;;  %v1131_v53 = vld [vmem:[%s10733_s30 + $0x13e8] sm:$0xff] }
 0x5a1   : > { %4825 = vmatpush1.bf16.msra.mxu0 %v2746_v4  ;;  %6137 = vmatpush1.bf16.msra.mxu1 %v2748_v57  ;;  %v2788_v4 = vunpack.c.h.s8.bf16 %v1128_v44  ;;  %v2791_v57 = vunpack.c.l.s8.bf16 %v1131_v53 }
 0x5a2   : > { %4826 = vmatprep.subr.bf16.mxu0 %v2751_v33  ;;  %6138 = vmatprep.subr.bf16.mxu1 %v2753_v55  ;;  %v2793_v33 = vunpack.c.l.s8.bf16 %v1133_v30  ;;  %v1130_v55 = vld [vmem:[%s10733_s30 + $0x13e0] sm:$0xff] }
 0x5a5   : > { %4827 = vmatpush1.bf16.msra.mxu0 %v2750_v39  ;;  %6139 = vmatpush1.bf16.msra.mxu1 %v2752_v61  ;;  %v2790_v39 = vunpack.c.l.s8.bf16 %v1130_v55  ;;  %v2792_v61 = vunpack.c.l.s8.bf16 %v1132_v34 }
 0x5a6   : > { %4828 = vmatprep.subr.bf16.mxu0 %v2755_v40  ;;  %6140 = vmatprep.subr.bf16.mxu1 %v2757_v42  ;;  %v2795_v40 = vunpack.c.h.s8.bf16 %v1131_v53  ;;  %v2797_v42 = vunpack.c.h.s8.bf16 %v1133_v30 }
 0x5a9   : > { %4829 = vmatpush1.bf16.msra.mxu0 %v2754_v50  ;;  %6141 = vmatpush1.bf16.msra.mxu1 %v2756_v47  ;;  %v11639_v50 = vrot.slane %v11633_v36, %v10781_v49  ;;  %v2794_v47 = vunpack.c.h.s8.bf16 %v1130_v55 }
 0x5aa   : > { %4830 = vmatprep.subr.bf16.mxu0 %v2759_v48  ;;  %6142 = vmatprep.subr.bf16.mxu1 %v2761_v51  ;;  %v2796_v48 = vunpack.c.h.s8.bf16 %v1132_v34  ;;  %v2799_v51 = vunpack.c.l.s8.bf16 %v1135_v45 }
 0x5ad   : > { %4831 = vmatpush1.bf16.msra.mxu0 %v2758_v54  ;;  %6143 = vmatpush1.bf16.msra.mxu1 %v2760_v8  ;;  %v1136_v54 = vld [vmem:[%s10733_s30 + $0x1410] sm:$0xff]  ;;  %v3843_v8 = vcombine.high %v11639_v50, %v11639_v50 }
 0x5ae   : > { %4832 = vmatprep.subr.bf16.mxu0 %v2763_v5  ;;  %6144 = vmatprep.subr.bf16.mxu1 %v2765_v56  ;;  %v3825_v5 = vcombine.high %v11598_v14, %v11598_v14  ;;  %v2798_v56 = vunpack.c.l.s8.bf16 %v1134_v62  ;;  %v2800_v60 = vunpack.c.l.s8.bf16 %v1136_v54  ;;  %v2802_v14 = vunpack.c.h.s8.bf16 %v1134_v62 }
 0x5af   : > { %v2804_v32 = vunpack.c.h.s8.bf16 %v1136_v54 }
 0x5b1   : > { %4833 = vmatpush1.bf16.msra.mxu0 %v2762_v10  ;;  %6145 = vmatpush1.bf16.msra.mxu1 %v2764_v28  ;;  %v2805_v10 = vunpack.c.h.s8.bf16 %v1137_v46  ;;  %v1139_v28 = vld [vmem:[%s10733_s30 + $0x1428] sm:$0xff] }
 0x5b2   : > { %4834 = vmatprep.subr.bf16.mxu0 %v2767_v63  ;;  %6146 = vmatprep.subr.bf16.mxu1 %v2769_v0  ;;  %v1141_v63 = vld [vmem:[%s10733_s30 + $0x1438] sm:$0xff]  ;;  %v11650_v0 = vrot.slane %v3843_v8, %v10781_v49  ;;  %v2807_v20 = vunpack.c.l.s8.bf16 %v1139_v28  ;;  %v2811_v23 = vunpack.c.h.s8.bf16 %v1139_v28 }
 0x5b5   : > { %4835 = vmatpush1.bf16.msra.mxu0 %v2766_v2  ;;  %6147 = vmatpush1.bf16.msra.mxu1 %v2768_v58  ;;  %v2809_v2 = vunpack.c.l.s8.bf16 %v1141_v63  ;;  %v1138_v58 = vld [vmem:[%s10733_s30 + $0x1420] sm:$0xff] }
 0x5b6   : > { %4836 = vmatprep.subr.bf16.mxu0 %v2771_v3  ;;  %6148 = vmatprep.subr.bf16.mxu1 %v2773_v24  ;;  %v1140_v3 = vld [vmem:[%s10733_s30 + $0x1430] sm:$0xff]  ;;  %v2806_v24 = vunpack.c.l.s8.bf16 %v1138_v58 }
 0x5b7   : > { %v2808_v6 = vunpack.c.l.s8.bf16 %v1140_v3  ;;  %v2812_v12 = vunpack.c.h.s8.bf16 %v1140_v3  ;;  %v1158_v3 = vld [vmem:[%s10733_s30 + $0x14c0] sm:$0xff] }
 0x5b9   : > { %4837 = vmatpush1.bf16.msra.mxu0 %v2770_v7  ;;  %6149 = vmatpush1.bf16.msra.mxu1 %v2772_v9  ;;  %v2813_v7 = vunpack.c.h.s8.bf16 %v1141_v63  ;;  %v1143_v9 = vld [vmem:[%s10733_s30 + $0x1448] sm:$0xff] }
 0x5ba   : > { %4838 = vmatprep.subr.bf16.mxu0 %v2775_v11  ;;  %6150 = vmatprep.subr.bf16.mxu1 %v2777_v27  ;;  %v1145_v11 = vld [vmem:[%s10733_s30 + $0x1458] sm:$0xff]  ;;  %v2810_v27 = vunpack.c.h.s8.bf16 %v1138_v58  ;;  %v2815_v13 = vunpack.c.l.s8.bf16 %v1143_v9  ;;  %v2819_v18 = vunpack.c.h.s8.bf16 %v1143_v9  ;;  %v1159_v63 = vld [vmem:[%s10733_s30 + $0x14c8] sm:$0xff] }
 0x5bd   : > { %4839 = vmatpush1.bf16.msra.mxu0 %v2774_v15  ;;  %6151 = vmatpush1.bf16.msra.mxu1 %v2776_v16  ;;  %v2817_v15 = vunpack.c.l.s8.bf16 %v1145_v11  ;;  %v1142_v16 = vld [vmem:[%s10733_s30 + $0x1440] sm:$0xff] }
 0x5be   : > { %4840 = vmatprep.subr.bf16.mxu0 %v2779_v25  ;;  %6152 = vmatprep.subr.bf16.mxu1 %v2781_v17  ;;  %v1144_v25 = vld [vmem:[%s10733_s30 + $0x1450] sm:$0xff]  ;;  %v2814_v17 = vunpack.c.l.s8.bf16 %v1142_v16 }
 0x5bf   : > { %v2816_v35 = vunpack.c.l.s8.bf16 %v1144_v25  ;;  %v2820_v37 = vunpack.c.h.s8.bf16 %v1144_v25  ;;  %v1162_v25 = vld [vmem:[%s10733_s30 + $0x14e0] sm:$0xff] }
 0x5c1   : > { %4841 = vmatpush1.bf16.msra.mxu0 %v2778_v19  ;;  %6153 = vmatpush1.bf16.msra.mxu1 %v2780_v29  ;;  %v2821_v19 = vunpack.c.h.s8.bf16 %v1145_v11  ;;  %v1147_v29 = vld [vmem:[%s10733_s30 + $0x1468] sm:$0xff] }
 0x5c2   : > { %4842 = vmatprep.subr.bf16.mxu0 %v2783_v22  ;;  %6154 = vmatprep.subr.bf16.mxu1 %v2785_v41  ;;  %v1149_v22 = vld [vmem:[%s10733_s30 + $0x1478] sm:$0xff]  ;;  %v2818_v41 = vunpack.c.h.s8.bf16 %v1142_v16  ;;  %v2823_v44 = vunpack.c.l.s8.bf16 %v1147_v29  ;;  %v2827_v30 = vunpack.c.h.s8.bf16 %v1147_v29  ;;  %v1163_v11 = vld [vmem:[%s10733_s30 + $0x14e8] sm:$0xff] }
 0x5c5   : > { %4843 = vmatpush1.bf16.msra.mxu0 %v2782_v26  ;;  %6155 = vmatpush1.bf16.msra.mxu1 %v2784_v59  ;;  %v2825_v26 = vunpack.c.l.s8.bf16 %v1149_v22  ;;  %v1146_v59 = vld [vmem:[%s10733_s30 + $0x1460] sm:$0xff] }
 0x5c6   : > { %4844 = vmatprep.subr.bf16.mxu0 %v2787_v43  ;;  %6156 = vmatprep.subr.bf16.mxu1 %v2789_v1  ;;  %v1148_v43 = vld [vmem:[%s10733_s30 + $0x1470] sm:$0xff]  ;;  %v2822_v1 = vunpack.c.l.s8.bf16 %v1146_v59 }
 0x5c7   : > { %v2824_v53 = vunpack.c.l.s8.bf16 %v1148_v43  ;;  %v2828_v55 = vunpack.c.h.s8.bf16 %v1148_v43  ;;  %v1166_v43 = vld [vmem:[%s10733_s30 + $0x1500] sm:$0xff] }
 0x5c9   : > { %4845 = vmatpush1.bf16.msra.mxu0 %v2786_v31  ;;  %6157 = vmatpush1.bf16.msra.mxu1 %v2788_v4  ;;  %v2829_v31 = vunpack.c.h.s8.bf16 %v1149_v22  ;;  %v1151_v4 = vld [vmem:[%s10733_s30 + $0x1488] sm:$0xff] }
 0x5ca   : > { %4846 = vmatprep.subr.bf16.mxu0 %v2791_v57  ;;  %6158 = vmatprep.subr.bf16.mxu1 %v2793_v33  ;;  %v1153_v57 = vld [vmem:[%s10733_s30 + $0x1498] sm:$0xff]  ;;  %v2826_v33 = vunpack.c.h.s8.bf16 %v1146_v59  ;;  %v2831_v34 = vunpack.c.l.s8.bf16 %v1151_v4  ;;  %v2835_v46 = vunpack.c.h.s8.bf16 %v1151_v4  ;;  %v1167_v22 = vld [vmem:[%s10733_s30 + $0x1508] sm:$0xff] }
 0x5cb   : > { %v2867_v4 = vunpack.c.h.s8.bf16 %v1167_v22 }
 0x5cd   : > { %4847 = vmatpush1.bf16.msra.mxu0 %v2790_v39  ;;  %6159 = vmatpush1.bf16.msra.mxu1 %v2792_v61  ;;  %v2833_v39 = vunpack.c.l.s8.bf16 %v1153_v57  ;;  %v1150_v61 = vld [vmem:[%s10733_s30 + $0x1480] sm:$0xff] }
 0x5ce   : > { %4848 = vmatprep.subr.bf16.mxu0 %v2795_v40  ;;  %6160 = vmatprep.subr.bf16.mxu1 %v2797_v42  ;;  %v1152_v40 = vld [vmem:[%s10733_s30 + $0x1490] sm:$0xff]  ;;  %v2830_v42 = vunpack.c.l.s8.bf16 %v1150_v61 }
 0x5cf   : > { %v2832_v45 = vunpack.c.l.s8.bf16 %v1152_v40  ;;  %v2836_v62 = vunpack.c.h.s8.bf16 %v1152_v40 }
 0x5d1   : > { %4849 = vmatpush1.bf16.msra.mxu0 %v2794_v47  ;;  %6161 = vmatpush1.bf16.msra.mxu1 %v2796_v48  ;;  %v2837_v47 = vunpack.c.h.s8.bf16 %v1153_v57  ;;  %v1155_v48 = vld [vmem:[%s10733_s30 + $0x14a8] sm:$0xff] }
 0x5d2   : > { %4859 = vmatprep.subr.bf16.mxu0 %v2799_v51  ;;  %6171 = vmatprep.subr.bf16.mxu1 %v2801_v52  ;;  %v1157_v51 = vld [vmem:[%s10733_s30 + $0x14b8] sm:$0xff]  ;;  %v2834_v52 = vunpack.c.h.s8.bf16 %v1150_v61  ;;  %v2839_v54 = vunpack.c.l.s8.bf16 %v1155_v48 }
 0x5d3   : > { %v2841_v8 = vunpack.c.l.s8.bf16 %v1157_v51  ;;  %v2845_v28 = vunpack.c.h.s8.bf16 %v1157_v51  ;;  %v1175_v51 = vld [vmem:[%s10733_s30 + $0x1548] sm:$0xff] }
 0x5d4   : > { %4851 = vmatmul.mubr.bf16.vlgmr.msra.gmra.mrb[0].mxu0 %v3825_v5  ;;  %6163 = vmatmul.mubr.bf16.vlgmr.msra.gmra.mrb[0].mxu1 %v3825_v5  ;;  %v1154_v5 = vld [vmem:[%s10733_s30 + $0x14a0] sm:$0xff] }
 0x5d5   : > { %4860 = vmatpush1.bf16.msra.mxu0 %v2798_v56  ;;  %6172 = vmatpush1.bf16.msra.mxu1 %v2800_v60  ;;  %v1156_v56 = vld [vmem:[%s10733_s30 + $0x14b0] sm:$0xff]  ;;  %v2838_v60 = vunpack.c.l.s8.bf16 %v1154_v5 }
 0x5d6   : > { %4861 = vmatprep.subr.bf16.mxu0 %v2803_v21  ;;  %6173 = vmatprep.subr.bf16.mxu1 %v2805_v10  ;;  %v2840_v21 = vunpack.c.l.s8.bf16 %v1156_v56  ;;  %v2843_v10 = vunpack.c.h.s8.bf16 %v1155_v48 }
 0x5d7   : > { %4891 = vmatprep.mubr.bf16.mxu0 %v11650_v0  ;;  %6203 = vmatprep.mubr.bf16.mxu1 %v11650_v0 }
 0x5d9   : > { %4862 = vmatpush1.bf16.msra.mxu0 %v2802_v14  ;;  %6174 = vmatpush1.bf16.msra.mxu1 %v2804_v32  ;;  %v1161_v14 = vld [vmem:[%s10733_s30 + $0x14d8] sm:$0xff]  ;;  %v2842_v32 = vunpack.c.h.s8.bf16 %v1154_v5 }
 0x5da   : > { %4863 = vmatprep.subr.bf16.mxu0 %v2807_v20  ;;  %6175 = vmatprep.subr.bf16.mxu1 %v2809_v2  ;;  %v2844_v20 = vunpack.c.h.s8.bf16 %v1156_v56  ;;  %v2847_v2 = vunpack.c.l.s8.bf16 %v1159_v63  ;;  %v2849_v58 = vunpack.c.l.s8.bf16 %v1161_v14  ;;  %v2853_v9 = vunpack.c.h.s8.bf16 %v1161_v14  ;;  %v1174_v56 = vld [vmem:[%s10733_s30 + $0x1540] sm:$0xff]  ;;  %v1179_v14 = vld [vmem:[%s10733_s30 + $0x1568] sm:$0xff] }
 0x5dd   : > { %4864 = vmatpush1.bf16.msra.mxu0 %v2806_v24  ;;  %6176 = vmatpush1.bf16.msra.mxu1 %v2808_v6  ;;  %v1160_v24 = vld [vmem:[%s10733_s30 + $0x14d0] sm:$0xff]  ;;  %v2846_v6 = vunpack.c.l.s8.bf16 %v1158_v3 }
 0x5de   : > { %4865 = vmatprep.subr.bf16.mxu0 %v2811_v23  ;;  %6177 = vmatprep.subr.bf16.mxu1 %v2813_v7  ;;  %v2848_v23 = vunpack.c.l.s8.bf16 %v1160_v24  ;;  %v2851_v7 = vunpack.c.h.s8.bf16 %v1159_v63 }
 0x5e1   : > { %4866 = vmatpush1.bf16.msra.mxu0 %v2810_v27  ;;  %6178 = vmatpush1.bf16.msra.mxu1 %v2812_v12  ;;  %v1165_v27 = vld [vmem:[%s10733_s30 + $0x14f8] sm:$0xff]  ;;  %v2850_v12 = vunpack.c.h.s8.bf16 %v1158_v3 }
 0x5e2   : > { %4867 = vmatprep.subr.bf16.mxu0 %v2815_v13  ;;  %6179 = vmatprep.subr.bf16.mxu1 %v2817_v15  ;;  %v2852_v13 = vunpack.c.h.s8.bf16 %v1160_v24  ;;  %v2855_v15 = vunpack.c.l.s8.bf16 %v1163_v11  ;;  %v2857_v16 = vunpack.c.l.s8.bf16 %v1165_v27  ;;  %v2861_v29 = vunpack.c.h.s8.bf16 %v1165_v27  ;;  %v1178_v24 = vld [vmem:[%s10733_s30 + $0x1560] sm:$0xff]  ;;  %v1183_v27 = vld [vmem:[%s10733_s30 + $0x1588] sm:$0xff] }
 0x5e5   : > { %4868 = vmatpush1.bf16.msra.mxu0 %v2814_v17  ;;  %6180 = vmatpush1.bf16.msra.mxu1 %v2816_v35  ;;  %v1164_v17 = vld [vmem:[%s10733_s30 + $0x14f0] sm:$0xff]  ;;  %v2854_v35 = vunpack.c.l.s8.bf16 %v1162_v25 }
 0x5e6   : > { %4869 = vmatprep.subr.bf16.mxu0 %v2819_v18  ;;  %6181 = vmatprep.subr.bf16.mxu1 %v2821_v19  ;;  %v2856_v18 = vunpack.c.l.s8.bf16 %v1164_v17  ;;  %v2859_v19 = vunpack.c.h.s8.bf16 %v1163_v11 }
 0x5e9   : > { %4870 = vmatpush1.bf16.msra.mxu0 %v2818_v41  ;;  %6182 = vmatpush1.bf16.msra.mxu1 %v2820_v37  ;;  %v1169_v41 = vld [vmem:[%s10733_s30 + $0x1518] sm:$0xff]  ;;  %v2858_v37 = vunpack.c.h.s8.bf16 %v1162_v25 }
 0x5ea   : > { %4871 = vmatprep.subr.bf16.mxu0 %v2823_v44  ;;  %6183 = vmatprep.subr.bf16.mxu1 %v2825_v26  ;;  %v2860_v44 = vunpack.c.h.s8.bf16 %v1164_v17  ;;  %v2863_v26 = vunpack.c.l.s8.bf16 %v1167_v22  ;;  %v2865_v59 = vunpack.c.l.s8.bf16 %v1169_v41  ;;  %v2869_v57 = vunpack.c.h.s8.bf16 %v1169_v41  ;;  %v1182_v17 = vld [vmem:[%s10733_s30 + $0x1580] sm:$0xff]  ;;  %v1187_v41 = vld [vmem:[%s10733_s30 + $0x15a8] sm:$0xff] }
 0x5ed   : > { %4872 = vmatpush1.bf16.msra.mxu0 %v2822_v1  ;;  %6184 = vmatpush1.bf16.msra.mxu1 %v2824_v53  ;;  %v1168_v1 = vld [vmem:[%s10733_s30 + $0x1510] sm:$0xff]  ;;  %v11686_v53 = vrot.slane %v11639_v50, %v10781_v49  ;;  %v2866_v50 = vunpack.c.h.s8.bf16 %v1166_v43 }
 0x5ee   : > { %4873 = vmatprep.subr.bf16.mxu0 %v2827_v30  ;;  %6185 = vmatprep.subr.bf16.mxu1 %v2829_v31  ;;  %v2862_v30 = vunpack.c.l.s8.bf16 %v1166_v43  ;;  %v2864_v31 = vunpack.c.l.s8.bf16 %v1168_v1 }
 0x5f1   : > { %4874 = vmatpush1.bf16.msra.mxu0 %v2826_v33  ;;  %6186 = vmatpush1.bf16.msra.mxu1 %v2828_v55  ;;  %v1171_v33 = vld [vmem:[%s10733_s30 + $0x1528] sm:$0xff]  ;;  %v1173_v55 = vld [vmem:[%s10733_s30 + $0x1538] sm:$0xff] }
 0x5f2   : > { %4875 = vmatprep.subr.bf16.mxu0 %v2831_v34  ;;  %6187 = vmatprep.subr.bf16.mxu1 %v2833_v39  ;;  %v3875_v34 = vcombine.high %v11650_v0, %v11650_v0  ;;  %v2868_v39 = vunpack.c.h.s8.bf16 %v1168_v1  ;;  %v2871_v61 = vunpack.c.l.s8.bf16 %v1171_v33  ;;  %v2873_v40 = vunpack.c.l.s8.bf16 %v1173_v55  ;;  %v1186_v1 = vld [vmem:[%s10733_s30 + $0x15a0] sm:$0xff] }
 0x5f3   : > { %v2877_v48 = vunpack.c.h.s8.bf16 %v1173_v55  ;;  %v1191_v55 = vld [vmem:[%s10733_s30 + $0x15c8] sm:$0xff] }
 0x5f5   : > { %4876 = vmatpush1.bf16.msra.mxu0 %v2830_v42  ;;  %6188 = vmatpush1.bf16.msra.mxu1 %v2832_v45  ;;  %v1170_v42 = vld [vmem:[%s10733_s30 + $0x1520] sm:$0xff]  ;;  %v1172_v45 = vld [vmem:[%s10733_s30 + $0x1530] sm:$0xff] }
 0x5f6   : > { %4877 = vmatprep.subr.bf16.mxu0 %v2835_v46  ;;  %6189 = vmatprep.subr.bf16.mxu1 %v2837_v47  ;;  %v2870_v0 = vunpack.c.l.s8.bf16 %v1170_v42  ;;  %v2872_v46 = vunpack.c.l.s8.bf16 %v1172_v45  ;;  %v2875_v47 = vunpack.c.h.s8.bf16 %v1171_v33 }
 0x5f9   : > { %4878 = vmatpush1.bf16.msra.mxu0 %v2834_v52  ;;  %6190 = vmatpush1.bf16.msra.mxu1 %v2836_v62  ;;  %v1177_v52 = vld [vmem:[%s10733_s30 + $0x1558] sm:$0xff]  ;;  %v2874_v62 = vunpack.c.h.s8.bf16 %v1170_v42  ;;  %v1190_v42 = vld [vmem:[%s10733_s30 + $0x15c0] sm:$0xff] }
 0x5fa   : > { %4879 = vmatprep.subr.bf16.mxu0 %v2839_v54  ;;  %6191 = vmatprep.subr.bf16.mxu1 %v2841_v8  ;;  %v2876_v54 = vunpack.c.h.s8.bf16 %v1172_v45  ;;  %v2879_v8 = vunpack.c.l.s8.bf16 %v1175_v51  ;;  %v2881_v5 = vunpack.c.l.s8.bf16 %v1177_v52  ;;  %v2885_v63 = vunpack.c.h.s8.bf16 %v1177_v52  ;;  %v1192_v45 = vld [vmem:[%s10733_s30 + $0x15d0] sm:$0xff]  ;;  %v1197_v52 = vld [vmem:[%s10733_s30 + $0x15f8] sm:$0xff] }
 0x5fd   : > { %4880 = vmatpush1.bf16.msra.mxu0 %v2838_v60  ;;  %6192 = vmatpush1.bf16.msra.mxu1 %v2840_v21  ;;  %v1176_v60 = vld [vmem:[%s10733_s30 + $0x1550] sm:$0xff]  ;;  %v2878_v21 = vunpack.c.l.s8.bf16 %v1174_v56 }
 0x5fe   : > { %4881 = vmatprep.subr.bf16.mxu0 %v2843_v10  ;;  %6193 = vmatprep.subr.bf16.mxu1 %v2845_v28  ;;  %v2880_v10 = vunpack.c.l.s8.bf16 %v1176_v60  ;;  %v2883_v28 = vunpack.c.h.s8.bf16 %v1175_v51  ;;  %v1195_v51 = vld [vmem:[%s10733_s30 + $0x15e8] sm:$0xff] }
 0x601   : > { %4882 = vmatpush1.bf16.msra.mxu0 %v2842_v32  ;;  %6194 = vmatpush1.bf16.msra.mxu1 %v2844_v20  ;;  %v1181_v32 = vld [vmem:[%s10733_s30 + $0x1578] sm:$0xff]  ;;  %v2882_v20 = vunpack.c.h.s8.bf16 %v1174_v56  ;;  %v1194_v56 = vld [vmem:[%s10733_s30 + $0x15e0] sm:$0xff] }
 0x602   : > { %4883 = vmatprep.subr.bf16.mxu0 %v2847_v2  ;;  %6195 = vmatprep.subr.bf16.mxu1 %v2849_v58  ;;  %v2884_v2 = vunpack.c.h.s8.bf16 %v1176_v60  ;;  %v2887_v58 = vunpack.c.l.s8.bf16 %v1179_v14  ;;  %v2889_v3 = vunpack.c.l.s8.bf16 %v1181_v32  ;;  %v2893_v11 = vunpack.c.h.s8.bf16 %v1181_v32  ;;  %v1196_v60 = vld [vmem:[%s10733_s30 + $0x15f0] sm:$0xff]  ;;  %v1199_v32 = vld [vmem:[%s10733_s30 + $0x1608] sm:$0xff] }
 0x605   : > { %4884 = vmatpush1.bf16.msra.mxu0 %v2846_v6  ;;  %6196 = vmatpush1.bf16.msra.mxu1 %v2848_v23  ;;  %v1180_v6 = vld [vmem:[%s10733_s30 + $0x1570] sm:$0xff]  ;;  %v2886_v23 = vunpack.c.l.s8.bf16 %v1178_v24 }
 0x606   : > { %4885 = vmatprep.subr.bf16.mxu0 %v2851_v7  ;;  %6197 = vmatprep.subr.bf16.mxu1 %v2853_v9  ;;  %v2888_v7 = vunpack.c.l.s8.bf16 %v1180_v6  ;;  %v2891_v9 = vunpack.c.h.s8.bf16 %v1179_v14  ;;  %v2925_v14 = vunpack.c.h.s8.bf16 %v1197_v52 }
 0x609   : > { %4886 = vmatpush1.bf16.msra.mxu0 %v2850_v12  ;;  %6198 = vmatpush1.bf16.msra.mxu1 %v2852_v13  ;;  %v1185_v12 = vld [vmem:[%s10733_s30 + $0x1598] sm:$0xff]  ;;  %v2890_v13 = vunpack.c.h.s8.bf16 %v1178_v24 }
 0x60a   : > { %4887 = vmatprep.subr.bf16.mxu0 %v2855_v15  ;;  %6199 = vmatprep.subr.bf16.mxu1 %v2857_v16  ;;  %v2892_v15 = vunpack.c.h.s8.bf16 %v1180_v6  ;;  %v2895_v16 = vunpack.c.l.s8.bf16 %v1183_v27  ;;  %v2897_v25 = vunpack.c.l.s8.bf16 %v1185_v12  ;;  %v2901_v22 = vunpack.c.h.s8.bf16 %v1185_v12  ;;  %v1198_v6 = vld [vmem:[%s10733_s30 + $0x1600] sm:$0xff] }
 0x60b   : > { %v2931_v12 = vunpack.c.h.s8.bf16 %v1199_v32 }
 0x60d   : > { %4888 = vmatpush1.bf16.msra.mxu0 %v2854_v35  ;;  %6200 = vmatpush1.bf16.msra.mxu1 %v2856_v18  ;;  %v1184_v35 = vld [vmem:[%s10733_s30 + $0x1590] sm:$0xff]  ;;  %v2894_v18 = vunpack.c.l.s8.bf16 %v1182_v17 }
 0x60e   : > { %4889 = vmatprep.subr.bf16.mxu0 %v2859_v19  ;;  %6201 = vmatprep.subr.bf16.mxu1 %v2861_v29  ;;  %v2896_v19 = vunpack.c.l.s8.bf16 %v1184_v35  ;;  %v2899_v29 = vunpack.c.h.s8.bf16 %v1183_v27 }
 0x611   : > { %4890 = vmatpush1.bf16.msra.mxu0 %v2858_v37  ;;  %6202 = vmatpush1.bf16.msra.mxu1 %v2860_v44  ;;  %v1189_v37 = vld [vmem:[%s10733_s30 + $0x15b8] sm:$0xff]  ;;  %v2898_v44 = vunpack.c.h.s8.bf16 %v1182_v17 }
 0x612   : > { %4900 = vmatprep.subr.bf16.mxu0 %v2863_v26  ;;  %6212 = vmatprep.subr.bf16.mxu1 %v2865_v59  ;;  %v2900_v26 = vunpack.c.h.s8.bf16 %v1184_v35  ;;  %v2903_v59 = vunpack.c.l.s8.bf16 %v1187_v41  ;;  %v2905_v43 = vunpack.c.l.s8.bf16 %v1189_v37  ;;  %v2909_v33 = vunpack.c.h.s8.bf16 %v1189_v37 }
 0x614   : > { %4892 = vmatmul.mubr.bf16.vlgmr.msra.gmra.mrb[0].mxu0 %v11686_v53  ;;  %6204 = vmatmul.mubr.bf16.vlgmr.msra.gmra.mrb[0].mxu1 %v11686_v53 }
 0x615   : > { %4901 = vmatpush1.bf16.msra.mxu0 %v2862_v30  ;;  %6213 = vmatpush1.bf16.msra.mxu1 %v2864_v31  ;;  %v1188_v30 = vld [vmem:[%s10733_s30 + $0x15b0] sm:$0xff]  ;;  %v2902_v31 = vunpack.c.l.s8.bf16 %v1186_v1 }
 0x616   : > { %4902 = vmatprep.subr.bf16.mxu0 %v2867_v4  ;;  %6214 = vmatprep.subr.bf16.mxu1 %v2869_v57  ;;  %v2904_v4 = vunpack.c.l.s8.bf16 %v1188_v30  ;;  %v2907_v57 = vunpack.c.h.s8.bf16 %v1187_v41 }
 0x617   : > { %4932 = vmatprep.mubr.bf16.mxu0 %v3875_v34  ;;  %6244 = vmatprep.mubr.bf16.mxu1 %v3875_v34  ;;  %v1193_v34 = vld [vmem:[%s10733_s30 + $0x15d8] sm:$0xff] }
 0x619   : > { %4903 = vmatpush1.bf16.msra.mxu0 %v2866_v50  ;;  %6215 = vmatpush1.bf16.msra.mxu1 %v2868_v39  ;;  %v2906_v50 = vunpack.c.h.s8.bf16 %v1186_v1  ;;  %v2908_v39 = vunpack.c.h.s8.bf16 %v1188_v30 }
 0x61a   : > { %4904 = vmatprep.subr.bf16.mxu0 %v2871_v61  ;;  %6216 = vmatprep.subr.bf16.mxu1 %v2873_v40  ;;  %v2911_v61 = vunpack.c.l.s8.bf16 %v1191_v55  ;;  %v2913_v40 = vunpack.c.l.s8.bf16 %v1193_v34 }
 0x61d   : > { %4905 = vmatpush1.bf16.msra.mxu0 %v2870_v0  ;;  %6217 = vmatpush1.bf16.msra.mxu1 %v2872_v46  ;;  %v2910_v0 = vunpack.c.l.s8.bf16 %v1190_v42  ;;  %v2912_v46 = vunpack.c.l.s8.bf16 %v1192_v45 }
 0x61e   : > { %4906 = vmatprep.subr.bf16.mxu0 %v2875_v47  ;;  %6218 = vmatprep.subr.bf16.mxu1 %v2877_v48  ;;  %v2915_v47 = vunpack.c.h.s8.bf16 %v1191_v55  ;;  %v2917_v48 = vunpack.c.h.s8.bf16 %v1193_v34 }
 0x621   : > { %4907 = vmatpush1.bf16.msra.mxu0 %v2874_v62  ;;  %6219 = vmatpush1.bf16.msra.mxu1 %v2876_v54  ;;  %v2914_v62 = vunpack.c.h.s8.bf16 %v1190_v42  ;;  %v2916_v54 = vunpack.c.h.s8.bf16 %v1192_v45 }
 0x622   : > { %4908 = vmatprep.subr.bf16.mxu0 %v2879_v8  ;;  %6220 = vmatprep.subr.bf16.mxu1 %v2881_v5  ;;  %v2919_v8 = vunpack.c.l.s8.bf16 %v1195_v51  ;;  %v2921_v5 = vunpack.c.l.s8.bf16 %v1197_v52 }
 0x625   : > { %4909 = vmatpush1.bf16.msra.mxu0 %v2878_v21  ;;  %6221 = vmatpush1.bf16.msra.mxu1 %v2880_v10  ;;  %v3828_v21 = vcombine.high %v11633_v36, %v11633_v36  ;;  %v2918_v10 = vunpack.c.l.s8.bf16 %v1194_v56  ;;  %v2927_v36 = vunpack.c.l.s8.bf16 %v1199_v32 }
 0x626   : > { %4910 = vmatprep.subr.bf16.mxu0 %v2883_v28  ;;  %6222 = vmatprep.subr.bf16.mxu1 %v2885_v63  ;;  %v2920_v28 = vunpack.c.l.s8.bf16 %v1196_v60  ;;  %v2923_v63 = vunpack.c.h.s8.bf16 %v1195_v51 }
 0x629   : > { %4911 = vmatpush1.bf16.msra.mxu0 %v2882_v20  ;;  %6223 = vmatpush1.bf16.msra.mxu1 %v2884_v2  ;;  %v1201_v20 = vld [vmem:[%s10733_s30 + $0x1618] sm:$0xff]  ;;  %v11725_v2 = vrot.slane %v3828_v21, %v10781_v49 }
 0x62a   : > { %4912 = vmatprep.subr.bf16.mxu0 %v2887_v58  ;;  %6224 = vmatprep.subr.bf16.mxu1 %v2889_v3  ;;  %v2922_v58 = vunpack.c.h.s8.bf16 %v1194_v56  ;;  %v2924_v3 = vunpack.c.h.s8.bf16 %v1196_v60  ;;  %v2929_v24 = vunpack.c.l.s8.bf16 %v1201_v20 }
 0x62d   : > { %4913 = vmatpush1.bf16.msra.mxu0 %v2886_v23  ;;  %6225 = vmatpush1.bf16.msra.mxu1 %v2888_v7  ;;  %v1200_v23 = vld [vmem:[%s10733_s30 + $0x1610] sm:$0xff]  ;;  %v3844_v7 = vcombine.high %v11725_v2, %v11725_v2 }
 0x62e   : > { %4914 = vmatprep.subr.bf16.mxu0 %v2891_v9  ;;  %6226 = vmatprep.subr.bf16.mxu1 %v2893_v11  ;;  %v3873_v9 = vcombine.high %v11686_v53, %v11686_v53  ;;  %v2926_v11 = vunpack.c.l.s8.bf16 %v1198_v6  ;;  %v2928_v27 = vunpack.c.l.s8.bf16 %v1200_v23  ;;  %v2930_v53 = vunpack.c.h.s8.bf16 %v1198_v6 }
 0x62f   : > { %v2932_v17 = vunpack.c.h.s8.bf16 %v1200_v23 }
 0x631   : > { %4915 = vmatpush1.bf16.msra.mxu0 %v2890_v13  ;;  %6227 = vmatpush1.bf16.msra.mxu1 %v2892_v15  ;;  %v2933_v13 = vunpack.c.h.s8.bf16 %v1201_v20  ;;  %v1203_v15 = vld [vmem:[%s10733_s30 + $0x1628] sm:$0xff] }
 0x632   : > { %4916 = vmatprep.subr.bf16.mxu0 %v2895_v16  ;;  %6228 = vmatprep.subr.bf16.mxu1 %v2897_v25  ;;  %v1205_v16 = vld [vmem:[%s10733_s30 + $0x1638] sm:$0xff]  ;;  %v11736_v25 = vrot.slane %v3844_v7, %v10781_v49  ;;  %v2935_v35 = vunpack.c.l.s8.bf16 %v1203_v15  ;;  %v2939_v37 = vunpack.c.h.s8.bf16 %v1203_v15  ;;  %v1218_v7 = vld [vmem:[%s10733_s30 + $0x16a0] sm:$0xff]  ;;  %v1223_v15 = vld [vmem:[%s10733_s30 + $0x16c8] sm:$0xff] }
 0x635   : > { %4917 = vmatpush1.bf16.msra.mxu0 %v2894_v18  ;;  %6229 = vmatpush1.bf16.msra.mxu1 %v2896_v19  ;;  %v2937_v18 = vunpack.c.l.s8.bf16 %v1205_v16  ;;  %v1202_v19 = vld [vmem:[%s10733_s30 + $0x1620] sm:$0xff] }
 0x636   : > { %4918 = vmatprep.subr.bf16.mxu0 %v2899_v29  ;;  %6230 = vmatprep.subr.bf16.mxu1 %v2901_v22  ;;  %v1204_v29 = vld [vmem:[%s10733_s30 + $0x1630] sm:$0xff]  ;;  %v2934_v22 = vunpack.c.l.s8.bf16 %v1202_v19 }
 0x637   : > { %v2936_v41 = vunpack.c.l.s8.bf16 %v1204_v29  ;;  %v2940_v1 = vunpack.c.h.s8.bf16 %v1204_v29  ;;  %v1224_v29 = vld [vmem:[%s10733_s30 + $0x16d0] sm:$0xff] }
 0x639   : > { %4919 = vmatpush1.bf16.msra.mxu0 %v2898_v44  ;;  %6231 = vmatpush1.bf16.msra.mxu1 %v2900_v26  ;;  %v2941_v44 = vunpack.c.h.s8.bf16 %v1205_v16  ;;  %v1207_v26 = vld [vmem:[%s10733_s30 + $0x1648] sm:$0xff]  ;;  %v1225_v16 = vld [vmem:[%s10733_s30 + $0x16d8] sm:$0xff] }
 0x63a   : > { %4920 = vmatprep.subr.bf16.mxu0 %v2903_v59  ;;  %6232 = vmatprep.subr.bf16.mxu1 %v2905_v43  ;;  %v1209_v59 = vld [vmem:[%s10733_s30 + $0x1658] sm:$0xff]  ;;  %v2938_v43 = vunpack.c.h.s8.bf16 %v1202_v19  ;;  %v2943_v30 = vunpack.c.l.s8.bf16 %v1207_v26  ;;  %v2947_v34 = vunpack.c.h.s8.bf16 %v1207_v26  ;;  %v1222_v19 = vld [vmem:[%s10733_s30 + $0x16c0] sm:$0xff]  ;;  %v1227_v26 = vld [vmem:[%s10733_s30 + $0x16e8] sm:$0xff] }
 0x63d   : > { %4921 = vmatpush1.bf16.msra.mxu0 %v2902_v31  ;;  %6233 = vmatpush1.bf16.msra.mxu1 %v2904_v4  ;;  %v2945_v31 = vunpack.c.l.s8.bf16 %v1209_v59  ;;  %v1206_v4 = vld [vmem:[%s10733_s30 + $0x1640] sm:$0xff] }
 0x63e   : > { %4922 = vmatprep.subr.bf16.mxu0 %v2907_v57  ;;  %6234 = vmatprep.subr.bf16.mxu1 %v2909_v33  ;;  %v1208_v57 = vld [vmem:[%s10733_s30 + $0x1650] sm:$0xff]  ;;  %v2942_v33 = vunpack.c.l.s8.bf16 %v1206_v4 }
 0x63f   : > { %v2944_v55 = vunpack.c.l.s8.bf16 %v1208_v57  ;;  %v2948_v42 = vunpack.c.h.s8.bf16 %v1208_v57  ;;  %v1228_v57 = vld [vmem:[%s10733_s30 + $0x16f0] sm:$0xff] }
 0x641   : > { %4923 = vmatpush1.bf16.msra.mxu0 %v2906_v50  ;;  %6235 = vmatpush1.bf16.msra.mxu1 %v2908_v39  ;;  %v2949_v50 = vunpack.c.h.s8.bf16 %v1209_v59  ;;  %v1211_v39 = vld [vmem:[%s10733_s30 + $0x1668] sm:$0xff]  ;;  %v1229_v59 = vld [vmem:[%s10733_s30 + $0x16f8] sm:$0xff] }
 0x642   : > { %4924 = vmatprep.subr.bf16.mxu0 %v2911_v61  ;;  %6236 = vmatprep.subr.bf16.mxu1 %v2913_v40  ;;  %v1213_v61 = vld [vmem:[%s10733_s30 + $0x1678] sm:$0xff]  ;;  %v2946_v40 = vunpack.c.h.s8.bf16 %v1206_v4  ;;  %v2951_v45 = vunpack.c.l.s8.bf16 %v1211_v39  ;;  %v2955_v52 = vunpack.c.h.s8.bf16 %v1211_v39  ;;  %v1226_v4 = vld [vmem:[%s10733_s30 + $0x16e0] sm:$0xff]  ;;  %v1231_v39 = vld [vmem:[%s10733_s30 + $0x1708] sm:$0xff] }
 0x645   : > { %4925 = vmatpush1.bf16.msra.mxu0 %v2910_v0  ;;  %6237 = vmatpush1.bf16.msra.mxu1 %v2912_v46  ;;  %v2953_v0 = vunpack.c.l.s8.bf16 %v1213_v61  ;;  %v1210_v46 = vld [vmem:[%s10733_s30 + $0x1660] sm:$0xff] }
 0x646   : > { %4926 = vmatprep.subr.bf16.mxu0 %v2915_v47  ;;  %6238 = vmatprep.subr.bf16.mxu1 %v2917_v48  ;;  %v1212_v47 = vld [vmem:[%s10733_s30 + $0x1670] sm:$0xff]  ;;  %v2950_v48 = vunpack.c.l.s8.bf16 %v1210_v46 }
 0x647   : > { %v2952_v51 = vunpack.c.l.s8.bf16 %v1212_v47  ;;  %v2956_v56 = vunpack.c.h.s8.bf16 %v1212_v47  ;;  %v1232_v47 = vld [vmem:[%s10733_s30 + $0x1710] sm:$0xff] }
 0x649   : > { %4927 = vmatpush1.bf16.msra.mxu0 %v2914_v62  ;;  %6239 = vmatpush1.bf16.msra.mxu1 %v2916_v54  ;;  %v2957_v62 = vunpack.c.h.s8.bf16 %v1213_v61  ;;  %v1215_v54 = vld [vmem:[%s10733_s30 + $0x1688] sm:$0xff]  ;;  %v1233_v61 = vld [vmem:[%s10733_s30 + $0x1718] sm:$0xff] }
 0x64a   : > { %4928 = vmatprep.subr.bf16.mxu0 %v2919_v8  ;;  %6240 = vmatprep.subr.bf16.mxu1 %v2921_v5  ;;  %v1217_v8 = vld [vmem:[%s10733_s30 + $0x1698] sm:$0xff]  ;;  %v2954_v5 = vunpack.c.h.s8.bf16 %v1210_v46  ;;  %v2959_v60 = vunpack.c.l.s8.bf16 %v1215_v54  ;;  %v2963_v32 = vunpack.c.h.s8.bf16 %v1215_v54  ;;  %v1230_v46 = vld [vmem:[%s10733_s30 + $0x1700] sm:$0xff]  ;;  %v2997_v54 = vunpack.c.h.s8.bf16 %v1233_v61 }
 0x64b   : > { %v2961_v21 = vunpack.c.l.s8.bf16 %v1217_v8  ;;  %v2965_v20 = vunpack.c.h.s8.bf16 %v1217_v8  ;;  %v1235_v8 = vld [vmem:[%s10733_s30 + $0x1728] sm:$0xff] }
 0x64d   : > { %4929 = vmatpush1.bf16.msra.mxu0 %v2918_v10  ;;  %6241 = vmatpush1.bf16.msra.mxu1 %v2920_v28  ;;  %v1214_v10 = vld [vmem:[%s10733_s30 + $0x1680] sm:$0xff]  ;;  %v1216_v28 = vld [vmem:[%s10733_s30 + $0x1690] sm:$0xff] }
 0x64e   : > { %4930 = vmatprep.subr.bf16.mxu0 %v2923_v63  ;;  %6242 = vmatprep.subr.bf16.mxu1 %v2925_v14  ;;  %v2958_v63 = vunpack.c.l.s8.bf16 %v1214_v10  ;;  %v2960_v14 = vunpack.c.l.s8.bf16 %v1216_v28 }
 0x651   : > { %4931 = vmatpush1.bf16.msra.mxu0 %v2922_v58  ;;  %6243 = vmatpush1.bf16.msra.mxu1 %v2924_v3  ;;  %v1219_v58 = vld [vmem:[%s10733_s30 + $0x16a8] sm:$0xff]  ;;  %v1221_v3 = vld [vmem:[%s10733_s30 + $0x16b8] sm:$0xff] }
 0x652   : > { %4941 = vmatprep.subr.bf16.mxu0 %v2927_v36  ;;  %6253 = vmatprep.subr.bf16.mxu1 %v2929_v24  ;;  %v2962_v36 = vunpack.c.h.s8.bf16 %v1214_v10  ;;  %v2964_v24 = vunpack.c.h.s8.bf16 %v1216_v28  ;;  %v2967_v6 = vunpack.c.l.s8.bf16 %v1219_v58  ;;  %v2969_v23 = vunpack.c.l.s8.bf16 %v1221_v3  ;;  %v1234_v28 = vld [vmem:[%s10733_s30 + $0x1720] sm:$0xff] }
 0x654   : > { %4933 = vmatmul.mubr.bf16.vlgmr.msra.gmra.mrb[0].mxu0 %v3873_v9  ;;  %6245 = vmatmul.mubr.bf16.vlgmr.msra.gmra.mrb[0].mxu1 %v3873_v9  ;;  %v1220_v9 = vld [vmem:[%s10733_s30 + $0x16b0] sm:$0xff] }
 0x655   : > { %4942 = vmatpush1.bf16.msra.mxu0 %v2926_v11  ;;  %6254 = vmatpush1.bf16.msra.mxu1 %v2928_v27  ;;  %v2966_v11 = vunpack.c.l.s8.bf16 %v1218_v7  ;;  %v2968_v27 = vunpack.c.l.s8.bf16 %v1220_v9 }
 0x656   : > { %4943 = vmatprep.subr.bf16.mxu0 %v2931_v12  ;;  %6255 = vmatprep.subr.bf16.mxu1 %v2933_v13  ;;  %v2971_v12 = vunpack.c.h.s8.bf16 %v1219_v58  ;;  %v2973_v13 = vunpack.c.h.s8.bf16 %v1221_v3  ;;  %v1239_v58 = vld [vmem:[%s10733_s30 + $0x1748] sm:$0xff]  ;;  %v1241_v3 = vld [vmem:[%s10733_s30 + $0x1758] sm:$0xff] }
 0x657   : > { %4973 = vmatprep.mubr.bf16.mxu0 %v11736_v25  ;;  %6285 = vmatprep.mubr.bf16.mxu1 %v11736_v25 }
 0x659   : > { %4944 = vmatpush1.bf16.msra.mxu0 %v2930_v53  ;;  %6256 = vmatpush1.bf16.msra.mxu1 %v2932_v17  ;;  %v2970_v53 = vunpack.c.h.s8.bf16 %v1218_v7  ;;  %v2972_v17 = vunpack.c.h.s8.bf16 %v1220_v9  ;;  %v1238_v7 = vld [vmem:[%s10733_s30 + $0x1740] sm:$0xff]  ;;  %v1240_v9 = vld [vmem:[%s10733_s30 + $0x1750] sm:$0xff] }
 0x65a   : > { %4945 = vmatprep.subr.bf16.mxu0 %v2935_v35  ;;  %6257 = vmatprep.subr.bf16.mxu1 %v2937_v18  ;;  %v2975_v35 = vunpack.c.l.s8.bf16 %v1223_v15  ;;  %v2977_v18 = vunpack.c.l.s8.bf16 %v1225_v16 }
 0x65d   : > { %4946 = vmatpush1.bf16.msra.mxu0 %v2934_v22  ;;  %6258 = vmatpush1.bf16.msra.mxu1 %v2936_v41  ;;  %v2974_v22 = vunpack.c.l.s8.bf16 %v1222_v19  ;;  %v2976_v41 = vunpack.c.l.s8.bf16 %v1224_v29 }
 0x65e   : > { %4947 = vmatprep.subr.bf16.mxu0 %v2939_v37  ;;  %6259 = vmatprep.subr.bf16.mxu1 %v2941_v44  ;;  %v2979_v37 = vunpack.c.h.s8.bf16 %v1223_v15  ;;  %v2981_v44 = vunpack.c.h.s8.bf16 %v1225_v16  ;;  %v1243_v15 = vld [vmem:[%s10733_s30 + $0x1768] sm:$0xff]  ;;  %v1245_v16 = vld [vmem:[%s10733_s30 + $0x1778] sm:$0xff] }
 0x661   : > { %4948 = vmatpush1.bf16.msra.mxu0 %v2938_v43  ;;  %6260 = vmatpush1.bf16.msra.mxu1 %v2940_v1  ;;  %v2978_v43 = vunpack.c.h.s8.bf16 %v1222_v19  ;;  %v2980_v1 = vunpack.c.h.s8.bf16 %v1224_v29  ;;  %v1242_v19 = vld [vmem:[%s10733_s30 + $0x1760] sm:$0xff]  ;;  %v1244_v29 = vld [vmem:[%s10733_s30 + $0x1770] sm:$0xff] }
 0x662   : > { %4949 = vmatprep.subr.bf16.mxu0 %v2943_v30  ;;  %6261 = vmatprep.subr.bf16.mxu1 %v2945_v31  ;;  %v2983_v30 = vunpack.c.l.s8.bf16 %v1227_v26  ;;  %v2985_v31 = vunpack.c.l.s8.bf16 %v1229_v59 }
 0x665   : > { %4950 = vmatpush1.bf16.msra.mxu0 %v2942_v33  ;;  %6262 = vmatpush1.bf16.msra.mxu1 %v2944_v55  ;;  %v2982_v33 = vunpack.c.l.s8.bf16 %v1226_v4  ;;  %v2984_v55 = vunpack.c.l.s8.bf16 %v1228_v57 }
 0x666   : > { %4951 = vmatprep.subr.bf16.mxu0 %v2947_v34  ;;  %6263 = vmatprep.subr.bf16.mxu1 %v2949_v50  ;;  %v2987_v34 = vunpack.c.h.s8.bf16 %v1227_v26  ;;  %v2989_v50 = vunpack.c.h.s8.bf16 %v1229_v59  ;;  %v1247_v26 = vld [vmem:[%s10733_s30 + $0x1788] sm:$0xff]  ;;  %v1249_v59 = vld [vmem:[%s10733_s30 + $0x1798] sm:$0xff] }
 0x669   : > { %4952 = vmatpush1.bf16.msra.mxu0 %v2946_v40  ;;  %6264 = vmatpush1.bf16.msra.mxu1 %v2948_v42  ;;  %v2986_v40 = vunpack.c.h.s8.bf16 %v1226_v4  ;;  %v2988_v42 = vunpack.c.h.s8.bf16 %v1228_v57  ;;  %v1246_v4 = vld [vmem:[%s10733_s30 + $0x1780] sm:$0xff]  ;;  %v1248_v57 = vld [vmem:[%s10733_s30 + $0x1790] sm:$0xff] }
 0x66a   : > { %4953 = vmatprep.subr.bf16.mxu0 %v2951_v45  ;;  %6265 = vmatprep.subr.bf16.mxu1 %v2953_v0  ;;  %v2991_v45 = vunpack.c.l.s8.bf16 %v1231_v39  ;;  %v2993_v0 = vunpack.c.l.s8.bf16 %v1233_v61  ;;  %v1253_v61 = vld [vmem:[%s10733_s30 + $0x17b8] sm:$0xff] }
 0x66d   : > { %4954 = vmatpush1.bf16.msra.mxu0 %v2950_v48  ;;  %6266 = vmatpush1.bf16.msra.mxu1 %v2952_v51  ;;  %v11772_v48 = vrot.slane %v11725_v2, %v10781_v49  ;;  %v2990_v51 = vunpack.c.l.s8.bf16 %v1230_v46  ;;  %v2994_v2 = vunpack.c.h.s8.bf16 %v1230_v46  ;;  %v1250_v46 = vld [vmem:[%s10733_s30 + $0x17a0] sm:$0xff] }
 0x66e   : > { %4955 = vmatprep.subr.bf16.mxu0 %v2955_v52  ;;  %6267 = vmatprep.subr.bf16.mxu1 %v2957_v62  ;;  %v2992_v52 = vunpack.c.l.s8.bf16 %v1232_v47  ;;  %v2995_v62 = vunpack.c.h.s8.bf16 %v1231_v39  ;;  %v1251_v39 = vld [vmem:[%s10733_s30 + $0x17a8] sm:$0xff] }
 0x671   : > { %4956 = vmatpush1.bf16.msra.mxu0 %v2954_v5  ;;  %6268 = vmatpush1.bf16.msra.mxu1 %v2956_v56  ;;  %v1237_v5 = vld [vmem:[%s10733_s30 + $0x1738] sm:$0xff]  ;;  %v3876_v56 = vcombine.high %v11736_v25, %v11736_v25  ;;  %v2998_v25 = vunpack.c.l.s8.bf16 %v1234_v28 }
 0x672   : > { %4957 = vmatprep.subr.bf16.mxu0 %v2959_v60  ;;  %6269 = vmatprep.subr.bf16.mxu1 %v2961_v21  ;;  %v2996_v60 = vunpack.c.h.s8.bf16 %v1232_v47  ;;  %v2999_v21 = vunpack.c.l.s8.bf16 %v1235_v8  ;;  %v3001_v10 = vunpack.c.l.s8.bf16 %v1237_v5  ;;  %v1252_v47 = vld [vmem:[%s10733_s30 + $0x17b0] sm:$0xff] }
 0x675   : > { %4958 = vmatpush1.bf16.msra.mxu0 %v2958_v63  ;;  %6270 = vmatpush1.bf16.msra.mxu1 %v2960_v14  ;;  %v1236_v63 = vld [vmem:[%s10733_s30 + $0x1730] sm:$0xff] }
 0x676   : > { %4959 = vmatprep.subr.bf16.mxu0 %v2963_v32  ;;  %6271 = vmatprep.subr.bf16.mxu1 %v2965_v20  ;;  %v3000_v14 = vunpack.c.l.s8.bf16 %v1236_v63  ;;  %v3003_v32 = vunpack.c.h.s8.bf16 %v1235_v8  ;;  %v3005_v20 = vunpack.c.h.s8.bf16 %v1237_v5  ;;  %v1255_v8 = vld [vmem:[%s10733_s30 + $0x17c8] sm:$0xff]  ;;  %v1257_v5 = vld [vmem:[%s10733_s30 + $0x17d8] sm:$0xff] }
 0x679   : > { %4960 = vmatpush1.bf16.msra.mxu0 %v2962_v36  ;;  %6272 = vmatpush1.bf16.msra.mxu1 %v2964_v24  ;;  %v3002_v36 = vunpack.c.h.s8.bf16 %v1234_v28  ;;  %v3004_v24 = vunpack.c.h.s8.bf16 %v1236_v63  ;;  %v1256_v28 = vld [vmem:[%s10733_s30 + $0x17d0] sm:$0xff] }
 0x67a   : > { %4961 = vmatprep.subr.bf16.mxu0 %v2967_v6  ;;  %6273 = vmatprep.subr.bf16.mxu1 %v2969_v23  ;;  %v3007_v6 = vunpack.c.l.s8.bf16 %v1239_v58  ;;  %v3009_v23 = vunpack.c.l.s8.bf16 %v1241_v3 }
 0x67d   : > { %4962 = vmatpush1.bf16.msra.mxu0 %v2966_v11  ;;  %6274 = vmatpush1.bf16.msra.mxu1 %v2968_v27  ;;  %v3006_v11 = vunpack.c.l.s8.bf16 %v1238_v7  ;;  %v3008_v27 = vunpack.c.l.s8.bf16 %v1240_v9 }
 0x67e   : > { %4963 = vmatprep.subr.bf16.mxu0 %v2971_v12  ;;  %6275 = vmatprep.subr.bf16.mxu1 %v2973_v13  ;;  %v3011_v12 = vunpack.c.h.s8.bf16 %v1239_v58  ;;  %v3013_v13 = vunpack.c.h.s8.bf16 %v1241_v3  ;;  %v1261_v58 = vld [vmem:[%s10733_s30 + $0x17f8] sm:$0xff] }
 0x681   : > { %4964 = vmatpush1.bf16.msra.mxu0 %v2970_v53  ;;  %6276 = vmatpush1.bf16.msra.mxu1 %v2972_v17  ;;  %v3010_v53 = vunpack.c.h.s8.bf16 %v1238_v7  ;;  %v3012_v17 = vunpack.c.h.s8.bf16 %v1240_v9  ;;  %v1260_v7 = vld [vmem:[%s10733_s30 + $0x17f0] sm:$0xff]  ;;  %v11807_v9 = vld [vmem:[%s10755_s15 + $0x30] sm:$0xff] }
 0x682   : > { %4965 = vmatprep.subr.bf16.mxu0 %v2975_v35  ;;  %6277 = vmatprep.subr.bf16.mxu1 %v2977_v18  ;;  %v3015_v35 = vunpack.c.l.s8.bf16 %v1243_v15  ;;  %v3017_v18 = vunpack.c.l.s8.bf16 %v1245_v16 }
 0x685   : > { %4966 = vmatpush1.bf16.msra.mxu0 %v2974_v22  ;;  %6278 = vmatpush1.bf16.msra.mxu1 %v2976_v41  ;;  %v3014_v22 = vunpack.c.l.s8.bf16 %v1242_v19  ;;  %v3016_v41 = vunpack.c.l.s8.bf16 %v1244_v29 }
 0x686   : > { %4967 = vmatprep.subr.bf16.mxu0 %v2979_v37  ;;  %6279 = vmatprep.subr.bf16.mxu1 %v2981_v44  ;;  %v3019_v37 = vunpack.c.h.s8.bf16 %v1243_v15  ;;  %v3021_v44 = vunpack.c.h.s8.bf16 %v1245_v16  ;;  %v1263_v15 = vld [vmem:[%s10733_s30 + $0x1808] sm:$0xff]  ;;  %v1265_v16 = vld [vmem:[%s10733_s30 + $0x1818] sm:$0xff] }
 0x689   : > { %4968 = vmatpush1.bf16.msra.mxu0 %v2978_v43  ;;  %6280 = vmatpush1.bf16.msra.mxu1 %v2980_v1  ;;  %v3018_v43 = vunpack.c.h.s8.bf16 %v1242_v19  ;;  %v3020_v1 = vunpack.c.h.s8.bf16 %v1244_v29  ;;  %v3057_v19 = vunpack.c.l.s8.bf16 %v1265_v16  ;;  %v1262_v29 = vld [vmem:[%s10733_s30 + $0x1800] sm:$0xff] }
 0x68a   : > { %4969 = vmatprep.subr.bf16.mxu0 %v2983_v30  ;;  %6281 = vmatprep.subr.bf16.mxu1 %v2985_v31  ;;  %v3023_v30 = vunpack.c.l.s8.bf16 %v1247_v26  ;;  %v3025_v31 = vunpack.c.l.s8.bf16 %v1249_v59 }
 0x68d   : > { %4970 = vmatpush1.bf16.msra.mxu0 %v2982_v33  ;;  %6282 = vmatpush1.bf16.msra.mxu1 %v2984_v55  ;;  %v3022_v33 = vunpack.c.l.s8.bf16 %v1246_v4  ;;  %v3024_v55 = vunpack.c.l.s8.bf16 %v1248_v57 }
 0x68e   : > { %4971 = vmatprep.subr.bf16.mxu0 %v2987_v34  ;;  %6283 = vmatprep.subr.bf16.mxu1 %v2989_v50  ;;  %v3027_v34 = vunpack.c.h.s8.bf16 %v1247_v26  ;;  %v3029_v50 = vunpack.c.h.s8.bf16 %v1249_v59  ;;  %v3059_v59 = vunpack.c.h.s8.bf16 %v1263_v15 }
 0x691   : > { %4972 = vmatpush1.bf16.msra.mxu0 %v2986_v40  ;;  %6284 = vmatpush1.bf16.msra.mxu1 %v2988_v42  ;;  %v3026_v40 = vunpack.c.h.s8.bf16 %v1246_v4  ;;  %v3028_v42 = vunpack.c.h.s8.bf16 %v1248_v57 }
 0x692   : > { %4982 = vmatprep.subr.bf16.mxu0 %v2991_v45  ;;  %6294 = vmatprep.subr.bf16.mxu1 %v2993_v0  ;;  %v3031_v45 = vunpack.c.l.s8.bf16 %v1251_v39  ;;  %v3033_v0 = vunpack.c.l.s8.bf16 %v1253_v61 }
 0x694   : > { %4974 = vmatmul.mubr.bf16.vlgmr.msra.gmra.mrb[0].mxu0 %v11772_v48  ;;  %6286 = vmatmul.mubr.bf16.vlgmr.msra.gmra.mrb[0].mxu1 %v11772_v48 }
 0x695   : > { %4983 = vmatpush1.bf16.msra.mxu0 %v2990_v51  ;;  %6295 = vmatpush1.bf16.msra.mxu1 %v2992_v52  ;;  %v3030_v51 = vunpack.c.l.s8.bf16 %v1250_v46  ;;  %v3032_v52 = vunpack.c.l.s8.bf16 %v1252_v47 }
 0x696   : > { %4984 = vmatprep.subr.bf16.mxu0 %v2995_v62  ;;  %6296 = vmatprep.subr.bf16.mxu1 %v2997_v54  ;;  %v3035_v62 = vunpack.c.h.s8.bf16 %v1251_v39  ;;  %v3037_v54 = vunpack.c.h.s8.bf16 %v1253_v61 }
 0x697   : > { %5014 = vmatprep.mubr.bf16.mxu0 %v3876_v56  ;;  %6326 = vmatprep.mubr.bf16.mxu1 %v3876_v56  ;;  %v3034_v56 = vunpack.c.h.s8.bf16 %v1250_v46 }
 0x699   : > { %4985 = vmatpush1.bf16.msra.mxu0 %v2994_v2  ;;  %6297 = vmatpush1.bf16.msra.mxu1 %v2996_v60  ;;  %v3036_v2 = vunpack.c.h.s8.bf16 %v1252_v47  ;;  %v3039_v60 = vunpack.c.l.s8.bf16 %v1255_v8 }
 0x69a   : > { %4986 = vmatprep.subr.bf16.mxu0 %v2999_v21  ;;  %6298 = vmatprep.subr.bf16.mxu1 %v3001_v10  ;;  %v3041_v21 = vunpack.c.l.s8.bf16 %v1257_v5  ;;  %v1254_v10 = vld [vmem:[%s10733_s30 + $0x17c0] sm:$0xff] }
 0x69b   : > { %v3038_v63 = vunpack.c.l.s8.bf16 %v1254_v10  ;;  %v3042_v3 = vunpack.c.h.s8.bf16 %v1254_v10 }
 0x69d   : > { %4987 = vmatpush1.bf16.msra.mxu0 %v2998_v25  ;;  %6299 = vmatpush1.bf16.msra.mxu1 %v3000_v14  ;;  %v3040_v25 = vunpack.c.l.s8.bf16 %v1256_v28  ;;  %v3043_v14 = vunpack.c.h.s8.bf16 %v1255_v8 }
 0x69e   : > { %4988 = vmatprep.subr.bf16.mxu0 %v3003_v32  ;;  %6300 = vmatprep.subr.bf16.mxu1 %v3005_v20  ;;  %v3045_v32 = vunpack.c.h.s8.bf16 %v1257_v5  ;;  %v1259_v20 = vld [vmem:[%s10733_s30 + $0x17e8] sm:$0xff] }
 0x6a1   : > { %4989 = vmatpush1.bf16.msra.mxu0 %v3002_v36  ;;  %6301 = vmatpush1.bf16.msra.mxu1 %v3004_v24  ;;  %v3044_v36 = vunpack.c.h.s8.bf16 %v1256_v28  ;;  %v3047_v24 = vunpack.c.l.s8.bf16 %v1259_v20 }
 0x6a2   : > { %4990 = vmatprep.subr.bf16.mxu0 %v3007_v6  ;;  %6302 = vmatprep.subr.bf16.mxu1 %v3009_v23  ;;  %v3049_v6 = vunpack.c.l.s8.bf16 %v1261_v58  ;;  %v1258_v23 = vld [vmem:[%s10733_s30 + $0x17e0] sm:$0xff] }
 0x6a5   : > { %4991 = vmatpush1.bf16.msra.mxu0 %v3006_v11  ;;  %6303 = vmatpush1.bf16.msra.mxu1 %v3008_v27  ;;  %v3046_v11 = vunpack.c.l.s8.bf16 %v1258_v23  ;;  %v3048_v27 = vunpack.c.l.s8.bf16 %v1260_v7 }
 0x6a6   : > { %4992 = vmatprep.subr.bf16.mxu0 %v3011_v12  ;;  %6304 = vmatprep.subr.bf16.mxu1 %v3013_v13  ;;  %v3051_v12 = vunpack.c.h.s8.bf16 %v1259_v20  ;;  %v3053_v13 = vunpack.c.h.s8.bf16 %v1261_v58 }
 0x6a9   : > { %4993 = vmatpush1.bf16.msra.mxu0 %v3010_v53  ;;  %6305 = vmatpush1.bf16.msra.mxu1 %v3012_v17  ;;  %v11813_v53 = vrot.slane %v11807_v9, %v10781_v49  ;;  %v3050_v17 = vunpack.c.h.s8.bf16 %v1258_v23 }
 0x6aa   : > { %4994 = vmatprep.subr.bf16.mxu0 %v3015_v35  ;;  %6306 = vmatprep.subr.bf16.mxu1 %v3017_v18  ;;  %v3052_v35 = vunpack.c.h.s8.bf16 %v1260_v7  ;;  %v3055_v18 = vunpack.c.l.s8.bf16 %v1263_v15 }
 0x6ad   : > { %4995 = vmatpush1.bf16.msra.mxu0 %v3014_v22  ;;  %6307 = vmatpush1.bf16.msra.mxu1 %v3016_v41  ;;  %v1264_v22 = vld [vmem:[%s10733_s30 + $0x1810] sm:$0xff]  ;;  %v3892_v41 = vcombine.high %v11813_v53, %v11813_v53 }
 0x6ae   : > { %4996 = vmatprep.subr.bf16.mxu0 %v3019_v37  ;;  %6308 = vmatprep.subr.bf16.mxu1 %v3021_v44  ;;  %v3874_v37 = vcombine.high %v11772_v48, %v11772_v48  ;;  %v3054_v44 = vunpack.c.l.s8.bf16 %v1262_v29  ;;  %v3056_v26 = vunpack.c.l.s8.bf16 %v1264_v22  ;;  %v3058_v48 = vunpack.c.h.s8.bf16 %v1262_v29 }
 0x6af   : > { %v3060_v4 = vunpack.c.h.s8.bf16 %v1264_v22 }
 0x6b1   : > { %4997 = vmatpush1.bf16.msra.mxu0 %v3018_v43  ;;  %6309 = vmatpush1.bf16.msra.mxu1 %v3020_v1  ;;  %v3061_v43 = vunpack.c.h.s8.bf16 %v1265_v16  ;;  %v1267_v1 = vld [vmem:[%s10733_s30 + $0x1828] sm:$0xff] }
 0x6b2   : > { %4998 = vmatprep.subr.bf16.mxu0 %v3023_v30  ;;  %6310 = vmatprep.subr.bf16.mxu1 %v3025_v31  ;;  %v1269_v30 = vld [vmem:[%s10733_s30 + $0x1838] sm:$0xff]  ;;  %v11824_v31 = vrot.slane %v3892_v41, %v10781_v49  ;;  %v3063_v57 = vunpack.c.l.s8.bf16 %v1267_v1  ;;  %v3067_v61 = vunpack.c.h.s8.bf16 %v1267_v1 }
 0x6b5   : > { %4999 = vmatpush1.bf16.msra.mxu0 %v3022_v33  ;;  %6311 = vmatpush1.bf16.msra.mxu1 %v3024_v55  ;;  %v3065_v33 = vunpack.c.l.s8.bf16 %v1269_v30  ;;  %v1266_v55 = vld [vmem:[%s10733_s30 + $0x1820] sm:$0xff] }
 0x6b6   : > { %5000 = vmatprep.subr.bf16.mxu0 %v3027_v34  ;;  %6312 = vmatprep.subr.bf16.mxu1 %v3029_v50  ;;  %v1268_v34 = vld [vmem:[%s10733_s30 + $0x1830] sm:$0xff]  ;;  %v3062_v50 = vunpack.c.l.s8.bf16 %v1266_v55 }
 0x6b7   : > { %v3064_v39 = vunpack.c.l.s8.bf16 %v1268_v34  ;;  %v3068_v46 = vunpack.c.h.s8.bf16 %v1268_v34  ;;  %v1286_v34 = vld [vmem:[%s10733_s30 + $0x18c0] sm:$0xff] }
 0x6b9   : > { %5001 = vmatpush1.bf16.msra.mxu0 %v3026_v40  ;;  %6313 = vmatpush1.bf16.msra.mxu1 %v3028_v42  ;;  %v3069_v40 = vunpack.c.h.s8.bf16 %v1269_v30  ;;  %v1271_v42 = vld [vmem:[%s10733_s30 + $0x1848] sm:$0xff] }
 0x6ba   : > { %5002 = vmatprep.subr.bf16.mxu0 %v3031_v45  ;;  %6314 = vmatprep.subr.bf16.mxu1 %v3033_v0  ;;  %v1273_v45 = vld [vmem:[%s10733_s30 + $0x1858] sm:$0xff]  ;;  %v3066_v0 = vunpack.c.h.s8.bf16 %v1266_v55  ;;  %v3071_v47 = vunpack.c.l.s8.bf16 %v1271_v42  ;;  %v3075_v5 = vunpack.c.h.s8.bf16 %v1271_v42  ;;  %v1287_v30 = vld [vmem:[%s10733_s30 + $0x18c8] sm:$0xff] }
 0x6bd   : > { %5003 = vmatpush1.bf16.msra.mxu0 %v3030_v51  ;;  %6315 = vmatpush1.bf16.msra.mxu1 %v3032_v52  ;;  %v3073_v51 = vunpack.c.l.s8.bf16 %v1273_v45  ;;  %v1270_v52 = vld [vmem:[%s10733_s30 + $0x1840] sm:$0xff] }
 0x6be   : > { %5004 = vmatprep.subr.bf16.mxu0 %v3035_v62  ;;  %6316 = vmatprep.subr.bf16.mxu1 %v3037_v54  ;;  %v1272_v62 = vld [vmem:[%s10733_s30 + $0x1850] sm:$0xff]  ;;  %v3070_v54 = vunpack.c.l.s8.bf16 %v1270_v52 }
 0x6bf   : > { %v3072_v8 = vunpack.c.l.s8.bf16 %v1272_v62  ;;  %v3076_v10 = vunpack.c.h.s8.bf16 %v1272_v62  ;;  %v1290_v62 = vld [vmem:[%s10733_s30 + $0x18e0] sm:$0xff] }
 0x6c1   : > { %5005 = vmatpush1.bf16.msra.mxu0 %v3034_v56  ;;  %6317 = vmatpush1.bf16.msra.mxu1 %v3036_v2  ;;  %v3077_v56 = vunpack.c.h.s8.bf16 %v1273_v45  ;;  %v1275_v2 = vld [vmem:[%s10733_s30 + $0x1868] sm:$0xff] }
 0x6c2   : > { %5006 = vmatprep.subr.bf16.mxu0 %v3039_v60  ;;  %6318 = vmatprep.subr.bf16.mxu1 %v3041_v21  ;;  %v1277_v60 = vld [vmem:[%s10733_s30 + $0x1878] sm:$0xff]  ;;  %v3074_v21 = vunpack.c.h.s8.bf16 %v1270_v52  ;;  %v3079_v28 = vunpack.c.l.s8.bf16 %v1275_v2  ;;  %v3083_v58 = vunpack.c.h.s8.bf16 %v1275_v2  ;;  %v1291_v45 = vld [vmem:[%s10733_s30 + $0x18e8] sm:$0xff] }
 0x6c5   : > { %5007 = vmatpush1.bf16.msra.mxu0 %v3038_v63  ;;  %6319 = vmatpush1.bf16.msra.mxu1 %v3040_v25  ;;  %v3081_v63 = vunpack.c.l.s8.bf16 %v1277_v60  ;;  %v1274_v25 = vld [vmem:[%s10733_s30 + $0x1860] sm:$0xff] }
 0x6c6   : > { %5008 = vmatprep.subr.bf16.mxu0 %v3043_v14  ;;  %6320 = vmatprep.subr.bf16.mxu1 %v3045_v32  ;;  %v1276_v14 = vld [vmem:[%s10733_s30 + $0x1870] sm:$0xff]  ;;  %v3078_v32 = vunpack.c.l.s8.bf16 %v1274_v25 }
 0x6c7   : > { %v3080_v20 = vunpack.c.l.s8.bf16 %v1276_v14  ;;  %v3084_v23 = vunpack.c.h.s8.bf16 %v1276_v14  ;;  %v1294_v14 = vld [vmem:[%s10733_s30 + $0x1900] sm:$0xff] }
 0x6c9   : > { %5009 = vmatpush1.bf16.msra.mxu0 %v3042_v3  ;;  %6321 = vmatpush1.bf16.msra.mxu1 %v3044_v36  ;;  %v3085_v3 = vunpack.c.h.s8.bf16 %v1277_v60  ;;  %v1279_v36 = vld [vmem:[%s10733_s30 + $0x1888] sm:$0xff] }
 0x6ca   : > { %5010 = vmatprep.subr.bf16.mxu0 %v3047_v24  ;;  %6322 = vmatprep.subr.bf16.mxu1 %v3049_v6  ;;  %v1281_v24 = vld [vmem:[%s10733_s30 + $0x1898] sm:$0xff]  ;;  %v3082_v6 = vunpack.c.h.s8.bf16 %v1274_v25  ;;  %v3087_v7 = vunpack.c.l.s8.bf16 %v1279_v36  ;;  %v3091_v16 = vunpack.c.h.s8.bf16 %v1279_v36  ;;  %v1295_v60 = vld [vmem:[%s10733_s30 + $0x1908] sm:$0xff] }
 0x6cb   : > { %v3123_v36 = vunpack.c.h.s8.bf16 %v1295_v60 }
 0x6cd   : > { %5011 = vmatpush1.bf16.msra.mxu0 %v3046_v11  ;;  %6323 = vmatpush1.bf16.msra.mxu1 %v3048_v27  ;;  %v3089_v11 = vunpack.c.l.s8.bf16 %v1281_v24  ;;  %v1278_v27 = vld [vmem:[%s10733_s30 + $0x1880] sm:$0xff] }
 0x6ce   : > { %5012 = vmatprep.subr.bf16.mxu0 %v3051_v12  ;;  %6324 = vmatprep.subr.bf16.mxu1 %v3053_v13  ;;  %v1280_v12 = vld [vmem:[%s10733_s30 + $0x1890] sm:$0xff]  ;;  %v3086_v13 = vunpack.c.l.s8.bf16 %v1278_v27 }
 0x6cf   : > { %v3088_v15 = vunpack.c.l.s8.bf16 %v1280_v12  ;;  %v3092_v29 = vunpack.c.h.s8.bf16 %v1280_v12 }
 0x6d1   : > { %5013 = vmatpush1.bf16.msra.mxu0 %v3050_v17  ;;  %6325 = vmatpush1.bf16.msra.mxu1 %v3052_v35  ;;  %v3093_v17 = vunpack.c.h.s8.bf16 %v1281_v24  ;;  %v1283_v35 = vld [vmem:[%s10733_s30 + $0x18a8] sm:$0xff] }
 0x6d2   : > { %5023 = vmatprep.subr.bf16.mxu0 %v3055_v18  ;;  %6335 = vmatprep.subr.bf16.mxu1 %v3057_v19  ;;  %v1285_v18 = vld [vmem:[%s10733_s30 + $0x18b8] sm:$0xff]  ;;  %v3090_v19 = vunpack.c.h.s8.bf16 %v1278_v27  ;;  %v3095_v22 = vunpack.c.l.s8.bf16 %v1283_v35 }
 0x6d3   : > { %v3097_v41 = vunpack.c.l.s8.bf16 %v1285_v18  ;;  %v3101_v1 = vunpack.c.h.s8.bf16 %v1285_v18  ;;  %v1303_v18 = vld [vmem:[%s10733_s30 + $0x1948] sm:$0xff] }
 0x6d4   : > { %5015 = vmatmul.mubr.bf16.vlgmr.msra.gmra.mrb[0].mxu0 %v3874_v37  ;;  %6327 = vmatmul.mubr.bf16.vlgmr.msra.gmra.mrb[0].mxu1 %v3874_v37  ;;  %v1282_v37 = vld [vmem:[%s10733_s30 + $0x18a0] sm:$0xff] }
 0x6d5   : > { %5024 = vmatpush1.bf16.msra.mxu0 %v3054_v44  ;;  %6336 = vmatpush1.bf16.msra.mxu1 %v3056_v26  ;;  %v1284_v44 = vld [vmem:[%s10733_s30 + $0x18b0] sm:$0xff]  ;;  %v3094_v26 = vunpack.c.l.s8.bf16 %v1282_v37 }
 0x6d6   : > { %5025 = vmatprep.subr.bf16.mxu0 %v3059_v59  ;;  %6337 = vmatprep.subr.bf16.mxu1 %v3061_v43  ;;  %v3096_v59 = vunpack.c.l.s8.bf16 %v1284_v44  ;;  %v3099_v43 = vunpack.c.h.s8.bf16 %v1283_v35 }
 0x6d7   : > { %5055 = vmatprep.mubr.bf16.mxu0 %v11824_v31  ;;  %6367 = vmatprep.mubr.bf16.mxu1 %v11824_v31 }
 0x6d9   : > { %5026 = vmatpush1.bf16.msra.mxu0 %v3058_v48  ;;  %6338 = vmatpush1.bf16.msra.mxu1 %v3060_v4  ;;  %v1289_v48 = vld [vmem:[%s10733_s30 + $0x18d8] sm:$0xff]  ;;  %v3098_v4 = vunpack.c.h.s8.bf16 %v1282_v37 }
 0x6da   : > { %5027 = vmatprep.subr.bf16.mxu0 %v3063_v57  ;;  %6339 = vmatprep.subr.bf16.mxu1 %v3065_v33  ;;  %v3100_v57 = vunpack.c.h.s8.bf16 %v1284_v44  ;;  %v3103_v33 = vunpack.c.l.s8.bf16 %v1287_v30  ;;  %v3105_v55 = vunpack.c.l.s8.bf16 %v1289_v48  ;;  %v3109_v42 = vunpack.c.h.s8.bf16 %v1289_v48  ;;  %v1302_v44 = vld [vmem:[%s10733_s30 + $0x1940] sm:$0xff]  ;;  %v1307_v48 = vld [vmem:[%s10733_s30 + $0x1968] sm:$0xff] }
 0x6dd   : > { %5028 = vmatpush1.bf16.msra.mxu0 %v3062_v50  ;;  %6340 = vmatpush1.bf16.msra.mxu1 %v3064_v39  ;;  %v1288_v50 = vld [vmem:[%s10733_s30 + $0x18d0] sm:$0xff]  ;;  %v3102_v39 = vunpack.c.l.s8.bf16 %v1286_v34 }
 0x6de   : > { %5029 = vmatprep.subr.bf16.mxu0 %v3067_v61  ;;  %6341 = vmatprep.subr.bf16.mxu1 %v3069_v40  ;;  %v3104_v61 = vunpack.c.l.s8.bf16 %v1288_v50  ;;  %v3107_v40 = vunpack.c.h.s8.bf16 %v1287_v30 }
 0x6e1   : > { %5030 = vmatpush1.bf16.msra.mxu0 %v3066_v0  ;;  %6342 = vmatpush1.bf16.msra.mxu1 %v3068_v46  ;;  %v1293_v0 = vld [vmem:[%s10733_s30 + $0x18f8] sm:$0xff]  ;;  %v3106_v46 = vunpack.c.h.s8.bf16 %v1286_v34 }
 0x6e2   : > { %5031 = vmatprep.subr.bf16.mxu0 %v3071_v47  ;;  %6343 = vmatprep.subr.bf16.mxu1 %v3073_v51  ;;  %v3108_v47 = vunpack.c.h.s8.bf16 %v1288_v50  ;;  %v3111_v51 = vunpack.c.l.s8.bf16 %v1291_v45  ;;  %v3113_v52 = vunpack.c.l.s8.bf16 %v1293_v0  ;;  %v3117_v2 = vunpack.c.h.s8.bf16 %v1293_v0  ;;  %v1306_v50 = vld [vmem:[%s10733_s30 + $0x1960] sm:$0xff]  ;;  %v1311_v0 = vld [vmem:[%s10733_s30 + $0x1988] sm:$0xff] }
 0x6e5   : > { %5032 = vmatpush1.bf16.msra.mxu0 %v3070_v54  ;;  %6344 = vmatpush1.bf16.msra.mxu1 %v3072_v8  ;;  %v1292_v54 = vld [vmem:[%s10733_s30 + $0x18f0] sm:$0xff]  ;;  %v3110_v8 = vunpack.c.l.s8.bf16 %v1290_v62 }
 0x6e6   : > { %5033 = vmatprep.subr.bf16.mxu0 %v3075_v5  ;;  %6345 = vmatprep.subr.bf16.mxu1 %v3077_v56  ;;  %v3112_v5 = vunpack.c.l.s8.bf16 %v1292_v54  ;;  %v3115_v56 = vunpack.c.h.s8.bf16 %v1291_v45 }
 0x6e9   : > { %5034 = vmatpush1.bf16.msra.mxu0 %v3074_v21  ;;  %6346 = vmatpush1.bf16.msra.mxu1 %v3076_v10  ;;  %v1297_v21 = vld [vmem:[%s10733_s30 + $0x1918] sm:$0xff]  ;;  %v3114_v10 = vunpack.c.h.s8.bf16 %v1290_v62 }
 0x6ea   : > { %5035 = vmatprep.subr.bf16.mxu0 %v3079_v28  ;;  %6347 = vmatprep.subr.bf16.mxu1 %v3081_v63  ;;  %v3116_v28 = vunpack.c.h.s8.bf16 %v1292_v54  ;;  %v3119_v63 = vunpack.c.l.s8.bf16 %v1295_v60  ;;  %v3121_v25 = vunpack.c.l.s8.bf16 %v1297_v21  ;;  %v3125_v24 = vunpack.c.h.s8.bf16 %v1297_v21  ;;  %v1310_v54 = vld [vmem:[%s10733_s30 + $0x1980] sm:$0xff]  ;;  %v1315_v21 = vld [vmem:[%s10733_s30 + $0x19a8] sm:$0xff] }
 0x6ed   : > { %5036 = vmatpush1.bf16.msra.mxu0 %v3078_v32  ;;  %6348 = vmatpush1.bf16.msra.mxu1 %v3080_v20  ;;  %v1296_v32 = vld [vmem:[%s10733_s30 + $0x1910] sm:$0xff]  ;;  %v11860_v20 = vrot.slane %v11813_v53, %v10781_v49  ;;  %v3122_v53 = vunpack.c.h.s8.bf16 %v1294_v14 }
 0x6ee   : > { %5037 = vmatprep.subr.bf16.mxu0 %v3083_v58  ;;  %6349 = vmatprep.subr.bf16.mxu1 %v3085_v3  ;;  %v3118_v58 = vunpack.c.l.s8.bf16 %v1294_v14  ;;  %v3120_v3 = vunpack.c.l.s8.bf16 %v1296_v32 }
 0x6f1   : > { %5038 = vmatpush1.bf16.msra.mxu0 %v3082_v6  ;;  %6350 = vmatpush1.bf16.msra.mxu1 %v3084_v23  ;;  %v1299_v6 = vld [vmem:[%s10733_s30 + $0x1928] sm:$0xff]  ;;  %v1301_v23 = vld [vmem:[%s10733_s30 + $0x1938] sm:$0xff] }
 0x6f2   : > { %5039 = vmatprep.subr.bf16.mxu0 %v3087_v7  ;;  %6351 = vmatprep.subr.bf16.mxu1 %v3089_v11  ;;  %v3924_v7 = vcombine.high %v11824_v31, %v11824_v31  ;;  %v3124_v11 = vunpack.c.h.s8.bf16 %v1296_v32  ;;  %v3127_v27 = vunpack.c.l.s8.bf16 %v1299_v6  ;;  %v3129_v12 = vunpack.c.l.s8.bf16 %v1301_v23  ;;  %v1314_v32 = vld [vmem:[%s10733_s30 + $0x19a0] sm:$0xff] }
 0x6f3   : > { %v3133_v35 = vunpack.c.h.s8.bf16 %v1301_v23  ;;  %v1319_v23 = vld [vmem:[%s10733_s30 + $0x19c8] sm:$0xff] }
 0x6f5   : > { %5040 = vmatpush1.bf16.msra.mxu0 %v3086_v13  ;;  %6352 = vmatpush1.bf16.msra.mxu1 %v3088_v15  ;;  %v1298_v13 = vld [vmem:[%s10733_s30 + $0x1920] sm:$0xff]  ;;  %v1300_v15 = vld [vmem:[%s10733_s30 + $0x1930] sm:$0xff] }
 0x6f6   : > { %5041 = vmatprep.subr.bf16.mxu0 %v3091_v16  ;;  %6353 = vmatprep.subr.bf16.mxu1 %v3093_v17  ;;  %v3126_v31 = vunpack.c.l.s8.bf16 %v1298_v13  ;;  %v3128_v16 = vunpack.c.l.s8.bf16 %v1300_v15  ;;  %v3131_v17 = vunpack.c.h.s8.bf16 %v1299_v6 }
 0x6f9   : > { %5042 = vmatpush1.bf16.msra.mxu0 %v3090_v19  ;;  %6354 = vmatpush1.bf16.msra.mxu1 %v3092_v29  ;;  %v1305_v19 = vld [vmem:[%s10733_s30 + $0x1958] sm:$0xff]  ;;  %v3130_v29 = vunpack.c.h.s8.bf16 %v1298_v13  ;;  %v1318_v13 = vld [vmem:[%s10733_s30 + $0x19c0] sm:$0xff] }
 0x6fa   : > { %5043 = vmatprep.subr.bf16.mxu0 %v3095_v22  ;;  %6355 = vmatprep.subr.bf16.mxu1 %v3097_v41  ;;  %v3132_v22 = vunpack.c.h.s8.bf16 %v1300_v15  ;;  %v3135_v41 = vunpack.c.l.s8.bf16 %v1303_v18  ;;  %v3137_v37 = vunpack.c.l.s8.bf16 %v1305_v19  ;;  %v3141_v30 = vunpack.c.h.s8.bf16 %v1305_v19  ;;  %v1320_v15 = vld [vmem:[%s10733_s30 + $0x19d0] sm:$0xff]  ;;  %v1325_v19 = vld [vmem:[%s10733_s30 + $0x19f8] sm:$0xff] }
 0x6fd   : > { %5044 = vmatpush1.bf16.msra.mxu0 %v3094_v26  ;;  %6356 = vmatpush1.bf16.msra.mxu1 %v3096_v59  ;;  %v1304_v26 = vld [vmem:[%s10733_s30 + $0x1950] sm:$0xff]  ;;  %v3134_v59 = vunpack.c.l.s8.bf16 %v1302_v44 }
 0x6fe   : > { %5045 = vmatprep.subr.bf16.mxu0 %v3099_v43  ;;  %6357 = vmatprep.subr.bf16.mxu1 %v3101_v1  ;;  %v3136_v43 = vunpack.c.l.s8.bf16 %v1304_v26  ;;  %v3139_v1 = vunpack.c.h.s8.bf16 %v1303_v18  ;;  %v1323_v18 = vld [vmem:[%s10733_s30 + $0x19e8] sm:$0xff] }
 0x701   : > { %5046 = vmatpush1.bf16.msra.mxu0 %v3098_v4  ;;  %6358 = vmatpush1.bf16.msra.mxu1 %v3100_v57  ;;  %v1309_v4 = vld [vmem:[%s10733_s30 + $0x1978] sm:$0xff]  ;;  %v3138_v57 = vunpack.c.h.s8.bf16 %v1302_v44  ;;  %v1322_v44 = vld [vmem:[%s10733_s30 + $0x19e0] sm:$0xff] }
 0x702   : > { %5047 = vmatprep.subr.bf16.mxu0 %v3103_v33  ;;  %6359 = vmatprep.subr.bf16.mxu1 %v3105_v55  ;;  %v3140_v33 = vunpack.c.h.s8.bf16 %v1304_v26  ;;  %v3143_v55 = vunpack.c.l.s8.bf16 %v1307_v48  ;;  %v3145_v34 = vunpack.c.l.s8.bf16 %v1309_v4  ;;  %v3149_v45 = vunpack.c.h.s8.bf16 %v1309_v4  ;;  %v1324_v26 = vld [vmem:[%s10733_s30 + $0x19f0] sm:$0xff]  ;;  %v1327_v4 = vld [vmem:[%s10733_s30 + $0x1a08] sm:$0xff] }
 0x705   : > { %5048 = vmatpush1.bf16.msra.mxu0 %v3102_v39  ;;  %6360 = vmatpush1.bf16.msra.mxu1 %v3104_v61  ;;  %v1308_v39 = vld [vmem:[%s10733_s30 + $0x1970] sm:$0xff]  ;;  %v3142_v61 = vunpack.c.l.s8.bf16 %v1306_v50 }
 0x706   : > { %5049 = vmatprep.subr.bf16.mxu0 %v3107_v40  ;;  %6361 = vmatprep.subr.bf16.mxu1 %v3109_v42  ;;  %v3144_v40 = vunpack.c.l.s8.bf16 %v1308_v39  ;;  %v3147_v42 = vunpack.c.h.s8.bf16 %v1307_v48  ;;  %v3181_v48 = vunpack.c.h.s8.bf16 %v1325_v19 }
 0x709   : > { %5050 = vmatpush1.bf16.msra.mxu0 %v3106_v46  ;;  %6362 = vmatpush1.bf16.msra.mxu1 %v3108_v47  ;;  %v1313_v46 = vld [vmem:[%s10733_s30 + $0x1998] sm:$0xff]  ;;  %v3146_v47 = vunpack.c.h.s8.bf16 %v1306_v50 }
 0x70a   : > { %5051 = vmatprep.subr.bf16.mxu0 %v3111_v51  ;;  %6363 = vmatprep.subr.bf16.mxu1 %v3113_v52  ;;  %v3148_v51 = vunpack.c.h.s8.bf16 %v1308_v39  ;;  %v3151_v52 = vunpack.c.l.s8.bf16 %v1311_v0  ;;  %v3153_v62 = vunpack.c.l.s8.bf16 %v1313_v46  ;;  %v3157_v60 = vunpack.c.h.s8.bf16 %v1313_v46  ;;  %v1326_v39 = vld [vmem:[%s10733_s30 + $0x1a00] sm:$0xff] }
 0x70b   : > { %v3187_v46 = vunpack.c.h.s8.bf16 %v1327_v4 }
 0x70d   : > { %5052 = vmatpush1.bf16.msra.mxu0 %v3110_v8  ;;  %6364 = vmatpush1.bf16.msra.mxu1 %v3112_v5  ;;  %v1312_v8 = vld [vmem:[%s10733_s30 + $0x1990] sm:$0xff]  ;;  %v3150_v5 = vunpack.c.l.s8.bf16 %v1310_v54 }
 0x70e   : > { %5053 = vmatprep.subr.bf16.mxu0 %v3115_v56  ;;  %6365 = vmatprep.subr.bf16.mxu1 %v3117_v2  ;;  %v3152_v56 = vunpack.c.l.s8.bf16 %v1312_v8  ;;  %v3155_v2 = vunpack.c.h.s8.bf16 %v1311_v0 }
 0x711   : > { %5054 = vmatpush1.bf16.msra.mxu0 %v3114_v10  ;;  %6366 = vmatpush1.bf16.msra.mxu1 %v3116_v28  ;;  %v1317_v10 = vld [vmem:[%s10733_s30 + $0x19b8] sm:$0xff]  ;;  %v3154_v28 = vunpack.c.h.s8.bf16 %v1310_v54 }
 0x712   : > { %5064 = vmatprep.subr.bf16.mxu0 %v3119_v63  ;;  %6376 = vmatprep.subr.bf16.mxu1 %v3121_v25  ;;  %v3156_v63 = vunpack.c.h.s8.bf16 %v1312_v8  ;;  %v3159_v25 = vunpack.c.l.s8.bf16 %v1315_v21  ;;  %v3161_v14 = vunpack.c.l.s8.bf16 %v1317_v10  ;;  %v3165_v6 = vunpack.c.h.s8.bf16 %v1317_v10 }
 0x714   : > { %5056 = vmatmul.mubr.bf16.vlgmr.msra.gmra.mrb[0].mxu0 %v11860_v20  ;;  %6368 = vmatmul.mubr.bf16.vlgmr.msra.gmra.mrb[0].mxu1 %v11860_v20 }
 0x715   : > { %5065 = vmatpush1.bf16.msra.mxu0 %v3118_v58  ;;  %6377 = vmatpush1.bf16.msra.mxu1 %v3120_v3  ;;  %v1316_v58 = vld [vmem:[%s10733_s30 + $0x19b0] sm:$0xff]  ;;  %v3158_v3 = vunpack.c.l.s8.bf16 %v1314_v32 }
 0x716   : > { %5066 = vmatprep.subr.bf16.mxu0 %v3123_v36  ;;  %6378 = vmatprep.subr.bf16.mxu1 %v3125_v24  ;;  %v3160_v36 = vunpack.c.l.s8.bf16 %v1316_v58  ;;  %v3163_v24 = vunpack.c.h.s8.bf16 %v1315_v21 }
 0x717   : > { %5096 = vmatprep.mubr.bf16.mxu0 %v3924_v7  ;;  %6408 = vmatprep.mubr.bf16.mxu1 %v3924_v7  ;;  %v1321_v7 = vld [vmem:[%s10733_s30 + $0x19d8] sm:$0xff] }
 0x719   : > { %5067 = vmatpush1.bf16.msra.mxu0 %v3122_v53  ;;  %6379 = vmatpush1.bf16.msra.mxu1 %v3124_v11  ;;  %v3162_v53 = vunpack.c.h.s8.bf16 %v1314_v32  ;;  %v3164_v11 = vunpack.c.h.s8.bf16 %v1316_v58 }
 0x71a   : > { %5068 = vmatprep.subr.bf16.mxu0 %v3127_v27  ;;  %6380 = vmatprep.subr.bf16.mxu1 %v3129_v12  ;;  %v3167_v27 = vunpack.c.l.s8.bf16 %v1319_v23  ;;  %v3169_v12 = vunpack.c.l.s8.bf16 %v1321_v7 }
 0x71d   : > { %5069 = vmatpush1.bf16.msra.mxu0 %v3126_v31  ;;  %6381 = vmatpush1.bf16.msra.mxu1 %v3128_v16  ;;  %v3166_v31 = vunpack.c.l.s8.bf16 %v1318_v13  ;;  %v3168_v16 = vunpack.c.l.s8.bf16 %v1320_v15 }
 0x71e   : > { %5070 = vmatprep.subr.bf16.mxu0 %v3131_v17  ;;  %6382 = vmatprep.subr.bf16.mxu1 %v3133_v35  ;;  %v3171_v17 = vunpack.c.h.s8.bf16 %v1319_v23  ;;  %v3173_v35 = vunpack.c.h.s8.bf16 %v1321_v7 }
 0x721   : > { %5071 = vmatpush1.bf16.msra.mxu0 %v3130_v29  ;;  %6383 = vmatpush1.bf16.msra.mxu1 %v3132_v22  ;;  %v3170_v29 = vunpack.c.h.s8.bf16 %v1318_v13  ;;  %v3172_v22 = vunpack.c.h.s8.bf16 %v1320_v15 }
 0x722   : > { %5072 = vmatprep.subr.bf16.mxu0 %v3135_v41  ;;  %6384 = vmatprep.subr.bf16.mxu1 %v3137_v37  ;;  %v3175_v41 = vunpack.c.l.s8.bf16 %v1323_v18  ;;  %v3177_v37 = vunpack.c.l.s8.bf16 %v1325_v19 }
 0x725   : > { %5073 = vmatpush1.bf16.msra.mxu0 %v3134_v59  ;;  %6385 = vmatpush1.bf16.msra.mxu1 %v3136_v43  ;;  %v3877_v59 = vcombine.high %v11807_v9, %v11807_v9  ;;  %v3174_v43 = vunpack.c.l.s8.bf16 %v1322_v44  ;;  %v3183_v9 = vunpack.c.l.s8.bf16 %v1327_v4 }
 0x726   : > { %5074 = vmatprep.subr.bf16.mxu0 %v3139_v1  ;;  %6386 = vmatprep.subr.bf16.mxu1 %v3141_v30  ;;  %v3176_v1 = vunpack.c.l.s8.bf16 %v1324_v26  ;;  %v3179_v30 = vunpack.c.h.s8.bf16 %v1323_v18 }
 0x729   : > { %5075 = vmatpush1.bf16.msra.mxu0 %v3138_v57  ;;  %6387 = vmatpush1.bf16.msra.mxu1 %v3140_v33  ;;  %v1329_v57 = vld [vmem:[%s10733_s30 + $0x1a18] sm:$0xff]  ;;  %v11899_v33 = vrot.slane %v3877_v59, %v10781_v49 }
 0x72a   : > { %5076 = vmatprep.subr.bf16.mxu0 %v3143_v55  ;;  %6388 = vmatprep.subr.bf16.mxu1 %v3145_v34  ;;  %v3178_v55 = vunpack.c.h.s8.bf16 %v1322_v44  ;;  %v3180_v34 = vunpack.c.h.s8.bf16 %v1324_v26  ;;  %v3185_v50 = vunpack.c.l.s8.bf16 %v1329_v57 }
 0x72d   : > { %5077 = vmatpush1.bf16.msra.mxu0 %v3142_v61  ;;  %6389 = vmatpush1.bf16.msra.mxu1 %v3144_v40  ;;  %v1328_v61 = vld [vmem:[%s10733_s30 + $0x1a10] sm:$0xff]  ;;  %v3893_v40 = vcombine.high %v11899_v33, %v11899_v33 }
 0x72e   : > { %5078 = vmatprep.subr.bf16.mxu0 %v3147_v42  ;;  %6390 = vmatprep.subr.bf16.mxu1 %v3149_v45  ;;  %v3922_v42 = vcombine.high %v11860_v20, %v11860_v20  ;;  %v3182_v45 = vunpack.c.l.s8.bf16 %v1326_v39  ;;  %v3184_v0 = vunpack.c.l.s8.bf16 %v1328_v61  ;;  %v3186_v20 = vunpack.c.h.s8.bf16 %v1326_v39 }
 0x72f   : > { %v3188_v54 = vunpack.c.h.s8.bf16 %v1328_v61 }
 0x731   : > { %5079 = vmatpush1.bf16.msra.mxu0 %v3146_v47  ;;  %6391 = vmatpush1.bf16.msra.mxu1 %v3148_v51  ;;  %v3189_v47 = vunpack.c.h.s8.bf16 %v1329_v57  ;;  %v1331_v51 = vld [vmem:[%s10733_s30 + $0x1a28] sm:$0xff] }
 0x732   : > { %5080 = vmatprep.subr.bf16.mxu0 %v3151_v52  ;;  %6392 = vmatprep.subr.bf16.mxu1 %v3153_v62  ;;  %v1333_v52 = vld [vmem:[%s10733_s30 + $0x1a38] sm:$0xff]  ;;  %v11910_v62 = vrot.slane %v3893_v40, %v10781_v49  ;;  %v3191_v8 = vunpack.c.l.s8.bf16 %v1331_v51  ;;  %v3195_v10 = vunpack.c.h.s8.bf16 %v1331_v51  ;;  %v1346_v40 = vld [vmem:[%s10733_s30 + $0x1aa0] sm:$0xff]  ;;  %v1351_v51 = vld [vmem:[%s10733_s30 + $0x1ac8] sm:$0xff] }
 0x735   : > { %5081 = vmatpush1.bf16.msra.mxu0 %v3150_v5  ;;  %6393 = vmatpush1.bf16.msra.mxu1 %v3152_v56  ;;  %v3193_v5 = vunpack.c.l.s8.bf16 %v1333_v52  ;;  %v1330_v56 = vld [vmem:[%s10733_s30 + $0x1a20] sm:$0xff] }
 0x736   : > { %5082 = vmatprep.subr.bf16.mxu0 %v3155_v2  ;;  %6394 = vmatprep.subr.bf16.mxu1 %v3157_v60  ;;  %v1332_v2 = vld [vmem:[%s10733_s30 + $0x1a30] sm:$0xff]  ;;  %v3190_v60 = vunpack.c.l.s8.bf16 %v1330_v56 }
 0x737   : > { %v3192_v21 = vunpack.c.l.s8.bf16 %v1332_v2  ;;  %v3196_v32 = vunpack.c.h.s8.bf16 %v1332_v2  ;;  %v1352_v2 = vld [vmem:[%s10733_s30 + $0x1ad0] sm:$0xff] }
 0x739   : > { %5083 = vmatpush1.bf16.msra.mxu0 %v3154_v28  ;;  %6395 = vmatpush1.bf16.msra.mxu1 %v3156_v63  ;;  %v3197_v28 = vunpack.c.h.s8.bf16 %v1333_v52  ;;  %v1335_v63 = vld [vmem:[%s10733_s30 + $0x1a48] sm:$0xff]  ;;  %v1353_v52 = vld [vmem:[%s10733_s30 + $0x1ad8] sm:$0xff] }
 0x73a   : > { %5084 = vmatprep.subr.bf16.mxu0 %v3159_v25  ;;  %6396 = vmatprep.subr.bf16.mxu1 %v3161_v14  ;;  %v1337_v25 = vld [vmem:[%s10733_s30 + $0x1a58] sm:$0xff]  ;;  %v3194_v14 = vunpack.c.h.s8.bf16 %v1330_v56  ;;  %v3199_v58 = vunpack.c.l.s8.bf16 %v1335_v63  ;;  %v3203_v7 = vunpack.c.h.s8.bf16 %v1335_v63  ;;  %v1350_v56 = vld [vmem:[%s10733_s30 + $0x1ac0] sm:$0xff]  ;;  %v1355_v63 = vld [vmem:[%s10733_s30 + $0x1ae8] sm:$0xff] }
 0x73d   : > { %5085 = vmatpush1.bf16.msra.mxu0 %v3158_v3  ;;  %6397 = vmatpush1.bf16.msra.mxu1 %v3160_v36  ;;  %v3201_v3 = vunpack.c.l.s8.bf16 %v1337_v25  ;;  %v1334_v36 = vld [vmem:[%s10733_s30 + $0x1a40] sm:$0xff] }
 0x73e   : > { %5086 = vmatprep.subr.bf16.mxu0 %v3163_v24  ;;  %6398 = vmatprep.subr.bf16.mxu1 %v3165_v6  ;;  %v1336_v24 = vld [vmem:[%s10733_s30 + $0x1a50] sm:$0xff]  ;;  %v3198_v6 = vunpack.c.l.s8.bf16 %v1334_v36 }
 0x73f   : > { %v3200_v23 = vunpack.c.l.s8.bf16 %v1336_v24  ;;  %v3204_v13 = vunpack.c.h.s8.bf16 %v1336_v24  ;;  %v1356_v24 = vld [vmem:[%s10733_s30 + $0x1af0] sm:$0xff] }
 0x741   : > { %5087 = vmatpush1.bf16.msra.mxu0 %v3162_v53  ;;  %6399 = vmatpush1.bf16.msra.mxu1 %v3164_v11  ;;  %v3205_v53 = vunpack.c.h.s8.bf16 %v1337_v25  ;;  %v1339_v11 = vld [vmem:[%s10733_s30 + $0x1a68] sm:$0xff]  ;;  %v1357_v25 = vld [vmem:[%s10733_s30 + $0x1af8] sm:$0xff] }
 0x742   : > { %5088 = vmatprep.subr.bf16.mxu0 %v3167_v27  ;;  %6400 = vmatprep.subr.bf16.mxu1 %v3169_v12  ;;  %v1341_v27 = vld [vmem:[%s10733_s30 + $0x1a78] sm:$0xff]  ;;  %v3202_v12 = vunpack.c.h.s8.bf16 %v1334_v36  ;;  %v3207_v15 = vunpack.c.l.s8.bf16 %v1339_v11  ;;  %v3211_v19 = vunpack.c.h.s8.bf16 %v1339_v11  ;;  %v1354_v36 = vld [vmem:[%s10733_s30 + $0x1ae0] sm:$0xff]  ;;  %v1359_v11 = vld [vmem:[%s10733_s30 + $0x1b08] sm:$0xff] }
 0x745   : > { %5089 = vmatpush1.bf16.msra.mxu0 %v3166_v31  ;;  %6401 = vmatpush1.bf16.msra.mxu1 %v3168_v16  ;;  %v3209_v31 = vunpack.c.l.s8.bf16 %v1341_v27  ;;  %v1338_v16 = vld [vmem:[%s10733_s30 + $0x1a60] sm:$0xff] }
 0x746   : > { %5090 = vmatprep.subr.bf16.mxu0 %v3171_v17  ;;  %6402 = vmatprep.subr.bf16.mxu1 %v3173_v35  ;;  %v1340_v17 = vld [vmem:[%s10733_s30 + $0x1a70] sm:$0xff]  ;;  %v3206_v35 = vunpack.c.l.s8.bf16 %v1338_v16 }
 0x747   : > { %v3208_v18 = vunpack.c.l.s8.bf16 %v1340_v17  ;;  %v3212_v44 = vunpack.c.h.s8.bf16 %v1340_v17  ;;  %v1360_v17 = vld [vmem:[%s10733_s30 + $0x1b10] sm:$0xff] }
 0x749   : > { %5091 = vmatpush1.bf16.msra.mxu0 %v3170_v29  ;;  %6403 = vmatpush1.bf16.msra.mxu1 %v3172_v22  ;;  %v3213_v29 = vunpack.c.h.s8.bf16 %v1341_v27  ;;  %v1343_v22 = vld [vmem:[%s10733_s30 + $0x1a88] sm:$0xff]  ;;  %v1361_v27 = vld [vmem:[%s10733_s30 + $0x1b18] sm:$0xff] }
 0x74a   : > { %5092 = vmatprep.subr.bf16.mxu0 %v3175_v41  ;;  %6404 = vmatprep.subr.bf16.mxu1 %v3177_v37  ;;  %v1345_v41 = vld [vmem:[%s10733_s30 + $0x1a98] sm:$0xff]  ;;  %v3210_v37 = vunpack.c.h.s8.bf16 %v1338_v16  ;;  %v3215_v26 = vunpack.c.l.s8.bf16 %v1343_v22  ;;  %v3219_v4 = vunpack.c.h.s8.bf16 %v1343_v22  ;;  %v1358_v16 = vld [vmem:[%s10733_s30 + $0x1b00] sm:$0xff]  ;;  %v3253_v22 = vunpack.c.h.s8.bf16 %v1361_v27 }
 0x74b   : > { %v3217_v59 = vunpack.c.l.s8.bf16 %v1345_v41  ;;  %v3221_v57 = vunpack.c.h.s8.bf16 %v1345_v41  ;;  %v1363_v41 = vld [vmem:[%s10733_s30 + $0x1b28] sm:$0xff] }
 0x74d   : > { %5093 = vmatpush1.bf16.msra.mxu0 %v3174_v43  ;;  %6405 = vmatpush1.bf16.msra.mxu1 %v3176_v1  ;;  %v1342_v43 = vld [vmem:[%s10733_s30 + $0x1a80] sm:$0xff]  ;;  %v1344_v1 = vld [vmem:[%s10733_s30 + $0x1a90] sm:$0xff] }
 0x74e   : > { %5094 = vmatprep.subr.bf16.mxu0 %v3179_v30  ;;  %6406 = vmatprep.subr.bf16.mxu1 %v3181_v48  ;;  %v3214_v30 = vunpack.c.l.s8.bf16 %v1342_v43  ;;  %v3216_v48 = vunpack.c.l.s8.bf16 %v1344_v1 }
 0x751   : > { %5095 = vmatpush1.bf16.msra.mxu0 %v3178_v55  ;;  %6407 = vmatpush1.bf16.msra.mxu1 %v3180_v34  ;;  %v1347_v55 = vld [vmem:[%s10733_s30 + $0x1aa8] sm:$0xff]  ;;  %v1349_v34 = vld [vmem:[%s10733_s30 + $0x1ab8] sm:$0xff] }
 0x752   : > { %5105 = vmatprep.subr.bf16.mxu0 %v3183_v9  ;;  %6417 = vmatprep.subr.bf16.mxu1 %v3185_v50  ;;  %v3218_v9 = vunpack.c.h.s8.bf16 %v1342_v43  ;;  %v3220_v50 = vunpack.c.h.s8.bf16 %v1344_v1  ;;  %v3223_v39 = vunpack.c.l.s8.bf16 %v1347_v55  ;;  %v3225_v61 = vunpack.c.l.s8.bf16 %v1349_v34  ;;  %v1362_v1 = vld [vmem:[%s10733_s30 + $0x1b20] sm:$0xff] }
 0x754   : > { %5097 = vmatmul.mubr.bf16.vlgmr.msra.gmra.mrb[0].mxu0 %v3922_v42  ;;  %6409 = vmatmul.mubr.bf16.vlgmr.msra.gmra.mrb[0].mxu1 %v3922_v42  ;;  %v1348_v42 = vld [vmem:[%s10733_s30 + $0x1ab0] sm:$0xff] }
 0x755   : > { %5106 = vmatpush1.bf16.msra.mxu0 %v3182_v45  ;;  %6418 = vmatpush1.bf16.msra.mxu1 %v3184_v0  ;;  %v3222_v45 = vunpack.c.l.s8.bf16 %v1346_v40  ;;  %v3224_v0 = vunpack.c.l.s8.bf16 %v1348_v42 }
 0x756   : > { %5107 = vmatprep.subr.bf16.mxu0 %v3187_v46  ;;  %6419 = vmatprep.subr.bf16.mxu1 %v3189_v47  ;;  %v3227_v46 = vunpack.c.h.s8.bf16 %v1347_v55  ;;  %v3229_v47 = vunpack.c.h.s8.bf16 %v1349_v34  ;;  %v1367_v55 = vld [vmem:[%s10733_s30 + $0x1b48] sm:$0xff]  ;;  %v1369_v34 = vld [vmem:[%s10733_s30 + $0x1b58] sm:$0xff] }
 0x757   : > { %5137 = vmatprep.mubr.bf16.mxu0 %v11910_v62  ;;  %6449 = vmatprep.mubr.bf16.mxu1 %v11910_v62 }
 0x759   : > { %5108 = vmatpush1.bf16.msra.mxu0 %v3186_v20  ;;  %6420 = vmatpush1.bf16.msra.mxu1 %v3188_v54  ;;  %v3226_v20 = vunpack.c.h.s8.bf16 %v1346_v40  ;;  %v3228_v54 = vunpack.c.h.s8.bf16 %v1348_v42  ;;  %v1366_v40 = vld [vmem:[%s10733_s30 + $0x1b40] sm:$0xff]  ;;  %v1368_v42 = vld [vmem:[%s10733_s30 + $0x1b50] sm:$0xff] }
 0x75a   : > { %5109 = vmatprep.subr.bf16.mxu0 %v3191_v8  ;;  %6421 = vmatprep.subr.bf16.mxu1 %v3193_v5  ;;  %v3231_v8 = vunpack.c.l.s8.bf16 %v1351_v51  ;;  %v3233_v5 = vunpack.c.l.s8.bf16 %v1353_v52 }
 0x75d   : > { %5110 = vmatpush1.bf16.msra.mxu0 %v3190_v60  ;;  %6422 = vmatpush1.bf16.msra.mxu1 %v3192_v21  ;;  %v3230_v60 = vunpack.c.l.s8.bf16 %v1350_v56  ;;  %v3232_v21 = vunpack.c.l.s8.bf16 %v1352_v2 }
 0x75e   : > { %5111 = vmatprep.subr.bf16.mxu0 %v3195_v10  ;;  %6423 = vmatprep.subr.bf16.mxu1 %v3197_v28  ;;  %v3235_v10 = vunpack.c.h.s8.bf16 %v1351_v51  ;;  %v3237_v28 = vunpack.c.h.s8.bf16 %v1353_v52  ;;  %v1371_v51 = vld [vmem:[%s10733_s30 + $0x1b68] sm:$0xff]  ;;  %v1373_v52 = vld [vmem:[%s10733_s30 + $0x1b78] sm:$0xff] }
 0x761   : > { %5112 = vmatpush1.bf16.msra.mxu0 %v3194_v14  ;;  %6424 = vmatpush1.bf16.msra.mxu1 %v3196_v32  ;;  %v3234_v14 = vunpack.c.h.s8.bf16 %v1350_v56  ;;  %v3236_v32 = vunpack.c.h.s8.bf16 %v1352_v2  ;;  %v1370_v56 = vld [vmem:[%s10733_s30 + $0x1b60] sm:$0xff]  ;;  %v1372_v2 = vld [vmem:[%s10733_s30 + $0x1b70] sm:$0xff] }
 0x762   : > { %5113 = vmatprep.subr.bf16.mxu0 %v3199_v58  ;;  %6425 = vmatprep.subr.bf16.mxu1 %v3201_v3  ;;  %v3239_v58 = vunpack.c.l.s8.bf16 %v1355_v63  ;;  %v3241_v3 = vunpack.c.l.s8.bf16 %v1357_v25 }
 0x765   : > { %5114 = vmatpush1.bf16.msra.mxu0 %v3198_v6  ;;  %6426 = vmatpush1.bf16.msra.mxu1 %v3200_v23  ;;  %v3238_v6 = vunpack.c.l.s8.bf16 %v1354_v36  ;;  %v3240_v23 = vunpack.c.l.s8.bf16 %v1356_v24 }
 0x766   : > { %5115 = vmatprep.subr.bf16.mxu0 %v3203_v7  ;;  %6427 = vmatprep.subr.bf16.mxu1 %v3205_v53  ;;  %v3243_v7 = vunpack.c.h.s8.bf16 %v1355_v63  ;;  %v3245_v53 = vunpack.c.h.s8.bf16 %v1357_v25  ;;  %v1375_v63 = vld [vmem:[%s10733_s30 + $0x1b88] sm:$0xff]  ;;  %v1377_v25 = vld [vmem:[%s10733_s30 + $0x1b98] sm:$0xff] }
 0x769   : > { %5116 = vmatpush1.bf16.msra.mxu0 %v3202_v12  ;;  %6428 = vmatpush1.bf16.msra.mxu1 %v3204_v13  ;;  %v3242_v12 = vunpack.c.h.s8.bf16 %v1354_v36  ;;  %v3244_v13 = vunpack.c.h.s8.bf16 %v1356_v24  ;;  %v1374_v36 = vld [vmem:[%s10733_s30 + $0x1b80] sm:$0xff]  ;;  %v1376_v24 = vld [vmem:[%s10733_s30 + $0x1b90] sm:$0xff] }
 0x76a   : > { %5117 = vmatprep.subr.bf16.mxu0 %v3207_v15  ;;  %6429 = vmatprep.subr.bf16.mxu1 %v3209_v31  ;;  %v3247_v15 = vunpack.c.l.s8.bf16 %v1359_v11  ;;  %v3249_v31 = vunpack.c.l.s8.bf16 %v1361_v27  ;;  %v1381_v27 = vld [vmem:[%s10733_s30 + $0x1bb8] sm:$0xff] }
 0x76d   : > { %5118 = vmatpush1.bf16.msra.mxu0 %v3206_v35  ;;  %6430 = vmatpush1.bf16.msra.mxu1 %v3208_v18  ;;  %v11946_v35 = vrot.slane %v11899_v33, %v10781_v49  ;;  %v3246_v18 = vunpack.c.l.s8.bf16 %v1358_v16  ;;  %v3250_v33 = vunpack.c.h.s8.bf16 %v1358_v16  ;;  %v1378_v16 = vld [vmem:[%s10733_s30 + $0x1ba0] sm:$0xff] }
 0x76e   : > { %5119 = vmatprep.subr.bf16.mxu0 %v3211_v19  ;;  %6431 = vmatprep.subr.bf16.mxu1 %v3213_v29  ;;  %v3248_v19 = vunpack.c.l.s8.bf16 %v1360_v17  ;;  %v3251_v29 = vunpack.c.h.s8.bf16 %v1359_v11  ;;  %v1379_v11 = vld [vmem:[%s10733_s30 + $0x1ba8] sm:$0xff] }
 0x771   : > { %5120 = vmatpush1.bf16.msra.mxu0 %v3210_v37  ;;  %6432 = vmatpush1.bf16.msra.mxu1 %v3212_v44  ;;  %v1365_v37 = vld [vmem:[%s10733_s30 + $0x1b38] sm:$0xff]  ;;  %v3925_v44 = vcombine.high %v11910_v62, %v11910_v62  ;;  %v3254_v62 = vunpack.c.l.s8.bf16 %v1362_v1 }
 0x772   : > { %5121 = vmatprep.subr.bf16.mxu0 %v3215_v26  ;;  %6433 = vmatprep.subr.bf16.mxu1 %v3217_v59  ;;  %v3252_v26 = vunpack.c.h.s8.bf16 %v1360_v17  ;;  %v3255_v59 = vunpack.c.l.s8.bf16 %v1363_v41  ;;  %v3257_v43 = vunpack.c.l.s8.bf16 %v1365_v37  ;;  %v1380_v17 = vld [vmem:[%s10733_s30 + $0x1bb0] sm:$0xff] }
 0x775   : > { %5122 = vmatpush1.bf16.msra.mxu0 %v3214_v30  ;;  %6434 = vmatpush1.bf16.msra.mxu1 %v3216_v48  ;;  %v1364_v30 = vld [vmem:[%s10733_s30 + $0x1b30] sm:$0xff] }
 0x776   : > { %5123 = vmatprep.subr.bf16.mxu0 %v3219_v4  ;;  %6435 = vmatprep.subr.bf16.mxu1 %v3221_v57  ;;  %v3256_v48 = vunpack.c.l.s8.bf16 %v1364_v30  ;;  %v3259_v4 = vunpack.c.h.s8.bf16 %v1363_v41  ;;  %v3261_v57 = vunpack.c.h.s8.bf16 %v1365_v37  ;;  %v1383_v41 = vld [vmem:[%s10733_s30 + $0x1bc8] sm:$0xff]  ;;  %v1385_v37 = vld [vmem:[%s10733_s30 + $0x1bd8] sm:$0xff] }
 0x779   : > { %5124 = vmatpush1.bf16.msra.mxu0 %v3218_v9  ;;  %6436 = vmatpush1.bf16.msra.mxu1 %v3220_v50  ;;  %v3258_v9 = vunpack.c.h.s8.bf16 %v1362_v1  ;;  %v3260_v50 = vunpack.c.h.s8.bf16 %v1364_v30  ;;  %v1384_v1 = vld [vmem:[%s10733_s30 + $0x1bd0] sm:$0xff] }
 0x77a   : > { %5125 = vmatprep.subr.bf16.mxu0 %v3223_v39  ;;  %6437 = vmatprep.subr.bf16.mxu1 %v3225_v61  ;;  %v3263_v39 = vunpack.c.l.s8.bf16 %v1367_v55  ;;  %v3265_v61 = vunpack.c.l.s8.bf16 %v1369_v34 }
 0x77d   : > { %5126 = vmatpush1.bf16.msra.mxu0 %v3222_v45  ;;  %6438 = vmatpush1.bf16.msra.mxu1 %v3224_v0  ;;  %v3262_v45 = vunpack.c.l.s8.bf16 %v1366_v40  ;;  %v3264_v0 = vunpack.c.l.s8.bf16 %v1368_v42 }
 0x77e   : > { %5127 = vmatprep.subr.bf16.mxu0 %v3227_v46  ;;  %6439 = vmatprep.subr.bf16.mxu1 %v3229_v47  ;;  %v3267_v46 = vunpack.c.h.s8.bf16 %v1367_v55  ;;  %v3269_v47 = vunpack.c.h.s8.bf16 %v1369_v34  ;;  %v1389_v55 = vld [vmem:[%s10733_s30 + $0x1bf8] sm:$0xff] }
 0x781   : > { %5128 = vmatpush1.bf16.msra.mxu0 %v3226_v20  ;;  %6440 = vmatpush1.bf16.msra.mxu1 %v3228_v54  ;;  %v3266_v20 = vunpack.c.h.s8.bf16 %v1366_v40  ;;  %v3268_v54 = vunpack.c.h.s8.bf16 %v1368_v42  ;;  %v1388_v40 = vld [vmem:[%s10733_s30 + $0x1bf0] sm:$0xff] }
 0x782   : > { %5129 = vmatprep.subr.bf16.mxu0 %v3231_v8  ;;  %6441 = vmatprep.subr.bf16.mxu1 %v3233_v5  ;;  %v3271_v8 = vunpack.c.l.s8.bf16 %v1371_v51  ;;  %v3273_v5 = vunpack.c.l.s8.bf16 %v1373_v52  ;;  %v11981_v42 = vld [vmem:[%s10755_s15 + $0x38] sm:$0xff] }
 0x785   : > { %5130 = vmatpush1.bf16.msra.mxu0 %v3230_v60  ;;  %6442 = vmatpush1.bf16.msra.mxu1 %v3232_v21  ;;  %v3270_v60 = vunpack.c.l.s8.bf16 %v1370_v56  ;;  %v3272_v21 = vunpack.c.l.s8.bf16 %v1372_v2 }
 0x786   : > { %5131 = vmatprep.subr.bf16.mxu0 %v3235_v10  ;;  %6443 = vmatprep.subr.bf16.mxu1 %v3237_v28  ;;  %v3275_v10 = vunpack.c.h.s8.bf16 %v1371_v51  ;;  %v3277_v28 = vunpack.c.h.s8.bf16 %v1373_v52  ;;  %v1391_v51 = vld [vmem:[%s10733_s30 + $0x1c08] sm:$0xff]  ;;  %v1393_v52 = vld [vmem:[%s10733_s30 + $0x1c18] sm:$0xff] }
 0x789   : > { %5132 = vmatpush1.bf16.msra.mxu0 %v3234_v14  ;;  %6444 = vmatpush1.bf16.msra.mxu1 %v3236_v32  ;;  %v3274_v14 = vunpack.c.h.s8.bf16 %v1370_v56  ;;  %v3276_v32 = vunpack.c.h.s8.bf16 %v1372_v2  ;;  %v3313_v56 = vunpack.c.l.s8.bf16 %v1393_v52  ;;  %v1390_v2 = vld [vmem:[%s10733_s30 + $0x1c00] sm:$0xff] }
 0x78a   : > { %5133 = vmatprep.subr.bf16.mxu0 %v3239_v58  ;;  %6445 = vmatprep.subr.bf16.mxu1 %v3241_v3  ;;  %v3279_v58 = vunpack.c.l.s8.bf16 %v1375_v63  ;;  %v3281_v3 = vunpack.c.l.s8.bf16 %v1377_v25 }
 0x78d   : > { %5134 = vmatpush1.bf16.msra.mxu0 %v3238_v6  ;;  %6446 = vmatpush1.bf16.msra.mxu1 %v3240_v23  ;;  %v3278_v6 = vunpack.c.l.s8.bf16 %v1374_v36  ;;  %v3280_v23 = vunpack.c.l.s8.bf16 %v1376_v24 }
 0x78e   : > { %5135 = vmatprep.subr.bf16.mxu0 %v3243_v7  ;;  %6447 = vmatprep.subr.bf16.mxu1 %v3245_v53  ;;  %v3283_v7 = vunpack.c.h.s8.bf16 %v1375_v63  ;;  %v3285_v53 = vunpack.c.h.s8.bf16 %v1377_v25  ;;  %v3315_v25 = vunpack.c.h.s8.bf16 %v1391_v51 }
 0x791   : > { %5136 = vmatpush1.bf16.msra.mxu0 %v3242_v12  ;;  %6448 = vmatpush1.bf16.msra.mxu1 %v3244_v13  ;;  %v3282_v12 = vunpack.c.h.s8.bf16 %v1374_v36  ;;  %v3284_v13 = vunpack.c.h.s8.bf16 %v1376_v24 }
 0x792   : > { %5146 = vmatprep.subr.bf16.mxu0 %v3247_v15  ;;  %6458 = vmatprep.subr.bf16.mxu1 %v3249_v31  ;;  %v3287_v15 = vunpack.c.l.s8.bf16 %v1379_v11  ;;  %v3289_v31 = vunpack.c.l.s8.bf16 %v1381_v27 }
 0x794   : > { %5138 = vmatmul.mubr.bf16.vlgmr.msra.gmra.mrb[0].mxu0 %v11946_v35  ;;  %6450 = vmatmul.mubr.bf16.vlgmr.msra.gmra.mrb[0].mxu1 %v11946_v35 }
 0x795   : > { %5147 = vmatpush1.bf16.msra.mxu0 %v3246_v18  ;;  %6459 = vmatpush1.bf16.msra.mxu1 %v3248_v19  ;;  %v3286_v18 = vunpack.c.l.s8.bf16 %v1378_v16  ;;  %v3288_v19 = vunpack.c.l.s8.bf16 %v1380_v17 }
 0x796   : > { %5148 = vmatprep.subr.bf16.mxu0 %v3251_v29  ;;  %6460 = vmatprep.subr.bf16.mxu1 %v3253_v22  ;;  %v3291_v29 = vunpack.c.h.s8.bf16 %v1379_v11  ;;  %v3293_v22 = vunpack.c.h.s8.bf16 %v1381_v27 }
 0x797   : > { %5178 = vmatprep.mubr.bf16.mxu0 %v3925_v44  ;;  %6490 = vmatprep.mubr.bf16.mxu1 %v3925_v44  ;;  %v3290_v44 = vunpack.c.h.s8.bf16 %v1378_v16 }
 0x799   : > { %5149 = vmatpush1.bf16.msra.mxu0 %v3250_v33  ;;  %6461 = vmatpush1.bf16.msra.mxu1 %v3252_v26  ;;  %v3292_v33 = vunpack.c.h.s8.bf16 %v1380_v17  ;;  %v3295_v26 = vunpack.c.l.s8.bf16 %v1383_v41 }
 0x79a   : > { %5150 = vmatprep.subr.bf16.mxu0 %v3255_v59  ;;  %6462 = vmatprep.subr.bf16.mxu1 %v3257_v43  ;;  %v3297_v59 = vunpack.c.l.s8.bf16 %v1385_v37  ;;  %v1382_v43 = vld [vmem:[%s10733_s30 + $0x1bc0] sm:$0xff] }
 0x79b   : > { %v3294_v30 = vunpack.c.l.s8.bf16 %v1382_v43  ;;  %v3298_v34 = vunpack.c.h.s8.bf16 %v1382_v43 }
 0x79d   : > { %5151 = vmatpush1.bf16.msra.mxu0 %v3254_v62  ;;  %6463 = vmatpush1.bf16.msra.mxu1 %v3256_v48  ;;  %v3296_v62 = vunpack.c.l.s8.bf16 %v1384_v1  ;;  %v3299_v48 = vunpack.c.h.s8.bf16 %v1383_v41 }
 0x79e   : > { %5152 = vmatprep.subr.bf16.mxu0 %v3259_v4  ;;  %6464 = vmatprep.subr.bf16.mxu1 %v3261_v57  ;;  %v3301_v4 = vunpack.c.h.s8.bf16 %v1385_v37  ;;  %v1387_v57 = vld [vmem:[%s10733_s30 + $0x1be8] sm:$0xff] }
 0x7a1   : > { %5153 = vmatpush1.bf16.msra.mxu0 %v3258_v9  ;;  %6465 = vmatpush1.bf16.msra.mxu1 %v3260_v50  ;;  %v3300_v9 = vunpack.c.h.s8.bf16 %v1384_v1  ;;  %v3303_v50 = vunpack.c.l.s8.bf16 %v1387_v57 }
 0x7a2   : > { %5154 = vmatprep.subr.bf16.mxu0 %v3263_v39  ;;  %6466 = vmatprep.subr.bf16.mxu1 %v3265_v61  ;;  %v3305_v39 = vunpack.c.l.s8.bf16 %v1389_v55  ;;  %v1386_v61 = vld [vmem:[%s10733_s30 + $0x1be0] sm:$0xff] }
 0x7a5   : > { %5155 = vmatpush1.bf16.msra.mxu0 %v3262_v45  ;;  %6467 = vmatpush1.bf16.msra.mxu1 %v3264_v0  ;;  %v3302_v45 = vunpack.c.l.s8.bf16 %v1386_v61  ;;  %v3304_v0 = vunpack.c.l.s8.bf16 %v1388_v40 }
 0x7a6   : > { %5156 = vmatprep.subr.bf16.mxu0 %v3267_v46  ;;  %6468 = vmatprep.subr.bf16.mxu1 %v3269_v47  ;;  %v3307_v46 = vunpack.c.h.s8.bf16 %v1387_v57  ;;  %v3309_v47 = vunpack.c.h.s8.bf16 %v1389_v55 }
 0x7a9   : > { %5157 = vmatpush1.bf16.msra.mxu0 %v3266_v20  ;;  %6469 = vmatpush1.bf16.msra.mxu1 %v3268_v54  ;;  %v11987_v20 = vrot.slane %v11981_v42, %v10781_v49  ;;  %v3306_v54 = vunpack.c.h.s8.bf16 %v1386_v61 }
 0x7aa   : > { %5158 = vmatprep.subr.bf16.mxu0 %v3271_v8  ;;  %6470 = vmatprep.subr.bf16.mxu1 %v3273_v5  ;;  %v3308_v8 = vunpack.c.h.s8.bf16 %v1388_v40  ;;  %v3311_v5 = vunpack.c.l.s8.bf16 %v1391_v51 }
 0x7ad   : > { %5159 = vmatpush1.bf16.msra.mxu0 %v3270_v60  ;;  %6471 = vmatpush1.bf16.msra.mxu1 %v3272_v21  ;;  %v1392_v60 = vld [vmem:[%s10733_s30 + $0x1c10] sm:$0xff]  ;;  %v3941_v21 = vcombine.high %v11987_v20, %v11987_v20 }
 0x7ae   : > { %5160 = vmatprep.subr.bf16.mxu0 %v3275_v10  ;;  %6472 = vmatprep.subr.bf16.mxu1 %v3277_v28  ;;  %v3923_v10 = vcombine.high %v11946_v35, %v11946_v35  ;;  %v3310_v28 = vunpack.c.l.s8.bf16 %v1390_v2  ;;  %v3312_v63 = vunpack.c.l.s8.bf16 %v1392_v60  ;;  %v3314_v35 = vunpack.c.h.s8.bf16 %v1390_v2 }
 0x7af   : > { %v3316_v36 = vunpack.c.h.s8.bf16 %v1392_v60 }
 0x7b1   : > { %5161 = vmatpush1.bf16.msra.mxu0 %v3274_v14  ;;  %6473 = vmatpush1.bf16.msra.mxu1 %v3276_v32  ;;  %v3317_v14 = vunpack.c.h.s8.bf16 %v1393_v52  ;;  %v1395_v32 = vld [vmem:[%s10733_s30 + $0x1c28] sm:$0xff] }
 0x7b2   : > { %5162 = vmatprep.subr.bf16.mxu0 %v3279_v58  ;;  %6474 = vmatprep.subr.bf16.mxu1 %v3281_v3  ;;  %v1397_v58 = vld [vmem:[%s10733_s30 + $0x1c38] sm:$0xff]  ;;  %v11998_v3 = vrot.slane %v3941_v21, %v10781_v49  ;;  %v3319_v24 = vunpack.c.l.s8.bf16 %v1395_v32  ;;  %v3323_v27 = vunpack.c.h.s8.bf16 %v1395_v32 }
 0x7b5   : > { %5163 = vmatpush1.bf16.msra.mxu0 %v3278_v6  ;;  %6475 = vmatpush1.bf16.msra.mxu1 %v3280_v23  ;;  %v3321_v6 = vunpack.c.l.s8.bf16 %v1397_v58  ;;  %v1394_v23 = vld [vmem:[%s10733_s30 + $0x1c20] sm:$0xff] }
 0x7b6   : > { %5164 = vmatprep.subr.bf16.mxu0 %v3283_v7  ;;  %6476 = vmatprep.subr.bf16.mxu1 %v3285_v53  ;;  %v1396_v7 = vld [vmem:[%s10733_s30 + $0x1c30] sm:$0xff]  ;;  %v3318_v53 = vunpack.c.l.s8.bf16 %v1394_v23 }
 0x7b7   : > { %v3320_v11 = vunpack.c.l.s8.bf16 %v1396_v7  ;;  %v3324_v16 = vunpack.c.h.s8.bf16 %v1396_v7  ;;  %v1414_v7 = vld [vmem:[%s10733_s30 + $0x1cc0] sm:$0xff] }
 0x7b9   : > { %5165 = vmatpush1.bf16.msra.mxu0 %v3282_v12  ;;  %6477 = vmatpush1.bf16.msra.mxu1 %v3284_v13  ;;  %v3325_v12 = vunpack.c.h.s8.bf16 %v1397_v58  ;;  %v1399_v13 = vld [vmem:[%s10733_s30 + $0x1c48] sm:$0xff] }
 0x7ba   : > { %5166 = vmatprep.subr.bf16.mxu0 %v3287_v15  ;;  %6478 = vmatprep.subr.bf16.mxu1 %v3289_v31  ;;  %v1401_v15 = vld [vmem:[%s10733_s30 + $0x1c58] sm:$0xff]  ;;  %v3322_v31 = vunpack.c.h.s8.bf16 %v1394_v23  ;;  %v3327_v17 = vunpack.c.l.s8.bf16 %v1399_v13  ;;  %v3331_v37 = vunpack.c.h.s8.bf16 %v1399_v13  ;;  %v1415_v58 = vld [vmem:[%s10733_s30 + $0x1cc8] sm:$0xff] }
 0x7bd   : > { %5167 = vmatpush1.bf16.msra.mxu0 %v3286_v18  ;;  %6479 = vmatpush1.bf16.msra.mxu1 %v3288_v19  ;;  %v3329_v18 = vunpack.c.l.s8.bf16 %v1401_v15  ;;  %v1398_v19 = vld [vmem:[%s10733_s30 + $0x1c40] sm:$0xff] }
 0x7be   : > { %5168 = vmatprep.subr.bf16.mxu0 %v3291_v29  ;;  %6480 = vmatprep.subr.bf16.mxu1 %v3293_v22  ;;  %v1400_v29 = vld [vmem:[%s10733_s30 + $0x1c50] sm:$0xff]  ;;  %v3326_v22 = vunpack.c.l.s8.bf16 %v1398_v19 }
 0x7bf   : > { %v3328_v41 = vunpack.c.l.s8.bf16 %v1400_v29  ;;  %v3332_v43 = vunpack.c.h.s8.bf16 %v1400_v29  ;;  %v1418_v29 = vld [vmem:[%s10733_s30 + $0x1ce0] sm:$0xff] }
 0x7c1   : > { %5169 = vmatpush1.bf16.msra.mxu0 %v3290_v44  ;;  %6481 = vmatpush1.bf16.msra.mxu1 %v3292_v33  ;;  %v3333_v44 = vunpack.c.h.s8.bf16 %v1401_v15  ;;  %v1403_v33 = vld [vmem:[%s10733_s30 + $0x1c68] sm:$0xff] }
 0x7c2   : > { %5170 = vmatprep.subr.bf16.mxu0 %v3295_v26  ;;  %6482 = vmatprep.subr.bf16.mxu1 %v3297_v59  ;;  %v1405_v26 = vld [vmem:[%s10733_s30 + $0x1c78] sm:$0xff]  ;;  %v3330_v59 = vunpack.c.h.s8.bf16 %v1398_v19  ;;  %v3335_v1 = vunpack.c.l.s8.bf16 %v1403_v33  ;;  %v3339_v55 = vunpack.c.h.s8.bf16 %v1403_v33  ;;  %v1419_v15 = vld [vmem:[%s10733_s30 + $0x1ce8] sm:$0xff] }
 0x7c5   : > { %5171 = vmatpush1.bf16.msra.mxu0 %v3294_v30  ;;  %6483 = vmatpush1.bf16.msra.mxu1 %v3296_v62  ;;  %v3337_v30 = vunpack.c.l.s8.bf16 %v1405_v26  ;;  %v1402_v62 = vld [vmem:[%s10733_s30 + $0x1c60] sm:$0xff] }
 0x7c6   : > { %5172 = vmatprep.subr.bf16.mxu0 %v3299_v48  ;;  %6484 = vmatprep.subr.bf16.mxu1 %v3301_v4  ;;  %v1404_v48 = vld [vmem:[%s10733_s30 + $0x1c70] sm:$0xff]  ;;  %v3334_v4 = vunpack.c.l.s8.bf16 %v1402_v62 }
 0x7c7   : > { %v3336_v57 = vunpack.c.l.s8.bf16 %v1404_v48  ;;  %v3340_v61 = vunpack.c.h.s8.bf16 %v1404_v48  ;;  %v1422_v48 = vld [vmem:[%s10733_s30 + $0x1d00] sm:$0xff] }
 0x7c9   : > { %5173 = vmatpush1.bf16.msra.mxu0 %v3298_v34  ;;  %6485 = vmatpush1.bf16.msra.mxu1 %v3300_v9  ;;  %v3341_v34 = vunpack.c.h.s8.bf16 %v1405_v26  ;;  %v1407_v9 = vld [vmem:[%s10733_s30 + $0x1c88] sm:$0xff] }
 0x7ca   : > { %5174 = vmatprep.subr.bf16.mxu0 %v3303_v50  ;;  %6486 = vmatprep.subr.bf16.mxu1 %v3305_v39  ;;  %v1409_v50 = vld [vmem:[%s10733_s30 + $0x1c98] sm:$0xff]  ;;  %v3338_v39 = vunpack.c.h.s8.bf16 %v1402_v62  ;;  %v3343_v40 = vunpack.c.l.s8.bf16 %v1407_v9  ;;  %v3347_v52 = vunpack.c.h.s8.bf16 %v1407_v9  ;;  %v1423_v26 = vld [vmem:[%s10733_s30 + $0x1d08] sm:$0xff] }
 0x7cb   : > { %v3379_v9 = vunpack.c.h.s8.bf16 %v1423_v26 }
 0x7cd   : > { %5175 = vmatpush1.bf16.msra.mxu0 %v3302_v45  ;;  %6487 = vmatpush1.bf16.msra.mxu1 %v3304_v0  ;;  %v3345_v45 = vunpack.c.l.s8.bf16 %v1409_v50  ;;  %v1406_v0 = vld [vmem:[%s10733_s30 + $0x1c80] sm:$0xff] }
 0x7ce   : > { %5176 = vmatprep.subr.bf16.mxu0 %v3307_v46  ;;  %6488 = vmatprep.subr.bf16.mxu1 %v3309_v47  ;;  %v1408_v46 = vld [vmem:[%s10733_s30 + $0x1c90] sm:$0xff]  ;;  %v3342_v47 = vunpack.c.l.s8.bf16 %v1406_v0 }
 0x7cf   : > { %v3344_v51 = vunpack.c.l.s8.bf16 %v1408_v46  ;;  %v3348_v2 = vunpack.c.h.s8.bf16 %v1408_v46 }
 0x7d1   : > { %5177 = vmatpush1.bf16.msra.mxu0 %v3306_v54  ;;  %6489 = vmatpush1.bf16.msra.mxu1 %v3308_v8  ;;  %v3349_v54 = vunpack.c.h.s8.bf16 %v1409_v50  ;;  %v1411_v8 = vld [vmem:[%s10733_s30 + $0x1ca8] sm:$0xff] }
 0x7d2   : > { %5187 = vmatprep.subr.bf16.mxu0 %v3311_v5  ;;  %6499 = vmatprep.subr.bf16.mxu1 %v3313_v56  ;;  %v1413_v5 = vld [vmem:[%s10733_s30 + $0x1cb8] sm:$0xff]  ;;  %v3346_v56 = vunpack.c.h.s8.bf16 %v1406_v0  ;;  %v3351_v60 = vunpack.c.l.s8.bf16 %v1411_v8 }
 0x7d3   : > { %v3353_v21 = vunpack.c.l.s8.bf16 %v1413_v5  ;;  %v3357_v32 = vunpack.c.h.s8.bf16 %v1413_v5  ;;  %v1431_v5 = vld [vmem:[%s10733_s30 + $0x1d48] sm:$0xff] }
 0x7d4   : > { %5179 = vmatmul.mubr.bf16.vlgmr.msra.gmra.mrb[0].mxu0 %v3923_v10  ;;  %6491 = vmatmul.mubr.bf16.vlgmr.msra.gmra.mrb[0].mxu1 %v3923_v10  ;;  %v1410_v10 = vld [vmem:[%s10733_s30 + $0x1ca0] sm:$0xff] }
 0x7d5   : > { %5188 = vmatpush1.bf16.msra.mxu0 %v3310_v28  ;;  %6500 = vmatpush1.bf16.msra.mxu1 %v3312_v63  ;;  %v1412_v28 = vld [vmem:[%s10733_s30 + $0x1cb0] sm:$0xff]  ;;  %v3350_v63 = vunpack.c.l.s8.bf16 %v1410_v10 }
 0x7d6   : > { %5189 = vmatprep.subr.bf16.mxu0 %v3315_v25  ;;  %6501 = vmatprep.subr.bf16.mxu1 %v3317_v14  ;;  %v3352_v25 = vunpack.c.l.s8.bf16 %v1412_v28  ;;  %v3355_v14 = vunpack.c.h.s8.bf16 %v1411_v8 }
 0x7d7   : > { %5219 = vmatprep.mubr.bf16.mxu0 %v11998_v3  ;;  %6531 = vmatprep.mubr.bf16.mxu1 %v11998_v3 }
 0x7d9   : > { %5190 = vmatpush1.bf16.msra.mxu0 %v3314_v35  ;;  %6502 = vmatpush1.bf16.msra.mxu1 %v3316_v36  ;;  %v1417_v35 = vld [vmem:[%s10733_s30 + $0x1cd8] sm:$0xff]  ;;  %v3354_v36 = vunpack.c.h.s8.bf16 %v1410_v10 }
 0x7da   : > { %5191 = vmatprep.subr.bf16.mxu0 %v3319_v24  ;;  %6503 = vmatprep.subr.bf16.mxu1 %v3321_v6  ;;  %v3356_v24 = vunpack.c.h.s8.bf16 %v1412_v28  ;;  %v3359_v6 = vunpack.c.l.s8.bf16 %v1415_v58  ;;  %v3361_v23 = vunpack.c.l.s8.bf16 %v1417_v35  ;;  %v3365_v13 = vunpack.c.h.s8.bf16 %v1417_v35  ;;  %v1430_v28 = vld [vmem:[%s10733_s30 + $0x1d40] sm:$0xff]  ;;  %v1435_v35 = vld [vmem:[%s10733_s30 + $0x1d68] sm:$0xff] }
 0x7dd   : > { %5192 = vmatpush1.bf16.msra.mxu0 %v3318_v53  ;;  %6504 = vmatpush1.bf16.msra.mxu1 %v3320_v11  ;;  %v1416_v53 = vld [vmem:[%s10733_s30 + $0x1cd0] sm:$0xff]  ;;  %v3358_v11 = vunpack.c.l.s8.bf16 %v1414_v7 }
 0x7de   : > { %5193 = vmatprep.subr.bf16.mxu0 %v3323_v27  ;;  %6505 = vmatprep.subr.bf16.mxu1 %v3325_v12  ;;  %v3360_v27 = vunpack.c.l.s8.bf16 %v1416_v53  ;;  %v3363_v12 = vunpack.c.h.s8.bf16 %v1415_v58 }
 0x7e1   : > { %5194 = vmatpush1.bf16.msra.mxu0 %v3322_v31  ;;  %6506 = vmatpush1.bf16.msra.mxu1 %v3324_v16  ;;  %v1421_v31 = vld [vmem:[%s10733_s30 + $0x1cf8] sm:$0xff]  ;;  %v3362_v16 = vunpack.c.h.s8.bf16 %v1414_v7 }
 0x7e2   : > { %5195 = vmatprep.subr.bf16.mxu0 %v3327_v17  ;;  %6507 = vmatprep.subr.bf16.mxu1 %v3329_v18  ;;  %v3364_v17 = vunpack.c.h.s8.bf16 %v1416_v53  ;;  %v3367_v18 = vunpack.c.l.s8.bf16 %v1419_v15  ;;  %v3369_v19 = vunpack.c.l.s8.bf16 %v1421_v31  ;;  %v3373_v33 = vunpack.c.h.s8.bf16 %v1421_v31  ;;  %v1434_v53 = vld [vmem:[%s10733_s30 + $0x1d60] sm:$0xff]  ;;  %v1439_v31 = vld [vmem:[%s10733_s30 + $0x1d88] sm:$0xff] }
 0x7e5   : > { %5196 = vmatpush1.bf16.msra.mxu0 %v3326_v22  ;;  %6508 = vmatpush1.bf16.msra.mxu1 %v3328_v41  ;;  %v1420_v22 = vld [vmem:[%s10733_s30 + $0x1cf0] sm:$0xff]  ;;  %v3366_v41 = vunpack.c.l.s8.bf16 %v1418_v29 }
 0x7e6   : > { %5197 = vmatprep.subr.bf16.mxu0 %v3331_v37  ;;  %6509 = vmatprep.subr.bf16.mxu1 %v3333_v44  ;;  %v3368_v37 = vunpack.c.l.s8.bf16 %v1420_v22  ;;  %v3371_v44 = vunpack.c.h.s8.bf16 %v1419_v15 }
 0x7e9   : > { %5198 = vmatpush1.bf16.msra.mxu0 %v3330_v59  ;;  %6510 = vmatpush1.bf16.msra.mxu1 %v3332_v43  ;;  %v1425_v59 = vld [vmem:[%s10733_s30 + $0x1d18] sm:$0xff]  ;;  %v3370_v43 = vunpack.c.h.s8.bf16 %v1418_v29 }
 0x7ea   : > { %5199 = vmatprep.subr.bf16.mxu0 %v3335_v1  ;;  %6511 = vmatprep.subr.bf16.mxu1 %v3337_v30  ;;  %v3372_v1 = vunpack.c.h.s8.bf16 %v1420_v22  ;;  %v3375_v30 = vunpack.c.l.s8.bf16 %v1423_v26  ;;  %v3377_v62 = vunpack.c.l.s8.bf16 %v1425_v59  ;;  %v3381_v50 = vunpack.c.h.s8.bf16 %v1425_v59  ;;  %v1438_v22 = vld [vmem:[%s10733_s30 + $0x1d80] sm:$0xff]  ;;  %v1443_v59 = vld [vmem:[%s10733_s30 + $0x1da8] sm:$0xff] }
 0x7ed   : > { %5200 = vmatpush1.bf16.msra.mxu0 %v3334_v4  ;;  %6512 = vmatpush1.bf16.msra.mxu1 %v3336_v57  ;;  %v1424_v4 = vld [vmem:[%s10733_s30 + $0x1d10] sm:$0xff]  ;;  %v12034_v57 = vrot.slane %v11987_v20, %v10781_v49  ;;  %v3378_v20 = vunpack.c.h.s8.bf16 %v1422_v48 }
 0x7ee   : > { %5201 = vmatprep.subr.bf16.mxu0 %v3339_v55  ;;  %6513 = vmatprep.subr.bf16.mxu1 %v3341_v34  ;;  %v3374_v55 = vunpack.c.l.s8.bf16 %v1422_v48  ;;  %v3376_v34 = vunpack.c.l.s8.bf16 %v1424_v4 }
 0x7f1   : > { %5202 = vmatpush1.bf16.msra.mxu0 %v3338_v39  ;;  %6514 = vmatpush1.bf16.msra.mxu1 %v3340_v61  ;;  %v1427_v39 = vld [vmem:[%s10733_s30 + $0x1d28] sm:$0xff]  ;;  %v1429_v61 = vld [vmem:[%s10733_s30 + $0x1d38] sm:$0xff] }
 0x7f2   : > { %5203 = vmatprep.subr.bf16.mxu0 %v3343_v40  ;;  %6515 = vmatprep.subr.bf16.mxu1 %v3345_v45  ;;  %v3973_v40 = vcombine.high %v11998_v3, %v11998_v3  ;;  %v3380_v45 = vunpack.c.h.s8.bf16 %v1424_v4  ;;  %v3383_v0 = vunpack.c.l.s8.bf16 %v1427_v39  ;;  %v3385_v46 = vunpack.c.l.s8.bf16 %v1429_v61  ;;  %v1442_v4 = vld [vmem:[%s10733_s30 + $0x1da0] sm:$0xff] }
 0x7f3   : > { %v3389_v8 = vunpack.c.h.s8.bf16 %v1429_v61  ;;  %v1447_v61 = vld [vmem:[%s10733_s30 + $0x1dc8] sm:$0xff] }
 0x7f5   : > { %5204 = vmatpush1.bf16.msra.mxu0 %v3342_v47  ;;  %6516 = vmatpush1.bf16.msra.mxu1 %v3344_v51  ;;  %v1426_v47 = vld [vmem:[%s10733_s30 + $0x1d20] sm:$0xff]  ;;  %v1428_v51 = vld [vmem:[%s10733_s30 + $0x1d30] sm:$0xff] }
 0x7f6   : > { %5205 = vmatprep.subr.bf16.mxu0 %v3347_v52  ;;  %6517 = vmatprep.subr.bf16.mxu1 %v3349_v54  ;;  %v3382_v3 = vunpack.c.l.s8.bf16 %v1426_v47  ;;  %v3384_v52 = vunpack.c.l.s8.bf16 %v1428_v51  ;;  %v3387_v54 = vunpack.c.h.s8.bf16 %v1427_v39 }
 0x7f9   : > { %5206 = vmatpush1.bf16.msra.mxu0 %v3346_v56  ;;  %6518 = vmatpush1.bf16.msra.mxu1 %v3348_v2  ;;  %v1433_v56 = vld [vmem:[%s10733_s30 + $0x1d58] sm:$0xff]  ;;  %v3386_v2 = vunpack.c.h.s8.bf16 %v1426_v47  ;;  %v1446_v47 = vld [vmem:[%s10733_s30 + $0x1dc0] sm:$0xff] }
 0x7fa   : > { %5207 = vmatprep.subr.bf16.mxu0 %v3351_v60  ;;  %6519 = vmatprep.subr.bf16.mxu1 %v3353_v21  ;;  %v3388_v60 = vunpack.c.h.s8.bf16 %v1428_v51  ;;  %v3391_v21 = vunpack.c.l.s8.bf16 %v1431_v5  ;;  %v3393_v10 = vunpack.c.l.s8.bf16 %v1433_v56  ;;  %v3397_v58 = vunpack.c.h.s8.bf16 %v1433_v56  ;;  %v1448_v51 = vld [vmem:[%s10733_s30 + $0x1dd0] sm:$0xff]  ;;  %v1453_v56 = vld [vmem:[%s10733_s30 + $0x1df8] sm:$0xff] }
 0x7fd   : > { %5208 = vmatpush1.bf16.msra.mxu0 %v3350_v63  ;;  %6520 = vmatpush1.bf16.msra.mxu1 %v3352_v25  ;;  %v1432_v63 = vld [vmem:[%s10733_s30 + $0x1d50] sm:$0xff]  ;;  %v3390_v25 = vunpack.c.l.s8.bf16 %v1430_v28 }
 0x7fe   : > { %5209 = vmatprep.subr.bf16.mxu0 %v3355_v14  ;;  %6521 = vmatprep.subr.bf16.mxu1 %v3357_v32  ;;  %v3392_v14 = vunpack.c.l.s8.bf16 %v1432_v63  ;;  %v3395_v32 = vunpack.c.h.s8.bf16 %v1431_v5  ;;  %v1451_v5 = vld [vmem:[%s10733_s30 + $0x1de8] sm:$0xff] }
 0x801   : > { %5210 = vmatpush1.bf16.msra.mxu0 %v3354_v36  ;;  %6522 = vmatpush1.bf16.msra.mxu1 %v3356_v24  ;;  %v1437_v36 = vld [vmem:[%s10733_s30 + $0x1d78] sm:$0xff]  ;;  %v3394_v24 = vunpack.c.h.s8.bf16 %v1430_v28  ;;  %v1450_v28 = vld [vmem:[%s10733_s30 + $0x1de0] sm:$0xff] }
 0x802   : > { %5211 = vmatprep.subr.bf16.mxu0 %v3359_v6  ;;  %6523 = vmatprep.subr.bf16.mxu1 %v3361_v23  ;;  %v3396_v6 = vunpack.c.h.s8.bf16 %v1432_v63  ;;  %v3399_v23 = vunpack.c.l.s8.bf16 %v1435_v35  ;;  %v3401_v7 = vunpack.c.l.s8.bf16 %v1437_v36  ;;  %v3405_v15 = vunpack.c.h.s8.bf16 %v1437_v36  ;;  %v1452_v63 = vld [vmem:[%s10733_s30 + $0x1df0] sm:$0xff]  ;;  %v1455_v36 = vld [vmem:[%s10733_s30 + $0x1e08] sm:$0xff] }
 0x805   : > { %5212 = vmatpush1.bf16.msra.mxu0 %v3358_v11  ;;  %6524 = vmatpush1.bf16.msra.mxu1 %v3360_v27  ;;  %v1436_v11 = vld [vmem:[%s10733_s30 + $0x1d70] sm:$0xff]  ;;  %v3398_v27 = vunpack.c.l.s8.bf16 %v1434_v53 }
 0x806   : > { %5213 = vmatprep.subr.bf16.mxu0 %v3363_v12  ;;  %6525 = vmatprep.subr.bf16.mxu1 %v3365_v13  ;;  %v3400_v12 = vunpack.c.l.s8.bf16 %v1436_v11  ;;  %v3403_v13 = vunpack.c.h.s8.bf16 %v1435_v35  ;;  %v3437_v35 = vunpack.c.h.s8.bf16 %v1453_v56 }
 0x809   : > { %5214 = vmatpush1.bf16.msra.mxu0 %v3362_v16  ;;  %6526 = vmatpush1.bf16.msra.mxu1 %v3364_v17  ;;  %v1441_v16 = vld [vmem:[%s10733_s30 + $0x1d98] sm:$0xff]  ;;  %v3402_v17 = vunpack.c.h.s8.bf16 %v1434_v53 }
 0x80a   : > { %5215 = vmatprep.subr.bf16.mxu0 %v3367_v18  ;;  %6527 = vmatprep.subr.bf16.mxu1 %v3369_v19  ;;  %v3404_v18 = vunpack.c.h.s8.bf16 %v1436_v11  ;;  %v3407_v19 = vunpack.c.l.s8.bf16 %v1439_v31  ;;  %v3409_v29 = vunpack.c.l.s8.bf16 %v1441_v16  ;;  %v3413_v26 = vunpack.c.h.s8.bf16 %v1441_v16  ;;  %v1454_v11 = vld [vmem:[%s10733_s30 + $0x1e00] sm:$0xff] }
 0x80b   : > { %v3443_v16 = vunpack.c.h.s8.bf16 %v1455_v36 }
 0x80d   : > { %5216 = vmatpush1.bf16.msra.mxu0 %v3366_v41  ;;  %6528 = vmatpush1.bf16.msra.mxu1 %v3368_v37  ;;  %v1440_v41 = vld [vmem:[%s10733_s30 + $0x1d90] sm:$0xff]  ;;  %v3406_v37 = vunpack.c.l.s8.bf16 %v1438_v22 }
 0x80e   : > { %5217 = vmatprep.subr.bf16.mxu0 %v3371_v44  ;;  %6529 = vmatprep.subr.bf16.mxu1 %v3373_v33  ;;  %v3408_v44 = vunpack.c.l.s8.bf16 %v1440_v41  ;;  %v3411_v33 = vunpack.c.h.s8.bf16 %v1439_v31 }
 0x811   : > { %5218 = vmatpush1.bf16.msra.mxu0 %v3370_v43  ;;  %6530 = vmatpush1.bf16.msra.mxu1 %v3372_v1  ;;  %v1445_v43 = vld [vmem:[%s10733_s30 + $0x1db8] sm:$0xff]  ;;  %v3410_v1 = vunpack.c.h.s8.bf16 %v1438_v22 }
 0x812   : > { %5228 = vmatprep.subr.bf16.mxu0 %v3375_v30  ;;  %6540 = vmatprep.subr.bf16.mxu1 %v3377_v62  ;;  %v3412_v30 = vunpack.c.h.s8.bf16 %v1440_v41  ;;  %v3415_v62 = vunpack.c.l.s8.bf16 %v1443_v59  ;;  %v3417_v48 = vunpack.c.l.s8.bf16 %v1445_v43  ;;  %v3421_v39 = vunpack.c.h.s8.bf16 %v1445_v43 }
 0x814   : > { %5220 = vmatmul.mubr.bf16.vlgmr.msra.gmra.mrb[0].mxu0 %v12034_v57  ;;  %6532 = vmatmul.mubr.bf16.vlgmr.msra.gmra.mrb[0].mxu1 %v12034_v57 }
 0x815   : > { %5229 = vmatpush1.bf16.msra.mxu0 %v3374_v55  ;;  %6541 = vmatpush1.bf16.msra.mxu1 %v3376_v34  ;;  %v1444_v55 = vld [vmem:[%s10733_s30 + $0x1db0] sm:$0xff]  ;;  %v3414_v34 = vunpack.c.l.s8.bf16 %v1442_v4 }
 0x816   : > { %5230 = vmatprep.subr.bf16.mxu0 %v3379_v9  ;;  %6542 = vmatprep.subr.bf16.mxu1 %v3381_v50  ;;  %v3416_v9 = vunpack.c.l.s8.bf16 %v1444_v55  ;;  %v3419_v50 = vunpack.c.h.s8.bf16 %v1443_v59 }
 0x817   : > { %5260 = vmatprep.mubr.bf16.mxu0 %v3973_v40  ;;  %6572 = vmatprep.mubr.bf16.mxu1 %v3973_v40  ;;  %v1449_v40 = vld [vmem:[%s10733_s30 + $0x1dd8] sm:$0xff] }
 0x819   : > { %5231 = vmatpush1.bf16.msra.mxu0 %v3378_v20  ;;  %6543 = vmatpush1.bf16.msra.mxu1 %v3380_v45  ;;  %v3418_v20 = vunpack.c.h.s8.bf16 %v1442_v4  ;;  %v3420_v45 = vunpack.c.h.s8.bf16 %v1444_v55 }
 0x81a   : > { %5232 = vmatprep.subr.bf16.mxu0 %v3383_v0  ;;  %6544 = vmatprep.subr.bf16.mxu1 %v3385_v46  ;;  %v3423_v0 = vunpack.c.l.s8.bf16 %v1447_v61  ;;  %v3425_v46 = vunpack.c.l.s8.bf16 %v1449_v40 }
 0x81d   : > { %5233 = vmatpush1.bf16.msra.mxu0 %v3382_v3  ;;  %6545 = vmatpush1.bf16.msra.mxu1 %v3384_v52  ;;  %v3422_v3 = vunpack.c.l.s8.bf16 %v1446_v47  ;;  %v3424_v52 = vunpack.c.l.s8.bf16 %v1448_v51 }
 0x81e   : > { %5234 = vmatprep.subr.bf16.mxu0 %v3387_v54  ;;  %6546 = vmatprep.subr.bf16.mxu1 %v3389_v8  ;;  %v3427_v54 = vunpack.c.h.s8.bf16 %v1447_v61  ;;  %v3429_v8 = vunpack.c.h.s8.bf16 %v1449_v40 }
 0x821   : > { %5235 = vmatpush1.bf16.msra.mxu0 %v3386_v2  ;;  %6547 = vmatpush1.bf16.msra.mxu1 %v3388_v60  ;;  %v3426_v2 = vunpack.c.h.s8.bf16 %v1446_v47  ;;  %v3428_v60 = vunpack.c.h.s8.bf16 %v1448_v51 }
 0x822   : > { %5236 = vmatprep.subr.bf16.mxu0 %v3391_v21  ;;  %6548 = vmatprep.subr.bf16.mxu1 %v3393_v10  ;;  %v3431_v21 = vunpack.c.l.s8.bf16 %v1451_v5  ;;  %v3433_v10 = vunpack.c.l.s8.bf16 %v1453_v56 }
 0x825   : > { %5237 = vmatpush1.bf16.msra.mxu0 %v3390_v25  ;;  %6549 = vmatpush1.bf16.msra.mxu1 %v3392_v14  ;;  %v3926_v25 = vcombine.high %v11981_v42, %v11981_v42  ;;  %v3430_v14 = vunpack.c.l.s8.bf16 %v1450_v28  ;;  %v3439_v42 = vunpack.c.l.s8.bf16 %v1455_v36 }
 0x826   : > { %5238 = vmatprep.subr.bf16.mxu0 %v3395_v32  ;;  %6550 = vmatprep.subr.bf16.mxu1 %v3397_v58  ;;  %v3432_v32 = vunpack.c.l.s8.bf16 %v1452_v63  ;;  %v3435_v58 = vunpack.c.h.s8.bf16 %v1451_v5 }
 0x829   : > { %5239 = vmatpush1.bf16.msra.mxu0 %v3394_v24  ;;  %6551 = vmatpush1.bf16.msra.mxu1 %v3396_v6  ;;  %v1457_v24 = vld [vmem:[%s10733_s30 + $0x1e18] sm:$0xff]  ;;  %v12073_v6 = vrot.slane %v3926_v25, %v10781_v49 }
 0x82a   : > { %5240 = vmatprep.subr.bf16.mxu0 %v3399_v23  ;;  %6552 = vmatprep.subr.bf16.mxu1 %v3401_v7  ;;  %v3434_v23 = vunpack.c.h.s8.bf16 %v1450_v28  ;;  %v3436_v7 = vunpack.c.h.s8.bf16 %v1452_v63  ;;  %v3441_v53 = vunpack.c.l.s8.bf16 %v1457_v24 }
 0x82d   : > { %5241 = vmatpush1.bf16.msra.mxu0 %v3398_v27  ;;  %6553 = vmatpush1.bf16.msra.mxu1 %v3400_v12  ;;  %v1456_v27 = vld [vmem:[%s10733_s30 + $0x1e10] sm:$0xff]  ;;  %v3942_v12 = vcombine.high %v12073_v6, %v12073_v6 }
 0x82e   : > { %5242 = vmatprep.subr.bf16.mxu0 %v3403_v13  ;;  %6554 = vmatprep.subr.bf16.mxu1 %v3405_v15  ;;  %v3971_v13 = vcombine.high %v12034_v57, %v12034_v57  ;;  %v3438_v15 = vunpack.c.l.s8.bf16 %v1454_v11  ;;  %v3440_v31 = vunpack.c.l.s8.bf16 %v1456_v27  ;;  %v3442_v57 = vunpack.c.h.s8.bf16 %v1454_v11 }
 0x82f   : > { %v3444_v22 = vunpack.c.h.s8.bf16 %v1456_v27 }
 0x831   : > { %5243 = vmatpush1.bf16.msra.mxu0 %v3402_v17  ;;  %6555 = vmatpush1.bf16.msra.mxu1 %v3404_v18  ;;  %v3445_v17 = vunpack.c.h.s8.bf16 %v1457_v24  ;;  %v1459_v18 = vld [vmem:[%s10733_s30 + $0x1e28] sm:$0xff] }
 0x832   : > { %5244 = vmatprep.subr.bf16.mxu0 %v3407_v19  ;;  %6556 = vmatprep.subr.bf16.mxu1 %v3409_v29  ;;  %v1461_v19 = vld [vmem:[%s10733_s30 + $0x1e38] sm:$0xff]  ;;  %v12084_v29 = vrot.slane %v3942_v12, %v10781_v49  ;;  %v3447_v41 = vunpack.c.l.s8.bf16 %v1459_v18  ;;  %v3451_v43 = vunpack.c.h.s8.bf16 %v1459_v18  ;;  %v1474_v12 = vld [vmem:[%s10733_s30 + $0x1ea0] sm:$0xff]  ;;  %v1479_v18 = vld [vmem:[%s10733_s30 + $0x1ec8] sm:$0xff] }
 0x835   : > { %5245 = vmatpush1.bf16.msra.mxu0 %v3406_v37  ;;  %6557 = vmatpush1.bf16.msra.mxu1 %v3408_v44  ;;  %v3449_v37 = vunpack.c.l.s8.bf16 %v1461_v19  ;;  %v1458_v44 = vld [vmem:[%s10733_s30 + $0x1e20] sm:$0xff] }
 0x836   : > { %5246 = vmatprep.subr.bf16.mxu0 %v3411_v33  ;;  %6558 = vmatprep.subr.bf16.mxu1 %v3413_v26  ;;  %v1460_v33 = vld [vmem:[%s10733_s30 + $0x1e30] sm:$0xff]  ;;  %v3446_v26 = vunpack.c.l.s8.bf16 %v1458_v44 }
 0x837   : > { %v3448_v59 = vunpack.c.l.s8.bf16 %v1460_v33  ;;  %v3452_v4 = vunpack.c.h.s8.bf16 %v1460_v33  ;;  %v1480_v33 = vld [vmem:[%s10733_s30 + $0x1ed0] sm:$0xff] }
 0x839   : > { %5247 = vmatpush1.bf16.msra.mxu0 %v3410_v1  ;;  %6559 = vmatpush1.bf16.msra.mxu1 %v3412_v30  ;;  %v3453_v1 = vunpack.c.h.s8.bf16 %v1461_v19  ;;  %v1463_v30 = vld [vmem:[%s10733_s30 + $0x1e48] sm:$0xff]  ;;  %v1481_v19 = vld [vmem:[%s10733_s30 + $0x1ed8] sm:$0xff] }
 0x83a   : > { %5248 = vmatprep.subr.bf16.mxu0 %v3415_v62  ;;  %6560 = vmatprep.subr.bf16.mxu1 %v3417_v48  ;;  %v1465_v62 = vld [vmem:[%s10733_s30 + $0x1e58] sm:$0xff]  ;;  %v3450_v48 = vunpack.c.h.s8.bf16 %v1458_v44  ;;  %v3455_v55 = vunpack.c.l.s8.bf16 %v1463_v30  ;;  %v3459_v40 = vunpack.c.h.s8.bf16 %v1463_v30  ;;  %v1478_v44 = vld [vmem:[%s10733_s30 + $0x1ec0] sm:$0xff]  ;;  %v1483_v30 = vld [vmem:[%s10733_s30 + $0x1ee8] sm:$0xff] }
 0x83d   : > { %5249 = vmatpush1.bf16.msra.mxu0 %v3414_v34  ;;  %6561 = vmatpush1.bf16.msra.mxu1 %v3416_v9  ;;  %v3457_v34 = vunpack.c.l.s8.bf16 %v1465_v62  ;;  %v1462_v9 = vld [vmem:[%s10733_s30 + $0x1e40] sm:$0xff] }
 0x83e   : > { %5250 = vmatprep.subr.bf16.mxu0 %v3419_v50  ;;  %6562 = vmatprep.subr.bf16.mxu1 %v3421_v39  ;;  %v1464_v50 = vld [vmem:[%s10733_s30 + $0x1e50] sm:$0xff]  ;;  %v3454_v39 = vunpack.c.l.s8.bf16 %v1462_v9 }
 0x83f   : > { %v3456_v61 = vunpack.c.l.s8.bf16 %v1464_v50  ;;  %v3460_v47 = vunpack.c.h.s8.bf16 %v1464_v50  ;;  %v1484_v50 = vld [vmem:[%s10733_s30 + $0x1ef0] sm:$0xff] }
 0x841   : > { %5251 = vmatpush1.bf16.msra.mxu0 %v3418_v20  ;;  %6563 = vmatpush1.bf16.msra.mxu1 %v3420_v45  ;;  %v3461_v20 = vunpack.c.h.s8.bf16 %v1465_v62  ;;  %v1467_v45 = vld [vmem:[%s10733_s30 + $0x1e68] sm:$0xff]  ;;  %v1485_v62 = vld [vmem:[%s10733_s30 + $0x1ef8] sm:$0xff] }
 0x842   : > { %5252 = vmatprep.subr.bf16.mxu0 %v3423_v0  ;;  %6564 = vmatprep.subr.bf16.mxu1 %v3425_v46  ;;  %v1469_v0 = vld [vmem:[%s10733_s30 + $0x1e78] sm:$0xff]  ;;  %v3458_v46 = vunpack.c.h.s8.bf16 %v1462_v9  ;;  %v3463_v51 = vunpack.c.l.s8.bf16 %v1467_v45  ;;  %v3467_v56 = vunpack.c.h.s8.bf16 %v1467_v45  ;;  %v1482_v9 = vld [vmem:[%s10733_s30 + $0x1ee0] sm:$0xff]  ;;  %v1487_v45 = vld [vmem:[%s10733_s30 + $0x1f08] sm:$0xff] }
 0x845   : > { %5253 = vmatpush1.bf16.msra.mxu0 %v3422_v3  ;;  %6565 = vmatpush1.bf16.msra.mxu1 %v3424_v52  ;;  %v3465_v3 = vunpack.c.l.s8.bf16 %v1469_v0  ;;  %v1466_v52 = vld [vmem:[%s10733_s30 + $0x1e60] sm:$0xff] }
 0x846   : > { %5254 = vmatprep.subr.bf16.mxu0 %v3427_v54  ;;  %6566 = vmatprep.subr.bf16.mxu1 %v3429_v8  ;;  %v1468_v54 = vld [vmem:[%s10733_s30 + $0x1e70] sm:$0xff]  ;;  %v3462_v8 = vunpack.c.l.s8.bf16 %v1466_v52 }
 0x847   : > { %v3464_v5 = vunpack.c.l.s8.bf16 %v1468_v54  ;;  %v3468_v28 = vunpack.c.h.s8.bf16 %v1468_v54  ;;  %v1488_v54 = vld [vmem:[%s10733_s30 + $0x1f10] sm:$0xff] }
 0x849   : > { %5255 = vmatpush1.bf16.msra.mxu0 %v3426_v2  ;;  %6567 = vmatpush1.bf16.msra.mxu1 %v3428_v60  ;;  %v3469_v2 = vunpack.c.h.s8.bf16 %v1469_v0  ;;  %v1471_v60 = vld [vmem:[%s10733_s30 + $0x1e88] sm:$0xff]  ;;  %v1489_v0 = vld [vmem:[%s10733_s30 + $0x1f18] sm:$0xff] }
 0x84a   : > { %5256 = vmatprep.subr.bf16.mxu0 %v3431_v21  ;;  %6568 = vmatprep.subr.bf16.mxu1 %v3433_v10  ;;  %v1473_v21 = vld [vmem:[%s10733_s30 + $0x1e98] sm:$0xff]  ;;  %v3466_v10 = vunpack.c.h.s8.bf16 %v1466_v52  ;;  %v3471_v63 = vunpack.c.l.s8.bf16 %v1471_v60  ;;  %v3475_v36 = vunpack.c.h.s8.bf16 %v1471_v60  ;;  %v1486_v52 = vld [vmem:[%s10733_s30 + $0x1f00] sm:$0xff]  ;;  %v3509_v60 = vunpack.c.h.s8.bf16 %v1489_v0 }
 0x84b   : > { %v3473_v25 = vunpack.c.l.s8.bf16 %v1473_v21  ;;  %v3477_v24 = vunpack.c.h.s8.bf16 %v1473_v21  ;;  %v1491_v21 = vld [vmem:[%s10733_s30 + $0x1f28] sm:$0xff] }
 0x84d   : > { %5257 = vmatpush1.bf16.msra.mxu0 %v3430_v14  ;;  %6569 = vmatpush1.bf16.msra.mxu1 %v3432_v32  ;;  %v1470_v14 = vld [vmem:[%s10733_s30 + $0x1e80] sm:$0xff]  ;;  %v1472_v32 = vld [vmem:[%s10733_s30 + $0x1e90] sm:$0xff] }
 0x84e   : > { %5258 = vmatprep.subr.bf16.mxu0 %v3435_v58  ;;  %6570 = vmatprep.subr.bf16.mxu1 %v3437_v35  ;;  %v3470_v58 = vunpack.c.l.s8.bf16 %v1470_v14  ;;  %v3472_v35 = vunpack.c.l.s8.bf16 %v1472_v32 }
 0x851   : > { %5259 = vmatpush1.bf16.msra.mxu0 %v3434_v23  ;;  %6571 = vmatpush1.bf16.msra.mxu1 %v3436_v7  ;;  %v1475_v23 = vld [vmem:[%s10733_s30 + $0x1ea8] sm:$0xff]  ;;  %v1477_v7 = vld [vmem:[%s10733_s30 + $0x1eb8] sm:$0xff] }
 0x852   : > { %5269 = vmatprep.subr.bf16.mxu0 %v3439_v42  ;;  %6581 = vmatprep.subr.bf16.mxu1 %v3441_v53  ;;  %v3474_v42 = vunpack.c.h.s8.bf16 %v1470_v14  ;;  %v3476_v53 = vunpack.c.h.s8.bf16 %v1472_v32  ;;  %v3479_v11 = vunpack.c.l.s8.bf16 %v1475_v23  ;;  %v3481_v27 = vunpack.c.l.s8.bf16 %v1477_v7  ;;  %v1490_v14 = vld [vmem:[%s10733_s30 + $0x1f20] sm:$0xff]  ;;  %v1492_v32 = vld [vmem:[%s10733_s30 + $0x1f30] sm:$0xff] }
 0x854   : > { %5261 = vmatmul.mubr.bf16.vlgmr.msra.gmra.mrb[0].mxu0 %v3971_v13  ;;  %6573 = vmatmul.mubr.bf16.vlgmr.msra.gmra.mrb[0].mxu1 %v3971_v13  ;;  %v1476_v13 = vld [vmem:[%s10733_s30 + $0x1eb0] sm:$0xff] }
 0x855   : > { %5270 = vmatpush1.bf16.msra.mxu0 %v3438_v15  ;;  %6582 = vmatpush1.bf16.msra.mxu1 %v3440_v31  ;;  %v3478_v15 = vunpack.c.l.s8.bf16 %v1474_v12  ;;  %v3480_v31 = vunpack.c.l.s8.bf16 %v1476_v13 }
 0x856   : > { %5271 = vmatprep.subr.bf16.mxu0 %v3443_v16  ;;  %6583 = vmatprep.subr.bf16.mxu1 %v3445_v17  ;;  %v3483_v16 = vunpack.c.h.s8.bf16 %v1475_v23  ;;  %v3485_v17 = vunpack.c.h.s8.bf16 %v1477_v7  ;;  %v1497_v23 = vld [vmem:[%s10733_s30 + $0x1f58] sm:$0xff]  ;;  %v3514_v7 = vunpack.c.h.s8.bf16 %v1490_v14 }
 0x857   : > { %5301 = vmatprep.mubr.bf16.mxu0 %v12084_v29  ;;  %6613 = vmatprep.mubr.bf16.mxu1 %v12084_v29 }
 0x859   : > { %5272 = vmatpush1.bf16.msra.mxu0 %v3442_v57  ;;  %6584 = vmatpush1.bf16.msra.mxu1 %v3444_v22  ;;  %v3482_v57 = vunpack.c.h.s8.bf16 %v1474_v12  ;;  %v3484_v22 = vunpack.c.h.s8.bf16 %v1476_v13  ;;  %v1496_v12 = vld [vmem:[%s10733_s30 + $0x1f50] sm:$0xff] }
 0x85a   : > { %5273 = vmatprep.subr.bf16.mxu0 %v3447_v41  ;;  %6585 = vmatprep.subr.bf16.mxu1 %v3449_v37  ;;  %v3487_v41 = vunpack.c.l.s8.bf16 %v1479_v18  ;;  %v3489_v37 = vunpack.c.l.s8.bf16 %v1481_v19 }
 0x85d   : > { %5274 = vmatpush1.bf16.msra.mxu0 %v3446_v26  ;;  %6586 = vmatpush1.bf16.msra.mxu1 %v3448_v59  ;;  %v3486_v26 = vunpack.c.l.s8.bf16 %v1478_v44  ;;  %v3488_v59 = vunpack.c.l.s8.bf16 %v1480_v33 }
 0x85e   : > { %5275 = vmatprep.subr.bf16.mxu0 %v3451_v43  ;;  %6587 = vmatprep.subr.bf16.mxu1 %v3453_v1  ;;  %v3491_v43 = vunpack.c.h.s8.bf16 %v1479_v18  ;;  %v3493_v1 = vunpack.c.h.s8.bf16 %v1481_v19  ;;  %v1501_v18 = vld [vmem:[%s10733_s30 + $0x1f78] sm:$0xff] }
 0x861   : > { %5276 = vmatpush1.bf16.msra.mxu0 %v3450_v48  ;;  %6588 = vmatpush1.bf16.msra.mxu1 %v3452_v4  ;;  %v3490_v48 = vunpack.c.h.s8.bf16 %v1478_v44  ;;  %v3492_v4 = vunpack.c.h.s8.bf16 %v1480_v33  ;;  %v1500_v44 = vld [vmem:[%s10733_s30 + $0x1f70] sm:$0xff] }
 0x862   : > { %5277 = vmatprep.subr.bf16.mxu0 %v3455_v55  ;;  %6589 = vmatprep.subr.bf16.mxu1 %v3457_v34  ;;  %v3495_v55 = vunpack.c.l.s8.bf16 %v1483_v30  ;;  %v3497_v34 = vunpack.c.l.s8.bf16 %v1485_v62 }
 0x865   : > { %5278 = vmatpush1.bf16.msra.mxu0 %v3454_v39  ;;  %6590 = vmatpush1.bf16.msra.mxu1 %v3456_v61  ;;  %v3494_v39 = vunpack.c.l.s8.bf16 %v1482_v9  ;;  %v3496_v61 = vunpack.c.l.s8.bf16 %v1484_v50 }
 0x866   : > { %5279 = vmatprep.subr.bf16.mxu0 %v3459_v40  ;;  %6591 = vmatprep.subr.bf16.mxu1 %v3461_v20  ;;  %v3499_v40 = vunpack.c.h.s8.bf16 %v1483_v30  ;;  %v3501_v20 = vunpack.c.h.s8.bf16 %v1485_v62  ;;  %v1505_v30 = vld [vmem:[%s10733_s30 + $0x1f98] sm:$0xff] }
 0x869   : > { %5280 = vmatpush1.bf16.msra.mxu0 %v3458_v46  ;;  %6592 = vmatpush1.bf16.msra.mxu1 %v3460_v47  ;;  %v3498_v46 = vunpack.c.h.s8.bf16 %v1482_v9  ;;  %v3500_v47 = vunpack.c.h.s8.bf16 %v1484_v50  ;;  %v1504_v9 = vld [vmem:[%s10733_s30 + $0x1f90] sm:$0xff] }
 0x86a   : > { %5281 = vmatprep.subr.bf16.mxu0 %v3463_v51  ;;  %6593 = vmatprep.subr.bf16.mxu1 %v3465_v3  ;;  %v3503_v51 = vunpack.c.l.s8.bf16 %v1487_v45  ;;  %v3505_v3 = vunpack.c.l.s8.bf16 %v1489_v0 }
 0x86d   : > { %5282 = vmatpush1.bf16.msra.mxu0 %v3462_v8  ;;  %6594 = vmatpush1.bf16.msra.mxu1 %v3464_v5  ;;  %v12120_v8 = vrot.slane %v12073_v6, %v10781_v49  ;;  %v3502_v5 = vunpack.c.l.s8.bf16 %v1486_v52  ;;  %v3506_v49 = vunpack.c.h.s8.bf16 %v1486_v52  ;;  %v3508_v6 = vunpack.c.h.s8.bf16 %v1488_v54  ;;  %v1508_v52 = vld [vmem:[%s10733_s30 + $0x1fb0] sm:$0xff] }
 0x86e   : > { %5283 = vmatprep.subr.bf16.mxu0 %v3467_v56  ;;  %6595 = vmatprep.subr.bf16.mxu1 %v3469_v2  ;;  %v3504_v56 = vunpack.c.l.s8.bf16 %v1488_v54  ;;  %v3507_v2 = vunpack.c.h.s8.bf16 %v1487_v45  ;;  %v1509_v45 = vld [vmem:[%s10733_s30 + $0x1fb8] sm:$0xff] }
 0x871   : > { %5284 = vmatpush1.bf16.msra.mxu0 %v3466_v10  ;;  %6596 = vmatpush1.bf16.msra.mxu1 %v3468_v28  ;;  %v1493_v10 = vld [vmem:[%s10733_s30 + $0x1f38] sm:$0xff]  ;;  %v3974_v28 = vcombine.high %v12084_v29, %v12084_v29  ;;  %v3510_v29 = vunpack.c.l.s8.bf16 %v1490_v14 }
 0x872   : > { %5285 = vmatprep.subr.bf16.mxu0 %v3471_v63  ;;  %6597 = vmatprep.subr.bf16.mxu1 %v3473_v25  ;;  %v3511_v63 = vunpack.c.l.s8.bf16 %v1491_v21  ;;  %v3513_v25 = vunpack.c.l.s8.bf16 %v1493_v10 }
 0x875   : > { %5286 = vmatpush1.bf16.msra.mxu0 %v3470_v58  ;;  %6598 = vmatpush1.bf16.msra.mxu1 %v3472_v35  ;;  %v3512_v58 = vunpack.c.l.s8.bf16 %v1492_v32  ;;  %v3515_v35 = vunpack.c.h.s8.bf16 %v1491_v21  ;;  %v1513_v21 = vld [vmem:[%s10733_s30 + $0x1fd8] sm:$0xff] }
 0x876   : > { %5287 = vmatprep.subr.bf16.mxu0 %v3475_v36  ;;  %6599 = vmatprep.subr.bf16.mxu1 %v3477_v24  ;;  %v3517_v36 = vunpack.c.h.s8.bf16 %v1493_v10  ;;  %v1495_v24 = vld [vmem:[%s10733_s30 + $0x1f48] sm:$0xff] }
 0x879   : > { %5288 = vmatpush1.bf16.msra.mxu0 %v3474_v42  ;;  %6600 = vmatpush1.bf16.msra.mxu1 %v3476_v53  ;;  %v3516_v42 = vunpack.c.h.s8.bf16 %v1492_v32  ;;  %v3519_v53 = vunpack.c.l.s8.bf16 %v1495_v24 }
 0x87a   : > { %5289 = vmatprep.subr.bf16.mxu0 %v3479_v11  ;;  %6601 = vmatprep.subr.bf16.mxu1 %v3481_v27  ;;  %v3521_v11 = vunpack.c.l.s8.bf16 %v1497_v23  ;;  %v1494_v27 = vld [vmem:[%s10733_s30 + $0x1f40] sm:$0xff] }
 0x87b   : > { %v3518_v13 = vunpack.c.l.s8.bf16 %v1494_v27  ;;  %v3522_v19 = vunpack.c.h.s8.bf16 %v1494_v27 }
 0x87d   : > { %5290 = vmatpush1.bf16.msra.mxu0 %v3478_v15  ;;  %6602 = vmatpush1.bf16.msra.mxu1 %v3480_v31  ;;  %v3520_v15 = vunpack.c.l.s8.bf16 %v1496_v12  ;;  %v3523_v31 = vunpack.c.h.s8.bf16 %v1495_v24 }
 0x87e   : > { %5291 = vmatprep.subr.bf16.mxu0 %v3483_v16  ;;  %6603 = vmatprep.subr.bf16.mxu1 %v3485_v17  ;;  %v3525_v16 = vunpack.c.h.s8.bf16 %v1497_v23  ;;  %v1499_v17 = vld [vmem:[%s10733_s30 + $0x1f68] sm:$0xff] }
 0x881   : > { %5292 = vmatpush1.bf16.msra.mxu0 %v3482_v57  ;;  %6604 = vmatpush1.bf16.msra.mxu1 %v3484_v22  ;;  %v3524_v57 = vunpack.c.h.s8.bf16 %v1496_v12  ;;  %v3527_v22 = vunpack.c.l.s8.bf16 %v1499_v17 }
 0x882   : > { %5293 = vmatprep.subr.bf16.mxu0 %v3487_v41  ;;  %6605 = vmatprep.subr.bf16.mxu1 %v3489_v37  ;;  %v3529_v41 = vunpack.c.l.s8.bf16 %v1501_v18  ;;  %v1498_v37 = vld [vmem:[%s10733_s30 + $0x1f60] sm:$0xff] }
 0x883   : > { %v3526_v33 = vunpack.c.l.s8.bf16 %v1498_v37  ;;  %v3530_v62 = vunpack.c.h.s8.bf16 %v1498_v37 }
 0x885   : > { %5294 = vmatpush1.bf16.msra.mxu0 %v3486_v26  ;;  %6606 = vmatpush1.bf16.msra.mxu1 %v3488_v59  ;;  %v3528_v26 = vunpack.c.l.s8.bf16 %v1500_v44  ;;  %v3531_v59 = vunpack.c.h.s8.bf16 %v1499_v17  ;;  %v3972_v17 = vcombine.high %v12120_v8, %v12120_v8 }
 0x886   : > { %5295 = vmatprep.subr.bf16.mxu0 %v3491_v43  ;;  %6607 = vmatprep.subr.bf16.mxu1 %v3493_v1  ;;  %v3533_v43 = vunpack.c.h.s8.bf16 %v1501_v18  ;;  %v1503_v1 = vld [vmem:[%s10733_s30 + $0x1f88] sm:$0xff]  ;;  %v10425_v18 = vmov 1983009808  }
 0x889   : > { %5296 = vmatpush1.bf16.msra.mxu0 %v3490_v48  ;;  %6608 = vmatpush1.bf16.msra.mxu1 %v3492_v4  ;;  %v3532_v48 = vunpack.c.h.s8.bf16 %v1500_v44  ;;  %v3535_v4 = vunpack.c.l.s8.bf16 %v1503_v1 }
 0x88a   : > { %5297 = vmatprep.subr.bf16.mxu0 %v3495_v55  ;;  %6609 = vmatprep.subr.bf16.mxu1 %v3497_v34  ;;  %v3537_v55 = vunpack.c.l.s8.bf16 %v1505_v30  ;;  %v1502_v34 = vld [vmem:[%s10733_s30 + $0x1f80] sm:$0xff] }
 0x88b   : > { %v3534_v50 = vunpack.c.l.s8.bf16 %v1502_v34  ;;  %v3538_v0 = vunpack.c.h.s8.bf16 %v1502_v34 }
 0x88d   : > { %5298 = vmatpush1.bf16.msra.mxu0 %v3494_v39  ;;  %6610 = vmatpush1.bf16.msra.mxu1 %v3496_v61  ;;  %v3536_v39 = vunpack.c.l.s8.bf16 %v1504_v9  ;;  %v3539_v61 = vunpack.c.h.s8.bf16 %v1503_v1 }
 0x88e   : > { %5299 = vmatprep.subr.bf16.mxu0 %v3499_v40  ;;  %6611 = vmatprep.subr.bf16.mxu1 %v3501_v20  ;;  %v3541_v40 = vunpack.c.h.s8.bf16 %v1505_v30  ;;  %v1507_v20 = vld [vmem:[%s10733_s30 + $0x1fa8] sm:$0xff] }
 0x891   : > { %5300 = vmatpush1.bf16.msra.mxu0 %v3498_v46  ;;  %6612 = vmatpush1.bf16.msra.mxu1 %v3500_v47  ;;  %v3540_v46 = vunpack.c.h.s8.bf16 %v1504_v9  ;;  %v3543_v47 = vunpack.c.l.s8.bf16 %v1507_v20  ;;  %v6782_v9 = vld [vmem:[%s13770_s4 + $0x80] sm:$0xff] (!%p8726_p9) }
 0x892   : > { %5310 = vmatprep.subr.bf16.mxu0 %v3503_v51  ;;  %6622 = vmatprep.subr.bf16.mxu1 %v3505_v3  ;;  %v3545_v51 = vunpack.c.l.s8.bf16 %v1509_v45  ;;  %v1506_v3 = vld [vmem:[%s10733_s30 + $0x1fa0] sm:$0xff] }
 0x893   : > { %v3542_v54 = vunpack.c.l.s8.bf16 %v1506_v3  ;;  %v3546_v10 = vunpack.c.h.s8.bf16 %v1506_v3  ;;  %v6786_v3 = vld [vmem:[%s13770_s4 + $0xa0] sm:$0xff] (!%p8726_p9) }
 0x894   : > { %5302 = vmatmul.mubr.bf16.vlgmr.msra.gmra.mrb[0].mxu0 %v12120_v8  ;;  %6614 = vmatmul.mubr.bf16.vlgmr.msra.gmra.mrb[0].mxu1 %v12120_v8 }
 0x895   : > { %5311 = vmatpush1.bf16.msra.mxu0 %v3502_v5  ;;  %6623 = vmatpush1.bf16.msra.mxu1 %v3504_v56  ;;  %v3544_v5 = vunpack.c.l.s8.bf16 %v1508_v52  ;;  %v3547_v56 = vunpack.c.h.s8.bf16 %v1507_v20  ;;  %v6784_v20 = vld [vmem:[%s13770_s4 + $0x90] sm:$0xff] (!%p8726_p9) }
 0x896   : > { %5312 = vmatprep.subr.bf16.mxu0 %v3507_v2  ;;  %6624 = vmatprep.subr.bf16.mxu1 %v3509_v60  ;;  %v3549_v2 = vunpack.c.h.s8.bf16 %v1509_v45  ;;  %v1511_v60 = vld [vmem:[%s10733_s30 + $0x1fc8] sm:$0xff]  ;;  %v6785_v45 = vld [vmem:[%s13770_s4 + $0x98] sm:$0xff] (!%p8726_p9) }
 0x897   : > { %5342 = vmatprep.mubr.bf16.mxu0 %v3974_v28  ;;  %6654 = vmatprep.mubr.bf16.mxu1 %v3974_v28  ;;  %v3548_v28 = vunpack.c.h.s8.bf16 %v1508_v52  ;;  %v6787_v52 = vld [vmem:[%s13770_s4 + $0xa8] sm:$0xff] (!%p8726_p9) }
 0x899   : > { %5313 = vmatpush1.bf16.msra.mxu0 %v3506_v49  ;;  %6625 = vmatpush1.bf16.msra.mxu1 %v3508_v6  ;;  %v3551_v49 = vunpack.c.l.s8.bf16 %v1511_v60  ;;  %v3553_v6 = vunpack.c.l.s8.bf16 %v1513_v21 }
 0x89a   : > { %5314 = vmatprep.subr.bf16.mxu0 %v3511_v63  ;;  %6626 = vmatprep.subr.bf16.mxu1 %v3513_v25  ;;  %v1510_v63 = vld [vmem:[%s10733_s30 + $0x1fc0] sm:$0xff]  ;;  %v1512_v25 = vld [vmem:[%s10733_s30 + $0x1fd0] sm:$0xff] }
 0x89b   : > { %v3550_v14 = vunpack.c.l.s8.bf16 %v1510_v63  ;;  %v3552_v32 = vunpack.c.l.s8.bf16 %v1512_v25  ;;  %v3554_v24 = vunpack.c.h.s8.bf16 %v1510_v63  ;;  %v3556_v23 = vunpack.c.h.s8.bf16 %v1512_v25  ;;  %v6790_v63 = vld [vmem:[%s13770_s4 + $0xc0] sm:$0xff] (!%p8726_p9)  ;;  %v6791_v25 = vld [vmem:[%s13770_s4 + $0xc8] sm:$0xff] (!%p8726_p9) }
 0x89d   : > { %5315 = vmatpush1.bf16.msra.mxu0 %v3510_v29  ;;  %6627 = vmatpush1.bf16.msra.mxu1 %v3512_v58  ;;  %v3555_v29 = vunpack.c.h.s8.bf16 %v1511_v60  ;;  %v3557_v58 = vunpack.c.h.s8.bf16 %v1513_v21  ;;  %v6788_v60 = vld [vmem:[%s13770_s4 + $0xb0] sm:$0xff] (!%p8726_p9)  ;;  %v6789_v21 = vld [vmem:[%s13770_s4 + $0xb8] sm:$0xff] (!%p8726_p9) }
 0x89e   : > { %5316 = vmatprep.subr.bf16.mxu0 %v3515_v35  ;;  %6628 = vmatprep.subr.bf16.mxu1 %v3517_v36  ;;  %v1515_v35 = vld [vmem:[%s10733_s30 + $0x1fe8] sm:$0xff]  ;;  %v1517_v36 = vld [vmem:[%s10733_s30 + $0x1ff8] sm:$0xff] }
 0x8a1   : > { %5317 = vmatpush1.bf16.msra.mxu0 %v3514_v7  ;;  %6629 = vmatpush1.bf16.msra.mxu1 %v3516_v42  ;;  %v3559_v7 = vunpack.c.l.s8.bf16 %v1515_v35  ;;  %v3561_v42 = vunpack.c.l.s8.bf16 %v1517_v36 }
 0x8a2   : > { %5318 = vmatprep.subr.bf16.mxu0 %v3519_v53  ;;  %6630 = vmatprep.subr.bf16.mxu1 %v3521_v11  ;;  %v1514_v53 = vld [vmem:[%s10733_s30 + $0x1fe0] sm:$0xff]  ;;  %v1516_v11 = vld [vmem:[%s10733_s30 + $0x1ff0] sm:$0xff] }
 0x8a3   : > { %v3558_v27 = vunpack.c.l.s8.bf16 %v1514_v53  ;;  %v3560_v12 = vunpack.c.l.s8.bf16 %v1516_v11 }
 0x8a5   : > { %5319 = vmatpush1.bf16.msra.mxu0 %v3518_v13  ;;  %6631 = vmatpush1.bf16.msra.mxu1 %v3520_v15  ;;  %v3563_v13 = vunpack.c.h.s8.bf16 %v1515_v35  ;;  %v3565_v15 = vunpack.c.h.s8.bf16 %v1517_v36  ;;  %v9273_v36 = vpack.c.bf16 (!%p8726_p9), %v6791_v25, %v6790_v63 }
 0x8a6   : > { %5320 = vmatprep.subr.bf16.mxu0 %v3523_v31  ;;  %6632 = vmatprep.subr.bf16.mxu1 %v3525_v16  ;;  %v3562_v31 = vunpack.c.h.s8.bf16 %v1514_v53  ;;  %v3564_v16 = vunpack.c.h.s8.bf16 %v1516_v11 }
 0x8a9   : > { %5321 = vmatpush1.bf16.msra.mxu0 %v3522_v19  ;;  %6633 = vmatpush1.bf16.msra.mxu1 %v3524_v57  ;;  %v6670_v19 = vunpack.c.l.s4 %v10425_v18 }
 0x8aa   : > { %5322 = vmatprep.subr.bf16.mxu0 %v3527_v22  ;;  %6634 = vmatprep.subr.bf16.mxu1 %v3529_v41 }
 0x8ab   : > { %v6671_v57 = vunpack.c.0.s8 %v6670_v19 }
 0x8ad   : > { %5323 = vmatpush1.bf16.msra.mxu0 %v3526_v33  ;;  %6635 = vmatpush1.bf16.msra.mxu1 %v3528_v26  ;;  %v12157_v37 = vsub.s32 %v6671_v57, %v10771_v38 }
 0x8ae   : > { %5324 = vmatprep.subr.bf16.mxu0 %v3531_v59  ;;  %6636 = vmatprep.subr.bf16.mxu1 %v3533_v43 }
 0x8b1   : > { %5325 = vmatpush1.bf16.msra.mxu0 %v3530_v62  ;;  %6637 = vmatpush1.bf16.msra.mxu1 %v3532_v48 }
 0x8b2   : > { %5326 = vmatprep.subr.bf16.mxu0 %v3535_v4  ;;  %6638 = vmatprep.subr.bf16.mxu1 %v3537_v55  ;;  %v3566_v4 = vld [vmem:[#allocation2] sm:$0xff] }
 0x8b5   : > { %5327 = vmatpush1.bf16.msra.mxu0 %v3534_v50  ;;  %6639 = vmatpush1.bf16.msra.mxu1 %v3536_v39  ;;  %v6783_v50 = vld [vmem:[%s13770_s4 + $0x88] sm:$0xff] (!%p8726_p9)  ;;  %v6766_v39 = vld [vmem:[%s13770_s4] sm:$0xff] (!%p8726_p9) }
 0x8b6   : > { %5328 = vmatprep.subr.bf16.mxu0 %v3539_v61  ;;  %6640 = vmatprep.subr.bf16.mxu1 %v3541_v40  ;;  %v9257_v61 = vpack.c.bf16 (!%p8726_p9), %v6783_v50, %v6782_v9  ;;  %v6767_v40 = vld [vmem:[%s13770_s4 + $0x8] sm:$0xff] (!%p8726_p9) }
 0x8b9   : > { %5329 = vmatpush1.bf16.msra.mxu0 %v3538_v0  ;;  %6641 = vmatpush1.bf16.msra.mxu1 %v3540_v46  ;;  %v9259_v0 = vpack.c.bf16 (!%p8726_p9), %v6767_v40, %v6766_v39  ;;  %v9261_v46 = vpack.c.bf16 (!%p8726_p9), %v6785_v45, %v6784_v20  ;;  %v6778_v39 = vld [vmem:[%s13770_s4 + $0x60] sm:$0xff] (!%p8726_p9)  ;;  %v6796_v40 = vld [vmem:[%s13770_s4 + $0xf0] sm:$0xff] (!%p8726_p9)  ;;  %v6797_v20 = vld [vmem:[%s13770_s4 + $0xf8] sm:$0xff] (!%p8726_p9) }
 0x8ba   : > { %5330 = vmatprep.subr.bf16.mxu0 %v3543_v47  ;;  %6642 = vmatprep.subr.bf16.mxu1 %v3545_v51  ;;  %v6768_v47 = vld [vmem:[%s13770_s4 + $0x10] sm:$0xff] (!%p8726_p9)  ;;  %v6769_v51 = vld [vmem:[%s13770_s4 + $0x18] sm:$0xff] (!%p8726_p9) }
 0x8bd   : > { %5331 = vmatpush1.bf16.msra.mxu0 %v3542_v54  ;;  %6643 = vmatpush1.bf16.msra.mxu1 %v3544_v5  ;;  %v9263_v54 = vpack.c.bf16 (!%p8726_p9), %v6769_v51, %v6768_v47  ;;  %v9265_v5 = vpack.c.bf16 (!%p8726_p9), %v6787_v52, %v6786_v3  ;;  %v9285_v51 = vpack.c.bf16 (!%p8726_p9), %v6797_v20, %v6796_v40  ;;  %v6780_v3 = vld [vmem:[%s13770_s4 + $0x70] sm:$0xff] (!%p8726_p9)  ;;  %v6781_v52 = vld [vmem:[%s13770_s4 + $0x78] sm:$0xff] (!%p8726_p9)  ;;  %v7095_v40 = vld [vmem:[%s13775_s9] sm:$0xff] (!%p8726_p9) }
 0x8be   : > { %5332 = vmatprep.subr.bf16.mxu0 %v3547_v56  ;;  %6644 = vmatprep.subr.bf16.mxu1 %v3549_v2  ;;  %v6770_v56 = vld [vmem:[%s13770_s4 + $0x20] sm:$0xff] (!%p8726_p9)  ;;  %v6771_v2 = vld [vmem:[%s13770_s4 + $0x28] sm:$0xff] (!%p8726_p9) }
 0x8c1   : > { %5333 = vmatpush1.bf16.msra.mxu0 %v3546_v10  ;;  %6645 = vmatpush1.bf16.msra.mxu1 %v3548_v28  ;;  %v6772_v10 = vld [vmem:[%s13770_s4 + $0x30] sm:$0xff] (!%p8726_p9)  ;;  %v6696_v28 = vsub.s32 (!%p8726_p9), 0, %v10771_v38 }
 0x8c2   : > { %5334 = vmatprep.subr.bf16.mxu0 %v3551_v49  ;;  %6646 = vmatprep.subr.bf16.mxu1 %v3553_v6  ;;  %v9267_v49 = vpack.c.bf16 (!%p8726_p9), %v6771_v2, %v6770_v56  ;;  %v6773_v6 = vld [vmem:[%s13770_s4 + $0x38] sm:$0xff] (!%p8726_p9)  ;;  %v6815_v56 = vld [vmem:[%s13770_s4 + $0x188] sm:$0xff] (!%p8726_p9)  ;;  %v9287_v2 = vpack.c.bf16 (!%p8726_p9), %v6781_v52, %v6780_v3  ;;  %v7097_v52 = vld [vmem:[%s13775_s9 + $0x10] sm:$0xff] (!%p8726_p9) }
 0x8c3   : > { %v9271_v35 = vpack.c.bf16 (!%p8726_p9), %v6773_v6, %v6772_v10  ;;  %v6798_v10 = vld [vmem:[%s13770_s4 + $0x100] sm:$0xff] (!%p8726_p9)  ;;  %v6817_v6 = vld [vmem:[%s13770_s4 + $0x198] sm:$0xff] (!%p8726_p9) }
 0x8c5   : > { %5335 = vmatpush1.bf16.msra.mxu0 %v3550_v14  ;;  %6647 = vmatpush1.bf16.msra.mxu1 %v3552_v32  ;;  %v6700_v14 = vsub.s32 (!%p8726_p9), 1, %v10771_v38  ;;  %v6704_v32 = vsub.s32 (!%p8726_p9), 2, %v10771_v38 }
 0x8c6   : > { %5336 = vmatprep.subr.bf16.mxu0 %v3555_v29  ;;  %6648 = vmatprep.subr.bf16.mxu1 %v3557_v58  ;;  %v6708_v29 = vsub.s32 (!%p8726_p9), 3, %v10771_v38  ;;  %v9269_v58 = vpack.c.bf16 (!%p8726_p9), %v6789_v21, %v6788_v60  ;;  %v6775_v38 = vld [vmem:[%s13770_s4 + $0x48] sm:$0xff] (!%p8726_p9) }
 0x8c9   : > { %5337 = vmatpush1.bf16.msra.mxu0 %v3554_v24  ;;  %6649 = vmatpush1.bf16.msra.mxu1 %v3556_v23  ;;  %v6692_v24 = vld [vmem:[#allocation6] sm:$0xf] (!%p8726_p9)  ;;  %v6729_v23 = vld [vmem:[#allocation8] sm:$0xf] (!%p8726_p9) }
 0x8ca   : > { %5338 = vmatprep.subr.bf16.mxu0 %v3559_v7  ;;  %6650 = vmatprep.subr.bf16.mxu1 %v3561_v42  ;;  %v6697_v7 = vrot.slane (!%p8726_p9), %v6692_v24, %v6696_v28  ;;  %v6701_v42 = vrot.slane (!%p8726_p9), %v6692_v24, %v6700_v14  ;;  %v6705_v53 = vrot.slane (!%p8726_p9), %v6692_v24, %v6704_v32 }
 0x8cb   : > { %v6709_v11 = vrot.slane (!%p8726_p9), %v6692_v24, %v6708_v29 }
 0x8cc   : > { %v6710_v18 = vcombine.low (!%p8726_p9), %v6697_v7, %v6701_v42  ;;  %v6803_v7 = vld [vmem:[%s13770_s4 + $0x128] sm:$0xff] (!%p8726_p9)  ;;  %v6820_v42 = vld [vmem:[%s13770_s4 + $0x1b0] sm:$0xff] (!%p8726_p9) }
 0x8cd   : > { %5339 = vmatpush1.bf16.msra.mxu0 %v3558_v27  ;;  %6651 = vmatpush1.bf16.msra.mxu1 %v3560_v12  ;;  %v6774_v27 = vld [vmem:[%s13770_s4 + $0x40] sm:$0xff] (!%p8726_p9)  ;;  %v6734_v12 = vrot.slane (!%p8726_p9), %v6729_v23, %v6696_v28  ;;  %v6711_v19 = vcombine.low (!%p8726_p9), %v6705_v53, %v6709_v11  ;;  %v6799_v28 = vld [vmem:[%s13770_s4 + $0x108] sm:$0xff] (!%p8726_p9)  ;;  %v6821_v53 = vld [vmem:[%s13770_s4 + $0x1b8] sm:$0xff] (!%p8726_p9) }
 0x8ce   : > { %5340 = vmatprep.subr.bf16.mxu0 %v3563_v13  ;;  %6652 = vmatprep.subr.bf16.mxu1 %v3565_v15  ;;  %v6738_v13 = vrot.slane (!%p8726_p9), %v6729_v23, %v6700_v14  ;;  %v6742_v15 = vrot.slane (!%p8726_p9), %v6729_v23, %v6704_v32  ;;  %v9291_v63 = vpack.c.bf16 (!%p8726_p9), %v6799_v28, %v6798_v10  ;;  %v6800_v32 = vld [vmem:[%s13770_s4 + $0x110] sm:$0xff] (!%p8726_p9)  ;;  %v7100_v10 = vld [vmem:[%s13775_s9 + $0x28] sm:$0xff] (!%p8726_p9)  ;;  %v6999_v28 = vld [vmem:[%s13798_s14] sm:$0xff] (!%p8726_p9) }
 0x8d0   : > { %v6747_v57 = vcombine.low (!%p8726_p9), %v6734_v12, %v6738_v13  ;;  %v6805_v12 = vld [vmem:[%s13770_s4 + $0x138] sm:$0xff] (!%p8726_p9)  ;;  %v6822_v13 = vld [vmem:[%s13770_s4 + $0x1c0] sm:$0xff] (!%p8726_p9) }
 0x8d1   : > { %5341 = vmatpush1.bf16.msra.mxu0 %v3562_v31  ;;  %6653 = vmatpush1.bf16.msra.mxu1 %v3564_v16  ;;  %v6746_v31 = vrot.slane (!%p8726_p9), %v6729_v23, %v6708_v29  ;;  %v6792_v16 = vld [vmem:[%s13770_s4 + $0xd0] sm:$0xff] (!%p8726_p9)  ;;  %v6801_v29 = vld [vmem:[%s13770_s4 + $0x118] sm:$0xff] (!%p8726_p9)  ;;  %v6802_v23 = vld [vmem:[%s13770_s4 + $0x120] sm:$0xff] (!%p8726_p9) }
 0x8d2   : > { %9258 = vmatprep.subr.bf16.mxu1 (!%p8726_p9), %v9257_v61  ;;  %v6779_v61 = vld [vmem:[%s13770_s4 + $0x68] sm:$0xff] (!%p8726_p9)  ;;  %v9299_v11 = vpack.c.bf16 (!%p8726_p9), %v6803_v7, %v6802_v23  ;;  %v7003_v23 = vld [vmem:[%s13798_s14 + $0x20] sm:$0xff] (!%p8726_p9) }
 0x8d3   : > { %v7004_v7 = vld [vmem:[%s13798_s14 + $0x28] sm:$0xff] (!%p8726_p9) }
 0x8d4   : > { %5343 = vmatmul.mubr.bf16.vlgmr.msra.gmra.mrb[0].mxu0 %v3972_v17  ;;  %6655 = vmatmul.mubr.bf16.vlgmr.msra.gmra.mrb[0].mxu1 %v3972_v17  ;;  %v6793_v17 = vld [vmem:[%s13770_s4 + $0xd8] sm:$0xff] (!%p8726_p9) }
 0x8d5   : > { %9260 = vmatpush3.bf16.msra.mxu1 (!%p8726_p9), %v9259_v0  ;;  %v9283_v0 = vpack.c.bf16 (!%p8726_p9), %v6779_v61, %v6778_v39  ;;  %v7111_v39 = vld [vmem:[%s13775_s9 + $0x80] sm:$0xff] (!%p8726_p9)  ;;  %v7112_v61 = vld [vmem:[%s13775_s9 + $0x88] sm:$0xff] (!%p8726_p9) }
 0x8d6   : > { %9262 = vmatprep.subr.bf16.mxu1 (!%p8726_p9), %v9261_v46  ;;  %v9333_v20 = vpack.c.bf16 (!%p8726_p9), %v7112_v61, %v7111_v39  ;;  %v12499_v61 = vld [vmem:[#allocation12] sm:$0xff] (!%p8726_p9) }
 0x8d9   : > { %9264 = vmatpush3.bf16.msra.mxu1 (!%p8726_p9), %v9263_v54 }
 0x8da   : > { %9266 = vmatprep.subr.bf16.mxu1 (!%p8726_p9), %v9265_v5  ;;  %v6814_v5 = vld [vmem:[%s13770_s4 + $0x180] sm:$0xff] (!%p8726_p9) }
 0x8db   : > { %v9289_v21 = vpack.c.bf16 (!%p8726_p9), %v6815_v56, %v6814_v5  ;;  %v7115_v5 = vld [vmem:[%s13775_s9 + $0xa0] sm:$0xff] (!%p8726_p9)  ;;  %v7116_v56 = vld [vmem:[%s13775_s9 + $0xa8] sm:$0xff] (!%p8726_p9) }
 0x8dd   : > { %9268 = vmatpush3.bf16.msra.mxu1 (!%p8726_p9), %v9267_v49  ;;  %v6816_v49 = vld [vmem:[%s13770_s4 + $0x190] sm:$0xff] (!%p8726_p9) }
 0x8de   : > { %9270 = vmatprep.subr.bf16.mxu1 (!%p8726_p9), %v9269_v58  ;;  %v9293_v14 = vpack.c.bf16 (!%p8726_p9), %v6817_v6, %v6816_v49  ;;  %v6818_v58 = vld [vmem:[%s13770_s4 + $0x1a0] sm:$0xff] (!%p8726_p9)  ;;  %v7000_v49 = vld [vmem:[%s13798_s14 + $0x8] sm:$0xff] (!%p8726_p9)  ;;  %v7117_v6 = vld [vmem:[%s13775_s9 + $0xb0] sm:$0xff] (!%p8726_p9) }
 0x8e1   : > { %9272 = vmatpush3.bf16.msra.mxu1 (!%p8726_p9), %v9271_v35  ;;  %v6819_v35 = vld [vmem:[%s13770_s4 + $0x1a8] sm:$0xff] (!%p8726_p9) }
 0x8e2   : > { %9274 = vmatprep.subr.bf16.mxu1 (!%p8726_p9), %v9273_v36  ;;  %v9295_v36 = vpack.c.bf16 (!%p8726_p9), %v6801_v29, %v6800_v32  ;;  %v9297_v24 = vpack.c.bf16 (!%p8726_p9), %v6819_v35, %v6818_v58  ;;  %v7002_v32 = vld [vmem:[%s13798_s14 + $0x18] sm:$0xff] (!%p8726_p9)  ;;  %v7101_v58 = vld [vmem:[%s13775_s9 + $0x30] sm:$0xff] (!%p8726_p9) }
 0x9a7   : > { %v5344_v22 = vpop.f32.mrb[0].mxu0  ;;  %v6656_v41 = vpop.f32.mrb[0].mxu1 }
 0x9a8   : > { %v5346_v44 = vpop.f32.mrb[1].mxu0  ;;  %v6658_v33 = vpop.f32.mrb[1].mxu1 }
 0x9a9   : > { %v6667_v26 = vcombine.low %v5344_v22, %v5346_v44  ;;  %v6668_v59 = vcombine.low %v6656_v41, %v6658_v33  ;;  %v5348_v43 = vpop.f32.mrb[2].mxu0  ;;  %v6660_v1 = vpop.f32.mrb[2].mxu1  ;;  %v6748_v22 = vcombine.low (!%p8726_p9), %v6742_v15, %v6746_v31  ;;  %v9275_v41 = vpack.c.bf16 (!%p8726_p9), %v6775_v38, %v6774_v27  ;;  %v6804_v38 = vld [vmem:[%s13770_s4 + $0x130] sm:$0xff] (!%p8726_p9)  ;;  %v6823_v15 = vld [vmem:[%s13770_s4 + $0x1c8] sm:$0xff] (!%p8726_p9) }
 0x9aa   : > { %v5349_v30 = vpop.f32.mrb[3].mxu0  ;;  %v6661_v8 = vpop.f32.mrb[3].mxu1  ;;  %v6718_v44 = vrot.slane (!%p8726_p9), %v6710_v18, %v12157_v37  ;;  %v6725_v33 = vrot.slane (!%p8726_p9), %v6711_v19, %v12157_v37  ;;  %v6777_v43 = vld [vmem:[%s13770_s4 + $0x58] sm:$0xff] (!%p8726_p9)  ;;  %v9301_v27 = vpack.c.bf16 (!%p8726_p9), %v6821_v53, %v6820_v42  ;;  %v9303_v31 = vpack.c.bf16 (!%p8726_p9), %v6805_v12, %v6804_v38  ;;  %v6807_v18 = vld [vmem:[%s13770_s4 + $0x148] sm:$0xff] (!%p8726_p9)  ;;  %v6824_v19 = vld [vmem:[%s13770_s4 + $0x1d0] sm:$0xff] (!%p8726_p9) }
 0x9ab   : > { %v6675_v62 = vrot.slane %v6667_v26, %v12157_v37  ;;  %v6682_v48 = vrot.slane %v6668_v59, %v12157_v37  ;;  %6690 = sbr.rel (%p8726_p9) target bundleno = 3520 (0xdc0), region = 100  ;;  %v9277_v26 = vpack.c.bf16 (!%p8726_p9), %v6793_v17, %v6792_v16  ;;  %v6776_v59 = vld [vmem:[%s13770_s4 + $0x50] sm:$0xff] (!%p8726_p9)  ;;  %v6755_v30 = vrot.slane (!%p8726_p9), %v6747_v57, %v12157_v37  ;;  %9276 = vmatpush3.bf16.msra.mxu1 (!%p8726_p9), %v9275_v41  ;;  %v6806_v17 = vld [vmem:[%s13770_s4 + $0x140] sm:$0xff] (!%p8726_p9)  ;;  %v6825_v57 = vld [vmem:[%s13770_s4 + $0x1d8] sm:$0xff] (!%p8726_p9) }
 0x9ac   : > { %v6762_v8 = vrot.slane (!%p8726_p9), %v6748_v22, %v12157_v37  ;;  %v9305_v16 = vpack.c.bf16 (!%p8726_p9), %v6823_v15, %v6822_v13  ;;  %v9307_v22 = vpack.c.bf16 (!%p8726_p9), %v6807_v18, %v6806_v17  ;;  %v9309_v41 = vpack.c.bf16 (!%p8726_p9), %v6825_v57, %v6824_v19  ;;  %v7119_v42 = vld [vmem:[%s13775_s9 + $0xc0] sm:$0xff] (!%p8726_p9)  ;;  %v7120_v53 = vld [vmem:[%s13775_s9 + $0xc8] sm:$0xff] (!%p8726_p9)  ;;  %v7121_v15 = vld [vmem:[%s13775_s9 + $0xd0] sm:$0xff] (!%p8726_p9) }
 0x9ad   : > { %v6683_v55 = vcombine.low %v6675_v62, %v6682_v48  ;;  %v6794_v62 = vld [vmem:[%s13770_s4 + $0xe0] sm:$0xff] (!%p8726_p9)  ;;  %v6795_v48 = vld [vmem:[%s13770_s4 + $0xe8] sm:$0xff] (!%p8726_p9)  ;;  %9278 = vmatprep.subr.bf16.mxu1 (!%p8726_p9), %v9277_v26  ;;  %v9349_v38 = vpack.c.bf16 (!%p8726_p9), %v7120_v53, %v7119_v42  ;;  %v7105_v18 = vld [vmem:[%s13775_s9 + $0x50] sm:$0xff] (!%p8726_p9) }
 0x9ae   : > { %v9281_v50 = vpack.c.bf16 (!%p8726_p9), %v6795_v48, %v6794_v62  ;;  %v6826_v26 = vld [vmem:[%s13770_s4 + $0x1e0] sm:$0xff] (!%p8726_p9)  ;;  %v6828_v62 = vld [vmem:[%s13770_s4 + $0x1f0] sm:$0xff] (!%p8726_p9)  ;;  %v6829_v48 = vld [vmem:[%s13770_s4 + $0x1f8] sm:$0xff] (!%p8726_p9) }
 0x9af   : > { %v6685_v34 = vadd.f32 %v6683_v55, %v3566_v4  ;;  %v6726_v4 = vcombine.low (!%p8726_p9), %v6718_v44, %v6725_v33  ;;  %v6763_v55 = vcombine.low (!%p8726_p9), %v6755_v30, %v6762_v8  ;;  %v6808_v44 = vld [vmem:[%s13770_s4 + $0x150] sm:$0xff] (!%p8726_p9)  ;;  %v6809_v33 = vld [vmem:[%s13770_s4 + $0x158] sm:$0xff] (!%p8726_p9)  ;;  %v6810_v30 = vld [vmem:[%s13770_s4 + $0x160] sm:$0xff] (!%p8726_p9) }
 0x9b0   : > { %v6811_v8 = vld [vmem:[%s13770_s4 + $0x168] sm:$0xff] (!%p8726_p9)  ;;  %v7103_v12 = vld [vmem:[%s13775_s9 + $0x40] sm:$0xff] (!%p8726_p9)  ;;  %v7106_v19 = vld [vmem:[%s13775_s9 + $0x58] sm:$0xff] (!%p8726_p9) }
 0x9b1   : > { %6686 = vst [vmem:[#allocation2] sm:$0xff] %v6685_v34  ;;  %v9279_v34 = vpack.c.bf16 (!%p8726_p9), %v6777_v43, %v6776_v59  ;;  %v6827_v59 = vld [vmem:[%s13770_s4 + $0x1e8] sm:$0xff] (!%p8726_p9)  ;;  %v9311_v43 = vpack.c.bf16 (!%p8726_p9), %v6809_v33, %v6808_v44  ;;  %v7123_v57 = vld [vmem:[%s13775_s9 + $0xe0] sm:$0xff] (!%p8726_p9) }
 0x9b2   : > { %v7104_v13 = vld [vmem:[%s13775_s9 + $0x48] sm:$0xff]  ;;  %v7107_v33 = vld [vmem:[%s13775_s9 + $0x60] sm:$0xff] }
 0x9b3   : > { %9280 = vmatpush3.bf16.msra.mxu1 %v9279_v34  ;;  %v6812_v34 = vld [vmem:[%s13770_s4 + $0x170] sm:$0xff]  ;;  %v7167_v53 = vld [vmem:[%s13775_s9 + $0x240] sm:$0xff] }
 0x9b4   : > { %9282 = vmatprep.subr.bf16.mxu1 %v9281_v50 }
 0x9b7   : > { %9284 = vmatpush3.bf16.msra.mxu1 %v9283_v0  ;;  %v7113_v0 = vld [vmem:[%s13775_s9 + $0x90] sm:$0xff] }
 0x9b8   : > { %v6691_v1 = vld [vmem:[#allocation2] sm:$0xff]  ;;  %9286 = vmatprep.subr.bf16.mxu1 %v9285_v51 }
 0x9b9   : > { %v6728_v9 = vmul.f32 %v6726_v4, %v6691_v1  ;;  %v9313_v1 = vpack.c.bf16 %v6827_v59, %v6826_v26  ;;  %v9315_v4 = vpack.c.bf16 %v6811_v8, %v6810_v30  ;;  %v7108_v26 = vld [vmem:[%s13775_s9 + $0x68] sm:$0xff]  ;;  %v7125_v8 = vld [vmem:[%s13775_s9 + $0xf0] sm:$0xff] }
 0x9ba   : > { %v9359_v59 = vpack.c.bf16 %v7108_v26, %v7107_v33  ;;  %v7190_v33 = vld [vmem:[%s13775_s9 + $0x2f8] sm:$0xff] }
 0x9bb   : > { %v6765_v45 = vadd.f32 %v6763_v55, %v6728_v9  ;;  %9288 = vmatpush3.bf16.msra.mxu1 %v9287_v2  ;;  %v9317_v55 = vpack.c.bf16 %v6829_v48, %v6828_v62  ;;  %v6813_v9 = vld [vmem:[%s13770_s4 + $0x178] sm:$0xff] }
 0x9bc   : > { %9290 = vmatprep.subr.bf16.mxu1 %v9289_v21  ;;  %v9319_v50 = vpack.c.bf16 %v6813_v9, %v6812_v34  ;;  %v9341_v21 = vpack.c.bf16 %v7116_v56, %v7115_v5  ;;  %v7126_v62 = vld [vmem:[%s13775_s9 + $0xf8] sm:$0xff]  ;;  %v7143_v9 = vld [vmem:[%s13775_s9 + $0x180] sm:$0xff]  ;;  %v7177_v5 = vld [vmem:[%s13775_s9 + $0x290] sm:$0xff] }
 0x9bd   : > { %v6838_v46 = vcombine.high %v6765_v45, %v6765_v45  ;;  %v6845_v47 = vrot.slane %v6765_v45, %v12157_v37  ;;  %v7096_v45 = vld [vmem:[%s13775_s9 + $0x8] sm:$0xff]  ;;  %v9361_v48 = vpack.c.bf16 %v7126_v62, %v7125_v8  ;;  %v7178_v56 = vld [vmem:[%s13775_s9 + $0x298] sm:$0xff] }
 0x9be   : > { %v9335_v51 = vpack.c.bf16 %v7096_v45, %v7095_v40  ;;  %v10428_v40 = vmov 0.0   ;;  %v7175_v45 = vld [vmem:[%s13775_s9 + $0x280] sm:$0xff] }
 0x9bf   : > { %v6853_v54 = vcombine.high %v6845_v47, %v6845_v47  ;;  %v12274_v60 = vrot.slane %v6838_v46, %v12157_v37  ;;  %v7114_v46 = vld [vmem:[%s13775_s9 + $0x98] sm:$0xff]  ;;  %9254 = vmatprep.mubr.msk.f32.mxu0 %vm10427_vm0, %v10428_v40 }
 0x9c0   : > { %v9337_v3 = vpack.c.bf16 %v7114_v46, %v7113_v0  ;;  %v7176_v0 = vld [vmem:[%s13775_s9 + $0x288] sm:$0xff]  ;;  %v7242_v40 = vld [vmem:[%s13775_s9 + $0x498] sm:$0xff] }
 0x9c1   : > { %6923 = vmatprep.mubr.f32.mxu1 %v6853_v54  ;;  %v6854_v25 = vcombine.high %v12274_v60, %v12274_v60  ;;  %v7098_v54 = vld [vmem:[%s13775_s9 + $0x18] sm:$0xff]  ;;  %v9397_v46 = vpack.c.bf16 %v7176_v0, %v7175_v45  ;;  %v7225_v45 = vld [vmem:[%s13775_s9 + $0x410] sm:$0xff] }
 0x9c2   : > { %6924 = vmatmul.mubr.f32.vlgmr.msra.gmra.mrb[0].mxu1 %v6845_v47  ;;  %v10426_v47 = vmov 0.0|0.0   ;;  %v9339_v2 = vpack.c.bf16 %v7098_v54, %v7097_v52  ;;  %v7226_v0 = vld [vmem:[%s13775_s9 + $0x418] sm:$0xff] }
 0x9c3   : > { %9292 = vmatpush3.bf16.msra.mxu1 %v9291_v63  ;;  %6993 = vmatprep.mubr.f32.mxu1 %v6854_v25  ;;  %v7118_v63 = vld [vmem:[%s13775_s9 + $0xb8] sm:$0xff]  ;;  %v9322_v25 = vpack.c.bf16 %v7000_v49, %v6999_v28  ;;  %v7179_v28 = vld [vmem:[%s13775_s9 + $0x2a0] sm:$0xff]  ;;  %v7180_v49 = vld [vmem:[%s13775_s9 + $0x2a8] sm:$0xff] }
 0x9c4   : > { %9294 = vmatprep.subr.bf16.mxu1 %v9293_v14  ;;  %9321 = vmatprep.subr.bf16.mxu0 %v10426_v47  ;;  %v7001_v14 = vld [vmem:[%s13798_s14 + $0x10] sm:$0xff] }
 0x9c5   : > { %9323 = vmatpush3.bf16.msra.mxu0 %v9322_v25  ;;  %v9325_v35 = vpack.c.bf16 %v7002_v32, %v7001_v14  ;;  %v7164_v25 = vld [vmem:[%s13775_s9 + $0x228] sm:$0xff]  ;;  %v7181_v32 = vld [vmem:[%s13775_s9 + $0x2b0] sm:$0xff] }
 0x9c6   : > { %9324 = vmatprep.subr.bf16.mxu0 %v10426_v47 }
 0x9c7   : > { %9296 = vmatpush3.bf16.msra.mxu1 %v9295_v36  ;;  %v9345_v36 = vpack.c.bf16 %v7118_v63, %v7117_v6  ;;  %v9405_v6 = vpack.c.bf16 %v7180_v49, %v7179_v28  ;;  %v7163_v63 = vld [vmem:[%s13775_s9 + $0x220] sm:$0xff]  ;;  %v7230_v28 = vld [vmem:[%s13775_s9 + $0x438] sm:$0xff] }
 0x9c8   : > { %9298 = vmatprep.subr.bf16.mxu1 %v9297_v24  ;;  %v7102_v24 = vld [vmem:[%s13775_s9 + $0x38] sm:$0xff]  ;;  %v9407_v14 = vpack.c.bf16 %v7164_v25, %v7163_v63  ;;  %v7248_v63 = vld [vmem:[%s13775_s9 + $0x4c8] sm:$0xff] }
 0x9c9   : > { %9326 = vmatpush3.bf16.msra.mxu0 %v9325_v35  ;;  %v7165_v35 = vld [vmem:[%s13775_s9 + $0x230] sm:$0xff] }
 0x9ca   : > { %9327 = vmatprep.subr.bf16.mxu0 %v10426_v47 }
 0x9cb   : > { %9300 = vmatpush3.bf16.msra.mxu1 %v9299_v11  ;;  %v9347_v11 = vpack.c.bf16 %v7102_v24, %v7101_v58 }
 0x9cc   : > { %9302 = vmatprep.subr.bf16.mxu1 %v9301_v27  ;;  %v9328_v27 = vpack.c.bf16 %v7004_v7, %v7003_v23  ;;  %v7183_v23 = vld [vmem:[%s13775_s9 + $0x2c0] sm:$0xff]  ;;  %v7184_v7 = vld [vmem:[%s13775_s9 + $0x2c8] sm:$0xff] }
 0x9cd   : > { %v9413_v42 = vpack.c.bf16 %v7184_v7, %v7183_v23  ;;  %v7234_v23 = vld [vmem:[%s13775_s9 + $0x458] sm:$0xff] }
 0x9ce   : > { %9329 = vmatpush3.bf16.msra.mxu0 %v9328_v27 }
 0x9cf   : > { %9304 = vmatpush3.bf16.msra.mxu1 %v9303_v31  ;;  %v7122_v31 = vld [vmem:[%s13775_s9 + $0xd8] sm:$0xff]  ;;  %9330 = vmatprep.subr.bf16.mxu0 %v10426_v47 }
 0x9d0   : > { %9306 = vmatprep.subr.bf16.mxu1 %v9305_v16  ;;  %v9351_v16 = vpack.c.bf16 %v7104_v13, %v7103_v12  ;;  %v9353_v17 = vpack.c.bf16 %v7122_v31, %v7121_v15  ;;  %v7186_v12 = vld [vmem:[%s13775_s9 + $0x2d8] sm:$0xff]  ;;  %v7169_v15 = vld [vmem:[%s13775_s9 + $0x250] sm:$0xff] }
 0x9d1   : > { %v7170_v31 = vld [vmem:[%s13775_s9 + $0x258] sm:$0xff] }
 0x9d3   : > { %9308 = vmatpush3.bf16.msra.mxu1 %v9307_v22  ;;  %v7124_v22 = vld [vmem:[%s13775_s9 + $0xe8] sm:$0xff] }
 0x9d4   : > { %9310 = vmatprep.subr.bf16.mxu1 %v9309_v41  ;;  %v9355_v41 = vpack.c.bf16 %v7106_v19, %v7105_v18  ;;  %v9357_v44 = vpack.c.bf16 %v7124_v22, %v7123_v57  ;;  %v7188_v18 = vld [vmem:[%s13775_s9 + $0x2e8] sm:$0xff]  ;;  %v7171_v57 = vld [vmem:[%s13775_s9 + $0x260] sm:$0xff] }
 0x9d5   : > { %v7172_v22 = vld [vmem:[%s13775_s9 + $0x268] sm:$0xff] }
 0x9d7   : > { %9312 = vmatpush3.bf16.msra.mxu1 %v9311_v43  ;;  %v7005_v43 = vld [vmem:[%s13798_s14 + $0x30] sm:$0xff] }
 0x9d8   : > { %9314 = vmatprep.subr.bf16.mxu1 %v9313_v1  ;;  %v7006_v1 = vld [vmem:[%s13798_s14 + $0x38] sm:$0xff] }
 0x9d9   : > { %v9331_v30 = vpack.c.bf16 %v7006_v1, %v7005_v43  ;;  %v7174_v43 = vld [vmem:[%s13775_s9 + $0x278] sm:$0xff] }
 0x9da   : > { %v12599_v1 = vld [vmem:[#allocation12 + $0x8] sm:$0xff] }
 0x9db   : > { %9316 = vmatpush3.bf16.msra.mxu1 %v9315_v4  ;;  %v7109_v4 = vld [vmem:[%s13775_s9 + $0x70] sm:$0xff]  ;;  %9332 = vmatpush3.bf16.msra.mxu0 %v9331_v30  ;;  %v7541_v8 = vrot.slane %v12599_v1, %v12157_v37 }
 0x9dc   : > { %9318 = vmatprep.subr.bf16.mxu1 %v9317_v55  ;;  %v7110_v55 = vld [vmem:[%s13775_s9 + $0x78] sm:$0xff] }
 0x9dd   : > { %v9363_v34 = vpack.c.bf16 %v7110_v55, %v7109_v4  ;;  %v7549_v62 = vcombine.high %v7541_v8, %v7541_v8  ;;  %v7240_v4 = vld [vmem:[%s13775_s9 + $0x488] sm:$0xff] }
 0x9df   : > { %9320 = vmatpush3.bf16.msra.mxu1 %v9319_v50  ;;  %v7144_v50 = vld [vmem:[%s13775_s9 + $0x188] sm:$0xff] }
 0x9e0   : > { %9334 = vmatprep.subr.bf16.mxu1 %v9333_v20  ;;  %v9365_v39 = vpack.c.bf16 %v7144_v50, %v7143_v9  ;;  %v7524_v20 = vrot.slane %v12499_v61, %v12157_v37  ;;  %v7224_v9 = vld [vmem:[%s13775_s9 + $0x408] sm:$0xff] }
 0x9e2   : > { %6994 = vmatmul.mubr.f32.vlgmr.msra.gmra.mrb[2].mxu1 %v12274_v60  ;;  %v7099_v60 = vld [vmem:[%s13775_s9 + $0x20] sm:$0xff]  ;;  %9366 = vmatprep.subr.bf16.mxu0 %v9365_v39  ;;  %v7532_v52 = vcombine.high %v7524_v20, %v7524_v20  ;;  %v7241_v39 = vld [vmem:[%s13775_s9 + $0x490] sm:$0xff] }
 0x9e3   : > { %9336 = vmatpush3.bf16.msra.mxu1 %v9335_v51  ;;  %v9343_v29 = vpack.c.bf16 %v7100_v10, %v7099_v60  ;;  %v7159_v51 = vld [vmem:[%s13775_s9 + $0x200] sm:$0xff]  ;;  %v7161_v60 = vld [vmem:[%s13775_s9 + $0x210] sm:$0xff] }
 0x9e4   : > { %9338 = vmatprep.subr.bf16.mxu1 %v9337_v3  ;;  %v7160_v3 = vld [vmem:[%s13775_s9 + $0x208] sm:$0xff]  ;;  %7718 = vmatprep.mubr.f32.mxu1 %v7532_v52 }
 0x9e5   : > { %v9399_v54 = vpack.c.bf16 %v7160_v3, %v7159_v51  ;;  %v7243_v51 = vld [vmem:[%s13775_s9 + $0x4a0] sm:$0xff]  ;;  %v7244_v3 = vld [vmem:[%s13775_s9 + $0x4a8] sm:$0xff] }
 0x9e6   : > { %v9469_v52 = vpack.c.bf16 %v7244_v3, %v7243_v51  ;;  %v7293_v51 = vld [vmem:[%s13775_s9 + $0x630] sm:$0xff]  ;;  %v7294_v3 = vld [vmem:[%s13775_s9 + $0x638] sm:$0xff] }
 0x9e7   : > { %9340 = vmatpush3.bf16.msra.mxu1 %v9339_v2  ;;  %v9401_v2 = vpack.c.bf16 %v7178_v56, %v7177_v5  ;;  %v7228_v5 = vld [vmem:[%s13775_s9 + $0x428] sm:$0xff] }
 0x9e8   : > { %9342 = vmatprep.subr.bf16.mxu1 %v9341_v21  ;;  %v7162_v21 = vld [vmem:[%s13775_s9 + $0x218] sm:$0xff] }
 0x9e9   : > { %v9403_v10 = vpack.c.bf16 %v7162_v21, %v7161_v60  ;;  %v7246_v60 = vld [vmem:[%s13775_s9 + $0x4b8] sm:$0xff] }
 0x9eb   : > { %9344 = vmatpush3.bf16.msra.mxu1 %v9343_v29  ;;  %v7182_v29 = vld [vmem:[%s13775_s9 + $0x2b8] sm:$0xff] }
 0x9ec   : > { %9346 = vmatprep.subr.bf16.mxu1 %v9345_v36  ;;  %v9409_v58 = vpack.c.bf16 %v7182_v29, %v7181_v32  ;;  %v7166_v36 = vld [vmem:[%s13775_s9 + $0x238] sm:$0xff]  ;;  %v7232_v32 = vld [vmem:[%s13775_s9 + $0x448] sm:$0xff] }
 0x9ed   : > { %v9411_v24 = vpack.c.bf16 %v7166_v36, %v7165_v35  ;;  %v7250_v35 = vld [vmem:[%s13775_s9 + $0x4d8] sm:$0xff] }
 0x9ef   : > { %9348 = vmatpush3.bf16.msra.mxu1 %v9347_v11  ;;  %v7168_v11 = vld [vmem:[%s13775_s9 + $0x248] sm:$0xff] }
 0x9f0   : > { %9350 = vmatprep.subr.bf16.mxu1 %v9349_v38  ;;  %v9415_v27 = vpack.c.bf16 %v7168_v11, %v7167_v53  ;;  %v7185_v38 = vld [vmem:[%s13775_s9 + $0x2d0] sm:$0xff]  ;;  %v7252_v53 = vld [vmem:[%s13775_s9 + $0x4e8] sm:$0xff] }
 0x9f1   : > { %v9417_v13 = vpack.c.bf16 %v7186_v12, %v7185_v38  ;;  %v7236_v38 = vld [vmem:[%s13775_s9 + $0x468] sm:$0xff] }
 0x9f3   : > { %9352 = vmatpush3.bf16.msra.mxu1 %v9351_v16  ;;  %v9419_v16 = vpack.c.bf16 %v7170_v31, %v7169_v15  ;;  %v7254_v15 = vld [vmem:[%s13775_s9 + $0x4f8] sm:$0xff] }
 0x9f4   : > { %9354 = vmatprep.subr.bf16.mxu1 %v9353_v17  ;;  %v7187_v17 = vld [vmem:[%s13775_s9 + $0x2e0] sm:$0xff] }
 0x9f5   : > { %v9421_v19 = vpack.c.bf16 %v7188_v18, %v7187_v17  ;;  %v7238_v17 = vld [vmem:[%s13775_s9 + $0x478] sm:$0xff]  ;;  %v12699_v18 = vld [vmem:[#allocation12 + $0x10] sm:$0xff] }
 0x9f7   : > { %9356 = vmatpush3.bf16.msra.mxu1 %v9355_v41  ;;  %v9423_v41 = vpack.c.bf16 %v7172_v22, %v7171_v57  ;;  %v7558_v57 = vrot.slane %v12699_v18, %v12157_v37 }
 0x9f8   : > { %9358 = vmatprep.subr.bf16.mxu1 %v9357_v44  ;;  %v7189_v44 = vld [vmem:[%s13775_s9 + $0x2f0] sm:$0xff] }
 0x9f9   : > { %v9425_v26 = vpack.c.bf16 %v7190_v33, %v7189_v44  ;;  %v7566_v22 = vcombine.high %v7558_v57, %v7558_v57  ;;  %v7304_v44 = vld [vmem:[%s13775_s9 + $0x688] sm:$0xff] }
 0x9fb   : > { %9360 = vmatpush3.bf16.msra.mxu1 %v9359_v59  ;;  %v7173_v59 = vld [vmem:[%s13775_s9 + $0x270] sm:$0xff] }
 0x9fc   : > { %9362 = vmatprep.subr.bf16.mxu1 %v9361_v48  ;;  %v9427_v30 = vpack.c.bf16 %v7174_v43, %v7173_v59  ;;  %v7239_v48 = vld [vmem:[%s13775_s9 + $0x480] sm:$0xff]  ;;  %v7288_v59 = vld [vmem:[%s13775_s9 + $0x608] sm:$0xff] }
 0x9fd   : > { %v9461_v55 = vpack.c.bf16 %v7240_v4, %v7239_v48  ;;  %v7289_v48 = vld [vmem:[%s13775_s9 + $0x610] sm:$0xff]  ;;  %v7290_v4 = vld [vmem:[%s13775_s9 + $0x618] sm:$0xff] }
 0x9ff   : > { %9364 = vmatpush3.bf16.msra.mxu1 %v9363_v34  ;;  %v7223_v34 = vld [vmem:[%s13775_s9 + $0x400] sm:$0xff] }
 0xa00   : > { %9398 = vmatprep.subr.bf16.mxu1 %v9397_v46  ;;  %v9463_v50 = vpack.c.bf16 %v7224_v9, %v7223_v34  ;;  %v9467_v46 = vpack.c.bf16 %v7226_v0, %v7225_v45  ;;  %v7307_v34 = vld [vmem:[%s13775_s9 + $0x6a0] sm:$0xff]  ;;  %v7308_v9 = vld [vmem:[%s13775_s9 + $0x6a8] sm:$0xff]  ;;  %v7309_v45 = vld [vmem:[%s13775_s9 + $0x6b0] sm:$0xff] }
 0xa01   : > { %v7310_v0 = vld [vmem:[%s13775_s9 + $0x6b8] sm:$0xff] }
 0xa02   : > { %7719 = vmatmul.mubr.f32.vlgmr.msra.gmra.mrb[4].mxu1 %v7524_v20  ;;  %v9465_v20 = vpack.c.bf16 %v7242_v40, %v7241_v39  ;;  %v7291_v39 = vld [vmem:[%s13775_s9 + $0x620] sm:$0xff]  ;;  %v7292_v40 = vld [vmem:[%s13775_s9 + $0x628] sm:$0xff] }
 0xa03   : > { %9400 = vmatpush3.bf16.msra.mxu1 %v9399_v54  ;;  %7858 = vmatprep.mubr.f32.mxu1 %v7549_v62  ;;  %v7227_v54 = vld [vmem:[%s13775_s9 + $0x420] sm:$0xff] }
 0xa04   : > { %9402 = vmatprep.subr.bf16.mxu1 %v9401_v2  ;;  %v9471_v56 = vpack.c.bf16 %v7228_v5, %v7227_v54  ;;  %v7245_v2 = vld [vmem:[%s13775_s9 + $0x4b0] sm:$0xff]  ;;  %v7311_v54 = vld [vmem:[%s13775_s9 + $0x6c0] sm:$0xff]  ;;  %v7312_v5 = vld [vmem:[%s13775_s9 + $0x6c8] sm:$0xff] }
 0xa05   : > { %v9473_v21 = vpack.c.bf16 %v7246_v60, %v7245_v2  ;;  %v7295_v2 = vld [vmem:[%s13775_s9 + $0x640] sm:$0xff]  ;;  %v7296_v60 = vld [vmem:[%s13775_s9 + $0x648] sm:$0xff] }
 0xa07   : > { %9404 = vmatpush3.bf16.msra.mxu1 %v9403_v10  ;;  %v7229_v10 = vld [vmem:[%s13775_s9 + $0x430] sm:$0xff] }
 0xa08   : > { %9406 = vmatprep.subr.bf16.mxu1 %v9405_v6  ;;  %v9475_v49 = vpack.c.bf16 %v7230_v28, %v7229_v10  ;;  %v7247_v6 = vld [vmem:[%s13775_s9 + $0x4c0] sm:$0xff]  ;;  %v7313_v10 = vld [vmem:[%s13775_s9 + $0x6d0] sm:$0xff]  ;;  %v7314_v28 = vld [vmem:[%s13775_s9 + $0x6d8] sm:$0xff] }
 0xa09   : > { %v9477_v25 = vpack.c.bf16 %v7248_v63, %v7247_v6  ;;  %v7297_v6 = vld [vmem:[%s13775_s9 + $0x650] sm:$0xff]  ;;  %v7298_v63 = vld [vmem:[%s13775_s9 + $0x658] sm:$0xff] }
 0xa0b   : > { %9408 = vmatpush3.bf16.msra.mxu1 %v9407_v14  ;;  %v7231_v14 = vld [vmem:[%s13775_s9 + $0x440] sm:$0xff] }
 0xa0c   : > { %9410 = vmatprep.subr.bf16.mxu1 %v9409_v58  ;;  %v9479_v29 = vpack.c.bf16 %v7232_v32, %v7231_v14  ;;  %v7249_v58 = vld [vmem:[%s13775_s9 + $0x4d0] sm:$0xff]  ;;  %v7315_v14 = vld [vmem:[%s13775_s9 + $0x6e0] sm:$0xff]  ;;  %v7316_v32 = vld [vmem:[%s13775_s9 + $0x6e8] sm:$0xff] }
 0xa0d   : > { %v9481_v36 = vpack.c.bf16 %v7250_v35, %v7249_v58  ;;  %v7299_v58 = vld [vmem:[%s13775_s9 + $0x660] sm:$0xff]  ;;  %v7300_v35 = vld [vmem:[%s13775_s9 + $0x668] sm:$0xff] }
 0xa0f   : > { %9412 = vmatpush3.bf16.msra.mxu1 %v9411_v24  ;;  %v7233_v24 = vld [vmem:[%s13775_s9 + $0x450] sm:$0xff] }
 0xa10   : > { %9414 = vmatprep.subr.bf16.mxu1 %v9413_v42  ;;  %v9483_v7 = vpack.c.bf16 %v7234_v23, %v7233_v24  ;;  %v7251_v42 = vld [vmem:[%s13775_s9 + $0x4e0] sm:$0xff] }
 0xa11   : > { %v9485_v11 = vpack.c.bf16 %v7252_v53, %v7251_v42  ;;  %v7318_v42 = vld [vmem:[%s13775_s9 + $0x6f8] sm:$0xff] }
 0xa13   : > { %9416 = vmatpush3.bf16.msra.mxu1 %v9415_v27  ;;  %v7235_v27 = vld [vmem:[%s13775_s9 + $0x460] sm:$0xff] }
 0xa14   : > { %9418 = vmatprep.subr.bf16.mxu1 %v9417_v13  ;;  %v9487_v12 = vpack.c.bf16 %v7236_v38, %v7235_v27  ;;  %v7253_v13 = vld [vmem:[%s13775_s9 + $0x4f0] sm:$0xff]  ;;  %v7302_v38 = vld [vmem:[%s13775_s9 + $0x678] sm:$0xff] }
 0xa15   : > { %v9489_v31 = vpack.c.bf16 %v7254_v15, %v7253_v13  ;;  %v7301_v27 = vld [vmem:[%s13775_s9 + $0x670] sm:$0xff] }
 0xa16   : > { %v9555_v13 = vpack.c.bf16 %v7302_v38, %v7301_v27 }
 0xa17   : > { %9420 = vmatpush3.bf16.msra.mxu1 %v9419_v16  ;;  %v7237_v16 = vld [vmem:[%s13775_s9 + $0x470] sm:$0xff] }
 0xa18   : > { %9422 = vmatprep.subr.bf16.mxu1 %v9421_v19  ;;  %v9491_v19 = vpack.c.bf16 %v7238_v17, %v7237_v16  ;;  %v7367_v16 = vld [vmem:[%s13775_s9 + $0x880] sm:$0xff]  ;;  %v7368_v17 = vld [vmem:[%s13775_s9 + $0x888] sm:$0xff] }
 0xa1b   : > { %9424 = vmatpush3.bf16.msra.mxu1 %v9423_v41  ;;  %v7303_v41 = vld [vmem:[%s13775_s9 + $0x680] sm:$0xff] }
 0xa1c   : > { %9426 = vmatprep.subr.bf16.mxu1 %v9425_v26  ;;  %v9525_v33 = vpack.c.bf16 %v7304_v44, %v7303_v41  ;;  %v7287_v26 = vld [vmem:[%s13775_s9 + $0x600] sm:$0xff]  ;;  %v7369_v44 = vld [vmem:[%s13775_s9 + $0x890] sm:$0xff] }
 0xa1d   : > { %v9527_v43 = vpack.c.bf16 %v7288_v59, %v7287_v26  ;;  %v7353_v59 = vld [vmem:[%s13775_s9 + $0x810] sm:$0xff] }
 0xa1f   : > { %9428 = vmatpush3.bf16.msra.mxu1 %v9427_v30  ;;  %v7305_v30 = vld [vmem:[%s13775_s9 + $0x690] sm:$0xff] }
 0xa20   : > { %9462 = vmatprep.subr.bf16.mxu1 %v9461_v55  ;;  %v9531_v55 = vpack.c.bf16 %v7290_v4, %v7289_v48  ;;  %v7355_v4 = vld [vmem:[%s13775_s9 + $0x820] sm:$0xff] }
 0xa22   : > { %7859 = vmatmul.mubr.f32.vlgmr.msra.gmra.mrb[6].mxu1 %v7541_v8  ;;  %v7306_v8 = vld [vmem:[%s13775_s9 + $0x698] sm:$0xff] }
 0xa23   : > { %9464 = vmatpush3.bf16.msra.mxu1 %v9463_v50  ;;  %7998 = vmatprep.mubr.f32.mxu1 %v7566_v22  ;;  %v9529_v62 = vpack.c.bf16 %v7306_v8, %v7305_v30  ;;  %v9533_v50 = vpack.c.bf16 %v7308_v9, %v7307_v34  ;;  %v7352_v22 = vld [vmem:[%s13775_s9 + $0x808] sm:$0xff]  ;;  %v7371_v8 = vld [vmem:[%s13775_s9 + $0x8a0] sm:$0xff]  ;;  %v7373_v9 = vld [vmem:[%s13775_s9 + $0x8b0] sm:$0xff] }
 0xa24   : > { %9466 = vmatprep.subr.bf16.mxu1 %v9465_v20  ;;  %v9535_v20 = vpack.c.bf16 %v7292_v40, %v7291_v39  ;;  %v7357_v40 = vld [vmem:[%s13775_s9 + $0x830] sm:$0xff] }
 0xa27   : > { %9468 = vmatpush3.bf16.msra.mxu1 %v9467_v46  ;;  %v9537_v46 = vpack.c.bf16 %v7310_v0, %v7309_v45  ;;  %v7375_v0 = vld [vmem:[%s13775_s9 + $0x8c0] sm:$0xff] }
 0xa28   : > { %9470 = vmatprep.subr.bf16.mxu1 %v9469_v52  ;;  %v9539_v52 = vpack.c.bf16 %v7294_v3, %v7293_v51  ;;  %v7359_v3 = vld [vmem:[%s13775_s9 + $0x840] sm:$0xff] }
 0xa2b   : > { %9472 = vmatpush3.bf16.msra.mxu1 %v9471_v56  ;;  %v9541_v56 = vpack.c.bf16 %v7312_v5, %v7311_v54  ;;  %v7377_v5 = vld [vmem:[%s13775_s9 + $0x8d0] sm:$0xff] }
 0xa2c   : > { %9474 = vmatprep.subr.bf16.mxu1 %v9473_v21  ;;  %v9543_v21 = vpack.c.bf16 %v7296_v60, %v7295_v2  ;;  %v7361_v60 = vld [vmem:[%s13775_s9 + $0x850] sm:$0xff] }
 0xa2f   : > { %9476 = vmatpush3.bf16.msra.mxu1 %v9475_v49  ;;  %v9545_v49 = vpack.c.bf16 %v7314_v28, %v7313_v10  ;;  %v7517_v10 = vcombine.high %v12499_v61, %v12499_v61  ;;  %v7364_v61 = vld [vmem:[%s13775_s9 + $0x868] sm:$0xff] }
 0xa30   : > { %9478 = vmatprep.subr.bf16.mxu1 %v9477_v25  ;;  %v9547_v25 = vpack.c.bf16 %v7298_v63, %v7297_v6  ;;  %v7380_v6 = vld [vmem:[%s13775_s9 + $0x8e8] sm:$0xff] }
 0xa33   : > { %9480 = vmatpush3.bf16.msra.mxu1 %v9479_v29  ;;  %v9549_v29 = vpack.c.bf16 %v7316_v32, %v7315_v14  ;;  %v8727_v14 = vld [vmem:[#allocation9] ss:$0 sm:$0xff]  ;;  %v12892_v32 = vrot.slane %v7517_v10, %v12157_v37  ;;  %v7435_v10 = vld [vmem:[%s13775_s9 + $0xaa0] sm:$0xff] }
 0xa34   : > { %9482 = vmatprep.subr.bf16.mxu1 %v9481_v36  ;;  %v9551_v36 = vpack.c.bf16 %v7300_v35, %v7299_v58  ;;  %v7127_v35 = vld [vmem:[%s13775_s9 + $0x100] sm:$0xff] }
 0xa37   : > { %9484 = vmatpush3.bf16.msra.mxu1 %v9483_v7  ;;  %v7317_v7 = vld [vmem:[%s13775_s9 + $0x6f0] sm:$0xff] }
 0xa38   : > { %9486 = vmatprep.subr.bf16.mxu1 %v9485_v11  ;;  %v9553_v11 = vpack.c.bf16 %v7318_v42, %v7317_v7  ;;  %v7146_v7 = vld [vmem:[%s13775_s9 + $0x198] sm:$0xff]  ;;  %v7381_v42 = vld [vmem:[%s13775_s9 + $0x8f0] sm:$0xff] }
 0xa3b   : > { %9488 = vmatpush3.bf16.msra.mxu1 %v9487_v12  ;;  %v12801_v12 = vld [vmem:[#allocation12 + $0x18] sm:$0xff] }
 0xa3c   : > { %9490 = vmatprep.subr.bf16.mxu1 %v9489_v31  ;;  %v7575_v15 = vrot.slane %v12801_v12, %v12157_v37 }
 0xa3e   : > { %v7583_v31 = vcombine.high %v7575_v15, %v7575_v15 }
 0xa3f   : > { %9492 = vmatpush3.bf16.msra.mxu1 %v9491_v19  ;;  %v9589_v19 = vpack.c.bf16 %v7368_v17, %v7367_v16  ;;  %v12919_v16 = vld [vmem:[#allocation12 + $0x20] sm:$0xff] }
 0xa40   : > { %9526 = vmatprep.subr.bf16.mxu1 %v9525_v33  ;;  %v7370_v33 = vld [vmem:[%s13775_s9 + $0x898] sm:$0xff] }
 0xa41   : > { %v9593_v26 = vpack.c.bf16 %v7370_v33, %v7369_v44  ;;  %v7130_v44 = vld [vmem:[%s13775_s9 + $0x118] sm:$0xff]  ;;  %v7147_v33 = vld [vmem:[%s13775_s9 + $0x1a0] sm:$0xff] }
 0xa42   : > { %7999 = vmatmul.mubr.f32.vlgmr.msra.gmra.mrb[8].mxu1 %v7558_v57  ;;  %v7351_v57 = vld [vmem:[%s13775_s9 + $0x800] sm:$0xff] }
 0xa43   : > { %9528 = vmatpush3.bf16.msra.mxu1 %v9527_v43  ;;  %8138 = vmatprep.mubr.f32.mxu1 %v7583_v31  ;;  %v9591_v41 = vpack.c.bf16 %v7352_v22, %v7351_v57  ;;  %v7354_v43 = vld [vmem:[%s13775_s9 + $0x818] sm:$0xff] }
 0xa44   : > { %9530 = vmatprep.subr.bf16.mxu1 %v9529_v62  ;;  %v9595_v30 = vpack.c.bf16 %v7354_v43, %v7353_v59  ;;  %v7372_v62 = vld [vmem:[%s13775_s9 + $0x8a8] sm:$0xff]  ;;  %v7366_v31 = vld [vmem:[%s13775_s9 + $0x878] sm:$0xff] }
 0xa45   : > { %v9597_v48 = vpack.c.bf16 %v7372_v62, %v7371_v8  ;;  %v7148_v59 = vld [vmem:[%s13775_s9 + $0x1a8] sm:$0xff] }
 0xa46   : > { %v7432_v8 = vld [vmem:[%s13775_s9 + $0xa88] sm:$0xff] }
 0xa47   : > { %9532 = vmatpush3.bf16.msra.mxu1 %v9531_v55  ;;  %v7356_v55 = vld [vmem:[%s13775_s9 + $0x828] sm:$0xff] }
 0xa48   : > { %9534 = vmatprep.subr.bf16.mxu1 %v9533_v50  ;;  %v9599_v34 = vpack.c.bf16 %v7356_v55, %v7355_v4  ;;  %v7374_v50 = vld [vmem:[%s13775_s9 + $0x8b8] sm:$0xff]  ;;  %v7416_v4 = vld [vmem:[%s13775_s9 + $0xa08] sm:$0xff] }
 0xa49   : > { %v9601_v39 = vpack.c.bf16 %v7374_v50, %v7373_v9  ;;  %v7131_v9 = vld [vmem:[%s13775_s9 + $0x120] sm:$0xff]  ;;  %v7132_v50 = vld [vmem:[%s13775_s9 + $0x128] sm:$0xff] }
 0xa4b   : > { %9536 = vmatpush3.bf16.msra.mxu1 %v9535_v20  ;;  %v7358_v20 = vld [vmem:[%s13775_s9 + $0x838] sm:$0xff] }
 0xa4c   : > { %9538 = vmatprep.subr.bf16.mxu1 %v9537_v46  ;;  %v9603_v45 = vpack.c.bf16 %v7358_v20, %v7357_v40  ;;  %v7376_v46 = vld [vmem:[%s13775_s9 + $0x8c8] sm:$0xff]  ;;  %v7150_v20 = vld [vmem:[%s13775_s9 + $0x1b8] sm:$0xff] }
 0xa4d   : > { %v9605_v51 = vpack.c.bf16 %v7376_v46, %v7375_v0  ;;  %v7434_v0 = vld [vmem:[%s13775_s9 + $0xa98] sm:$0xff] }
 0xa4f   : > { %9540 = vmatpush3.bf16.msra.mxu1 %v9539_v52  ;;  %v7360_v52 = vld [vmem:[%s13775_s9 + $0x848] sm:$0xff] }
 0xa50   : > { %9542 = vmatprep.subr.bf16.mxu1 %v9541_v56  ;;  %v9607_v54 = vpack.c.bf16 %v7360_v52, %v7359_v3  ;;  %v7378_v56 = vld [vmem:[%s13775_s9 + $0x8d8] sm:$0xff]  ;;  %v9375_v52 = vpack.c.bf16 %v7132_v50, %v7131_v9 }
 0xa51   : > { %v9609_v2 = vpack.c.bf16 %v7378_v56, %v7377_v5  ;;  %v7418_v3 = vld [vmem:[%s13775_s9 + $0xa18] sm:$0xff]  ;;  %v7133_v5 = vld [vmem:[%s13775_s9 + $0x130] sm:$0xff] }
 0xa52   : > { %v7134_v56 = vld [vmem:[%s13775_s9 + $0x138] sm:$0xff] }
 0xa53   : > { %9544 = vmatpush3.bf16.msra.mxu1 %v9543_v21  ;;  %v7362_v21 = vld [vmem:[%s13775_s9 + $0x858] sm:$0xff] }
 0xa54   : > { %9546 = vmatprep.subr.bf16.mxu1 %v9545_v49  ;;  %v9611_v28 = vpack.c.bf16 %v7362_v21, %v7361_v60  ;;  %v7379_v49 = vld [vmem:[%s13775_s9 + $0x8e0] sm:$0xff]  ;;  %v7152_v21 = vld [vmem:[%s13775_s9 + $0x1c8] sm:$0xff]  ;;  %v7426_v9 = vld [vmem:[%s13775_s9 + $0xa58] sm:$0xff] }
 0xa55   : > { %v9613_v63 = vpack.c.bf16 %v7380_v6, %v7379_v49  ;;  %v7419_v6 = vld [vmem:[%s13775_s9 + $0xa20] sm:$0xff] }
 0xa57   : > { %9548 = vmatpush3.bf16.msra.mxu1 %v9547_v25  ;;  %v7363_v25 = vld [vmem:[%s13775_s9 + $0x860] sm:$0xff] }
 0xa58   : > { %9550 = vmatprep.subr.bf16.mxu1 %v9549_v29  ;;  %v9615_v29 = vpack.c.bf16 %v7364_v61, %v7363_v25  ;;  %v9379_v25 = vpack.c.bf16 %v7134_v56, %v7133_v5  ;;  %v7428_v5 = vld [vmem:[%s13775_s9 + $0xa68] sm:$0xff] }
 0xa5b   : > { %9552 = vmatpush3.bf16.msra.mxu1 %v9551_v36  ;;  %v7128_v36 = vld [vmem:[%s13775_s9 + $0x108] sm:$0xff] }
 0xa5c   : > { %9554 = vmatprep.subr.bf16.mxu1 %v9553_v11  ;;  %v7382_v11 = vld [vmem:[%s13775_s9 + $0x8f8] sm:$0xff]  ;;  %v9367_v17 = vpack.c.bf16 %v7128_v36, %v7127_v35 }
 0xa5d   : > { %v7154_v36 = vld [vmem:[%s13775_s9 + $0x1d8] sm:$0xff] }
 0xa5f   : > { %9556 = vmatpush3.bf16.msra.mxu1 %v9555_v13  ;;  %v9617_v13 = vpack.c.bf16 %v7382_v11, %v7381_v42  ;;  %v7421_v42 = vld [vmem:[%s13775_s9 + $0xa30] sm:$0xff]  ;;  %v7422_v11 = vld [vmem:[%s13775_s9 + $0xa38] sm:$0xff] }
 0xa60   : > { %9590 = vmatprep.subr.bf16.mxu1 %v9589_v19  ;;  %v7533_v19 = vcombine.high %v12892_v32, %v12892_v32 }
 0xa62   : > { %8139 = vmatmul.mubr.f32.vlgmr.msra.gmra.mrb[10].mxu1 %v7575_v15  ;;  %v7365_v15 = vld [vmem:[%s13775_s9 + $0x870] sm:$0xff] }
 0xa63   : > { %9592 = vmatpush3.bf16.msra.mxu1 %v9591_v41  ;;  %v7129_v41 = vld [vmem:[%s13775_s9 + $0x110] sm:$0xff] }
 0xa64   : > { %9594 = vmatprep.subr.bf16.mxu1 %v9593_v26  ;;  %v9619_v26 = vpack.c.bf16 %v7366_v31, %v7365_v15  ;;  %v9371_v55 = vpack.c.bf16 %v7130_v44, %v7129_v41  ;;  %v7138_v15 = vld [vmem:[%s13775_s9 + $0x158] sm:$0xff]  ;;  %v7155_v31 = vld [vmem:[%s13775_s9 + $0x1e0] sm:$0xff]  ;;  %v7424_v44 = vld [vmem:[%s13775_s9 + $0xa48] sm:$0xff] }
 0xa65   : > { %v7423_v41 = vld [vmem:[%s13775_s9 + $0xa40] sm:$0xff] }
 0xa67   : > { %9596 = vmatpush3.bf16.msra.mxu1 %v9595_v30  ;;  %v7431_v30 = vld [vmem:[%s13775_s9 + $0xa80] sm:$0xff] }
 0xa68   : > { %9598 = vmatprep.subr.bf16.mxu1 %v9597_v48  ;;  %v9653_v62 = vpack.c.bf16 %v7432_v8, %v7431_v30  ;;  %v7415_v48 = vld [vmem:[%s13775_s9 + $0xa00] sm:$0xff]  ;;  %v7157_v30 = vld [vmem:[%s13775_s9 + $0x1f0] sm:$0xff]  ;;  %v9671_v8 = vpack.c.bf16 %v7424_v44, %v7423_v41  ;;  %v7198_v44 = vld [vmem:[%s13775_s9 + $0x338] sm:$0xff] }
 0xa69   : > { %v9655_v40 = vpack.c.bf16 %v7416_v4, %v7415_v48  ;;  %v7441_v48 = vld [vmem:[%s13775_s9 + $0xad0] sm:$0xff]  ;;  %v7442_v4 = vld [vmem:[%s13775_s9 + $0xad8] sm:$0xff] }
 0xa6a   : > { %v7197_v41 = vld [vmem:[%s13775_s9 + $0x330] sm:$0xff] }
 0xa6b   : > { %9600 = vmatpush3.bf16.msra.mxu1 %v9599_v34  ;;  %v9373_v34 = vpack.c.bf16 %v7148_v59, %v7147_v33  ;;  %v7139_v59 = vld [vmem:[%s13775_s9 + $0x160] sm:$0xff] }
 0xa6c   : > { %9602 = vmatprep.subr.bf16.mxu1 %v9601_v39  ;;  %v7149_v39 = vld [vmem:[%s13775_s9 + $0x1b0] sm:$0xff] }
 0xa6f   : > { %9604 = vmatpush3.bf16.msra.mxu1 %v9603_v45  ;;  %v7433_v45 = vld [vmem:[%s13775_s9 + $0xa90] sm:$0xff] }
 0xa70   : > { %9606 = vmatprep.subr.bf16.mxu1 %v9605_v51  ;;  %v9657_v46 = vpack.c.bf16 %v7434_v0, %v7433_v45  ;;  %v7417_v51 = vld [vmem:[%s13775_s9 + $0xa10] sm:$0xff]  ;;  %v7142_v45 = vld [vmem:[%s13775_s9 + $0x178] sm:$0xff]  ;;  %v7207_v0 = vld [vmem:[%s13775_s9 + $0x380] sm:$0xff] }
 0xa71   : > { %v9659_v60 = vpack.c.bf16 %v7418_v3, %v7417_v51  ;;  %v7443_v51 = vld [vmem:[%s13775_s9 + $0xae0] sm:$0xff]  ;;  %v7444_v3 = vld [vmem:[%s13775_s9 + $0xae8] sm:$0xff] }
 0xa73   : > { %9608 = vmatpush3.bf16.msra.mxu1 %v9607_v54  ;;  %v9377_v54 = vpack.c.bf16 %v7150_v20, %v7149_v39  ;;  %v7534_v39 = vcombine.high %v12599_v1, %v12599_v1  ;;  %v7141_v20 = vld [vmem:[%s13775_s9 + $0x170] sm:$0xff]  ;;  %v7208_v1 = vld [vmem:[%s13775_s9 + $0x388] sm:$0xff] }
 0xa74   : > { %9610 = vmatprep.subr.bf16.mxu1 %v9609_v2  ;;  %v7151_v2 = vld [vmem:[%s13775_s9 + $0x1c0] sm:$0xff]  ;;  %v9395_v56 = vpack.c.bf16 %v7142_v45, %v7141_v20 }
 0xa75   : > { %v9381_v61 = vpack.c.bf16 %v7152_v21, %v7151_v2  ;;  %v13097_v2 = vrot.slane %v7534_v39, %v12157_v37  ;;  %v7191_v21 = vld [vmem:[%s13775_s9 + $0x300] sm:$0xff]  ;;  %v7220_v39 = vld [vmem:[%s13775_s9 + $0x3e8] sm:$0xff] }
 0xa76   : > { %v7203_v45 = vld [vmem:[%s13775_s9 + $0x360] sm:$0xff] }
 0xa77   : > { %9612 = vmatpush3.bf16.msra.mxu1 %v9611_v28  ;;  %v7436_v28 = vld [vmem:[%s13775_s9 + $0xaa8] sm:$0xff] }
 0xa78   : > { %9614 = vmatprep.subr.bf16.mxu1 %v9613_v63  ;;  %v9661_v49 = vpack.c.bf16 %v7436_v28, %v7435_v10  ;;  %v7420_v63 = vld [vmem:[%s13775_s9 + $0xa28] sm:$0xff]  ;;  %v7209_v28 = vld [vmem:[%s13775_s9 + $0x390] sm:$0xff] }
 0xa79   : > { %v9663_v35 = vpack.c.bf16 %v7420_v63, %v7419_v6  ;;  %v7192_v10 = vld [vmem:[%s13775_s9 + $0x308] sm:$0xff]  ;;  %v7210_v6 = vld [vmem:[%s13775_s9 + $0x398] sm:$0xff]  ;;  %v7445_v63 = vld [vmem:[%s13775_s9 + $0xaf0] sm:$0xff] }
 0xa7b   : > { %9616 = vmatpush3.bf16.msra.mxu1 %v9615_v29  ;;  %v7136_v29 = vld [vmem:[%s13775_s9 + $0x148] sm:$0xff] }
 0xa7c   : > { %9618 = vmatprep.subr.bf16.mxu1 %v9617_v13  ;;  %v7137_v13 = vld [vmem:[%s13775_s9 + $0x150] sm:$0xff] }
 0xa7d   : > { %v9387_v33 = vpack.c.bf16 %v7138_v15, %v7137_v13 }
 0xa7f   : > { %9620 = vmatpush3.bf16.msra.mxu1 %v9619_v26 }
 0xa80   : > { %9654 = vmatprep.subr.bf16.mxu1 %v9653_v62  ;;  %v7158_v62 = vld [vmem:[%s13775_s9 + $0x1f8] sm:$0xff] }
 0xa95   : > { %v8771_v24 = vpop.f32.mrb[0].mxu1 }
 0xa96   : > { %v8772_v23 = vpop.f32.mrb[1].mxu1 }
 0xa97   : > { %v12793_v53 = vadd.f32 %v8772_v23, %v8771_v24  ;;  %v7145_v24 = vld [vmem:[%s13775_s9 + $0x190] sm:$0xff] }
 0xa98   : > { %v9369_v22 = vpack.c.bf16 %v7146_v7, %v7145_v24  ;;  %v7437_v24 = vld [vmem:[%s13775_s9 + $0xab0] sm:$0xff] }
 0xa99   : > { %v6926_v27 = vadd.f32 %v12793_v53, %v8727_v14  ;;  %v7592_v53 = vrot.slane %v12919_v16, %v12157_v37  ;;  %v7135_v14 = vld [vmem:[%s13775_s9 + $0x140] sm:$0xff] }
 0xa9b   : > { %v7600_v43 = vcombine.high %v7592_v53, %v7592_v53 }
 0xa9d   : > { %8278 = vmatprep.mubr.f32.mxu1 %v7600_v43  ;;  %v7140_v43 = vld [vmem:[%s13775_s9 + $0x168] sm:$0xff] }
 0xa9e   : > { %8279 = vmatmul.mubr.f32.vlgmr.msra.gmra.mrb[12].mxu1 %v7592_v53  ;;  %v7439_v53 = vld [vmem:[%s13775_s9 + $0xac0] sm:$0xff]  ;;  %v9391_v50 = vpack.c.bf16 %v7140_v43, %v7139_v59  ;;  %v9443_v59 = vpack.c.bf16 %v7198_v44, %v7197_v41  ;;  %v7281_v41 = vld [vmem:[%s13775_s9 + $0x5d0] sm:$0xff]  ;;  %v7282_v44 = vld [vmem:[%s13775_s9 + $0x5d8] sm:$0xff] }
 0xa9f   : > { %9656 = vmatpush3.bf16.msra.mxu1 %v9655_v40  ;;  %v9393_v40 = vpack.c.bf16 %v7158_v62, %v7157_v30  ;;  %v7199_v30 = vld [vmem:[%s13775_s9 + $0x340] sm:$0xff]  ;;  %v7217_v62 = vld [vmem:[%s13775_s9 + $0x3d0] sm:$0xff] }
 0xaa0   : > { %9658 = vmatprep.subr.bf16.mxu1 %v9657_v46 }
 0xaa3   : > { %9660 = vmatpush3.bf16.msra.mxu1 %v9659_v60  ;;  %v9429_v60 = vpack.c.bf16 %v7208_v1, %v7207_v0  ;;  %v7204_v0 = vld [vmem:[%s13775_s9 + $0x368] sm:$0xff]  ;;  %v7222_v1 = vld [vmem:[%s13775_s9 + $0x3f8] sm:$0xff] }
 0xaa4   : > { %9662 = vmatprep.subr.bf16.mxu1 %v9661_v49 }
 0xaa7   : > { %9664 = vmatpush3.bf16.msra.mxu1 %v9663_v35  ;;  %v9431_v35 = vpack.c.bf16 %v7192_v10, %v7191_v21 }
 0xab5   : > { %v8806_v58 = vpop.f32.mrb[2].mxu1 }
 0xab6   : > { %v8807_v23 = vpop.f32.mrb[3].mxu1 }
 0xab7   : > { %v8808_v38 = vadd.f32 %v8807_v23, %v8806_v58  ;;  %v7153_v58 = vld [vmem:[%s13775_s9 + $0x1d0] sm:$0xff]  ;;  %v7438_v23 = vld [vmem:[%s13775_s9 + $0xab8] sm:$0xff] }
 0xab8   : > { %v9665_v7 = vpack.c.bf16 %v7438_v23, %v7437_v24  ;;  %v9433_v23 = vpack.c.bf16 %v7210_v6, %v7209_v28  ;;  %v7255_v28 = vld [vmem:[%s13775_s9 + $0x500] sm:$0xff]  ;;  %v7273_v6 = vld [vmem:[%s13775_s9 + $0x590] sm:$0xff] }
 0xab9   : > { %v6996_v57 = vadd.f32 %v8808_v38, %v6926_v27  ;;  %v9383_v27 = vpack.c.bf16 %v7136_v29, %v7135_v14  ;;  %v9385_v38 = vpack.c.bf16 %v7154_v36, %v7153_v58  ;;  %v7429_v14 = vld [vmem:[%s13775_s9 + $0xa70] sm:$0xff]  ;;  %v7430_v29 = vld [vmem:[%s13775_s9 + $0xa78] sm:$0xff]  ;;  %v7550_v36 = vcombine.high %v13097_v2, %v13097_v2 }
 0xaba   : > { %9666 = vmatprep.subr.bf16.mxu1 %v9665_v7  ;;  %v13123_v58 = vld [vmem:[#allocation12 + $0x28] sm:$0xff]  ;;  %v7193_v7 = vld [vmem:[%s13775_s9 + $0x310] sm:$0xff] }
 0xabb   : > { %9255 = vmatmul.mubr.msk.f32.vlgmr.msra.gmra.mrb[0].mxu0 %vm7014_vm1, %v6996_v57  ;;  %v7440_v57 = vld [vmem:[%s13775_s9 + $0xac8] sm:$0xff]  ;;  %v7609_v24 = vrot.slane %v13123_v58, %v12157_v37 }
 0xabc   : > { %9368 = vmatpush3.bf16.msra.mxu0 %v9367_v17  ;;  %7788 = vmatprep.mubr.f32.mxu0 %v7533_v19  ;;  %v9667_v17 = vpack.c.bf16 %v7422_v11, %v7421_v42  ;;  %v7156_v19 = vld [vmem:[%s13775_s9 + $0x1e8] sm:$0xff]  ;;  %v7194_v42 = vld [vmem:[%s13775_s9 + $0x318] sm:$0xff]  ;;  %v9683_v11 = vpack.c.bf16 %v7430_v29, %v7429_v14  ;;  %v7257_v29 = vld [vmem:[%s13775_s9 + $0x510] sm:$0xff] }
 0xabd   : > { %9370 = vmatprep.subr.bf16.mxu0 %v9369_v22  ;;  %v9669_v22 = vpack.c.bf16 %v7440_v57, %v7439_v53  ;;  %v9389_v26 = vpack.c.bf16 %v7156_v19, %v7155_v31  ;;  %v7617_v13 = vcombine.high %v7609_v24, %v7609_v24  ;;  %v9435_v15 = vpack.c.bf16 %v7194_v42, %v7193_v7  ;;  %v7196_v19 = vld [vmem:[%s13775_s9 + $0x328] sm:$0xff]  ;;  %v7213_v53 = vld [vmem:[%s13775_s9 + $0x3b0] sm:$0xff]  ;;  %v7259_v42 = vld [vmem:[%s13775_s9 + $0x520] sm:$0xff] }
 0xabe   : > { %9668 = vmatpush3.bf16.msra.mxu1 %v9667_v17  ;;  %v7195_v17 = vld [vmem:[%s13775_s9 + $0x320] sm:$0xff] }
 0xabf   : > { %9670 = vmatprep.subr.bf16.mxu1 %v9669_v22  ;;  %8418 = vmatprep.mubr.f32.mxu1 %v7617_v13  ;;  %v9439_v57 = vpack.c.bf16 %v7196_v19, %v7195_v17  ;;  %v7279_v17 = vld [vmem:[%s13775_s9 + $0x5c0] sm:$0xff]  ;;  %v7280_v19 = vld [vmem:[%s13775_s9 + $0x5c8] sm:$0xff] }
 0xac0   : > { %9372 = vmatpush3.bf16.msra.mxu0 %v9371_v55  ;;  %v9673_v55 = vpack.c.bf16 %v7442_v4, %v7441_v48  ;;  %v7218_v48 = vld [vmem:[%s13775_s9 + $0x3d8] sm:$0xff] }
 0xac1   : > { %9374 = vmatprep.subr.bf16.mxu0 %v9373_v34  ;;  %v7425_v34 = vld [vmem:[%s13775_s9 + $0xa50] sm:$0xff] }
 0xac2   : > { %9672 = vmatpush3.bf16.msra.mxu1 %v9671_v8  ;;  %v9675_v46 = vpack.c.bf16 %v7426_v9, %v7425_v34  ;;  %v7200_v8 = vld [vmem:[%s13775_s9 + $0x348] sm:$0xff]  ;;  %v7201_v34 = vld [vmem:[%s13775_s9 + $0x350] sm:$0xff]  ;;  %v7202_v9 = vld [vmem:[%s13775_s9 + $0x358] sm:$0xff] }
 0xac3   : > { %9674 = vmatprep.subr.bf16.mxu1 %v9673_v55  ;;  %v9447_v4 = vpack.c.bf16 %v7200_v8, %v7199_v30  ;;  %v9449_v55 = vpack.c.bf16 %v7218_v48, %v7217_v62  ;;  %v7283_v30 = vld [vmem:[%s13775_s9 + $0x5e0] sm:$0xff]  ;;  %v7284_v8 = vld [vmem:[%s13775_s9 + $0x5e8] sm:$0xff] }
 0xac4   : > { %9376 = vmatpush3.bf16.msra.mxu0 %v9375_v52  ;;  %v9677_v52 = vpack.c.bf16 %v7444_v3, %v7443_v51  ;;  %v9455_v51 = vpack.c.bf16 %v7204_v0, %v7203_v45  ;;  %v7551_v3 = vcombine.high %v12699_v18, %v12699_v18  ;;  %v9517_v48 = vpack.c.bf16 %v7284_v8, %v7283_v30  ;;  %v7270_v45 = vld [vmem:[%s13775_s9 + $0x578] sm:$0xff]  ;;  %v7335_v0 = vld [vmem:[%s13775_s9 + $0x780] sm:$0xff]  ;;  %v7349_v30 = vld [vmem:[%s13775_s9 + $0x7f0] sm:$0xff] }
 0xac5   : > { %9378 = vmatprep.subr.bf16.mxu0 %v9377_v54  ;;  %v7427_v54 = vld [vmem:[%s13775_s9 + $0xa60] sm:$0xff]  ;;  %v7350_v8 = vld [vmem:[%s13775_s9 + $0x7f8] sm:$0xff] }
 0xac6   : > { %9676 = vmatpush3.bf16.msra.mxu1 %v9675_v46  ;;  %v9679_v49 = vpack.c.bf16 %v7428_v5, %v7427_v54  ;;  %v7221_v46 = vld [vmem:[%s13775_s9 + $0x3f0] sm:$0xff]  ;;  %v7206_v5 = vld [vmem:[%s13775_s9 + $0x378] sm:$0xff]  ;;  %v13217_v21 = vrot.slane %v7551_v3, %v12157_v37  ;;  %v7319_v3 = vld [vmem:[%s13775_s9 + $0x700] sm:$0xff] }
 0xac7   : > { %9678 = vmatprep.subr.bf16.mxu1 %v9677_v52  ;;  %v9457_v52 = vpack.c.bf16 %v7222_v1, %v7221_v46  ;;  %v7205_v54 = vld [vmem:[%s13775_s9 + $0x370] sm:$0xff]  ;;  %v7336_v46 = vld [vmem:[%s13775_s9 + $0x788] sm:$0xff] }
 0xac8   : > { %9380 = vmatpush3.bf16.msra.mxu0 %v9379_v25  ;;  %v7446_v25 = vld [vmem:[%s13775_s9 + $0xaf8] sm:$0xff]  ;;  %v9459_v18 = vpack.c.bf16 %v7206_v5, %v7205_v54  ;;  %v7337_v54 = vld [vmem:[%s13775_s9 + $0x790] sm:$0xff] }
 0xac9   : > { %9382 = vmatprep.subr.bf16.mxu0 %v9381_v61  ;;  %v9681_v61 = vpack.c.bf16 %v7446_v25, %v7445_v63  ;;  %v7274_v63 = vld [vmem:[%s13775_s9 + $0x598] sm:$0xff] }
 0xaca   : > { %9680 = vmatpush3.bf16.msra.mxu1 %v9679_v49  ;;  %v7256_v49 = vld [vmem:[%s13775_s9 + $0x508] sm:$0xff]  ;;  %v9497_v14 = vpack.c.bf16 %v7274_v63, %v7273_v6  ;;  %v7338_v5 = vld [vmem:[%s13775_s9 + $0x798] sm:$0xff] }
 0xacb   : > { %9682 = vmatprep.subr.bf16.mxu1 %v9681_v61  ;;  %v9495_v25 = vpack.c.bf16 %v7256_v49, %v7255_v28  ;;  %v7567_v61 = vcombine.high %v13217_v21, %v13217_v21  ;;  %v7322_v28 = vld [vmem:[%s13775_s9 + $0x718] sm:$0xff]  ;;  %v7339_v49 = vld [vmem:[%s13775_s9 + $0x7a0] sm:$0xff]  ;;  %v7340_v6 = vld [vmem:[%s13775_s9 + $0x7a8] sm:$0xff] }
 0xacc   : > { %9384 = vmatpush3.bf16.msra.mxu0 %v9383_v27  ;;  %v7211_v27 = vld [vmem:[%s13775_s9 + $0x3a0] sm:$0xff] }
 0xacd   : > { %9386 = vmatprep.subr.bf16.mxu0 %v9385_v38  ;;  %v7212_v38 = vld [vmem:[%s13775_s9 + $0x3a8] sm:$0xff] }
 0xace   : > { %v9437_v31 = vpack.c.bf16 %v7212_v38, %v7211_v27  ;;  %9684 = vmatpush3.bf16.msra.mxu1 %v9683_v11  ;;  %v7260_v11 = vld [vmem:[%s13775_s9 + $0x528] sm:$0xff]  ;;  %v7277_v27 = vld [vmem:[%s13775_s9 + $0x5b0] sm:$0xff] }
 0xacf   : > { %v9503_v38 = vpack.c.bf16 %v7260_v11, %v7259_v42  ;;  %v7344_v42 = vld [vmem:[%s13775_s9 + $0x7c8] sm:$0xff] }
 0xad0   : > { %9388 = vmatpush3.bf16.msra.mxu0 %v9387_v33  ;;  %v7215_v33 = vld [vmem:[%s13775_s9 + $0x3c0] sm:$0xff] }
 0xad1   : > { %9390 = vmatprep.subr.bf16.mxu0 %v9389_v26  ;;  %8419 = vmatmul.mubr.f32.vlgmr.msra.gmra.mrb[14].mxu1 %v7609_v24  ;;  %v7216_v26 = vld [vmem:[%s13775_s9 + $0x3c8] sm:$0xff] }
 0xad2   : > { %v9445_v43 = vpack.c.bf16 %v7216_v26, %v7215_v33  ;;  %v7276_v24 = vld [vmem:[%s13775_s9 + $0x5a8] sm:$0xff]  ;;  %v9513_v26 = vpack.c.bf16 %v7282_v44, %v7281_v41 }
 0xad4   : > { %9392 = vmatpush3.bf16.msra.mxu0 %v9391_v50  ;;  %v7219_v50 = vld [vmem:[%s13775_s9 + $0x3e0] sm:$0xff] }
 0xad5   : > { %9394 = vmatprep.subr.bf16.mxu0 %v9393_v40  ;;  %v9451_v40 = vpack.c.bf16 %v7202_v9, %v7201_v34  ;;  %v9453_v20 = vpack.c.bf16 %v7220_v39, %v7219_v50  ;;  %v7285_v34 = vld [vmem:[%s13775_s9 + $0x5f0] sm:$0xff]  ;;  %v7286_v9 = vld [vmem:[%s13775_s9 + $0x5f8] sm:$0xff]  ;;  %v7568_v39 = vcombine.high %v12801_v12, %v12801_v12 }
 0xad7   : > { %v13321_v1 = vrot.slane %v7568_v39, %v12157_v37 }
 0xad8   : > { %9396 = vmatpush3.bf16.msra.mxu0 %v9395_v56  ;;  %v7271_v56 = vld [vmem:[%s13775_s9 + $0x580] sm:$0xff] }
 0xad9   : > { %9430 = vmatprep.subr.bf16.mxu0 %v9429_v60  ;;  %v7272_v60 = vld [vmem:[%s13775_s9 + $0x588] sm:$0xff] }
 0xada   : > { %v9493_v10 = vpack.c.bf16 %v7272_v60, %v7271_v56  ;;  %v7584_v60 = vcombine.high %v13321_v1, %v13321_v1 }
 0xadb   : > { %7789 = vmatmul.mubr.f32.vlgmr.msra.gmra.mrb[2].mxu0 %v12892_v32  ;;  %v7214_v32 = vld [vmem:[%s13775_s9 + $0x3b8] sm:$0xff] }
 0xadc   : > { %9432 = vmatpush3.bf16.msra.mxu0 %v9431_v35  ;;  %7928 = vmatprep.mubr.f32.mxu0 %v7550_v36  ;;  %v9441_v22 = vpack.c.bf16 %v7214_v32, %v7213_v53  ;;  %v7258_v35 = vld [vmem:[%s13775_s9 + $0x518] sm:$0xff]  ;;  %v7275_v36 = vld [vmem:[%s13775_s9 + $0x5a0] sm:$0xff]  ;;  %v9509_v32 = vpack.c.bf16 %v7280_v19, %v7279_v17  ;;  %v7329_v19 = vld [vmem:[%s13775_s9 + $0x750] sm:$0xff] }
 0xadd   : > { %9434 = vmatprep.subr.bf16.mxu0 %v9433_v23  ;;  %v9499_v23 = vpack.c.bf16 %v7258_v35, %v7257_v29  ;;  %v9501_v7 = vpack.c.bf16 %v7276_v24, %v7275_v36  ;;  %v7341_v29 = vld [vmem:[%s13775_s9 + $0x7b0] sm:$0xff] }
 0xade   : > { %v7325_v24 = vld [vmem:[%s13775_s9 + $0x730] sm:$0xff] }
 0xae0   : > { %9436 = vmatpush3.bf16.msra.mxu0 %v9435_v15  ;;  %v7261_v15 = vld [vmem:[%s13775_s9 + $0x530] sm:$0xff] }
 0xae1   : > { %9438 = vmatprep.subr.bf16.mxu0 %v9437_v31  ;;  %v7262_v31 = vld [vmem:[%s13775_s9 + $0x538] sm:$0xff] }
 0xae2   : > { %v9507_v53 = vpack.c.bf16 %v7262_v31, %v7261_v15  ;;  %v7346_v15 = vld [vmem:[%s13775_s9 + $0x7d8] sm:$0xff] }
 0xae4   : > { %9440 = vmatpush3.bf16.msra.mxu0 %v9439_v57  ;;  %v7263_v57 = vld [vmem:[%s13775_s9 + $0x540] sm:$0xff] }
 0xae5   : > { %9442 = vmatprep.subr.bf16.mxu0 %v9441_v22  ;;  %v7264_v22 = vld [vmem:[%s13775_s9 + $0x548] sm:$0xff] }
 0xae6   : > { %v9511_v33 = vpack.c.bf16 %v7264_v22, %v7263_v57  ;;  %v7348_v57 = vld [vmem:[%s13775_s9 + $0x7e8] sm:$0xff]  ;;  %v8850_v22 = vpop.f32.mrb[4].mxu1 }
 0xae7   : > { %v8851_v44 = vpop.f32.mrb[5].mxu1 }
 0xae8   : > { %9444 = vmatpush3.bf16.msra.mxu0 %v9443_v59  ;;  %v7265_v59 = vld [vmem:[%s13775_s9 + $0x550] sm:$0xff] }
 0xae9   : > { %9446 = vmatprep.subr.bf16.mxu0 %v9445_v43  ;;  %v7266_v43 = vld [vmem:[%s13775_s9 + $0x558] sm:$0xff] }
 0xaea   : > { %v9515_v62 = vpack.c.bf16 %v7266_v43, %v7265_v59  ;;  %v7332_v59 = vld [vmem:[%s13775_s9 + $0x768] sm:$0xff]  ;;  %v13404_v43 = vadd.f32 %v8851_v44, %v8850_v22  ;;  %v7413_v22 = vld [vmem:[%s13775_s9 + $0x9f0] sm:$0xff] }
 0xaec   : > { %9448 = vmatpush3.bf16.msra.mxu0 %v9447_v4  ;;  %v7267_v4 = vld [vmem:[%s13775_s9 + $0x560] sm:$0xff] }
 0xaed   : > { %9450 = vmatprep.subr.bf16.mxu0 %v9449_v55  ;;  %v7268_v55 = vld [vmem:[%s13775_s9 + $0x568] sm:$0xff] }
 0xaee   : > { %v9519_v50 = vpack.c.bf16 %v7268_v55, %v7267_v4  ;;  %v9585_v4 = vpack.c.bf16 %v7350_v8, %v7349_v30  ;;  %v7333_v55 = vld [vmem:[%s13775_s9 + $0x770] sm:$0xff]  ;;  %v7398_v30 = vld [vmem:[%s13775_s9 + $0x978] sm:$0xff]  ;;  %v7463_v8 = vld [vmem:[%s13775_s9 + $0xb80] sm:$0xff] }
 0xaf0   : > { %9452 = vmatpush3.bf16.msra.mxu0 %v9451_v40  ;;  %v9521_v40 = vpack.c.bf16 %v7286_v9, %v7285_v34  ;;  %v7334_v34 = vld [vmem:[%s13775_s9 + $0x778] sm:$0xff]  ;;  %v7399_v9 = vld [vmem:[%s13775_s9 + $0x980] sm:$0xff] }
 0xaf1   : > { %9454 = vmatprep.subr.bf16.mxu0 %v9453_v20  ;;  %v7269_v20 = vld [vmem:[%s13775_s9 + $0x570] sm:$0xff] }
 0xaf2   : > { %v9523_v12 = vpack.c.bf16 %v7270_v45, %v7269_v20 }
 0xaf4   : > { %9456 = vmatpush3.bf16.msra.mxu0 %v9455_v51  ;;  %v9557_v51 = vpack.c.bf16 %v7336_v46, %v7335_v0  ;;  %v7383_v46 = vld [vmem:[%s13775_s9 + $0x900] sm:$0xff] }
 0xaf5   : > { %9458 = vmatprep.subr.bf16.mxu0 %v9457_v52  ;;  %v7320_v52 = vld [vmem:[%s13775_s9 + $0x708] sm:$0xff]  ;;  %v8920_v39 = vpop.f32.mrb[6].mxu1 }
 0xaf6   : > { %v9559_v56 = vpack.c.bf16 %v7320_v52, %v7319_v3  ;;  %v7402_v3 = vld [vmem:[%s13775_s9 + $0x998] sm:$0xff] }
 0xaf8   : > { %9460 = vmatpush3.bf16.msra.mxu0 %v9459_v18  ;;  %v9561_v18 = vpack.c.bf16 %v7338_v5, %v7337_v54 }
 0xaf9   : > { %9494 = vmatprep.subr.bf16.mxu0 %v9493_v10  ;;  %v7321_v10 = vld [vmem:[%s13775_s9 + $0x710] sm:$0xff] }
 0xafa   : > { %v9563_v63 = vpack.c.bf16 %v7322_v28, %v7321_v10  ;;  %v7404_v10 = vld [vmem:[%s13775_s9 + $0x9a8] sm:$0xff] }
 0xafb   : > { %7929 = vmatmul.mubr.f32.vlgmr.msra.gmra.mrb[4].mxu0 %v13097_v2  ;;  %v7278_v2 = vld [vmem:[%s13775_s9 + $0x5b8] sm:$0xff] }
 0xafc   : > { %9496 = vmatpush3.bf16.msra.mxu0 %v9495_v25  ;;  %8068 = vmatprep.mubr.f32.mxu0 %v7567_v61  ;;  %v9505_v13 = vpack.c.bf16 %v7278_v2, %v7277_v27  ;;  %v9565_v25 = vpack.c.bf16 %v7340_v6, %v7339_v49  ;;  %v7323_v61 = vld [vmem:[%s13775_s9 + $0x720] sm:$0xff] }
 0xafd   : > { %9498 = vmatprep.subr.bf16.mxu0 %v9497_v14  ;;  %v7324_v14 = vld [vmem:[%s13775_s9 + $0x728] sm:$0xff]  ;;  %v7327_v2 = vld [vmem:[%s13775_s9 + $0x740] sm:$0xff] }
 0xafe   : > { %v9567_v35 = vpack.c.bf16 %v7324_v14, %v7323_v61  ;;  %v7387_v6 = vld [vmem:[%s13775_s9 + $0x920] sm:$0xff] }
 0xb00   : > { %9500 = vmatpush3.bf16.msra.mxu0 %v9499_v23  ;;  %v7326_v23 = vld [vmem:[%s13775_s9 + $0x738] sm:$0xff] }
 0xb01   : > { %9502 = vmatprep.subr.bf16.mxu0 %v9501_v7  ;;  %v7343_v7 = vld [vmem:[%s13775_s9 + $0x7c0] sm:$0xff]  ;;  %v9571_v11 = vpack.c.bf16 %v7326_v23, %v7325_v24 }
 0xb02   : > { %v9573_v27 = vpack.c.bf16 %v7344_v42, %v7343_v7  ;;  %v7391_v7 = vld [vmem:[%s13775_s9 + $0x940] sm:$0xff]  ;;  %v7392_v42 = vld [vmem:[%s13775_s9 + $0x948] sm:$0xff] }
 0xb04   : > { %9504 = vmatpush3.bf16.msra.mxu0 %v9503_v38  ;;  %v7328_v38 = vld [vmem:[%s13775_s9 + $0x748] sm:$0xff] }
 0xb05   : > { %9506 = vmatprep.subr.bf16.mxu0 %v9505_v13  ;;  %v7345_v13 = vld [vmem:[%s13775_s9 + $0x7d0] sm:$0xff]  ;;  %v9575_v31 = vpack.c.bf16 %v7328_v38, %v7327_v2  ;;  %v9639_v2 = vpack.c.bf16 %v7392_v42, %v7391_v7  ;;  %v7458_v7 = vld [vmem:[%s13775_s9 + $0xb58] sm:$0xff]  ;;  %v7475_v42 = vld [vmem:[%s13775_s9 + $0xbe0] sm:$0xff] }
 0xb06   : > { %v9577_v17 = vpack.c.bf16 %v7346_v15, %v7345_v13  ;;  %v7393_v13 = vld [vmem:[%s13775_s9 + $0x950] sm:$0xff]  ;;  %v7394_v15 = vld [vmem:[%s13775_s9 + $0x958] sm:$0xff] }
 0xb08   : > { %9508 = vmatpush3.bf16.msra.mxu0 %v9507_v53  ;;  %v7330_v53 = vld [vmem:[%s13775_s9 + $0x758] sm:$0xff] }
 0xb09   : > { %9510 = vmatprep.subr.bf16.mxu0 %v9509_v32  ;;  %v7347_v32 = vld [vmem:[%s13775_s9 + $0x7e0] sm:$0xff]  ;;  %v9579_v41 = vpack.c.bf16 %v7330_v53, %v7329_v19  ;;  %v9643_v19 = vpack.c.bf16 %v7394_v15, %v7393_v13  ;;  %v7460_v13 = vld [vmem:[%s13775_s9 + $0xb68] sm:$0xff]  ;;  %v7477_v15 = vld [vmem:[%s13775_s9 + $0xbf0] sm:$0xff] }
 0xb0c   : > { %9512 = vmatpush3.bf16.msra.mxu0 %v9511_v33  ;;  %v9581_v33 = vpack.c.bf16 %v7348_v57, %v7347_v32  ;;  %v7395_v32 = vld [vmem:[%s13775_s9 + $0x960] sm:$0xff]  ;;  %v7396_v57 = vld [vmem:[%s13775_s9 + $0x968] sm:$0xff] }
 0xb0d   : > { %9514 = vmatprep.subr.bf16.mxu0 %v9513_v26  ;;  %v7331_v26 = vld [vmem:[%s13775_s9 + $0x760] sm:$0xff]  ;;  %v9647_v44 = vpack.c.bf16 %v7396_v57, %v7395_v32  ;;  %v7462_v32 = vld [vmem:[%s13775_s9 + $0xb78] sm:$0xff] }
 0xb10   : > { %9516 = vmatpush3.bf16.msra.mxu0 %v9515_v62  ;;  %v9583_v62 = vpack.c.bf16 %v7332_v59, %v7331_v26  ;;  %v7397_v59 = vld [vmem:[%s13775_s9 + $0x970] sm:$0xff] }
 0xb11   : > { %9518 = vmatprep.subr.bf16.mxu0 %v9517_v48  ;;  %v7585_v48 = vcombine.high %v12919_v16, %v12919_v16  ;;  %v8921_v16 = vpop.f32.mrb[7].mxu1 }
 0xb12   : > { %v13429_v45 = vadd.f32 %v8921_v16, %v8920_v39  ;;  %v7448_v39 = vld [vmem:[%s13775_s9 + $0xb08] sm:$0xff]  ;;  %v7465_v16 = vld [vmem:[%s13775_s9 + $0xb90] sm:$0xff] }
 0xb13   : > { %v13427_v20 = vrot.slane %v7585_v48, %v12157_v37 }
 0xb14   : > { %9520 = vmatpush3.bf16.msra.mxu0 %v9519_v50  ;;  %v7400_v50 = vld [vmem:[%s13775_s9 + $0x988] sm:$0xff] }
 0xb15   : > { %9522 = vmatprep.subr.bf16.mxu0 %v9521_v40  ;;  %v9587_v40 = vpack.c.bf16 %v7334_v34, %v7333_v55  ;;  %v9621_v0 = vpack.c.bf16 %v7400_v50, %v7399_v9  ;;  %v7601_v54 = vcombine.high %v13427_v20, %v13427_v20  ;;  %v8990_v48 = vpop.f32.mrb[8].mxu1  ;;  %v7447_v50 = vld [vmem:[%s13775_s9 + $0xb00] sm:$0xff] }
 0xb18   : > { %9524 = vmatpush3.bf16.msra.mxu0 %v9523_v12  ;;  %v7384_v12 = vld [vmem:[%s13775_s9 + $0x908] sm:$0xff] }
 0xb19   : > { %9558 = vmatprep.subr.bf16.mxu0 %v9557_v51  ;;  %v7401_v51 = vld [vmem:[%s13775_s9 + $0x990] sm:$0xff]  ;;  %v9623_v52 = vpack.c.bf16 %v7384_v12, %v7383_v46 }
 0xb1a   : > { %v9625_v5 = vpack.c.bf16 %v7402_v3, %v7401_v51  ;;  %v7449_v12 = vld [vmem:[%s13775_s9 + $0xb10] sm:$0xff]  ;;  %v7450_v51 = vld [vmem:[%s13775_s9 + $0xb18] sm:$0xff]  ;;  %v7467_v3 = vld [vmem:[%s13775_s9 + $0xba0] sm:$0xff] }
 0xb1b   : > { %8069 = vmatmul.mubr.f32.vlgmr.msra.gmra.mrb[6].mxu0 %v13217_v21  ;;  %v7342_v21 = vld [vmem:[%s13775_s9 + $0x7b8] sm:$0xff] }
 0xb1c   : > { %9560 = vmatpush3.bf16.msra.mxu0 %v9559_v56  ;;  %8208 = vmatprep.mubr.f32.mxu0 %v7584_v60  ;;  %v9569_v36 = vpack.c.bf16 %v7342_v21, %v7341_v29  ;;  %v7385_v56 = vld [vmem:[%s13775_s9 + $0x910] sm:$0xff]  ;;  %v7386_v60 = vld [vmem:[%s13775_s9 + $0x918] sm:$0xff] }
 0xb1d   : > { %9562 = vmatprep.subr.bf16.mxu0 %v9561_v18  ;;  %v7403_v18 = vld [vmem:[%s13775_s9 + $0x9a0] sm:$0xff]  ;;  %v9627_v28 = vpack.c.bf16 %v7386_v60, %v7385_v56  ;;  %v7389_v29 = vld [vmem:[%s13775_s9 + $0x930] sm:$0xff]  ;;  %v7390_v21 = vld [vmem:[%s13775_s9 + $0x938] sm:$0xff] }
 0xb1e   : > { %v9629_v49 = vpack.c.bf16 %v7404_v10, %v7403_v18  ;;  %v9635_v24 = vpack.c.bf16 %v7390_v21, %v7389_v29  ;;  %v7451_v56 = vld [vmem:[%s13775_s9 + $0xb20] sm:$0xff]  ;;  %v7452_v60 = vld [vmem:[%s13775_s9 + $0xb28] sm:$0xff]  ;;  %v7469_v18 = vld [vmem:[%s13775_s9 + $0xbb0] sm:$0xff] }
 0xb1f   : > { %v9695_v10 = vpack.c.bf16 %v7452_v60, %v7451_v56  ;;  %v7456_v29 = vld [vmem:[%s13775_s9 + $0xb48] sm:$0xff]  ;;  %v7473_v21 = vld [vmem:[%s13775_s9 + $0xbd0] sm:$0xff]  ;;  %v7494_v56 = vld [vmem:[%s13775_s9 + $0xc78] sm:$0xff] }
 0xb20   : > { %9564 = vmatpush3.bf16.msra.mxu0 %v9563_v63  ;;  %v7388_v63 = vld [vmem:[%s13775_s9 + $0x928] sm:$0xff] }
 0xb21   : > { %9566 = vmatprep.subr.bf16.mxu0 %v9565_v25  ;;  %v7405_v25 = vld [vmem:[%s13775_s9 + $0x9b0] sm:$0xff]  ;;  %v9631_v61 = vpack.c.bf16 %v7388_v63, %v7387_v6  ;;  %v7454_v6 = vld [vmem:[%s13775_s9 + $0xb38] sm:$0xff]  ;;  %v7471_v63 = vld [vmem:[%s13775_s9 + $0xbc0] sm:$0xff] }
 0xb24   : > { %9568 = vmatpush3.bf16.msra.mxu0 %v9567_v35  ;;  %v7407_v35 = vld [vmem:[%s13775_s9 + $0x9c0] sm:$0xff] }
 0xb25   : > { %9570 = vmatprep.subr.bf16.mxu0 %v9569_v36  ;;  %v7408_v36 = vld [vmem:[%s13775_s9 + $0x9c8] sm:$0xff] }
 0xb26   : > { %v9637_v23 = vpack.c.bf16 %v7408_v36, %v7407_v35  ;;  %v7474_v35 = vld [vmem:[%s13775_s9 + $0xbd8] sm:$0xff] }
 0xb28   : > { %9572 = vmatpush3.bf16.msra.mxu0 %v9571_v11  ;;  %v7409_v11 = vld [vmem:[%s13775_s9 + $0x9d0] sm:$0xff] }
 0xb29   : > { %9574 = vmatprep.subr.bf16.mxu0 %v9573_v27  ;;  %v7410_v27 = vld [vmem:[%s13775_s9 + $0x9d8] sm:$0xff] }
 0xb2a   : > { %v9641_v38 = vpack.c.bf16 %v7410_v27, %v7409_v11  ;;  %v7476_v11 = vld [vmem:[%s13775_s9 + $0xbe8] sm:$0xff] }
 0xb2c   : > { %9576 = vmatpush3.bf16.msra.mxu0 %v9575_v31  ;;  %v7411_v31 = vld [vmem:[%s13775_s9 + $0x9e0] sm:$0xff] }
 0xb2d   : > { %9578 = vmatprep.subr.bf16.mxu0 %v9577_v17  ;;  %v7412_v17 = vld [vmem:[%s13775_s9 + $0x9e8] sm:$0xff] }
 0xb2e   : > { %v9645_v53 = vpack.c.bf16 %v7412_v17, %v7411_v31  ;;  %v7478_v31 = vld [vmem:[%s13775_s9 + $0xbf8] sm:$0xff] }
 0xb30   : > { %9580 = vmatpush3.bf16.msra.mxu0 %v9579_v41  ;;  %v7414_v41 = vld [vmem:[%s13775_s9 + $0x9f8] sm:$0xff] }
 0xb31   : > { %9582 = vmatprep.subr.bf16.mxu0 %v9581_v33  ;;  %v7602_v33 = vcombine.high %v13123_v58, %v13123_v58  ;;  %v9649_v26 = vpack.c.bf16 %v7414_v41, %v7413_v22  ;;  %v8991_v58 = vpop.f32.mrb[9].mxu1 }
 0xb32   : > { %v13535_v34 = vadd.f32 %v8991_v58, %v8990_v48  ;;  %v7482_v48 = vld [vmem:[%s13775_s9 + $0xc18] sm:$0xff] }
 0xb33   : > { %v13533_v55 = vrot.slane %v7602_v33, %v12157_v37  ;;  %v7466_v37 = vld [vmem:[%s13775_s9 + $0xb98] sm:$0xff]  ;;  %v7479_v33 = vld [vmem:[%s13775_s9 + $0xc00] sm:$0xff] }
 0xb34   : > { %9584 = vmatpush3.bf16.msra.mxu0 %v9583_v62  ;;  %v7464_v62 = vld [vmem:[%s13775_s9 + $0xb88] sm:$0xff]  ;;  %v9689_v46 = vpack.c.bf16 %v7466_v37, %v7465_v16  ;;  %v7487_v37 = vld [vmem:[%s13775_s9 + $0xc40] sm:$0xff] }
 0xb35   : > { %9586 = vmatprep.subr.bf16.mxu0 %v9585_v4  ;;  %v9651_v4 = vpack.c.bf16 %v7398_v30, %v7397_v59  ;;  %v9685_v9 = vpack.c.bf16 %v7464_v62, %v7463_v8  ;;  %v9060_v57 = vpop.f32.mrb[10].mxu1  ;;  %v13638_v59 = vld.sshfl [vmem:[#allocation12 + $0x30] sm:$0x33 pattern:$0x76325410]  ;;  %v7481_v62 = vld [vmem:[%s13775_s9 + $0xc10] sm:$0xff] }
 0xb36   : > { %v9061_v22 = vpop.f32.mrb[11].mxu1  ;;  %v7626_v8 = vcombine.high %v13638_v59, %v13638_v59  ;;  %v9721_v58 = vpack.c.bf16 %v7482_v48, %v7481_v62 }
 0xb38   : > { %9588 = vmatpush3.bf16.msra.mxu0 %v9587_v40  ;;  %v9687_v40 = vpack.c.bf16 %v7448_v39, %v7447_v50  ;;  %v7486_v39 = vld [vmem:[%s13775_s9 + $0xc38] sm:$0xff] }
 0xb39   : > { %9622 = vmatprep.subr.bf16.mxu0 %v9621_v0  ;;  %v7618_v0 = vcombine.high %v13533_v55, %v13533_v55 }
 0xb3b   : > { %8209 = vmatmul.mubr.f32.vlgmr.msra.gmra.mrb[8].mxu0 %v13321_v1  ;;  %v7406_v1 = vld [vmem:[%s13775_s9 + $0x9b8] sm:$0xff] }
 0xb3c   : > { %9624 = vmatpush3.bf16.msra.mxu0 %v9623_v52  ;;  %8348 = vmatprep.mubr.f32.mxu0 %v7601_v54  ;;  %v9633_v14 = vpack.c.bf16 %v7406_v1, %v7405_v25  ;;  %v7468_v52 = vld [vmem:[%s13775_s9 + $0xba8] sm:$0xff]  ;;  %v9691_v54 = vpack.c.bf16 %v7450_v51, %v7449_v12  ;;  %v7490_v12 = vld [vmem:[%s13775_s9 + $0xc58] sm:$0xff] }
 0xb3d   : > { %9626 = vmatprep.subr.bf16.mxu0 %v9625_v5  ;;  %v9693_v5 = vpack.c.bf16 %v7468_v52, %v7467_v3  ;;  %v7472_v25 = vld [vmem:[%s13775_s9 + $0xbc8] sm:$0xff]  ;;  %v7491_v3 = vld [vmem:[%s13775_s9 + $0xc60] sm:$0xff] }
 0xb3e   : > { %v7492_v52 = vld [vmem:[%s13775_s9 + $0xc68] sm:$0xff] }
 0xb40   : > { %9628 = vmatpush3.bf16.msra.mxu0 %v9627_v28 }
 0xb41   : > { %9630 = vmatprep.subr.bf16.mxu0 %v9629_v49  ;;  %v7453_v49 = vld [vmem:[%s13775_s9 + $0xb30] sm:$0xff] }
 0xb42   : > { %v9699_v1 = vpack.c.bf16 %v7454_v6, %v7453_v49 }
 0xb44   : > { %9632 = vmatpush3.bf16.msra.mxu0 %v9631_v61  ;;  %v9701_v61 = vpack.c.bf16 %v7472_v25, %v7471_v63  ;;  %v7497_v63 = vld [vmem:[%s13775_s9 + $0xc90] sm:$0xff]  ;;  %v7498_v25 = vld [vmem:[%s13775_s9 + $0xc98] sm:$0xff] }
 0xb45   : > { %9634 = vmatprep.subr.bf16.mxu0 %v9633_v14  ;;  %v7455_v14 = vld [vmem:[%s13775_s9 + $0xb40] sm:$0xff] }
 0xb46   : > { %v9703_v36 = vpack.c.bf16 %v7456_v29, %v7455_v14  ;;  %v7500_v14 = vld [vmem:[%s13775_s9 + $0xca8] sm:$0xff] }
 0xb48   : > { %9636 = vmatpush3.bf16.msra.mxu0 %v9635_v24  ;;  %v9705_v24 = vpack.c.bf16 %v7474_v35, %v7473_v21  ;;  %v7501_v21 = vld [vmem:[%s13775_s9 + $0xcb0] sm:$0xff]  ;;  %v7502_v35 = vld [vmem:[%s13775_s9 + $0xcb8] sm:$0xff] }
 0xb49   : > { %9638 = vmatprep.subr.bf16.mxu0 %v9637_v23  ;;  %v7457_v23 = vld [vmem:[%s13775_s9 + $0xb50] sm:$0xff] }
 0xb4a   : > { %v9707_v27 = vpack.c.bf16 %v7458_v7, %v7457_v23 }
 0xb4c   : > { %9640 = vmatpush3.bf16.msra.mxu0 %v9639_v2  ;;  %v9709_v2 = vpack.c.bf16 %v7476_v11, %v7475_v42 }
 0xb4d   : > { %9642 = vmatprep.subr.bf16.mxu0 %v9641_v38  ;;  %v7459_v38 = vld [vmem:[%s13775_s9 + $0xb60] sm:$0xff] }
 0xb4e   : > { %v9711_v17 = vpack.c.bf16 %v7460_v13, %v7459_v38 }
 0xb50   : > { %9644 = vmatpush3.bf16.msra.mxu0 %v9643_v19  ;;  %v9713_v19 = vpack.c.bf16 %v7478_v31, %v7477_v15 }
 0xb51   : > { %9646 = vmatprep.subr.bf16.mxu0 %v9645_v53  ;;  %v7461_v53 = vld [vmem:[%s13775_s9 + $0xb70] sm:$0xff] }
 0xb52   : > { %v9715_v41 = vpack.c.bf16 %v7462_v32, %v7461_v53 }
 0xb54   : > { %9648 = vmatpush3.bf16.msra.mxu0 %v9647_v44  ;;  %v13630_v44 = vadd.f32 %v9061_v22, %v9060_v57 }
 0xb55   : > { %9650 = vmatprep.subr.bf16.mxu0 %v9649_v26  ;;  %v7480_v26 = vld [vmem:[%s13775_s9 + $0xc08] sm:$0xff] }
 0xb56   : > { %v9718_v30 = vpack.c.bf16 %v7480_v26, %v7479_v33 }
 0xb58   : > { %9652 = vmatpush3.bf16.msra.mxu0 %v9651_v4  ;;  %v7483_v4 = vld [vmem:[%s13775_s9 + $0xc20] sm:$0xff] }
 0xb59   : > { %9686 = vmatprep.subr.bf16.mxu0 %v9685_v9  ;;  %v7484_v9 = vld [vmem:[%s13775_s9 + $0xc28] sm:$0xff] }
 0xb5a   : > { %v9724_v50 = vpack.c.bf16 %v7484_v9, %v7483_v4 }
 0xb5b   : > { %8349 = vmatmul.mubr.f32.vlgmr.msra.gmra.mrb[10].mxu0 %v13427_v20  ;;  %v7470_v20 = vld [vmem:[%s13775_s9 + $0xbb8] sm:$0xff] }
 0xb5c   : > { %9688 = vmatpush3.bf16.msra.mxu0 %v9687_v40  ;;  %8488 = vmatprep.mubr.f32.mxu0 %v7618_v0  ;;  %v9697_v28 = vpack.c.bf16 %v7470_v20, %v7469_v18  ;;  %v7488_v40 = vld [vmem:[%s13775_s9 + $0xc48] sm:$0xff] }
 0xb5d   : > { %9690 = vmatprep.subr.bf16.mxu0 %v9689_v46  ;;  %v9730_v0 = vpack.c.bf16 %v7488_v40, %v7487_v37  ;;  %v7489_v46 = vld [vmem:[%s13775_s9 + $0xc50] sm:$0xff] }
 0xb5e   : > { %v9733_v51 = vpack.c.bf16 %v7490_v12, %v7489_v46 }
 0xb60   : > { %9692 = vmatpush3.bf16.msra.mxu0 %v9691_v54  ;;  %v9736_v54 = vpack.c.bf16 %v7492_v52, %v7491_v3 }
 0xb61   : > { %9694 = vmatprep.subr.bf16.mxu0 %v9693_v5  ;;  %v7493_v5 = vld [vmem:[%s13775_s9 + $0xc70] sm:$0xff] }
 0xb62   : > { %v9739_v18 = vpack.c.bf16 %v7494_v56, %v7493_v5 }
 0xb64   : > { %9696 = vmatpush3.bf16.msra.mxu0 %v9695_v10  ;;  %v7495_v10 = vld [vmem:[%s13775_s9 + $0xc80] sm:$0xff] }
 0xb65   : > { %9698 = vmatprep.subr.bf16.mxu0 %v9697_v28  ;;  %v7496_v28 = vld [vmem:[%s13775_s9 + $0xc88] sm:$0xff] }
 0xb66   : > { %v9742_v6 = vpack.c.bf16 %v7496_v28, %v7495_v10 }
 0xb68   : > { %9700 = vmatpush3.bf16.msra.mxu0 %v9699_v1  ;;  %v9745_v1 = vpack.c.bf16 %v7498_v25, %v7497_v63 }
 0xb69   : > { %9702 = vmatprep.subr.bf16.mxu0 %v9701_v61  ;;  %v7499_v61 = vld [vmem:[%s13775_s9 + $0xca0] sm:$0xff] }
 0xb6a   : > { %v9748_v29 = vpack.c.bf16 %v7500_v14, %v7499_v61 }
 0xb6c   : > { %9704 = vmatpush3.bf16.msra.mxu0 %v9703_v36  ;;  %v9751_v36 = vpack.c.bf16 %v7502_v35, %v7501_v21 }
 0xb6d   : > { %9706 = vmatprep.subr.bf16.mxu0 %v9705_v24  ;;  %v8730_v24 = vld [vmem:[#allocation14] ss:$0 sm:$0xff] }
 0xb6e   : > { %v7721_v23 = vadd.f32 %v13404_v43, %v8730_v24 }
 0xb70   : > { %9708 = vmatpush3.bf16.msra.mxu0 %v9707_v27 }
 0xb71   : > { %9710 = vmatprep.subr.bf16.mxu0 %v9709_v2  ;;  %v9130_v60 = vpop.f32.mrb[12].mxu1 }
 0xb72   : > { %v9131_v20 = vpop.f32.mrb[13].mxu1 }
 0xb73   : > { %v9132_v49 = vadd.f32 %v9131_v20, %v9130_v60 }
 0xb74   : > { %9712 = vmatpush3.bf16.msra.mxu0 %v9711_v17 }
 0xb75   : > { %9714 = vmatprep.subr.bf16.mxu0 %v9713_v19 }
 0xb78   : > { %9716 = vmatpush3.bf16.msra.mxu0 %v9715_v41 }
 0xb79   : > { %9717 = vmatprep.subr.bf16.mxu0 %v10426_v47 }
 0xb7b   : > { %8489 = vmatmul.mubr.f32.vlgmr.msra.gmra.mrb[12].mxu0 %v13533_v55  ;;  %v7485_v55 = vld [vmem:[%s13775_s9 + $0xc30] sm:$0xff] }
 0xb7c   : > { %9719 = vmatpush1.bf16.msra.mxu0 %v9718_v30  ;;  %8732 = vmatprep.mubr.msk.f32.mxu0 %vm7014_vm1, %v7626_v8  ;;  %v9727_v16 = vpack.c.bf16 %v7486_v39, %v7485_v55  ;;  %v8728_v39 = vld [vmem:[#allocation11] ss:$0 sm:$0xff] }
 0xb7d   : > { %9720 = vmatprep.subr.bf16.mxu0 %v10426_v47 }
 0xb80   : > { %9722 = vmatpush1.bf16.msra.mxu0 %v9721_v58 }
 0xb81   : > { %9723 = vmatprep.subr.bf16.mxu0 %v10426_v47 }
 0xb84   : > { %9725 = vmatpush1.bf16.msra.mxu0 %v9724_v50 }
 0xb85   : > { %9726 = vmatprep.subr.bf16.mxu0 %v10426_v47 }
 0xb88   : > { %9728 = vmatpush1.bf16.msra.mxu0 %v9727_v16 }
 0xb89   : > { %9729 = vmatprep.subr.bf16.mxu0 %v10426_v47 }
 0xb8c   : > { %9731 = vmatpush1.bf16.msra.mxu0 %v9730_v0 }
 0xb8d   : > { %9732 = vmatprep.subr.bf16.mxu0 %v10426_v47 }
 0xb90   : > { %9734 = vmatpush1.bf16.msra.mxu0 %v9733_v51 }
 0xb91   : > { %9735 = vmatprep.subr.bf16.mxu0 %v10426_v47 }
 0xb94   : > { %9737 = vmatpush1.bf16.msra.mxu0 %v9736_v54 }
 0xb95   : > { %9738 = vmatprep.subr.bf16.mxu0 %v10426_v47 }
 0xb98   : > { %9740 = vmatpush1.bf16.msra.mxu0 %v9739_v18 }
 0xb99   : > { %9741 = vmatprep.subr.bf16.mxu0 %v10426_v47 }
 0xb9c   : > { %9743 = vmatpush1.bf16.msra.mxu0 %v9742_v6 }
 0xb9d   : > { %9744 = vmatprep.subr.bf16.mxu0 %v10426_v47 }
 0xba0   : > { %9746 = vmatpush1.bf16.msra.mxu0 %v9745_v1 }
 0xba1   : > { %9747 = vmatprep.subr.bf16.mxu0 %v10426_v47 }
 0xba4   : > { %9749 = vmatpush1.bf16.msra.mxu0 %v9748_v29  ;;  %v9200_v2 = vpop.f32.mrb[14].mxu1 }
 0xba5   : > { %9750 = vmatprep.subr.bf16.mxu0 %v10426_v47  ;;  %v9201_v13 = vpop.f32.mrb[15].mxu1 }
 0xba6   : > { %v9202_v15 = vadd.f32 %v9201_v13, %v9200_v2 }
 0xba8   : > { %9752 = vmatpush1.bf16.msra.mxu0 %v9751_v36 }
 0xbab   : > { %8559 = vmatmul.mubr.f32.vlgmr.msra.gmra.mrb[0].mxu0 %v13638_v59 }
 0xbae   : > { %v8885_v7 = vpop.f32.mrb[2].mxu0 }
 0xbaf   : > { %v8886_v42 = vpop.f32.mrb[3].mxu0 }
 0xbb0   : > { %v8887_v11 = vadd.f32 %v8886_v42, %v8885_v7 }
 0xbb2   : > { %v7791_v27 = vadd.f32 %v8887_v11, %v7721_v23 }
 0xbb4   : > { %v7861_v38 = vadd.f32 %v13429_v45, %v7791_v27 }
 0xbce   : > { %v8955_v31 = vpop.f32.mrb[4].mxu0 }
 0xbcf   : > { %v8956_v17 = vpop.f32.mrb[5].mxu0 }
 0xbd0   : > { %v8957_v19 = vadd.f32 %v8956_v17, %v8955_v31 }
 0xbd2   : > { %v7931_v53 = vadd.f32 %v8957_v19, %v7861_v38 }
 0xbd4   : > { %v8001_v47 = vadd.f32 %v13535_v34, %v7931_v53 }
 0xbee   : > { %v9025_v32 = vpop.f32.mrb[6].mxu0 }
 0xbef   : > { %v9026_v57 = vpop.f32.mrb[7].mxu0 }
 0xbf0   : > { %v9027_v22 = vadd.f32 %v9026_v57, %v9025_v32 }
 0xbf2   : > { %v8071_v41 = vadd.f32 %v9027_v22, %v8001_v47 }
 0xbf4   : > { %v8141_v43 = vadd.f32 %v13630_v44, %v8071_v41 }
 0xc0e   : > { %v9095_v33 = vpop.f32.mrb[8].mxu0 }
 0xc0f   : > { %v9096_v26 = vpop.f32.mrb[9].mxu0 }
 0xc10   : > { %v9097_v59 = vadd.f32 %v9096_v26, %v9095_v33 }
 0xc12   : > { %v8211_v30 = vadd.f32 %v9097_v59, %v8141_v43 }
 0xc14   : > { %v8281_v8 = vadd.f32 %v9132_v49, %v8211_v30 }
 0xc2e   : > { %v9165_v45 = vpop.f32.mrb[10].mxu0 }
 0xc2f   : > { %v9166_v62 = vpop.f32.mrb[11].mxu0 }
 0xc30   : > { %v9167_v48 = vadd.f32 %v9166_v62, %v9165_v45 }
 0xc32   : > { %v8351_v58 = vadd.f32 %v9167_v48, %v8281_v8 }
 0xc34   : > { %v8421_v4 = vadd.f32 %v9202_v15, %v8351_v58 }
 0xc4e   : > { %v9235_v9 = vpop.f32.mrb[12].mxu0 }
 0xc4f   : > { %v9236_v50 = vpop.f32.mrb[13].mxu0 }
 0xc50   : > { %v9237_v55 = vadd.f32 %v9236_v50, %v9235_v9 }
 0xc52   : > { %v8491_v34 = vadd.f32 %v9237_v55, %v8421_v4 }
 0xc54   : > { %v10001_v16 = vadd.f32 %v8728_v39, %v8491_v34 }
 0xc7e   : > { %v8560_v37 = vpop.f32.mrb[0].mxu0 }
 0xc7f   : > { %v10002_v40 = vadd.f32 %v10001_v16, %v8560_v37  ;;  %v8562_v44 = vpop.f32.mrb[1].mxu0 }
 0xc81   : > { %v8566_v0 = vsel %vm8565_vm2, %v10002_v40, -inf }
 0xc82   : > { %8567 = vmax.xlane.f32.xlu0 %v8566_v0 }
 0xd0f   : > { %v8568_v46 = vpop.xlane.xlu0 %8567 }
 0xd10   : > { %v8569_v12 = vsub.f32 %v10002_v40, %v8568_v46 }
 0xd12   : > { %v8570_v51 = vmul.f32 1.442695, %v8569_v12 }
 0xd14   : > { %10134 = vpow2.f32 %v8570_v51 }
 0xd1e   : > { %v10135_v3 = vpop.eup %10134 }
 0xd1f   : > { %v8572_v52 = vsel %vm8565_vm2, %v10135_v3, 0.0 }
 0xd20   : > { %8573 = vadd.xlane.f32.xlu0 %v8572_v52 }
 0xdad   : > { %v8574_v54 = vpop.xlane.xlu0 %8573 }
 0xdae   : > { %10136 = vlog2.f32 %v8574_v54 }
 0xdb8   : > { %v10137_v5 = vpop.eup %10136 }
 0xdb9   : > { %v8576_v56 = vmul.f32 0.6931472, %v10137_v5 }
 0xdbb   : > { %v8577_v60 = vadd.f32 %v8576_v56, %v8568_v46 }
 0xdbd   : > { %v8578_v18 = vsub.f32 %v10002_v40, %v8577_v60 }
 0xdbf   : > { %8579 = vst.msk [vmem:[#allocation15] sm:$0x3] %vm8565_vm2, %v8578_v18 }
 0xdc0 PF: > { %p10071_p3 = scmp.eq.s32.totalorder %s10511_s23, 5  ;;  %s10429_s28 = smov [#allocation15]  }
 0xdc1   : > { %s8587_s11 = sshll.u32 %s10429_s28, 4  ;;  %s8588_s11 = int_to_ptr.vmem [resolvable:$true] %s8587_s11 }
 0xdc2   : > { %s10336_s29 = scalar_lea.vmem %s8588_s11, 32  ;;  %p10343_p10 = scmp.lt.s32.totalorder %s8588_s11, %s8588_s11 }
 0xdc3   : > { %p10337_p12 = scmp.ne.s32.totalorder %s8588_s11, %s10336_s29  ;;  %p10344_p11 = scmp.lt.s32.totalorder %s10336_s29, %s10336_s29 }
 0xdc5   : > { %p10338_p8 = pnand %p10337_p12, %p10071_p3  ;;  %p10345_p6 = por %p10344_p11, %p10343_p10 }
 0xdc7   : > { %p10339_p13 = pneg %p10338_p8 }
 0xdc9   : > { %p10346_p0 = pnand %p10345_p6, %p10339_p13 }
 0xdcb   : > { %10349 = shalt.err (!%p10346_p0)
}
 0xdcc   : > { %s13799_s24 = sld [smem:[#allocation22_spill]] }
 0xdd2   : > { %s10350_s21 = scalar_lea.hbm %s13799_s24, 32 }
 0xdd3   : > { %p10351_p1 = scmp.ne.s32.totalorder %s13799_s24, %s10350_s21  ;;  %p10356_p7 = scmp.lt.u32.totalorder %s10350_s21, %s13799_s24 }
 0xdd5   : > { %p10352_p4 = pnand %p10351_p1, %p10071_p3 }
 0xdd7   : > { %p10353_p2 = pneg %p10352_p4 }
 0xdd9   : > { %p10358_p5 = pnand %p10356_p7, %p10353_p2 }
 0xddb   : > { %10361 = shalt.err (!%p10358_p5)
}
 0xddc   : > { %10032 = dma.vmem_to_hbm [thread:$0]  (%p10071_p3), %s8588_s11, 32, %s13799_s24, [#allocation5]  }
 0xddd   : > { %10395 = dma.done.wait (%p10071_p3), [#allocation5], 32  }
 0xdde   : > { %10397 = vsyncadd (%p10071_p3), [#allocation5], 4294967264 }
 0xddf PF: > { %p25_p9 = scmp.ge.s32.totalorder %s10669_s25, 8   ;;  %s13800_s17 = smov %s10404_s18 }
 0xde0   : > { %s13801_s18 = smov %s10408_s19  ;;  %s13802_s19 = smov %s10681_s16 }
 0xde1   : > { %s13803_s20 = smov %s10669_s25  ;;  %27 = sbr.rel (!%p25_p9) target bundleno = 10 (0xa), region = 136 }
 0xde8   :  { %8600 = vsyncpa [#allocation4], 1 }
 0xde9   :  { %8602 = vsyncpa [#allocation4 + $0x1], 1 }
 0xdea   :  { %8603 = vsyncpa [#allocation7], 1 }
 0xdeb   :  { %8604 = vsyncpa [#allocation10], 1 }
 0xdec   :  { %8605 = vsyncpa [#allocation13], 1 }
 0xded   :  { %8606 = vsyncpa [#allocation5], 1 }
 0xdee   :  { %8608 = vsyncpa [#allocation5 + $0x1], 1 }

</bundles_post_ra>
